<compile_context>
chip_gen: v7x
topology: tpu7x:2x2x1
jax: 0.10.0
libtpu: 0.0.40
codegen_flags: <defaults>
</compile_context>

<pallas_src>
import functools

import jax
import jax.numpy as jnp
from jax.experimental import pallas as pl
from jax.experimental.pallas import tpu as pltpu

BN_EPS = 1e-5


def _round_up(v, m):
    return (v + m - 1) // m * m


def _cparams(n_grid_axes):
    return pltpu.CompilerParams(
        dimension_semantics=("parallel",) * n_grid_axes,
        vmem_limit_bytes=32 * 1024 * 1024)


def _choose_tile_m(M):
    """M-tile for the head matmul: big tiles (up to 512 rows) for HBM-roofline
    efficiency, but at least 2 grid steps when M allows (pipelining + v7x)."""
    if M >= 1024:
        return 512
    return max(8, _round_up((M + 1) // 2, 8))


# ----------------------------- Pallas kernels ----------------------------- #

def _head_kernel(x_ref, w1_ref, w2_ref, w4_ref, s1_ref, s2_ref, s4_ref,
                 b1_ref, b2_ref, b4_ref, o1_ref, o2_ref, o4_ref):
    """Three fused 1x1 convs + folded-BN affine + ReLU sharing one input tile.

    x_ref: (tm, Cin) bf16; w*: (Cin, Cout_i) bf16; s*/b*: (1, Cout_i) f32;
    o*: (tm, Cout_i) bf16 -- each output is stored lane-dense.
    """
    x = x_ref[...]
    for w_ref, s_ref, b_ref, o_ref in ((w1_ref, s1_ref, b1_ref, o1_ref),
                                       (w2_ref, s2_ref, b2_ref, o2_ref),
                                       (w4_ref, s4_ref, b4_ref, o4_ref)):
        y = jnp.dot(x, w_ref[...], preferred_element_type=jnp.float32)
        y = y * s_ref[...] + b_ref[...]
        o_ref[...] = jnp.maximum(y, 0.0).astype(o_ref.dtype)


def _conv7_h_kernel(x_ref, w_ref, scale_ref, bias_ref, o_ref, xpad_ref,
                    *, n_taps):
    """7-tap conv along the LEADING spatial axis (a (7,1) kernel on NHWC).

    Zero padding is applied inside the VMEM scratch (no HBM pad pass).
    x_ref: (1, T, Q, Cin) bf16; w_ref: (n_taps, Cin, Cout) bf16;
    xpad_ref: (T + n_taps - 1, Q, Cin) bf16 scratch; o_ref: (1, T, Q, Cout).
    """
    _, T, Q, Cout = o_ref.shape
    Cin = x_ref.shape[3]
    halo = (n_taps - 1) // 2
    xpad_ref[0:halo, :, :] = jnp.zeros((halo, Q, Cin), xpad_ref.dtype)
    xpad_ref[T + halo:T + 2 * halo, :, :] = jnp.zeros((halo, Q, Cin),
                                                      xpad_ref.dtype)
    xpad_ref[halo:T + halo, :, :] = x_ref[0]
    acc = jnp.zeros((T * Q, Cout), jnp.float32)
    for t in range(n_taps):            # static unroll; leading-axis slices
        xt = xpad_ref[t:t + T, :, :].reshape(T * Q, Cin)
        acc = acc + jnp.dot(xt, w_ref[t], preferred_element_type=jnp.float32)
    y = acc * scale_ref[...] + bias_ref[...]
    o_ref[...] = jnp.maximum(y, 0.0).astype(o_ref.dtype).reshape(1, T, Q, Cout)


def _conv7_w_kernel(x_ref, w_ref, scale_ref, bias_ref, o_ref, xpad_ref,
                    *, n_taps):
    """7-tap conv along the SUBLANE spatial axis (a (1,7) kernel on NHWC).

    Shifted sublane slices in VMEM replace the HBM transpose pair of v2.
    x_ref: (1, T, Q, Cin) bf16; xpad_ref: (T, Q + n_taps - 1, Cin) bf16.
    """
    _, T, Q, Cout = o_ref.shape
    Cin = x_ref.shape[3]
    halo = (n_taps - 1) // 2
    xpad_ref[:, 0:halo, :] = jnp.zeros((T, halo, Cin), xpad_ref.dtype)
    xpad_ref[:, Q + halo:Q + 2 * halo, :] = jnp.zeros((T, halo, Cin),
                                                      xpad_ref.dtype)
    xpad_ref[:, halo:Q + halo, :] = x_ref[0]
    acc = jnp.zeros((T * Q, Cout), jnp.float32)
    for t in range(n_taps):            # static unroll; shifted sublane slices
        xt = xpad_ref[:, t:t + Q, :].reshape(T * Q, Cin)
        acc = acc + jnp.dot(xt, w_ref[t], preferred_element_type=jnp.float32)
    y = acc * scale_ref[...] + bias_ref[...]
    o_ref[...] = jnp.maximum(y, 0.0).astype(o_ref.dtype).reshape(1, T, Q, Cout)


def _conv_pool_kernel(x_ref, w_ref, scale_ref, bias_ref, o_ref, zpad_ref):
    """branch3: 1x1 conv, then separable 3x3 AvgPool (stride 1, pad 1,
    count_include_pad=True), then folded-BN affine + ReLU.

    Conv/pool order is swapped vs the PyTorch graph (both linear, conv bias is
    applied after the pool anyway), so pooling runs on Cout=128 channels in
    f32 instead of Cin channels in bf16.
    x_ref: (1, H, W, Cin) bf16; w_ref: (Cin, Cout) bf16;
    zpad_ref: (H + 2, W + 2, Cout) f32 scratch (zero halo = conv's zero pad).
    """
    _, H, W, Cout = o_ref.shape
    Cin = x_ref.shape[3]
    z = jnp.dot(x_ref[0].reshape(H * W, Cin), w_ref[...],
                preferred_element_type=jnp.float32)
    zpad_ref[...] = jnp.zeros((H + 2, W + 2, Cout), jnp.float32)
    zpad_ref[1:H + 1, 1:W + 1, :] = z.reshape(H, W, Cout)
    # separable average: 1x3 along the sublane (W) axis, then 3x1 along H.
    s = (zpad_ref[:, 0:W, :] + zpad_ref[:, 1:W + 1, :] + zpad_ref[:, 2:W + 2, :])
    pooled = (s[0:H] + s[1:H + 1] + s[2:H + 2]) * (1.0 / 9.0)
    y = pooled.reshape(H * W, Cout) * scale_ref[...] + bias_ref[...]
    o_ref[...] = jnp.maximum(y, 0.0).astype(o_ref.dtype).reshape(1, H, W, Cout)


# ------------------------------ wrappers ---------------------------------- #

def head_conv_bn_relu(x, hp):
    """Fused 1x1 heads of branches 1, 2 and 4: x read from HBM once, three
    lane-dense outputs."""
    N, H, W, Cin = x.shape
    M = N * H * W
    tm = _choose_tile_m(M)
    Mp = _round_up(M, tm)
    x2 = x.reshape(M, Cin)
    if Mp != M:
        x2 = jnp.pad(x2, ((0, Mp - M), (0, 0)))
    couts = (hp["w1"].shape[1], hp["w2"].shape[1], hp["w4"].shape[1])
    outs = pl.pallas_call(
        _head_kernel,
        grid=(Mp // tm,),
        in_specs=[pl.BlockSpec((tm, Cin), lambda i: (i, 0))]
                + [pl.BlockSpec((Cin, c), lambda i: (0, 0)) for c in couts]
                + [pl.BlockSpec((1, c), lambda i: (0, 0)) for c in couts] * 2,
        out_specs=tuple(pl.BlockSpec((tm, c), lambda i: (i, 0)) for c in couts),
        out_shape=tuple(jax.ShapeDtypeStruct((Mp, c), jnp.bfloat16)
                        for c in couts),
        compiler_params=_cparams(1),
    )(x2, hp["w1"], hp["w2"], hp["w4"],
      hp["s1"], hp["s2"], hp["s4"], hp["b1"], hp["b2"], hp["b4"])
    return tuple(o[:M].reshape(N, H, W, c) for o, c in zip(outs, couts))


def conv7_bn_relu(x, w, scale, bias, axis):
    """7-tap ConvBlock along spatial `axis` (1 = H i.e. (7,1); 2 = W i.e.
    (1,7)). Padding is applied inside the kernel's VMEM scratch."""
    N, T, Q, Cin = x.shape
    K = w.shape[0]
    Cout = w.shape[-1]
    halo = (K - 1) // 2
    if axis == 1:
        kernel = functools.partial(_conv7_h_kernel, n_taps=K)
        pad_shape = (T + 2 * halo, Q, Cin)
    else:
        kernel = functools.partial(_conv7_w_kernel, n_taps=K)
        pad_shape = (T, Q + 2 * halo, Cin)
    # TODO(synk): for large N/H/W a second grid axis over 128-wide Cout tiles
    # (where Cout % 128 == 0) would add pipeline steps; omitted for clarity.
    return pl.pallas_call(
        kernel,
        grid=(N,),
        in_specs=[pl.BlockSpec((1, T, Q, Cin), lambda n: (n, 0, 0, 0)),
                  pl.BlockSpec((K, Cin, Cout), lambda n: (0, 0, 0)),
                  pl.BlockSpec((1, Cout), lambda n: (0, 0)),
                  pl.BlockSpec((1, Cout), lambda n: (0, 0))],
        out_specs=pl.BlockSpec((1, T, Q, Cout), lambda n: (n, 0, 0, 0)),
        out_shape=jax.ShapeDtypeStruct((N, T, Q, Cout), jnp.bfloat16),
        scratch_shapes=[pltpu.VMEM(pad_shape, jnp.bfloat16)],
        compiler_params=_cparams(1),
    )(x, w, scale, bias)


def conv_pool_bn_relu(x, w, scale, bias):
    """Fused branch3: 1x1 ConvBlock + 3x3 AvgPool (commuted). x: (N,H,W,Cin)."""
    N, H, W, Cin = x.shape
    Cout = w.shape[-1]
    return pl.pallas_call(
        _conv_pool_kernel,
        grid=(N,),
        in_specs=[pl.BlockSpec((1, H, W, Cin), lambda n: (n, 0, 0, 0)),
                  pl.BlockSpec((Cin, Cout), lambda n: (0, 0)),
                  pl.BlockSpec((1, Cout), lambda n: (0, 0)),
                  pl.BlockSpec((1, Cout), lambda n: (0, 0))],
        out_specs=pl.BlockSpec((1, H, W, Cout), lambda n: (n, 0, 0, 0)),
        out_shape=jax.ShapeDtypeStruct((N, H, W, Cout), jnp.bfloat16),
        scratch_shapes=[pltpu.VMEM((H + 2, W + 2, Cout), jnp.float32)],
        compiler_params=_cparams(1),
    )(x, w, scale, bias)


# --------------------------- parameter setup ------------------------------ #

def init_convblock(key, cin, cout, ksize):
    kh, kw = (ksize, ksize) if isinstance(ksize, int) else ksize
    K = kh * kw
    k1, k2, k3, k4, k5, k6 = jax.random.split(key, 6)
    wstd = 1.0 / (cin * K) ** 0.5
    w = jax.random.uniform(k1, (K, cin, cout), jnp.float32, -wstd, wstd)
    b = jax.random.uniform(k2, (cout,), jnp.float32, -wstd, wstd)
    gamma = jax.random.uniform(k3, (cout,), jnp.float32, 0.5, 1.5)
    beta = jax.random.uniform(k4, (cout,), jnp.float32, -0.5, 0.5)
    rmean = jax.random.uniform(k5, (cout,), jnp.float32, -0.5, 0.5)
    rvar = jax.random.uniform(k6, (cout,), jnp.float32, 0.5, 1.5)
    # Fold conv bias + eval-mode BN into a per-channel affine: y = s*conv(x)+t
    scale = gamma / jnp.sqrt(rvar + BN_EPS)
    bias = beta - scale * rmean + scale * b
    axis = 1 if kh > 1 else (2 if kw > 1 else 0)   # tap axis; 0 => pointwise
    return dict(w=w.astype(jnp.bfloat16),          # (K, Cin, Cout) bf16
                scale=scale.reshape(1, cout),      # f32
                bias=bias.reshape(1, cout),        # f32
                axis=axis)


def init_inception_block(key, channels):
    keys = jax.random.split(key, 10)
    b1 = [init_convblock(keys[0], channels, 192, 1),
          init_convblock(keys[1], 192, 192, (7, 1)),
          init_convblock(keys[2], 192, 224, (1, 7)),
          init_convblock(keys[3], 224, 224, (7, 1)),
          init_convblock(keys[4], 224, 256, (1, 7))]
    b2 = [init_convblock(keys[5], channels, 192, 1),
          init_convblock(keys[6], 192, 224, (1, 7)),
          init_convblock(keys[7], 224, 256, (7, 1))]
    b3 = init_convblock(keys[8], channels, 128, 1)
    b4 = init_convblock(keys[9], channels, 384, 1)
    head = dict(w1=b1[0]["w"][0], w2=b2[0]["w"][0], w4=b4["w"][0],
                s1=b1[0]["scale"], s2=b2[0]["scale"], s4=b4["scale"],
                b1=b1[0]["bias"], b2=b2[0]["bias"], b4=b4["bias"])
    return dict(head=head, b1_tail=b1[1:], b2_tail=b2[1:], b3=b3)


def apply_inception_block(x, params):
    x = x.astype(jnp.bfloat16)
    # One fused pointwise call for the three 1x1 branch heads reading x.
    y1, y2, y4 = head_conv_bn_relu(x, params["head"])
    for p in params["b1_tail"]:
        y1 = conv7_bn_relu(y1, p["w"], p["scale"], p["bias"], p["axis"])
    for p in params["b2_tail"]:
        y2 = conv7_bn_relu(y2, p["w"], p["scale"], p["bias"], p["axis"])
    p3 = params["b3"]
    y3 = conv_pool_bn_relu(x, p3["w"][0], p3["scale"], p3["bias"])
    # torch.cat(..., dim=1) on NCHW == concat on the channel (lane) axis here.
    # TODO(synk): this concat could be removed by writing each branch's final
    # kernel directly into its 128-aligned channel slice of a shared
    # (N,H,W,1024) buffer via input_output_aliases; kept for robustness.
    return jnp.concatenate([y1, y2, y3, y4], axis=-1)


def interface_inception_block_b(x_nchw, params_list):
    """Matches InterfaceInceptionBlockB.forward; input/output are NCHW."""
    x = jnp.transpose(x_nchw, (0, 2, 3, 1))      # NCHW -> NHWC
    for p in params_list:
        x = apply_inception_block(x, p)
    return jnp.transpose(x, (0, 3, 1, 2)).astype(jnp.float32)  # NHWC -> NCHW


# --------------------------------- main ------------------------------------ #

if __name__ == "__main__":
    channels, depth = 32, 1       # depth > 1 would require channels == 1024
    N, H, W = 2, 8, 8
    if depth > 1:
        assert channels == 1024

    key = jax.random.PRNGKey(0)
    kx, kp = jax.random.split(key)
    x = jax.random.normal(kx, (N, channels, H, W), jnp.float32)
    pkeys = jax.random.split(kp, depth)
    params_list = [init_inception_block(pkeys[i], channels)
                   for i in range(depth)]

    out = jax.jit(lambda xx: interface_inception_block_b(xx, params_list))(x)
    out = jax.block_until_ready(out)
    assert out.shape == (N, 256 + 256 + 128 + 384, H, W), out.shape
    assert bool(jnp.all(jnp.isfinite(out)))
    print("KERNEL_OK")
</pallas_src>

<mosaic_0001>
module attributes {stable_mosaic.version = 11 : i64} {
  func.func @_head_kernel(%arg0: i32, %arg1: memref<64x32xbf16, #tpu.memory_space<vmem>>, %arg2: memref<32x192xbf16, #tpu.memory_space<vmem>>, %arg3: memref<32x192xbf16, #tpu.memory_space<vmem>>, %arg4: memref<32x384xbf16, #tpu.memory_space<vmem>>, %arg5: memref<1x192xf32, #tpu.memory_space<vmem>>, %arg6: memref<1x192xf32, #tpu.memory_space<vmem>>, %arg7: memref<1x384xf32, #tpu.memory_space<vmem>>, %arg8: memref<1x192xf32, #tpu.memory_space<vmem>>, %arg9: memref<1x192xf32, #tpu.memory_space<vmem>>, %arg10: memref<1x384xf32, #tpu.memory_space<vmem>>, %arg11: memref<64x192xbf16, #tpu.memory_space<vmem>>, %arg12: memref<64x192xbf16, #tpu.memory_space<vmem>>, %arg13: memref<64x384xbf16, #tpu.memory_space<vmem>>) attributes {dimension_semantics = [#tpu.dimension_semantics<parallel>], iteration_bounds = array<i64: 2>, scalar_prefetch = 0 : i64, scratch_operands = 0 : i64, tpu.core_type = #tpu.core_type<tc>, window_params = [{transform_indices = @transform_0, window_bounds = array<i64: 64, 32>}, {pipeline_mode = #tpu.pipeline_mode<synchronous>, transform_indices = @transform_1, window_bounds = array<i64: 32, 192>}, {pipeline_mode = #tpu.pipeline_mode<synchronous>, transform_indices = @transform_2, window_bounds = array<i64: 32, 192>}, {pipeline_mode = #tpu.pipeline_mode<synchronous>, transform_indices = @transform_3, window_bounds = array<i64: 32, 384>}, {pipeline_mode = #tpu.pipeline_mode<synchronous>, transform_indices = @transform_4, window_bounds = array<i64: 1, 192>}, {pipeline_mode = #tpu.pipeline_mode<synchronous>, transform_indices = @transform_5, window_bounds = array<i64: 1, 192>}, {pipeline_mode = #tpu.pipeline_mode<synchronous>, transform_indices = @transform_6, window_bounds = array<i64: 1, 384>}, {pipeline_mode = #tpu.pipeline_mode<synchronous>, transform_indices = @transform_7, window_bounds = array<i64: 1, 192>}, {pipeline_mode = #tpu.pipeline_mode<synchronous>, transform_indices = @transform_8, window_bounds = array<i64: 1, 192>}, {pipeline_mode = #tpu.pipeline_mode<synchronous>, transform_indices = @transform_9, window_bounds = array<i64: 1, 384>}, {transform_indices = @transform_10, window_bounds = array<i64: 64, 192>}, {transform_indices = @transform_11, window_bounds = array<i64: 64, 192>}, {transform_indices = @transform_12, window_bounds = array<i64: 64, 384>}]} {
    %c0 = arith.constant 0 : index
    %c0_0 = arith.constant 0 : index
    %0 = vector.load %arg1[%c0, %c0_0] : memref<64x32xbf16, #tpu.memory_space<vmem>>, vector<64x32xbf16>
    %c0_1 = arith.constant 0 : index
    %c0_2 = arith.constant 0 : index
    %1 = vector.load %arg2[%c0_1, %c0_2] : memref<32x192xbf16, #tpu.memory_space<vmem>>, vector<32x192xbf16>
    %cst = arith.constant dense<0.000000e+00> : vector<64x192xf32>
    %2 = tpu.matmul %0, %1, %cst {dimension_numbers = #tpu.dot_dimension_numbers<[1], [0], [0], [1], [0, 0, 1, 1], [], []>} : vector<64x32xbf16>, vector<32x192xbf16>, vector<64x192xf32> -> vector<64x192xf32>
    %c0_3 = arith.constant 0 : index
    %c0_4 = arith.constant 0 : index
    %3 = vector.load %arg5[%c0_3, %c0_4] : memref<1x192xf32, #tpu.memory_space<vmem>>, vector<1x192xf32>
    %4 = vector.broadcast %3 : vector<1x192xf32> to vector<64x192xf32>
    %5 = arith.mulf %2, %4 : vector<64x192xf32>
    %c0_5 = arith.constant 0 : index
    %c0_6 = arith.constant 0 : index
    %6 = vector.load %arg8[%c0_5, %c0_6] : memref<1x192xf32, #tpu.memory_space<vmem>>, vector<1x192xf32>
    %7 = vector.broadcast %6 : vector<1x192xf32> to vector<64x192xf32>
    %8 = arith.addf %5, %7 : vector<64x192xf32>
    %cst_7 = arith.constant 0.000000e+00 : f32
    %9 = vector.broadcast %cst_7 : f32 to vector<64x192xf32>
    %10 = arith.maximumf %8, %9 : vector<64x192xf32>
    %11 = arith.truncf %10 : vector<64x192xf32> to vector<64x192xbf16>
    %c0_8 = arith.constant 0 : index
    %c0_9 = arith.constant 0 : index
    %12 = vector.load %arg11[%c0_8, %c0_9] : memref<64x192xbf16, #tpu.memory_space<vmem>>, vector<64x192xbf16>
    tpu.vector_store %arg11[%c0_8, %c0_9], %11 {strides = array<i32>} : memref<64x192xbf16, #tpu.memory_space<vmem>>, vector<64x192xbf16>,
    %c0_10 = arith.constant 0 : index
    %c0_11 = arith.constant 0 : index
    %13 = vector.load %arg3[%c0_10, %c0_11] : memref<32x192xbf16, #tpu.memory_space<vmem>>, vector<32x192xbf16>
    %cst_12 = arith.constant dense<0.000000e+00> : vector<64x192xf32>
    %14 = tpu.matmul %0, %13, %cst_12 {dimension_numbers = #tpu.dot_dimension_numbers<[1], [0], [0], [1], [0, 0, 1, 1], [], []>} : vector<64x32xbf16>, vector<32x192xbf16>, vector<64x192xf32> -> vector<64x192xf32>
    %c0_13 = arith.constant 0 : index
    %c0_14 = arith.constant 0 : index
    %15 = vector.load %arg6[%c0_13, %c0_14] : memref<1x192xf32, #tpu.memory_space<vmem>>, vector<1x192xf32>
    %16 = vector.broadcast %15 : vector<1x192xf32> to vector<64x192xf32>
    %17 = arith.mulf %14, %16 : vector<64x192xf32>
    %c0_15 = arith.constant 0 : index
    %c0_16 = arith.constant 0 : index
    %18 = vector.load %arg9[%c0_15, %c0_16] : memref<1x192xf32, #tpu.memory_space<vmem>>, vector<1x192xf32>
    %19 = vector.broadcast %18 : vector<1x192xf32> to vector<64x192xf32>
    %20 = arith.addf %17, %19 : vector<64x192xf32>
    %cst_17 = arith.constant 0.000000e+00 : f32
    %21 = vector.broadcast %cst_17 : f32 to vector<64x192xf32>
    %22 = arith.maximumf %20, %21 : vector<64x192xf32>
    %23 = arith.truncf %22 : vector<64x192xf32> to vector<64x192xbf16>
    %c0_18 = arith.constant 0 : index
    %c0_19 = arith.constant 0 : index
    %24 = vector.load %arg12[%c0_18, %c0_19] : memref<64x192xbf16, #tpu.memory_space<vmem>>, vector<64x192xbf16>
    tpu.vector_store %arg12[%c0_18, %c0_19], %23 {strides = array<i32>} : memref<64x192xbf16, #tpu.memory_space<vmem>>, vector<64x192xbf16>,
    %c0_20 = arith.constant 0 : index
    %c0_21 = arith.constant 0 : index
    %25 = vector.load %arg4[%c0_20, %c0_21] : memref<32x384xbf16, #tpu.memory_space<vmem>>, vector<32x384xbf16>
    %cst_22 = arith.constant dense<0.000000e+00> : vector<64x384xf32>
    %26 = tpu.matmul %0, %25, %cst_22 {dimension_numbers = #tpu.dot_dimension_numbers<[1], [0], [0], [1], [0, 0, 1, 1], [], []>} : vector<64x32xbf16>, vector<32x384xbf16>, vector<64x384xf32> -> vector<64x384xf32>
    %c0_23 = arith.constant 0 : index
    %c0_24 = arith.constant 0 : index
    %27 = vector.load %arg7[%c0_23, %c0_24] : memref<1x384xf32, #tpu.memory_space<vmem>>, vector<1x384xf32>
    %28 = vector.broadcast %27 : vector<1x384xf32> to vector<64x384xf32>
    %29 = arith.mulf %26, %28 : vector<64x384xf32>
    %c0_25 = arith.constant 0 : index
    %c0_26 = arith.constant 0 : index
    %30 = vector.load %arg10[%c0_25, %c0_26] : memref<1x384xf32, #tpu.memory_space<vmem>>, vector<1x384xf32>
    %31 = vector.broadcast %30 : vector<1x384xf32> to vector<64x384xf32>
    %32 = arith.addf %29, %31 : vector<64x384xf32>
    %cst_27 = arith.constant 0.000000e+00 : f32
    %33 = vector.broadcast %cst_27 : f32 to vector<64x384xf32>
    %34 = arith.maximumf %32, %33 : vector<64x384xf32>
    %35 = arith.truncf %34 : vector<64x384xf32> to vector<64x384xbf16>
    %c0_28 = arith.constant 0 : index
    %c0_29 = arith.constant 0 : index
    %36 = vector.load %arg13[%c0_28, %c0_29] : memref<64x384xbf16, #tpu.memory_space<vmem>>, vector<64x384xbf16>
    tpu.vector_store %arg13[%c0_28, %c0_29], %35 {strides = array<i32>} : memref<64x384xbf16, #tpu.memory_space<vmem>>, vector<64x384xbf16>,
    return
  }
  func.func @transform_0(%arg0: i32) -> (i32, i32) {
    %c0_i32 = arith.constant 0 : i32
    %c0_i32_0 = arith.constant 0 : i32
    return %arg0, %c0_i32 : i32, i32
  }
  func.func @transform_1(%arg0: i32) -> (i32, i32) {
    %c0_i32 = arith.constant 0 : i32
    %c0_i32_0 = arith.constant 0 : i32
    %c0_i32_1 = arith.constant 0 : i32
    return %c0_i32, %c0_i32_0 : i32, i32
  }
  func.func @transform_2(%arg0: i32) -> (i32, i32) {
    %c0_i32 = arith.constant 0 : i32
    %c0_i32_0 = arith.constant 0 : i32
    %c0_i32_1 = arith.constant 0 : i32
    return %c0_i32, %c0_i32_0 : i32, i32
  }
  func.func @transform_3(%arg0: i32) -> (i32, i32) {
    %c0_i32 = arith.constant 0 : i32
    %c0_i32_0 = arith.constant 0 : i32
    %c0_i32_1 = arith.constant 0 : i32
    return %c0_i32, %c0_i32_0 : i32, i32
  }
  func.func @transform_4(%arg0: i32) -> (i32, i32) {
    %c0_i32 = arith.constant 0 : i32
    %c0_i32_0 = arith.constant 0 : i32
    %c0_i32_1 = arith.constant 0 : i32
    return %c0_i32, %c0_i32_0 : i32, i32
  }
  func.func @transform_5(%arg0: i32) -> (i32, i32) {
    %c0_i32 = arith.constant 0 : i32
    %c0_i32_0 = arith.constant 0 : i32
    %c0_i32_1 = arith.constant 0 : i32
    return %c0_i32, %c0_i32_0 : i32, i32
  }
  func.func @transform_6(%arg0: i32) -> (i32, i32) {
    %c0_i32 = arith.constant 0 : i32
    %c0_i32_0 = arith.constant 0 : i32
    %c0_i32_1 = arith.constant 0 : i32
    return %c0_i32, %c0_i32_0 : i32, i32
  }
  func.func @transform_7(%arg0: i32) -> (i32, i32) {
    %c0_i32 = arith.constant 0 : i32
    %c0_i32_0 = arith.constant 0 : i32
    %c0_i32_1 = arith.constant 0 : i32
    return %c0_i32, %c0_i32_0 : i32, i32
  }
  func.func @transform_8(%arg0: i32) -> (i32, i32) {
    %c0_i32 = arith.constant 0 : i32
    %c0_i32_0 = arith.constant 0 : i32
    %c0_i32_1 = arith.constant 0 : i32
    return %c0_i32, %c0_i32_0 : i32, i32
  }
  func.func @transform_9(%arg0: i32) -> (i32, i32) {
    %c0_i32 = arith.constant 0 : i32
    %c0_i32_0 = arith.constant 0 : i32
    %c0_i32_1 = arith.constant 0 : i32
    return %c0_i32, %c0_i32_0 : i32, i32
  }
  func.func @transform_10(%arg0: i32) -> (i32, i32) {
    %c0_i32 = arith.constant 0 : i32
    %c0_i32_0 = arith.constant 0 : i32
    return %arg0, %c0_i32 : i32, i32
  }
  func.func @transform_11(%arg0: i32) -> (i32, i32) {
    %c0_i32 = arith.constant 0 : i32
    %c0_i32_0 = arith.constant 0 : i32
    return %arg0, %c0_i32 : i32, i32
  }
  func.func @transform_12(%arg0: i32) -> (i32, i32) {
    %c0_i32 = arith.constant 0 : i32
    %c0_i32_0 = arith.constant 0 : i32
    return %arg0, %c0_i32 : i32, i32
  }
}

module attributes {stable_mosaic.version = 11 : i64} {
  func.func @_conv7_h_kernel(%arg0: i32, %arg1: memref<1x8x8x192xbf16, #tpu.memory_space<vmem>>, %arg2: memref<7x192x192xbf16, #tpu.memory_space<vmem>>, %arg3: memref<1x192xf32, #tpu.memory_space<vmem>>, %arg4: memref<1x192xf32, #tpu.memory_space<vmem>>, %arg5: memref<1x8x8x192xbf16, #tpu.memory_space<vmem>>, %arg6: memref<14x8x192xbf16, #tpu.memory_space<vmem>>) attributes {dimension_semantics = [#tpu.dimension_semantics<parallel>], iteration_bounds = array<i64: 2>, scalar_prefetch = 0 : i64, scratch_operands = 1 : i64, tpu.core_type = #tpu.core_type<tc>, window_params = [{transform_indices = @transform_0, window_bounds = array<i64: 1, 8, 8, 192>}, {pipeline_mode = #tpu.pipeline_mode<synchronous>, transform_indices = @transform_1, window_bounds = array<i64: 7, 192, 192>}, {pipeline_mode = #tpu.pipeline_mode<synchronous>, transform_indices = @transform_2, window_bounds = array<i64: 1, 192>}, {pipeline_mode = #tpu.pipeline_mode<synchronous>, transform_indices = @transform_3, window_bounds = array<i64: 1, 192>}, {transform_indices = @transform_4, window_bounds = array<i64: 1, 8, 8, 192>}]} {
    %cst = arith.constant 0.000000e+00 : bf16
    %0 = vector.broadcast %cst : bf16 to vector<3x8x192xbf16>
    %c0 = arith.constant 0 : index
    %c0_0 = arith.constant 0 : index
    %c0_1 = arith.constant 0 : index
    %1 = vector.load %arg6[%c0, %c0_0, %c0_1] : memref<14x8x192xbf16, #tpu.memory_space<vmem>>, vector<3x8x192xbf16>
    tpu.vector_store %arg6[%c0, %c0_0, %c0_1], %0 {strides = array<i32>} : memref<14x8x192xbf16, #tpu.memory_space<vmem>>, vector<3x8x192xbf16>,
    %cst_2 = arith.constant 0.000000e+00 : bf16
    %2 = vector.broadcast %cst_2 : bf16 to vector<3x8x192xbf16>
    %c11 = arith.constant 11 : index
    %c0_3 = arith.constant 0 : index
    %c0_4 = arith.constant 0 : index
    %3 = vector.load %arg6[%c11, %c0_3, %c0_4] : memref<14x8x192xbf16, #tpu.memory_space<vmem>>, vector<3x8x192xbf16>
    tpu.vector_store %arg6[%c11, %c0_3, %c0_4], %2 {strides = array<i32>} : memref<14x8x192xbf16, #tpu.memory_space<vmem>>, vector<3x8x192xbf16>,
    %c0_5 = arith.constant 0 : index
    %c0_6 = arith.constant 0 : index
    %c0_7 = arith.constant 0 : index
    %c0_8 = arith.constant 0 : index
    %4 = vector.load %arg1[%c0_5, %c0_6, %c0_7, %c0_8] : memref<1x8x8x192xbf16, #tpu.memory_space<vmem>>, vector<1x8x8x192xbf16>
    %5 = vector.shape_cast %4 : vector<1x8x8x192xbf16> to vector<8x8x192xbf16>
    %c3 = arith.constant 3 : index
    %c0_9 = arith.constant 0 : index
    %c0_10 = arith.constant 0 : index
    %6 = vector.load %arg6[%c3, %c0_9, %c0_10] : memref<14x8x192xbf16, #tpu.memory_space<vmem>>, vector<8x8x192xbf16>
    tpu.vector_store %arg6[%c3, %c0_9, %c0_10], %5 {strides = array<i32>} : memref<14x8x192xbf16, #tpu.memory_space<vmem>>, vector<8x8x192xbf16>,
    %cst_11 = arith.constant 0.000000e+00 : f32
    %7 = vector.broadcast %cst_11 : f32 to vector<64x192xf32>
    %c0_12 = arith.constant 0 : index
    %c0_13 = arith.constant 0 : index
    %c0_14 = arith.constant 0 : index
    %8 = vector.load %arg6[%c0_12, %c0_13, %c0_14] : memref<14x8x192xbf16, #tpu.memory_space<vmem>>, vector<8x8x192xbf16>
    %9 = vector.shape_cast %8 : vector<8x8x192xbf16> to vector<64x192xbf16>
    %c0_15 = arith.constant 0 : index
    %c0_16 = arith.constant 0 : index
    %c0_17 = arith.constant 0 : index
    %10 = vector.load %arg2[%c0_15, %c0_16, %c0_17] : memref<7x192x192xbf16, #tpu.memory_space<vmem>>, vector<1x192x192xbf16>
    %11 = vector.shape_cast %10 : vector<1x192x192xbf16> to vector<192x192xbf16>
    %cst_18 = arith.constant dense<0.000000e+00> : vector<64x192xf32>
    %12 = tpu.matmul %9, %11, %cst_18 {dimension_numbers = #tpu.dot_dimension_numbers<[1], [0], [0], [1], [0, 0, 1, 1], [], []>} : vector<64x192xbf16>, vector<192x192xbf16>, vector<64x192xf32> -> vector<64x192xf32>
    %13 = arith.addf %7, %12 : vector<64x192xf32>
    %c1 = arith.constant 1 : index
    %c0_19 = arith.constant 0 : index
    %c0_20 = arith.constant 0 : index
    %14 = vector.load %arg6[%c1, %c0_19, %c0_20] : memref<14x8x192xbf16, #tpu.memory_space<vmem>>, vector<8x8x192xbf16>
    %15 = vector.shape_cast %14 : vector<8x8x192xbf16> to vector<64x192xbf16>
    %c1_21 = arith.constant 1 : index
    %c0_22 = arith.constant 0 : index
    %c0_23 = arith.constant 0 : index
    %16 = vector.load %arg2[%c1_21, %c0_22, %c0_23] : memref<7x192x192xbf16, #tpu.memory_space<vmem>>, vector<1x192x192xbf16>
    %17 = vector.shape_cast %16 : vector<1x192x192xbf16> to vector<192x192xbf16>
    %cst_24 = arith.constant dense<0.000000e+00> : vector<64x192xf32>
    %18 = tpu.matmul %15, %17, %cst_24 {dimension_numbers = #tpu.dot_dimension_numbers<[1], [0], [0], [1], [0, 0, 1, 1], [], []>} : vector<64x192xbf16>, vector<192x192xbf16>, vector<64x192xf32> -> vector<64x192xf32>
    %19 = arith.addf %13, %18 : vector<64x192xf32>
    %c2 = arith.constant 2 : index
    %c0_25 = arith.constant 0 : index
    %c0_26 = arith.constant 0 : index
    %20 = vector.load %arg6[%c2, %c0_25, %c0_26] : memref<14x8x192xbf16, #tpu.memory_space<vmem>>, vector<8x8x192xbf16>
    %21 = vector.shape_cast %20 : vector<8x8x192xbf16> to vector<64x192xbf16>
    %c2_27 = arith.constant 2 : index
    %c0_28 = arith.constant 0 : index
    %c0_29 = arith.constant 0 : index
    %22 = vector.load %arg2[%c2_27, %c0_28, %c0_29] : memref<7x192x192xbf16, #tpu.memory_space<vmem>>, vector<1x192x192xbf16>
    %23 = vector.shape_cast %22 : vector<1x192x192xbf16> to vector<192x192xbf16>
    %cst_30 = arith.constant dense<0.000000e+00> : vector<64x192xf32>
    %24 = tpu.matmul %21, %23, %cst_30 {dimension_numbers = #tpu.dot_dimension_numbers<[1], [0], [0], [1], [0, 0, 1, 1], [], []>} : vector<64x192xbf16>, vector<192x192xbf16>, vector<64x192xf32> -> vector<64x192xf32>
    %25 = arith.addf %19, %24 : vector<64x192xf32>
    %c3_31 = arith.constant 3 : index
    %c0_32 = arith.constant 0 : index
    %c0_33 = arith.constant 0 : index
    %26 = vector.load %arg6[%c3_31, %c0_32, %c0_33] : memref<14x8x192xbf16, #tpu.memory_space<vmem>>, vector<8x8x192xbf16>
    %27 = vector.shape_cast %26 : vector<8x8x192xbf16> to vector<64x192xbf16>
    %c3_34 = arith.constant 3 : index
    %c0_35 = arith.constant 0 : index
    %c0_36 = arith.constant 0 : index
    %28 = vector.load %arg2[%c3_34, %c0_35, %c0_36] : memref<7x192x192xbf16, #tpu.memory_space<vmem>>, vector<1x192x192xbf16>
    %29 = vector.shape_cast %28 : vector<1x192x192xbf16> to vector<192x192xbf16>
    %cst_37 = arith.constant dense<0.000000e+00> : vector<64x192xf32>
    %30 = tpu.matmul %27, %29, %cst_37 {dimension_numbers = #tpu.dot_dimension_numbers<[1], [0], [0], [1], [0, 0, 1, 1], [], []>} : vector<64x192xbf16>, vector<192x192xbf16>, vector<64x192xf32> -> vector<64x192xf32>
    %31 = arith.addf %25, %30 : vector<64x192xf32>
    %c4 = arith.constant 4 : index
    %c0_38 = arith.constant 0 : index
    %c0_39 = arith.constant 0 : index
    %32 = vector.load %arg6[%c4, %c0_38, %c0_39] : memref<14x8x192xbf16, #tpu.memory_space<vmem>>, vector<8x8x192xbf16>
    %33 = vector.shape_cast %32 : vector<8x8x192xbf16> to vector<64x192xbf16>
    %c4_40 = arith.constant 4 : index
    %c0_41 = arith.constant 0 : index
    %c0_42 = arith.constant 0 : index
    %34 = vector.load %arg2[%c4_40, %c0_41, %c0_42] : memref<7x192x192xbf16, #tpu.memory_space<vmem>>, vector<1x192x192xbf16>
    %35 = vector.shape_cast %34 : vector<1x192x192xbf16> to vector<192x192xbf16>
    %cst_43 = arith.constant dense<0.000000e+00> : vector<64x192xf32>
    %36 = tpu.matmul %33, %35, %cst_43 {dimension_numbers = #tpu.dot_dimension_numbers<[1], [0], [0], [1], [0, 0, 1, 1], [], []>} : vector<64x192xbf16>, vector<192x192xbf16>, vector<64x192xf32> -> vector<64x192xf32>
    %37 = arith.addf %31, %36 : vector<64x192xf32>
    %c5 = arith.constant 5 : index
    %c0_44 = arith.constant 0 : index
    %c0_45 = arith.constant 0 : index
    %38 = vector.load %arg6[%c5, %c0_44, %c0_45] : memref<14x8x192xbf16, #tpu.memory_space<vmem>>, vector<8x8x192xbf16>
    %39 = vector.shape_cast %38 : vector<8x8x192xbf16> to vector<64x192xbf16>
    %c5_46 = arith.constant 5 : index
    %c0_47 = arith.constant 0 : index
    %c0_48 = arith.constant 0 : index
    %40 = vector.load %arg2[%c5_46, %c0_47, %c0_48] : memref<7x192x192xbf16, #tpu.memory_space<vmem>>, vector<1x192x192xbf16>
    %41 = vector.shape_cast %40 : vector<1x192x192xbf16> to vector<192x192xbf16>
    %cst_49 = arith.constant dense<0.000000e+00> : vector<64x192xf32>
    %42 = tpu.matmul %39, %41, %cst_49 {dimension_numbers = #tpu.dot_dimension_numbers<[1], [0], [0], [1], [0, 0, 1, 1], [], []>} : vector<64x192xbf16>, vector<192x192xbf16>, vector<64x192xf32> -> vector<64x192xf32>
    %43 = arith.addf %37, %42 : vector<64x192xf32>
    %c6 = arith.constant 6 : index
    %c0_50 = arith.constant 0 : index
    %c0_51 = arith.constant 0 : index
    %44 = vector.load %arg6[%c6, %c0_50, %c0_51] : memref<14x8x192xbf16, #tpu.memory_space<vmem>>, vector<8x8x192xbf16>
    %45 = vector.shape_cast %44 : vector<8x8x192xbf16> to vector<64x192xbf16>
    %c6_52 = arith.constant 6 : index
    %c0_53 = arith.constant 0 : index
    %c0_54 = arith.constant 0 : index
    %46 = vector.load %arg2[%c6_52, %c0_53, %c0_54] : memref<7x192x192xbf16, #tpu.memory_space<vmem>>, vector<1x192x192xbf16>
    %47 = vector.shape_cast %46 : vector<1x192x192xbf16> to vector<192x192xbf16>
    %cst_55 = arith.constant dense<0.000000e+00> : vector<64x192xf32>
    %48 = tpu.matmul %45, %47, %cst_55 {dimension_numbers = #tpu.dot_dimension_numbers<[1], [0], [0], [1], [0, 0, 1, 1], [], []>} : vector<64x192xbf16>, vector<192x192xbf16>, vector<64x192xf32> -> vector<64x192xf32>
    %49 = arith.addf %43, %48 : vector<64x192xf32>
    %c0_56 = arith.constant 0 : index
    %c0_57 = arith.constant 0 : index
    %50 = vector.load %arg3[%c0_56, %c0_57] : memref<1x192xf32, #tpu.memory_space<vmem>>, vector<1x192xf32>
    %51 = vector.broadcast %50 : vector<1x192xf32> to vector<64x192xf32>
    %52 = arith.mulf %49, %51 : vector<64x192xf32>
    %c0_58 = arith.constant 0 : index
    %c0_59 = arith.constant 0 : index
    %53 = vector.load %arg4[%c0_58, %c0_59] : memref<1x192xf32, #tpu.memory_space<vmem>>, vector<1x192xf32>
    %54 = vector.broadcast %53 : vector<1x192xf32> to vector<64x192xf32>
    %55 = arith.addf %52, %54 : vector<64x192xf32>
    %cst_60 = arith.constant 0.000000e+00 : f32
    %56 = vector.broadcast %cst_60 : f32 to vector<64x192xf32>
    %57 = arith.maximumf %55, %56 : vector<64x192xf32>
    %58 = arith.truncf %57 : vector<64x192xf32> to vector<64x192xbf16>
    %59 = vector.shape_cast %58 : vector<64x192xbf16> to vector<1x8x8x192xbf16>
    %c0_61 = arith.constant 0 : index
    %c0_62 = arith.constant 0 : index
    %c0_63 = arith.constant 0 : index
    %c0_64 = arith.constant 0 : index
    %60 = vector.load %arg5[%c0_61, %c0_62, %c0_63, %c0_64] : memref<1x8x8x192xbf16, #tpu.memory_space<vmem>>, vector<1x8x8x192xbf16>
    tpu.vector_store %arg5[%c0_61, %c0_62, %c0_63, %c0_64], %59 {strides = array<i32>} : memref<1x8x8x192xbf16, #tpu.memory_space<vmem>>, vector<1x8x8x192xbf16>,
    return
  }
  func.func @transform_0(%arg0: i32) -> (i32, i32, i32, i32) {
    %c0_i32 = arith.constant 0 : i32
    %c0_i32_0 = arith.constant 0 : i32
    %c0_i32_1 = arith.constant 0 : i32
    %c0_i32_2 = arith.constant 0 : i32
    return %arg0, %c0_i32, %c0_i32_0, %c0_i32_1 : i32, i32, i32, i32
  }
  func.func @transform_1(%arg0: i32) -> (i32, i32, i32) {
    %c0_i32 = arith.constant 0 : i32
    %c0_i32_0 = arith.constant 0 : i32
    %c0_i32_1 = arith.constant 0 : i32
    %c0_i32_2 = arith.constant 0 : i32
    return %c0_i32, %c0_i32_0, %c0_i32_1 : i32, i32, i32
  }
  func.func @transform_2(%arg0: i32) -> (i32, i32) {
    %c0_i32 = arith.constant 0 : i32
    %c0_i32_0 = arith.constant 0 : i32
    %c0_i32_1 = arith.constant 0 : i32
    return %c0_i32, %c0_i32_0 : i32, i32
  }
  func.func @transform_3(%arg0: i32) -> (i32, i32) {
    %c0_i32 = arith.constant 0 : i32
    %c0_i32_0 = arith.constant 0 : i32
    %c0_i32_1 = arith.constant 0 : i32
    return %c0_i32, %c0_i32_0 : i32, i32
  }
  func.func @transform_4(%arg0: i32) -> (i32, i32, i32, i32) {
    %c0_i32 = arith.constant 0 : i32
    %c0_i32_0 = arith.constant 0 : i32
    %c0_i32_1 = arith.constant 0 : i32
    %c0_i32_2 = arith.constant 0 : i32
    return %arg0, %c0_i32, %c0_i32_0, %c0_i32_1 : i32, i32, i32, i32
  }
}

module attributes {stable_mosaic.version = 11 : i64} {
  func.func @_conv7_w_kernel(%arg0: i32, %arg1: memref<1x8x8x192xbf16, #tpu.memory_space<vmem>>, %arg2: memref<7x192x224xbf16, #tpu.memory_space<vmem>>, %arg3: memref<1x224xf32, #tpu.memory_space<vmem>>, %arg4: memref<1x224xf32, #tpu.memory_space<vmem>>, %arg5: memref<1x8x8x224xbf16, #tpu.memory_space<vmem>>, %arg6: memref<8x14x192xbf16, #tpu.memory_space<vmem>>) attributes {dimension_semantics = [#tpu.dimension_semantics<parallel>], iteration_bounds = array<i64: 2>, scalar_prefetch = 0 : i64, scratch_operands = 1 : i64, tpu.core_type = #tpu.core_type<tc>, window_params = [{transform_indices = @transform_0, window_bounds = array<i64: 1, 8, 8, 192>}, {pipeline_mode = #tpu.pipeline_mode<synchronous>, transform_indices = @transform_1, window_bounds = array<i64: 7, 192, 224>}, {pipeline_mode = #tpu.pipeline_mode<synchronous>, transform_indices = @transform_2, window_bounds = array<i64: 1, 224>}, {pipeline_mode = #tpu.pipeline_mode<synchronous>, transform_indices = @transform_3, window_bounds = array<i64: 1, 224>}, {transform_indices = @transform_4, window_bounds = array<i64: 1, 8, 8, 224>}]} {
    %cst = arith.constant 0.000000e+00 : bf16
    %0 = vector.broadcast %cst : bf16 to vector<8x3x192xbf16>
    %c0 = arith.constant 0 : index
    %c0_0 = arith.constant 0 : index
    %c0_1 = arith.constant 0 : index
    %1 = vector.load %arg6[%c0, %c0_0, %c0_1] : memref<8x14x192xbf16, #tpu.memory_space<vmem>>, vector<8x3x192xbf16>
    tpu.vector_store %arg6[%c0, %c0_0, %c0_1], %0 {strides = array<i32>} : memref<8x14x192xbf16, #tpu.memory_space<vmem>>, vector<8x3x192xbf16>,
    %cst_2 = arith.constant 0.000000e+00 : bf16
    %2 = vector.broadcast %cst_2 : bf16 to vector<8x3x192xbf16>
    %c0_3 = arith.constant 0 : index
    %c11 = arith.constant 11 : index
    %c0_4 = arith.constant 0 : index
    %3 = vector.load %arg6[%c0_3, %c11, %c0_4] : memref<8x14x192xbf16, #tpu.memory_space<vmem>>, vector<8x3x192xbf16>
    tpu.vector_store %arg6[%c0_3, %c11, %c0_4], %2 {strides = array<i32>} : memref<8x14x192xbf16, #tpu.memory_space<vmem>>, vector<8x3x192xbf16>,
    %c0_5 = arith.constant 0 : index
    %c0_6 = arith.constant 0 : index
    %c0_7 = arith.constant 0 : index
    %c0_8 = arith.constant 0 : index
    %4 = vector.load %arg1[%c0_5, %c0_6, %c0_7, %c0_8] : memref<1x8x8x192xbf16, #tpu.memory_space<vmem>>, vector<1x8x8x192xbf16>
    %5 = vector.shape_cast %4 : vector<1x8x8x192xbf16> to vector<8x8x192xbf16>
    %c0_9 = arith.constant 0 : index
    %c3 = arith.constant 3 : index
    %c0_10 = arith.constant 0 : index
    %6 = vector.load %arg6[%c0_9, %c3, %c0_10] : memref<8x14x192xbf16, #tpu.memory_space<vmem>>, vector<8x8x192xbf16>
    tpu.vector_store %arg6[%c0_9, %c3, %c0_10], %5 {strides = array<i32>} : memref<8x14x192xbf16, #tpu.memory_space<vmem>>, vector<8x8x192xbf16>,
    %cst_11 = arith.constant 0.000000e+00 : f32
    %7 = vector.broadcast %cst_11 : f32 to vector<64x224xf32>
    %c0_12 = arith.constant 0 : index
    %c0_13 = arith.constant 0 : index
    %c0_14 = arith.constant 0 : index
    %8 = vector.load %arg6[%c0_12, %c0_13, %c0_14] : memref<8x14x192xbf16, #tpu.memory_space<vmem>>, vector<8x8x192xbf16>
    %9 = vector.shape_cast %8 : vector<8x8x192xbf16> to vector<64x192xbf16>
    %c0_15 = arith.constant 0 : index
    %c0_16 = arith.constant 0 : index
    %c0_17 = arith.constant 0 : index
    %10 = vector.load %arg2[%c0_15, %c0_16, %c0_17] : memref<7x192x224xbf16, #tpu.memory_space<vmem>>, vector<1x192x224xbf16>
    %11 = vector.shape_cast %10 : vector<1x192x224xbf16> to vector<192x224xbf16>
    %cst_18 = arith.constant dense<0.000000e+00> : vector<64x224xf32>
    %12 = tpu.matmul %9, %11, %cst_18 {dimension_numbers = #tpu.dot_dimension_numbers<[1], [0], [0], [1], [0, 0, 1, 1], [], []>} : vector<64x192xbf16>, vector<192x224xbf16>, vector<64x224xf32> -> vector<64x224xf32>
    %13 = arith.addf %7, %12 : vector<64x224xf32>
    %c0_19 = arith.constant 0 : index
    %c1 = arith.constant 1 : index
    %c0_20 = arith.constant 0 : index
    %14 = vector.load %arg6[%c0_19, %c1, %c0_20] : memref<8x14x192xbf16, #tpu.memory_space<vmem>>, vector<8x8x192xbf16>
    %15 = vector.shape_cast %14 : vector<8x8x192xbf16> to vector<64x192xbf16>
    %c1_21 = arith.constant 1 : index
    %c0_22 = arith.constant 0 : index
    %c0_23 = arith.constant 0 : index
    %16 = vector.load %arg2[%c1_21, %c0_22, %c0_23] : memref<7x192x224xbf16, #tpu.memory_space<vmem>>, vector<1x192x224xbf16>
    %17 = vector.shape_cast %16 : vector<1x192x224xbf16> to vector<192x224xbf16>
    %cst_24 = arith.constant dense<0.000000e+00> : vector<64x224xf32>
    %18 = tpu.matmul %15, %17, %cst_24 {dimension_numbers = #tpu.dot_dimension_numbers<[1], [0], [0], [1], [0, 0, 1, 1], [], []>} : vector<64x192xbf16>, vector<192x224xbf16>, vector<64x224xf32> -> vector<64x224xf32>
    %19 = arith.addf %13, %18 : vector<64x224xf32>
    %c0_25 = arith.constant 0 : index
    %c2 = arith.constant 2 : index
    %c0_26 = arith.constant 0 : index
    %20 = vector.load %arg6[%c0_25, %c2, %c0_26] : memref<8x14x192xbf16, #tpu.memory_space<vmem>>, vector<8x8x192xbf16>
    %21 = vector.shape_cast %20 : vector<8x8x192xbf16> to vector<64x192xbf16>
    %c2_27 = arith.constant 2 : index
    %c0_28 = arith.constant 0 : index
    %c0_29 = arith.constant 0 : index
    %22 = vector.load %arg2[%c2_27, %c0_28, %c0_29] : memref<7x192x224xbf16, #tpu.memory_space<vmem>>, vector<1x192x224xbf16>
    %23 = vector.shape_cast %22 : vector<1x192x224xbf16> to vector<192x224xbf16>
    %cst_30 = arith.constant dense<0.000000e+00> : vector<64x224xf32>
    %24 = tpu.matmul %21, %23, %cst_30 {dimension_numbers = #tpu.dot_dimension_numbers<[1], [0], [0], [1], [0, 0, 1, 1], [], []>} : vector<64x192xbf16>, vector<192x224xbf16>, vector<64x224xf32> -> vector<64x224xf32>
    %25 = arith.addf %19, %24 : vector<64x224xf32>
    %c0_31 = arith.constant 0 : index
    %c3_32 = arith.constant 3 : index
    %c0_33 = arith.constant 0 : index
    %26 = vector.load %arg6[%c0_31, %c3_32, %c0_33] : memref<8x14x192xbf16, #tpu.memory_space<vmem>>, vector<8x8x192xbf16>
    %27 = vector.shape_cast %26 : vector<8x8x192xbf16> to vector<64x192xbf16>
    %c3_34 = arith.constant 3 : index
    %c0_35 = arith.constant 0 : index
    %c0_36 = arith.constant 0 : index
    %28 = vector.load %arg2[%c3_34, %c0_35, %c0_36] : memref<7x192x224xbf16, #tpu.memory_space<vmem>>, vector<1x192x224xbf16>
    %29 = vector.shape_cast %28 : vector<1x192x224xbf16> to vector<192x224xbf16>
    %cst_37 = arith.constant dense<0.000000e+00> : vector<64x224xf32>
    %30 = tpu.matmul %27, %29, %cst_37 {dimension_numbers = #tpu.dot_dimension_numbers<[1], [0], [0], [1], [0, 0, 1, 1], [], []>} : vector<64x192xbf16>, vector<192x224xbf16>, vector<64x224xf32> -> vector<64x224xf32>
    %31 = arith.addf %25, %30 : vector<64x224xf32>
    %c0_38 = arith.constant 0 : index
    %c4 = arith.constant 4 : index
    %c0_39 = arith.constant 0 : index
    %32 = vector.load %arg6[%c0_38, %c4, %c0_39] : memref<8x14x192xbf16, #tpu.memory_space<vmem>>, vector<8x8x192xbf16>
    %33 = vector.shape_cast %32 : vector<8x8x192xbf16> to vector<64x192xbf16>
    %c4_40 = arith.constant 4 : index
    %c0_41 = arith.constant 0 : index
    %c0_42 = arith.constant 0 : index
    %34 = vector.load %arg2[%c4_40, %c0_41, %c0_42] : memref<7x192x224xbf16, #tpu.memory_space<vmem>>, vector<1x192x224xbf16>
    %35 = vector.shape_cast %34 : vector<1x192x224xbf16> to vector<192x224xbf16>
    %cst_43 = arith.constant dense<0.000000e+00> : vector<64x224xf32>
    %36 = tpu.matmul %33, %35, %cst_43 {dimension_numbers = #tpu.dot_dimension_numbers<[1], [0], [0], [1], [0, 0, 1, 1], [], []>} : vector<64x192xbf16>, vector<192x224xbf16>, vector<64x224xf32> -> vector<64x224xf32>
    %37 = arith.addf %31, %36 : vector<64x224xf32>
    %c0_44 = arith.constant 0 : index
    %c5 = arith.constant 5 : index
    %c0_45 = arith.constant 0 : index
    %38 = vector.load %arg6[%c0_44, %c5, %c0_45] : memref<8x14x192xbf16, #tpu.memory_space<vmem>>, vector<8x8x192xbf16>
    %39 = vector.shape_cast %38 : vector<8x8x192xbf16> to vector<64x192xbf16>
    %c5_46 = arith.constant 5 : index
    %c0_47 = arith.constant 0 : index
    %c0_48 = arith.constant 0 : index
    %40 = vector.load %arg2[%c5_46, %c0_47, %c0_48] : memref<7x192x224xbf16, #tpu.memory_space<vmem>>, vector<1x192x224xbf16>
    %41 = vector.shape_cast %40 : vector<1x192x224xbf16> to vector<192x224xbf16>
    %cst_49 = arith.constant dense<0.000000e+00> : vector<64x224xf32>
    %42 = tpu.matmul %39, %41, %cst_49 {dimension_numbers = #tpu.dot_dimension_numbers<[1], [0], [0], [1], [0, 0, 1, 1], [], []>} : vector<64x192xbf16>, vector<192x224xbf16>, vector<64x224xf32> -> vector<64x224xf32>
    %43 = arith.addf %37, %42 : vector<64x224xf32>
    %c0_50 = arith.constant 0 : index
    %c6 = arith.constant 6 : index
    %c0_51 = arith.constant 0 : index
    %44 = vector.load %arg6[%c0_50, %c6, %c0_51] : memref<8x14x192xbf16, #tpu.memory_space<vmem>>, vector<8x8x192xbf16>
    %45 = vector.shape_cast %44 : vector<8x8x192xbf16> to vector<64x192xbf16>
    %c6_52 = arith.constant 6 : index
    %c0_53 = arith.constant 0 : index
    %c0_54 = arith.constant 0 : index
    %46 = vector.load %arg2[%c6_52, %c0_53, %c0_54] : memref<7x192x224xbf16, #tpu.memory_space<vmem>>, vector<1x192x224xbf16>
    %47 = vector.shape_cast %46 : vector<1x192x224xbf16> to vector<192x224xbf16>
    %cst_55 = arith.constant dense<0.000000e+00> : vector<64x224xf32>
    %48 = tpu.matmul %45, %47, %cst_55 {dimension_numbers = #tpu.dot_dimension_numbers<[1], [0], [0], [1], [0, 0, 1, 1], [], []>} : vector<64x192xbf16>, vector<192x224xbf16>, vector<64x224xf32> -> vector<64x224xf32>
    %49 = arith.addf %43, %48 : vector<64x224xf32>
    %c0_56 = arith.constant 0 : index
    %c0_57 = arith.constant 0 : index
    %50 = vector.load %arg3[%c0_56, %c0_57] : memref<1x224xf32, #tpu.memory_space<vmem>>, vector<1x224xf32>
    %51 = vector.broadcast %50 : vector<1x224xf32> to vector<64x224xf32>
    %52 = arith.mulf %49, %51 : vector<64x224xf32>
    %c0_58 = arith.constant 0 : index
    %c0_59 = arith.constant 0 : index
    %53 = vector.load %arg4[%c0_58, %c0_59] : memref<1x224xf32, #tpu.memory_space<vmem>>, vector<1x224xf32>
    %54 = vector.broadcast %53 : vector<1x224xf32> to vector<64x224xf32>
    %55 = arith.addf %52, %54 : vector<64x224xf32>
    %cst_60 = arith.constant 0.000000e+00 : f32
    %56 = vector.broadcast %cst_60 : f32 to vector<64x224xf32>
    %57 = arith.maximumf %55, %56 : vector<64x224xf32>
    %58 = arith.truncf %57 : vector<64x224xf32> to vector<64x224xbf16>
    %59 = vector.shape_cast %58 : vector<64x224xbf16> to vector<1x8x8x224xbf16>
    %c0_61 = arith.constant 0 : index
    %c0_62 = arith.constant 0 : index
    %c0_63 = arith.constant 0 : index
    %c0_64 = arith.constant 0 : index
    %60 = vector.load %arg5[%c0_61, %c0_62, %c0_63, %c0_64] : memref<1x8x8x224xbf16, #tpu.memory_space<vmem>>, vector<1x8x8x224xbf16>
    tpu.vector_store %arg5[%c0_61, %c0_62, %c0_63, %c0_64], %59 {strides = array<i32>} : memref<1x8x8x224xbf16, #tpu.memory_space<vmem>>, vector<1x8x8x224xbf16>,
    return
  }
  func.func @transform_0(%arg0: i32) -> (i32, i32, i32, i32) {
    %c0_i32 = arith.constant 0 : i32
    %c0_i32_0 = arith.constant 0 : i32
    %c0_i32_1 = arith.constant 0 : i32
    %c0_i32_2 = arith.constant 0 : i32
    return %arg0, %c0_i32, %c0_i32_0, %c0_i32_1 : i32, i32, i32, i32
  }
  func.func @transform_1(%arg0: i32) -> (i32, i32, i32) {
    %c0_i32 = arith.constant 0 : i32
    %c0_i32_0 = arith.constant 0 : i32
    %c0_i32_1 = arith.constant 0 : i32
    %c0_i32_2 = arith.constant 0 : i32
    return %c0_i32, %c0_i32_0, %c0_i32_1 : i32, i32, i32
  }
  func.func @transform_2(%arg0: i32) -> (i32, i32) {
    %c0_i32 = arith.constant 0 : i32
    %c0_i32_0 = arith.constant 0 : i32
    %c0_i32_1 = arith.constant 0 : i32
    return %c0_i32, %c0_i32_0 : i32, i32
  }
  func.func @transform_3(%arg0: i32) -> (i32, i32) {
    %c0_i32 = arith.constant 0 : i32
    %c0_i32_0 = arith.constant 0 : i32
    %c0_i32_1 = arith.constant 0 : i32
    return %c0_i32, %c0_i32_0 : i32, i32
  }
  func.func @transform_4(%arg0: i32) -> (i32, i32, i32, i32) {
    %c0_i32 = arith.constant 0 : i32
    %c0_i32_0 = arith.constant 0 : i32
    %c0_i32_1 = arith.constant 0 : i32
    %c0_i32_2 = arith.constant 0 : i32
    return %arg0, %c0_i32, %c0_i32_0, %c0_i32_1 : i32, i32, i32, i32
  }
}

module attributes {stable_mosaic.version = 11 : i64} {
  func.func @_conv7_h_kernel(%arg0: i32, %arg1: memref<1x8x8x224xbf16, #tpu.memory_space<vmem>>, %arg2: memref<7x224x224xbf16, #tpu.memory_space<vmem>>, %arg3: memref<1x224xf32, #tpu.memory_space<vmem>>, %arg4: memref<1x224xf32, #tpu.memory_space<vmem>>, %arg5: memref<1x8x8x224xbf16, #tpu.memory_space<vmem>>, %arg6: memref<14x8x224xbf16, #tpu.memory_space<vmem>>) attributes {dimension_semantics = [#tpu.dimension_semantics<parallel>], iteration_bounds = array<i64: 2>, scalar_prefetch = 0 : i64, scratch_operands = 1 : i64, tpu.core_type = #tpu.core_type<tc>, window_params = [{transform_indices = @transform_0, window_bounds = array<i64: 1, 8, 8, 224>}, {pipeline_mode = #tpu.pipeline_mode<synchronous>, transform_indices = @transform_1, window_bounds = array<i64: 7, 224, 224>}, {pipeline_mode = #tpu.pipeline_mode<synchronous>, transform_indices = @transform_2, window_bounds = array<i64: 1, 224>}, {pipeline_mode = #tpu.pipeline_mode<synchronous>, transform_indices = @transform_3, window_bounds = array<i64: 1, 224>}, {transform_indices = @transform_4, window_bounds = array<i64: 1, 8, 8, 224>}]} {
    %cst = arith.constant 0.000000e+00 : bf16
    %0 = vector.broadcast %cst : bf16 to vector<3x8x224xbf16>
    %c0 = arith.constant 0 : index
    %c0_0 = arith.constant 0 : index
    %c0_1 = arith.constant 0 : index
    %1 = vector.load %arg6[%c0, %c0_0, %c0_1] : memref<14x8x224xbf16, #tpu.memory_space<vmem>>, vector<3x8x224xbf16>
    tpu.vector_store %arg6[%c0, %c0_0, %c0_1], %0 {strides = array<i32>} : memref<14x8x224xbf16, #tpu.memory_space<vmem>>, vector<3x8x224xbf16>,
    %cst_2 = arith.constant 0.000000e+00 : bf16
    %2 = vector.broadcast %cst_2 : bf16 to vector<3x8x224xbf16>
    %c11 = arith.constant 11 : index
    %c0_3 = arith.constant 0 : index
    %c0_4 = arith.constant 0 : index
    %3 = vector.load %arg6[%c11, %c0_3, %c0_4] : memref<14x8x224xbf16, #tpu.memory_space<vmem>>, vector<3x8x224xbf16>
    tpu.vector_store %arg6[%c11, %c0_3, %c0_4], %2 {strides = array<i32>} : memref<14x8x224xbf16, #tpu.memory_space<vmem>>, vector<3x8x224xbf16>,
    %c0_5 = arith.constant 0 : index
    %c0_6 = arith.constant 0 : index
    %c0_7 = arith.constant 0 : index
    %c0_8 = arith.constant 0 : index
    %4 = vector.load %arg1[%c0_5, %c0_6, %c0_7, %c0_8] : memref<1x8x8x224xbf16, #tpu.memory_space<vmem>>, vector<1x8x8x224xbf16>
    %5 = vector.shape_cast %4 : vector<1x8x8x224xbf16> to vector<8x8x224xbf16>
    %c3 = arith.constant 3 : index
    %c0_9 = arith.constant 0 : index
    %c0_10 = arith.constant 0 : index
    %6 = vector.load %arg6[%c3, %c0_9, %c0_10] : memref<14x8x224xbf16, #tpu.memory_space<vmem>>, vector<8x8x224xbf16>
    tpu.vector_store %arg6[%c3, %c0_9, %c0_10], %5 {strides = array<i32>} : memref<14x8x224xbf16, #tpu.memory_space<vmem>>, vector<8x8x224xbf16>,
    %cst_11 = arith.constant 0.000000e+00 : f32
    %7 = vector.broadcast %cst_11 : f32 to vector<64x224xf32>
    %c0_12 = arith.constant 0 : index
    %c0_13 = arith.constant 0 : index
    %c0_14 = arith.constant 0 : index
    %8 = vector.load %arg6[%c0_12, %c0_13, %c0_14] : memref<14x8x224xbf16, #tpu.memory_space<vmem>>, vector<8x8x224xbf16>
    %9 = vector.shape_cast %8 : vector<8x8x224xbf16> to vector<64x224xbf16>
    %c0_15 = arith.constant 0 : index
    %c0_16 = arith.constant 0 : index
    %c0_17 = arith.constant 0 : index
    %10 = vector.load %arg2[%c0_15, %c0_16, %c0_17] : memref<7x224x224xbf16, #tpu.memory_space<vmem>>, vector<1x224x224xbf16>
    %11 = vector.shape_cast %10 : vector<1x224x224xbf16> to vector<224x224xbf16>
    %cst_18 = arith.constant dense<0.000000e+00> : vector<64x224xf32>
    %12 = tpu.matmul %9, %11, %cst_18 {dimension_numbers = #tpu.dot_dimension_numbers<[1], [0], [0], [1], [0, 0, 1, 1], [], []>} : vector<64x224xbf16>, vector<224x224xbf16>, vector<64x224xf32> -> vector<64x224xf32>
    %13 = arith.addf %7, %12 : vector<64x224xf32>
    %c1 = arith.constant 1 : index
    %c0_19 = arith.constant 0 : index
    %c0_20 = arith.constant 0 : index
    %14 = vector.load %arg6[%c1, %c0_19, %c0_20] : memref<14x8x224xbf16, #tpu.memory_space<vmem>>, vector<8x8x224xbf16>
    %15 = vector.shape_cast %14 : vector<8x8x224xbf16> to vector<64x224xbf16>
    %c1_21 = arith.constant 1 : index
    %c0_22 = arith.constant 0 : index
    %c0_23 = arith.constant 0 : index
    %16 = vector.load %arg2[%c1_21, %c0_22, %c0_23] : memref<7x224x224xbf16, #tpu.memory_space<vmem>>, vector<1x224x224xbf16>
    %17 = vector.shape_cast %16 : vector<1x224x224xbf16> to vector<224x224xbf16>
    %cst_24 = arith.constant dense<0.000000e+00> : vector<64x224xf32>
    %18 = tpu.matmul %15, %17, %cst_24 {dimension_numbers = #tpu.dot_dimension_numbers<[1], [0], [0], [1], [0, 0, 1, 1], [], []>} : vector<64x224xbf16>, vector<224x224xbf16>, vector<64x224xf32> -> vector<64x224xf32>
    %19 = arith.addf %13, %18 : vector<64x224xf32>
    %c2 = arith.constant 2 : index
    %c0_25 = arith.constant 0 : index
    %c0_26 = arith.constant 0 : index
    %20 = vector.load %arg6[%c2, %c0_25, %c0_26] : memref<14x8x224xbf16, #tpu.memory_space<vmem>>, vector<8x8x224xbf16>
    %21 = vector.shape_cast %20 : vector<8x8x224xbf16> to vector<64x224xbf16>
    %c2_27 = arith.constant 2 : index
    %c0_28 = arith.constant 0 : index
    %c0_29 = arith.constant 0 : index
    %22 = vector.load %arg2[%c2_27, %c0_28, %c0_29] : memref<7x224x224xbf16, #tpu.memory_space<vmem>>, vector<1x224x224xbf16>
    %23 = vector.shape_cast %22 : vector<1x224x224xbf16> to vector<224x224xbf16>
    %cst_30 = arith.constant dense<0.000000e+00> : vector<64x224xf32>
    %24 = tpu.matmul %21, %23, %cst_30 {dimension_numbers = #tpu.dot_dimension_numbers<[1], [0], [0], [1], [0, 0, 1, 1], [], []>} : vector<64x224xbf16>, vector<224x224xbf16>, vector<64x224xf32> -> vector<64x224xf32>
    %25 = arith.addf %19, %24 : vector<64x224xf32>
    %c3_31 = arith.constant 3 : index
    %c0_32 = arith.constant 0 : index
    %c0_33 = arith.constant 0 : index
    %26 = vector.load %arg6[%c3_31, %c0_32, %c0_33] : memref<14x8x224xbf16, #tpu.memory_space<vmem>>, vector<8x8x224xbf16>
    %27 = vector.shape_cast %26 : vector<8x8x224xbf16> to vector<64x224xbf16>
    %c3_34 = arith.constant 3 : index
    %c0_35 = arith.constant 0 : index
    %c0_36 = arith.constant 0 : index
    %28 = vector.load %arg2[%c3_34, %c0_35, %c0_36] : memref<7x224x224xbf16, #tpu.memory_space<vmem>>, vector<1x224x224xbf16>
    %29 = vector.shape_cast %28 : vector<1x224x224xbf16> to vector<224x224xbf16>
    %cst_37 = arith.constant dense<0.000000e+00> : vector<64x224xf32>
    %30 = tpu.matmul %27, %29, %cst_37 {dimension_numbers = #tpu.dot_dimension_numbers<[1], [0], [0], [1], [0, 0, 1, 1], [], []>} : vector<64x224xbf16>, vector<224x224xbf16>, vector<64x224xf32> -> vector<64x224xf32>
    %31 = arith.addf %25, %30 : vector<64x224xf32>
    %c4 = arith.constant 4 : index
    %c0_38 = arith.constant 0 : index
    %c0_39 = arith.constant 0 : index
    %32 = vector.load %arg6[%c4, %c0_38, %c0_39] : memref<14x8x224xbf16, #tpu.memory_space<vmem>>, vector<8x8x224xbf16>
    %33 = vector.shape_cast %32 : vector<8x8x224xbf16> to vector<64x224xbf16>
    %c4_40 = arith.constant 4 : index
    %c0_41 = arith.constant 0 : index
    %c0_42 = arith.constant 0 : index
    %34 = vector.load %arg2[%c4_40, %c0_41, %c0_42] : memref<7x224x224xbf16, #tpu.memory_space<vmem>>, vector<1x224x224xbf16>
    %35 = vector.shape_cast %34 : vector<1x224x224xbf16> to vector<224x224xbf16>
    %cst_43 = arith.constant dense<0.000000e+00> : vector<64x224xf32>
    %36 = tpu.matmul %33, %35, %cst_43 {dimension_numbers = #tpu.dot_dimension_numbers<[1], [0], [0], [1], [0, 0, 1, 1], [], []>} : vector<64x224xbf16>, vector<224x224xbf16>, vector<64x224xf32> -> vector<64x224xf32>
    %37 = arith.addf %31, %36 : vector<64x224xf32>
    %c5 = arith.constant 5 : index
    %c0_44 = arith.constant 0 : index
    %c0_45 = arith.constant 0 : index
    %38 = vector.load %arg6[%c5, %c0_44, %c0_45] : memref<14x8x224xbf16, #tpu.memory_space<vmem>>, vector<8x8x224xbf16>
    %39 = vector.shape_cast %38 : vector<8x8x224xbf16> to vector<64x224xbf16>
    %c5_46 = arith.constant 5 : index
    %c0_47 = arith.constant 0 : index
    %c0_48 = arith.constant 0 : index
    %40 = vector.load %arg2[%c5_46, %c0_47, %c0_48] : memref<7x224x224xbf16, #tpu.memory_space<vmem>>, vector<1x224x224xbf16>
    %41 = vector.shape_cast %40 : vector<1x224x224xbf16> to vector<224x224xbf16>
    %cst_49 = arith.constant dense<0.000000e+00> : vector<64x224xf32>
    %42 = tpu.matmul %39, %41, %cst_49 {dimension_numbers = #tpu.dot_dimension_numbers<[1], [0], [0], [1], [0, 0, 1, 1], [], []>} : vector<64x224xbf16>, vector<224x224xbf16>, vector<64x224xf32> -> vector<64x224xf32>
    %43 = arith.addf %37, %42 : vector<64x224xf32>
    %c6 = arith.constant 6 : index
    %c0_50 = arith.constant 0 : index
    %c0_51 = arith.constant 0 : index
    %44 = vector.load %arg6[%c6, %c0_50, %c0_51] : memref<14x8x224xbf16, #tpu.memory_space<vmem>>, vector<8x8x224xbf16>
    %45 = vector.shape_cast %44 : vector<8x8x224xbf16> to vector<64x224xbf16>
    %c6_52 = arith.constant 6 : index
    %c0_53 = arith.constant 0 : index
    %c0_54 = arith.constant 0 : index
    %46 = vector.load %arg2[%c6_52, %c0_53, %c0_54] : memref<7x224x224xbf16, #tpu.memory_space<vmem>>, vector<1x224x224xbf16>
    %47 = vector.shape_cast %46 : vector<1x224x224xbf16> to vector<224x224xbf16>
    %cst_55 = arith.constant dense<0.000000e+00> : vector<64x224xf32>
    %48 = tpu.matmul %45, %47, %cst_55 {dimension_numbers = #tpu.dot_dimension_numbers<[1], [0], [0], [1], [0, 0, 1, 1], [], []>} : vector<64x224xbf16>, vector<224x224xbf16>, vector<64x224xf32> -> vector<64x224xf32>
    %49 = arith.addf %43, %48 : vector<64x224xf32>
    %c0_56 = arith.constant 0 : index
    %c0_57 = arith.constant 0 : index
    %50 = vector.load %arg3[%c0_56, %c0_57] : memref<1x224xf32, #tpu.memory_space<vmem>>, vector<1x224xf32>
    %51 = vector.broadcast %50 : vector<1x224xf32> to vector<64x224xf32>
    %52 = arith.mulf %49, %51 : vector<64x224xf32>
    %c0_58 = arith.constant 0 : index
    %c0_59 = arith.constant 0 : index
    %53 = vector.load %arg4[%c0_58, %c0_59] : memref<1x224xf32, #tpu.memory_space<vmem>>, vector<1x224xf32>
    %54 = vector.broadcast %53 : vector<1x224xf32> to vector<64x224xf32>
    %55 = arith.addf %52, %54 : vector<64x224xf32>
    %cst_60 = arith.constant 0.000000e+00 : f32
    %56 = vector.broadcast %cst_60 : f32 to vector<64x224xf32>
    %57 = arith.maximumf %55, %56 : vector<64x224xf32>
    %58 = arith.truncf %57 : vector<64x224xf32> to vector<64x224xbf16>
    %59 = vector.shape_cast %58 : vector<64x224xbf16> to vector<1x8x8x224xbf16>
    %c0_61 = arith.constant 0 : index
    %c0_62 = arith.constant 0 : index
    %c0_63 = arith.constant 0 : index
    %c0_64 = arith.constant 0 : index
    %60 = vector.load %arg5[%c0_61, %c0_62, %c0_63, %c0_64] : memref<1x8x8x224xbf16, #tpu.memory_space<vmem>>, vector<1x8x8x224xbf16>
    tpu.vector_store %arg5[%c0_61, %c0_62, %c0_63, %c0_64], %59 {strides = array<i32>} : memref<1x8x8x224xbf16, #tpu.memory_space<vmem>>, vector<1x8x8x224xbf16>,
    return
  }
  func.func @transform_0(%arg0: i32) -> (i32, i32, i32, i32) {
    %c0_i32 = arith.constant 0 : i32
    %c0_i32_0 = arith.constant 0 : i32
    %c0_i32_1 = arith.constant 0 : i32
    %c0_i32_2 = arith.constant 0 : i32
    return %arg0, %c0_i32, %c0_i32_0, %c0_i32_1 : i32, i32, i32, i32
  }
  func.func @transform_1(%arg0: i32) -> (i32, i32, i32) {
    %c0_i32 = arith.constant 0 : i32
    %c0_i32_0 = arith.constant 0 : i32
    %c0_i32_1 = arith.constant 0 : i32
    %c0_i32_2 = arith.constant 0 : i32
    return %c0_i32, %c0_i32_0, %c0_i32_1 : i32, i32, i32
  }
  func.func @transform_2(%arg0: i32) -> (i32, i32) {
    %c0_i32 = arith.constant 0 : i32
    %c0_i32_0 = arith.constant 0 : i32
    %c0_i32_1 = arith.constant 0 : i32
    return %c0_i32, %c0_i32_0 : i32, i32
  }
  func.func @transform_3(%arg0: i32) -> (i32, i32) {
    %c0_i32 = arith.constant 0 : i32
    %c0_i32_0 = arith.constant 0 : i32
    %c0_i32_1 = arith.constant 0 : i32
    return %c0_i32, %c0_i32_0 : i32, i32
  }
  func.func @transform_4(%arg0: i32) -> (i32, i32, i32, i32) {
    %c0_i32 = arith.constant 0 : i32
    %c0_i32_0 = arith.constant 0 : i32
    %c0_i32_1 = arith.constant 0 : i32
    %c0_i32_2 = arith.constant 0 : i32
    return %arg0, %c0_i32, %c0_i32_0, %c0_i32_1 : i32, i32, i32, i32
  }
}

module attributes {stable_mosaic.version = 11 : i64} {
  func.func @_conv7_w_kernel(%arg0: i32, %arg1: memref<1x8x8x224xbf16, #tpu.memory_space<vmem>>, %arg2: memref<7x224x256xbf16, #tpu.memory_space<vmem>>, %arg3: memref<1x256xf32, #tpu.memory_space<vmem>>, %arg4: memref<1x256xf32, #tpu.memory_space<vmem>>, %arg5: memref<1x8x8x256xbf16, #tpu.memory_space<vmem>>, %arg6: memref<8x14x224xbf16, #tpu.memory_space<vmem>>) attributes {dimension_semantics = [#tpu.dimension_semantics<parallel>], iteration_bounds = array<i64: 2>, scalar_prefetch = 0 : i64, scratch_operands = 1 : i64, tpu.core_type = #tpu.core_type<tc>, window_params = [{transform_indices = @transform_0, window_bounds = array<i64: 1, 8, 8, 224>}, {pipeline_mode = #tpu.pipeline_mode<synchronous>, transform_indices = @transform_1, window_bounds = array<i64: 7, 224, 256>}, {pipeline_mode = #tpu.pipeline_mode<synchronous>, transform_indices = @transform_2, window_bounds = array<i64: 1, 256>}, {pipeline_mode = #tpu.pipeline_mode<synchronous>, transform_indices = @transform_3, window_bounds = array<i64: 1, 256>}, {transform_indices = @transform_4, window_bounds = array<i64: 1, 8, 8, 256>}]} {
    %cst = arith.constant 0.000000e+00 : bf16
    %0 = vector.broadcast %cst : bf16 to vector<8x3x224xbf16>
    %c0 = arith.constant 0 : index
    %c0_0 = arith.constant 0 : index
    %c0_1 = arith.constant 0 : index
    %1 = vector.load %arg6[%c0, %c0_0, %c0_1] : memref<8x14x224xbf16, #tpu.memory_space<vmem>>, vector<8x3x224xbf16>
    tpu.vector_store %arg6[%c0, %c0_0, %c0_1], %0 {strides = array<i32>} : memref<8x14x224xbf16, #tpu.memory_space<vmem>>, vector<8x3x224xbf16>,
    %cst_2 = arith.constant 0.000000e+00 : bf16
    %2 = vector.broadcast %cst_2 : bf16 to vector<8x3x224xbf16>
    %c0_3 = arith.constant 0 : index
    %c11 = arith.constant 11 : index
    %c0_4 = arith.constant 0 : index
    %3 = vector.load %arg6[%c0_3, %c11, %c0_4] : memref<8x14x224xbf16, #tpu.memory_space<vmem>>, vector<8x3x224xbf16>
    tpu.vector_store %arg6[%c0_3, %c11, %c0_4], %2 {strides = array<i32>} : memref<8x14x224xbf16, #tpu.memory_space<vmem>>, vector<8x3x224xbf16>,
    %c0_5 = arith.constant 0 : index
    %c0_6 = arith.constant 0 : index
    %c0_7 = arith.constant 0 : index
    %c0_8 = arith.constant 0 : index
    %4 = vector.load %arg1[%c0_5, %c0_6, %c0_7, %c0_8] : memref<1x8x8x224xbf16, #tpu.memory_space<vmem>>, vector<1x8x8x224xbf16>
    %5 = vector.shape_cast %4 : vector<1x8x8x224xbf16> to vector<8x8x224xbf16>
    %c0_9 = arith.constant 0 : index
    %c3 = arith.constant 3 : index
    %c0_10 = arith.constant 0 : index
    %6 = vector.load %arg6[%c0_9, %c3, %c0_10] : memref<8x14x224xbf16, #tpu.memory_space<vmem>>, vector<8x8x224xbf16>
    tpu.vector_store %arg6[%c0_9, %c3, %c0_10], %5 {strides = array<i32>} : memref<8x14x224xbf16, #tpu.memory_space<vmem>>, vector<8x8x224xbf16>,
    %cst_11 = arith.constant 0.000000e+00 : f32
    %7 = vector.broadcast %cst_11 : f32 to vector<64x256xf32>
    %c0_12 = arith.constant 0 : index
    %c0_13 = arith.constant 0 : index
    %c0_14 = arith.constant 0 : index
    %8 = vector.load %arg6[%c0_12, %c0_13, %c0_14] : memref<8x14x224xbf16, #tpu.memory_space<vmem>>, vector<8x8x224xbf16>
    %9 = vector.shape_cast %8 : vector<8x8x224xbf16> to vector<64x224xbf16>
    %c0_15 = arith.constant 0 : index
    %c0_16 = arith.constant 0 : index
    %c0_17 = arith.constant 0 : index
    %10 = vector.load %arg2[%c0_15, %c0_16, %c0_17] : memref<7x224x256xbf16, #tpu.memory_space<vmem>>, vector<1x224x256xbf16>
    %11 = vector.shape_cast %10 : vector<1x224x256xbf16> to vector<224x256xbf16>
    %cst_18 = arith.constant dense<0.000000e+00> : vector<64x256xf32>
    %12 = tpu.matmul %9, %11, %cst_18 {dimension_numbers = #tpu.dot_dimension_numbers<[1], [0], [0], [1], [0, 0, 1, 1], [], []>} : vector<64x224xbf16>, vector<224x256xbf16>, vector<64x256xf32> -> vector<64x256xf32>
    %13 = arith.addf %7, %12 : vector<64x256xf32>
    %c0_19 = arith.constant 0 : index
    %c1 = arith.constant 1 : index
    %c0_20 = arith.constant 0 : index
    %14 = vector.load %arg6[%c0_19, %c1, %c0_20] : memref<8x14x224xbf16, #tpu.memory_space<vmem>>, vector<8x8x224xbf16>
    %15 = vector.shape_cast %14 : vector<8x8x224xbf16> to vector<64x224xbf16>
    %c1_21 = arith.constant 1 : index
    %c0_22 = arith.constant 0 : index
    %c0_23 = arith.constant 0 : index
    %16 = vector.load %arg2[%c1_21, %c0_22, %c0_23] : memref<7x224x256xbf16, #tpu.memory_space<vmem>>, vector<1x224x256xbf16>
    %17 = vector.shape_cast %16 : vector<1x224x256xbf16> to vector<224x256xbf16>
    %cst_24 = arith.constant dense<0.000000e+00> : vector<64x256xf32>
    %18 = tpu.matmul %15, %17, %cst_24 {dimension_numbers = #tpu.dot_dimension_numbers<[1], [0], [0], [1], [0, 0, 1, 1], [], []>} : vector<64x224xbf16>, vector<224x256xbf16>, vector<64x256xf32> -> vector<64x256xf32>
    %19 = arith.addf %13, %18 : vector<64x256xf32>
    %c0_25 = arith.constant 0 : index
    %c2 = arith.constant 2 : index
    %c0_26 = arith.constant 0 : index
    %20 = vector.load %arg6[%c0_25, %c2, %c0_26] : memref<8x14x224xbf16, #tpu.memory_space<vmem>>, vector<8x8x224xbf16>
    %21 = vector.shape_cast %20 : vector<8x8x224xbf16> to vector<64x224xbf16>
    %c2_27 = arith.constant 2 : index
    %c0_28 = arith.constant 0 : index
    %c0_29 = arith.constant 0 : index
    %22 = vector.load %arg2[%c2_27, %c0_28, %c0_29] : memref<7x224x256xbf16, #tpu.memory_space<vmem>>, vector<1x224x256xbf16>
    %23 = vector.shape_cast %22 : vector<1x224x256xbf16> to vector<224x256xbf16>
    %cst_30 = arith.constant dense<0.000000e+00> : vector<64x256xf32>
    %24 = tpu.matmul %21, %23, %cst_30 {dimension_numbers = #tpu.dot_dimension_numbers<[1], [0], [0], [1], [0, 0, 1, 1], [], []>} : vector<64x224xbf16>, vector<224x256xbf16>, vector<64x256xf32> -> vector<64x256xf32>
    %25 = arith.addf %19, %24 : vector<64x256xf32>
    %c0_31 = arith.constant 0 : index
    %c3_32 = arith.constant 3 : index
    %c0_33 = arith.constant 0 : index
    %26 = vector.load %arg6[%c0_31, %c3_32, %c0_33] : memref<8x14x224xbf16, #tpu.memory_space<vmem>>, vector<8x8x224xbf16>
    %27 = vector.shape_cast %26 : vector<8x8x224xbf16> to vector<64x224xbf16>
    %c3_34 = arith.constant 3 : index
    %c0_35 = arith.constant 0 : index
    %c0_36 = arith.constant 0 : index
    %28 = vector.load %arg2[%c3_34, %c0_35, %c0_36] : memref<7x224x256xbf16, #tpu.memory_space<vmem>>, vector<1x224x256xbf16>
    %29 = vector.shape_cast %28 : vector<1x224x256xbf16> to vector<224x256xbf16>
    %cst_37 = arith.constant dense<0.000000e+00> : vector<64x256xf32>
    %30 = tpu.matmul %27, %29, %cst_37 {dimension_numbers = #tpu.dot_dimension_numbers<[1], [0], [0], [1], [0, 0, 1, 1], [], []>} : vector<64x224xbf16>, vector<224x256xbf16>, vector<64x256xf32> -> vector<64x256xf32>
    %31 = arith.addf %25, %30 : vector<64x256xf32>
    %c0_38 = arith.constant 0 : index
    %c4 = arith.constant 4 : index
    %c0_39 = arith.constant 0 : index
    %32 = vector.load %arg6[%c0_38, %c4, %c0_39] : memref<8x14x224xbf16, #tpu.memory_space<vmem>>, vector<8x8x224xbf16>
    %33 = vector.shape_cast %32 : vector<8x8x224xbf16> to vector<64x224xbf16>
    %c4_40 = arith.constant 4 : index
    %c0_41 = arith.constant 0 : index
    %c0_42 = arith.constant 0 : index
    %34 = vector.load %arg2[%c4_40, %c0_41, %c0_42] : memref<7x224x256xbf16, #tpu.memory_space<vmem>>, vector<1x224x256xbf16>
    %35 = vector.shape_cast %34 : vector<1x224x256xbf16> to vector<224x256xbf16>
    %cst_43 = arith.constant dense<0.000000e+00> : vector<64x256xf32>
    %36 = tpu.matmul %33, %35, %cst_43 {dimension_numbers = #tpu.dot_dimension_numbers<[1], [0], [0], [1], [0, 0, 1, 1], [], []>} : vector<64x224xbf16>, vector<224x256xbf16>, vector<64x256xf32> -> vector<64x256xf32>
    %37 = arith.addf %31, %36 : vector<64x256xf32>
    %c0_44 = arith.constant 0 : index
    %c5 = arith.constant 5 : index
    %c0_45 = arith.constant 0 : index
    %38 = vector.load %arg6[%c0_44, %c5, %c0_45] : memref<8x14x224xbf16, #tpu.memory_space<vmem>>, vector<8x8x224xbf16>
    %39 = vector.shape_cast %38 : vector<8x8x224xbf16> to vector<64x224xbf16>
    %c5_46 = arith.constant 5 : index
    %c0_47 = arith.constant 0 : index
    %c0_48 = arith.constant 0 : index
    %40 = vector.load %arg2[%c5_46, %c0_47, %c0_48] : memref<7x224x256xbf16, #tpu.memory_space<vmem>>, vector<1x224x256xbf16>
    %41 = vector.shape_cast %40 : vector<1x224x256xbf16> to vector<224x256xbf16>
    %cst_49 = arith.constant dense<0.000000e+00> : vector<64x256xf32>
    %42 = tpu.matmul %39, %41, %cst_49 {dimension_numbers = #tpu.dot_dimension_numbers<[1], [0], [0], [1], [0, 0, 1, 1], [], []>} : vector<64x224xbf16>, vector<224x256xbf16>, vector<64x256xf32> -> vector<64x256xf32>
    %43 = arith.addf %37, %42 : vector<64x256xf32>
    %c0_50 = arith.constant 0 : index
    %c6 = arith.constant 6 : index
    %c0_51 = arith.constant 0 : index
    %44 = vector.load %arg6[%c0_50, %c6, %c0_51] : memref<8x14x224xbf16, #tpu.memory_space<vmem>>, vector<8x8x224xbf16>
    %45 = vector.shape_cast %44 : vector<8x8x224xbf16> to vector<64x224xbf16>
    %c6_52 = arith.constant 6 : index
    %c0_53 = arith.constant 0 : index
    %c0_54 = arith.constant 0 : index
    %46 = vector.load %arg2[%c6_52, %c0_53, %c0_54] : memref<7x224x256xbf16, #tpu.memory_space<vmem>>, vector<1x224x256xbf16>
    %47 = vector.shape_cast %46 : vector<1x224x256xbf16> to vector<224x256xbf16>
    %cst_55 = arith.constant dense<0.000000e+00> : vector<64x256xf32>
    %48 = tpu.matmul %45, %47, %cst_55 {dimension_numbers = #tpu.dot_dimension_numbers<[1], [0], [0], [1], [0, 0, 1, 1], [], []>} : vector<64x224xbf16>, vector<224x256xbf16>, vector<64x256xf32> -> vector<64x256xf32>
    %49 = arith.addf %43, %48 : vector<64x256xf32>
    %c0_56 = arith.constant 0 : index
    %c0_57 = arith.constant 0 : index
    %50 = vector.load %arg3[%c0_56, %c0_57] : memref<1x256xf32, #tpu.memory_space<vmem>>, vector<1x256xf32>
    %51 = vector.broadcast %50 : vector<1x256xf32> to vector<64x256xf32>
    %52 = arith.mulf %49, %51 : vector<64x256xf32>
    %c0_58 = arith.constant 0 : index
    %c0_59 = arith.constant 0 : index
    %53 = vector.load %arg4[%c0_58, %c0_59] : memref<1x256xf32, #tpu.memory_space<vmem>>, vector<1x256xf32>
    %54 = vector.broadcast %53 : vector<1x256xf32> to vector<64x256xf32>
    %55 = arith.addf %52, %54 : vector<64x256xf32>
    %cst_60 = arith.constant 0.000000e+00 : f32
    %56 = vector.broadcast %cst_60 : f32 to vector<64x256xf32>
    %57 = arith.maximumf %55, %56 : vector<64x256xf32>
    %58 = arith.truncf %57 : vector<64x256xf32> to vector<64x256xbf16>
    %59 = vector.shape_cast %58 : vector<64x256xbf16> to vector<1x8x8x256xbf16>
    %c0_61 = arith.constant 0 : index
    %c0_62 = arith.constant 0 : index
    %c0_63 = arith.constant 0 : index
    %c0_64 = arith.constant 0 : index
    %60 = vector.load %arg5[%c0_61, %c0_62, %c0_63, %c0_64] : memref<1x8x8x256xbf16, #tpu.memory_space<vmem>>, vector<1x8x8x256xbf16>
    tpu.vector_store %arg5[%c0_61, %c0_62, %c0_63, %c0_64], %59 {strides = array<i32>} : memref<1x8x8x256xbf16, #tpu.memory_space<vmem>>, vector<1x8x8x256xbf16>,
    return
  }
  func.func @transform_0(%arg0: i32) -> (i32, i32, i32, i32) {
    %c0_i32 = arith.constant 0 : i32
    %c0_i32_0 = arith.constant 0 : i32
    %c0_i32_1 = arith.constant 0 : i32
    %c0_i32_2 = arith.constant 0 : i32
    return %arg0, %c0_i32, %c0_i32_0, %c0_i32_1 : i32, i32, i32, i32
  }
  func.func @transform_1(%arg0: i32) -> (i32, i32, i32) {
    %c0_i32 = arith.constant 0 : i32
    %c0_i32_0 = arith.constant 0 : i32
    %c0_i32_1 = arith.constant 0 : i32
    %c0_i32_2 = arith.constant 0 : i32
    return %c0_i32, %c0_i32_0, %c0_i32_1 : i32, i32, i32
  }
  func.func @transform_2(%arg0: i32) -> (i32, i32) {
    %c0_i32 = arith.constant 0 : i32
    %c0_i32_0 = arith.constant 0 : i32
    %c0_i32_1 = arith.constant 0 : i32
    return %c0_i32, %c0_i32_0 : i32, i32
  }
  func.func @transform_3(%arg0: i32) -> (i32, i32) {
    %c0_i32 = arith.constant 0 : i32
    %c0_i32_0 = arith.constant 0 : i32
    %c0_i32_1 = arith.constant 0 : i32
    return %c0_i32, %c0_i32_0 : i32, i32
  }
  func.func @transform_4(%arg0: i32) -> (i32, i32, i32, i32) {
    %c0_i32 = arith.constant 0 : i32
    %c0_i32_0 = arith.constant 0 : i32
    %c0_i32_1 = arith.constant 0 : i32
    %c0_i32_2 = arith.constant 0 : i32
    return %arg0, %c0_i32, %c0_i32_0, %c0_i32_1 : i32, i32, i32, i32
  }
}

module attributes {stable_mosaic.version = 11 : i64} {
  func.func @_conv7_h_kernel(%arg0: i32, %arg1: memref<1x8x8x224xbf16, #tpu.memory_space<vmem>>, %arg2: memref<7x224x256xbf16, #tpu.memory_space<vmem>>, %arg3: memref<1x256xf32, #tpu.memory_space<vmem>>, %arg4: memref<1x256xf32, #tpu.memory_space<vmem>>, %arg5: memref<1x8x8x256xbf16, #tpu.memory_space<vmem>>, %arg6: memref<14x8x224xbf16, #tpu.memory_space<vmem>>) attributes {dimension_semantics = [#tpu.dimension_semantics<parallel>], iteration_bounds = array<i64: 2>, scalar_prefetch = 0 : i64, scratch_operands = 1 : i64, tpu.core_type = #tpu.core_type<tc>, window_params = [{transform_indices = @transform_0, window_bounds = array<i64: 1, 8, 8, 224>}, {pipeline_mode = #tpu.pipeline_mode<synchronous>, transform_indices = @transform_1, window_bounds = array<i64: 7, 224, 256>}, {pipeline_mode = #tpu.pipeline_mode<synchronous>, transform_indices = @transform_2, window_bounds = array<i64: 1, 256>}, {pipeline_mode = #tpu.pipeline_mode<synchronous>, transform_indices = @transform_3, window_bounds = array<i64: 1, 256>}, {transform_indices = @transform_4, window_bounds = array<i64: 1, 8, 8, 256>}]} {
    %cst = arith.constant 0.000000e+00 : bf16
    %0 = vector.broadcast %cst : bf16 to vector<3x8x224xbf16>
    %c0 = arith.constant 0 : index
    %c0_0 = arith.constant 0 : index
    %c0_1 = arith.constant 0 : index
    %1 = vector.load %arg6[%c0, %c0_0, %c0_1] : memref<14x8x224xbf16, #tpu.memory_space<vmem>>, vector<3x8x224xbf16>
    tpu.vector_store %arg6[%c0, %c0_0, %c0_1], %0 {strides = array<i32>} : memref<14x8x224xbf16, #tpu.memory_space<vmem>>, vector<3x8x224xbf16>,
    %cst_2 = arith.constant 0.000000e+00 : bf16
    %2 = vector.broadcast %cst_2 : bf16 to vector<3x8x224xbf16>
    %c11 = arith.constant 11 : index
    %c0_3 = arith.constant 0 : index
    %c0_4 = arith.constant 0 : index
    %3 = vector.load %arg6[%c11, %c0_3, %c0_4] : memref<14x8x224xbf16, #tpu.memory_space<vmem>>, vector<3x8x224xbf16>
    tpu.vector_store %arg6[%c11, %c0_3, %c0_4], %2 {strides = array<i32>} : memref<14x8x224xbf16, #tpu.memory_space<vmem>>, vector<3x8x224xbf16>,
    %c0_5 = arith.constant 0 : index
    %c0_6 = arith.constant 0 : index
    %c0_7 = arith.constant 0 : index
    %c0_8 = arith.constant 0 : index
    %4 = vector.load %arg1[%c0_5, %c0_6, %c0_7, %c0_8] : memref<1x8x8x224xbf16, #tpu.memory_space<vmem>>, vector<1x8x8x224xbf16>
    %5 = vector.shape_cast %4 : vector<1x8x8x224xbf16> to vector<8x8x224xbf16>
    %c3 = arith.constant 3 : index
    %c0_9 = arith.constant 0 : index
    %c0_10 = arith.constant 0 : index
    %6 = vector.load %arg6[%c3, %c0_9, %c0_10] : memref<14x8x224xbf16, #tpu.memory_space<vmem>>, vector<8x8x224xbf16>
    tpu.vector_store %arg6[%c3, %c0_9, %c0_10], %5 {strides = array<i32>} : memref<14x8x224xbf16, #tpu.memory_space<vmem>>, vector<8x8x224xbf16>,
    %cst_11 = arith.constant 0.000000e+00 : f32
    %7 = vector.broadcast %cst_11 : f32 to vector<64x256xf32>
    %c0_12 = arith.constant 0 : index
    %c0_13 = arith.constant 0 : index
    %c0_14 = arith.constant 0 : index
    %8 = vector.load %arg6[%c0_12, %c0_13, %c0_14] : memref<14x8x224xbf16, #tpu.memory_space<vmem>>, vector<8x8x224xbf16>
    %9 = vector.shape_cast %8 : vector<8x8x224xbf16> to vector<64x224xbf16>
    %c0_15 = arith.constant 0 : index
    %c0_16 = arith.constant 0 : index
    %c0_17 = arith.constant 0 : index
    %10 = vector.load %arg2[%c0_15, %c0_16, %c0_17] : memref<7x224x256xbf16, #tpu.memory_space<vmem>>, vector<1x224x256xbf16>
    %11 = vector.shape_cast %10 : vector<1x224x256xbf16> to vector<224x256xbf16>
    %cst_18 = arith.constant dense<0.000000e+00> : vector<64x256xf32>
    %12 = tpu.matmul %9, %11, %cst_18 {dimension_numbers = #tpu.dot_dimension_numbers<[1], [0], [0], [1], [0, 0, 1, 1], [], []>} : vector<64x224xbf16>, vector<224x256xbf16>, vector<64x256xf32> -> vector<64x256xf32>
    %13 = arith.addf %7, %12 : vector<64x256xf32>
    %c1 = arith.constant 1 : index
    %c0_19 = arith.constant 0 : index
    %c0_20 = arith.constant 0 : index
    %14 = vector.load %arg6[%c1, %c0_19, %c0_20] : memref<14x8x224xbf16, #tpu.memory_space<vmem>>, vector<8x8x224xbf16>
    %15 = vector.shape_cast %14 : vector<8x8x224xbf16> to vector<64x224xbf16>
    %c1_21 = arith.constant 1 : index
    %c0_22 = arith.constant 0 : index
    %c0_23 = arith.constant 0 : index
    %16 = vector.load %arg2[%c1_21, %c0_22, %c0_23] : memref<7x224x256xbf16, #tpu.memory_space<vmem>>, vector<1x224x256xbf16>
    %17 = vector.shape_cast %16 : vector<1x224x256xbf16> to vector<224x256xbf16>
    %cst_24 = arith.constant dense<0.000000e+00> : vector<64x256xf32>
    %18 = tpu.matmul %15, %17, %cst_24 {dimension_numbers = #tpu.dot_dimension_numbers<[1], [0], [0], [1], [0, 0, 1, 1], [], []>} : vector<64x224xbf16>, vector<224x256xbf16>, vector<64x256xf32> -> vector<64x256xf32>
    %19 = arith.addf %13, %18 : vector<64x256xf32>
    %c2 = arith.constant 2 : index
    %c0_25 = arith.constant 0 : index
    %c0_26 = arith.constant 0 : index
    %20 = vector.load %arg6[%c2, %c0_25, %c0_26] : memref<14x8x224xbf16, #tpu.memory_space<vmem>>, vector<8x8x224xbf16>
    %21 = vector.shape_cast %20 : vector<8x8x224xbf16> to vector<64x224xbf16>
    %c2_27 = arith.constant 2 : index
    %c0_28 = arith.constant 0 : index
    %c0_29 = arith.constant 0 : index
    %22 = vector.load %arg2[%c2_27, %c0_28, %c0_29] : memref<7x224x256xbf16, #tpu.memory_space<vmem>>, vector<1x224x256xbf16>
    %23 = vector.shape_cast %22 : vector<1x224x256xbf16> to vector<224x256xbf16>
    %cst_30 = arith.constant dense<0.000000e+00> : vector<64x256xf32>
    %24 = tpu.matmul %21, %23, %cst_30 {dimension_numbers = #tpu.dot_dimension_numbers<[1], [0], [0], [1], [0, 0, 1, 1], [], []>} : vector<64x224xbf16>, vector<224x256xbf16>, vector<64x256xf32> -> vector<64x256xf32>
    %25 = arith.addf %19, %24 : vector<64x256xf32>
    %c3_31 = arith.constant 3 : index
    %c0_32 = arith.constant 0 : index
    %c0_33 = arith.constant 0 : index
    %26 = vector.load %arg6[%c3_31, %c0_32, %c0_33] : memref<14x8x224xbf16, #tpu.memory_space<vmem>>, vector<8x8x224xbf16>
    %27 = vector.shape_cast %26 : vector<8x8x224xbf16> to vector<64x224xbf16>
    %c3_34 = arith.constant 3 : index
    %c0_35 = arith.constant 0 : index
    %c0_36 = arith.constant 0 : index
    %28 = vector.load %arg2[%c3_34, %c0_35, %c0_36] : memref<7x224x256xbf16, #tpu.memory_space<vmem>>, vector<1x224x256xbf16>
    %29 = vector.shape_cast %28 : vector<1x224x256xbf16> to vector<224x256xbf16>
    %cst_37 = arith.constant dense<0.000000e+00> : vector<64x256xf32>
    %30 = tpu.matmul %27, %29, %cst_37 {dimension_numbers = #tpu.dot_dimension_numbers<[1], [0], [0], [1], [0, 0, 1, 1], [], []>} : vector<64x224xbf16>, vector<224x256xbf16>, vector<64x256xf32> -> vector<64x256xf32>
    %31 = arith.addf %25, %30 : vector<64x256xf32>
    %c4 = arith.constant 4 : index
    %c0_38 = arith.constant 0 : index
    %c0_39 = arith.constant 0 : index
    %32 = vector.load %arg6[%c4, %c0_38, %c0_39] : memref<14x8x224xbf16, #tpu.memory_space<vmem>>, vector<8x8x224xbf16>
    %33 = vector.shape_cast %32 : vector<8x8x224xbf16> to vector<64x224xbf16>
    %c4_40 = arith.constant 4 : index
    %c0_41 = arith.constant 0 : index
    %c0_42 = arith.constant 0 : index
    %34 = vector.load %arg2[%c4_40, %c0_41, %c0_42] : memref<7x224x256xbf16, #tpu.memory_space<vmem>>, vector<1x224x256xbf16>
    %35 = vector.shape_cast %34 : vector<1x224x256xbf16> to vector<224x256xbf16>
    %cst_43 = arith.constant dense<0.000000e+00> : vector<64x256xf32>
    %36 = tpu.matmul %33, %35, %cst_43 {dimension_numbers = #tpu.dot_dimension_numbers<[1], [0], [0], [1], [0, 0, 1, 1], [], []>} : vector<64x224xbf16>, vector<224x256xbf16>, vector<64x256xf32> -> vector<64x256xf32>
    %37 = arith.addf %31, %36 : vector<64x256xf32>
    %c5 = arith.constant 5 : index
    %c0_44 = arith.constant 0 : index
    %c0_45 = arith.constant 0 : index
    %38 = vector.load %arg6[%c5, %c0_44, %c0_45] : memref<14x8x224xbf16, #tpu.memory_space<vmem>>, vector<8x8x224xbf16>
    %39 = vector.shape_cast %38 : vector<8x8x224xbf16> to vector<64x224xbf16>
    %c5_46 = arith.constant 5 : index
    %c0_47 = arith.constant 0 : index
    %c0_48 = arith.constant 0 : index
    %40 = vector.load %arg2[%c5_46, %c0_47, %c0_48] : memref<7x224x256xbf16, #tpu.memory_space<vmem>>, vector<1x224x256xbf16>
    %41 = vector.shape_cast %40 : vector<1x224x256xbf16> to vector<224x256xbf16>
    %cst_49 = arith.constant dense<0.000000e+00> : vector<64x256xf32>
    %42 = tpu.matmul %39, %41, %cst_49 {dimension_numbers = #tpu.dot_dimension_numbers<[1], [0], [0], [1], [0, 0, 1, 1], [], []>} : vector<64x224xbf16>, vector<224x256xbf16>, vector<64x256xf32> -> vector<64x256xf32>
    %43 = arith.addf %37, %42 : vector<64x256xf32>
    %c6 = arith.constant 6 : index
    %c0_50 = arith.constant 0 : index
    %c0_51 = arith.constant 0 : index
    %44 = vector.load %arg6[%c6, %c0_50, %c0_51] : memref<14x8x224xbf16, #tpu.memory_space<vmem>>, vector<8x8x224xbf16>
    %45 = vector.shape_cast %44 : vector<8x8x224xbf16> to vector<64x224xbf16>
    %c6_52 = arith.constant 6 : index
    %c0_53 = arith.constant 0 : index
    %c0_54 = arith.constant 0 : index
    %46 = vector.load %arg2[%c6_52, %c0_53, %c0_54] : memref<7x224x256xbf16, #tpu.memory_space<vmem>>, vector<1x224x256xbf16>
    %47 = vector.shape_cast %46 : vector<1x224x256xbf16> to vector<224x256xbf16>
    %cst_55 = arith.constant dense<0.000000e+00> : vector<64x256xf32>
    %48 = tpu.matmul %45, %47, %cst_55 {dimension_numbers = #tpu.dot_dimension_numbers<[1], [0], [0], [1], [0, 0, 1, 1], [], []>} : vector<64x224xbf16>, vector<224x256xbf16>, vector<64x256xf32> -> vector<64x256xf32>
    %49 = arith.addf %43, %48 : vector<64x256xf32>
    %c0_56 = arith.constant 0 : index
    %c0_57 = arith.constant 0 : index
    %50 = vector.load %arg3[%c0_56, %c0_57] : memref<1x256xf32, #tpu.memory_space<vmem>>, vector<1x256xf32>
    %51 = vector.broadcast %50 : vector<1x256xf32> to vector<64x256xf32>
    %52 = arith.mulf %49, %51 : vector<64x256xf32>
    %c0_58 = arith.constant 0 : index
    %c0_59 = arith.constant 0 : index
    %53 = vector.load %arg4[%c0_58, %c0_59] : memref<1x256xf32, #tpu.memory_space<vmem>>, vector<1x256xf32>
    %54 = vector.broadcast %53 : vector<1x256xf32> to vector<64x256xf32>
    %55 = arith.addf %52, %54 : vector<64x256xf32>
    %cst_60 = arith.constant 0.000000e+00 : f32
    %56 = vector.broadcast %cst_60 : f32 to vector<64x256xf32>
    %57 = arith.maximumf %55, %56 : vector<64x256xf32>
    %58 = arith.truncf %57 : vector<64x256xf32> to vector<64x256xbf16>
    %59 = vector.shape_cast %58 : vector<64x256xbf16> to vector<1x8x8x256xbf16>
    %c0_61 = arith.constant 0 : index
    %c0_62 = arith.constant 0 : index
    %c0_63 = arith.constant 0 : index
    %c0_64 = arith.constant 0 : index
    %60 = vector.load %arg5[%c0_61, %c0_62, %c0_63, %c0_64] : memref<1x8x8x256xbf16, #tpu.memory_space<vmem>>, vector<1x8x8x256xbf16>
    tpu.vector_store %arg5[%c0_61, %c0_62, %c0_63, %c0_64], %59 {strides = array<i32>} : memref<1x8x8x256xbf16, #tpu.memory_space<vmem>>, vector<1x8x8x256xbf16>,
    return
  }
  func.func @transform_0(%arg0: i32) -> (i32, i32, i32, i32) {
    %c0_i32 = arith.constant 0 : i32
    %c0_i32_0 = arith.constant 0 : i32
    %c0_i32_1 = arith.constant 0 : i32
    %c0_i32_2 = arith.constant 0 : i32
    return %arg0, %c0_i32, %c0_i32_0, %c0_i32_1 : i32, i32, i32, i32
  }
  func.func @transform_1(%arg0: i32) -> (i32, i32, i32) {
    %c0_i32 = arith.constant 0 : i32
    %c0_i32_0 = arith.constant 0 : i32
    %c0_i32_1 = arith.constant 0 : i32
    %c0_i32_2 = arith.constant 0 : i32
    return %c0_i32, %c0_i32_0, %c0_i32_1 : i32, i32, i32
  }
  func.func @transform_2(%arg0: i32) -> (i32, i32) {
    %c0_i32 = arith.constant 0 : i32
    %c0_i32_0 = arith.constant 0 : i32
    %c0_i32_1 = arith.constant 0 : i32
    return %c0_i32, %c0_i32_0 : i32, i32
  }
  func.func @transform_3(%arg0: i32) -> (i32, i32) {
    %c0_i32 = arith.constant 0 : i32
    %c0_i32_0 = arith.constant 0 : i32
    %c0_i32_1 = arith.constant 0 : i32
    return %c0_i32, %c0_i32_0 : i32, i32
  }
  func.func @transform_4(%arg0: i32) -> (i32, i32, i32, i32) {
    %c0_i32 = arith.constant 0 : i32
    %c0_i32_0 = arith.constant 0 : i32
    %c0_i32_1 = arith.constant 0 : i32
    %c0_i32_2 = arith.constant 0 : i32
    return %arg0, %c0_i32, %c0_i32_0, %c0_i32_1 : i32, i32, i32, i32
  }
}

module attributes {stable_mosaic.version = 11 : i64} {
  func.func @_conv_pool_kernel(%arg0: i32, %arg1: memref<1x8x8x32xbf16, #tpu.memory_space<vmem>>, %arg2: memref<32x128xbf16, #tpu.memory_space<vmem>>, %arg3: memref<1x128xf32, #tpu.memory_space<vmem>>, %arg4: memref<1x128xf32, #tpu.memory_space<vmem>>, %arg5: memref<1x8x8x128xbf16, #tpu.memory_space<vmem>>, %arg6: memref<10x10x128xf32, #tpu.memory_space<vmem>>) attributes {dimension_semantics = [#tpu.dimension_semantics<parallel>], iteration_bounds = array<i64: 2>, scalar_prefetch = 0 : i64, scratch_operands = 1 : i64, tpu.core_type = #tpu.core_type<tc>, window_params = [{transform_indices = @transform_0, window_bounds = array<i64: 1, 8, 8, 32>}, {pipeline_mode = #tpu.pipeline_mode<synchronous>, transform_indices = @transform_1, window_bounds = array<i64: 32, 128>}, {pipeline_mode = #tpu.pipeline_mode<synchronous>, transform_indices = @transform_2, window_bounds = array<i64: 1, 128>}, {pipeline_mode = #tpu.pipeline_mode<synchronous>, transform_indices = @transform_3, window_bounds = array<i64: 1, 128>}, {transform_indices = @transform_4, window_bounds = array<i64: 1, 8, 8, 128>}]} {
    %c0 = arith.constant 0 : index
    %c0_0 = arith.constant 0 : index
    %c0_1 = arith.constant 0 : index
    %c0_2 = arith.constant 0 : index
    %0 = vector.load %arg1[%c0, %c0_0, %c0_1, %c0_2] : memref<1x8x8x32xbf16, #tpu.memory_space<vmem>>, vector<1x8x8x32xbf16>
    %1 = vector.shape_cast %0 : vector<1x8x8x32xbf16> to vector<8x8x32xbf16>
    %2 = vector.shape_cast %1 : vector<8x8x32xbf16> to vector<64x32xbf16>
    %c0_3 = arith.constant 0 : index
    %c0_4 = arith.constant 0 : index
    %3 = vector.load %arg2[%c0_3, %c0_4] : memref<32x128xbf16, #tpu.memory_space<vmem>>, vector<32x128xbf16>
    %cst = arith.constant dense<0.000000e+00> : vector<64x128xf32>
    %4 = tpu.matmul %2, %3, %cst {dimension_numbers = #tpu.dot_dimension_numbers<[1], [0], [0], [1], [0, 0, 1, 1], [], []>} : vector<64x32xbf16>, vector<32x128xbf16>, vector<64x128xf32> -> vector<64x128xf32>
    %cst_5 = arith.constant 0.000000e+00 : f32
    %5 = vector.broadcast %cst_5 : f32 to vector<10x10x128xf32>
    %c0_6 = arith.constant 0 : index
    %c0_7 = arith.constant 0 : index
    %c0_8 = arith.constant 0 : index
    %6 = vector.load %arg6[%c0_6, %c0_7, %c0_8] : memref<10x10x128xf32, #tpu.memory_space<vmem>>, vector<10x10x128xf32>
    tpu.vector_store %arg6[%c0_6, %c0_7, %c0_8], %5 {strides = array<i32>} : memref<10x10x128xf32, #tpu.memory_space<vmem>>, vector<10x10x128xf32>,
    %7 = vector.shape_cast %4 : vector<64x128xf32> to vector<8x8x128xf32>
    %c1 = arith.constant 1 : index
    %c1_9 = arith.constant 1 : index
    %c0_10 = arith.constant 0 : index
    %8 = vector.load %arg6[%c1, %c1_9, %c0_10] : memref<10x10x128xf32, #tpu.memory_space<vmem>>, vector<8x8x128xf32>
    tpu.vector_store %arg6[%c1, %c1_9, %c0_10], %7 {strides = array<i32>} : memref<10x10x128xf32, #tpu.memory_space<vmem>>, vector<8x8x128xf32>,
    %c0_11 = arith.constant 0 : index
    %c0_12 = arith.constant 0 : index
    %c0_13 = arith.constant 0 : index
    %9 = vector.load %arg6[%c0_11, %c0_12, %c0_13] : memref<10x10x128xf32, #tpu.memory_space<vmem>>, vector<10x8x128xf32>
    %c0_14 = arith.constant 0 : index
    %c1_15 = arith.constant 1 : index
    %c0_16 = arith.constant 0 : index
    %10 = vector.load %arg6[%c0_14, %c1_15, %c0_16] : memref<10x10x128xf32, #tpu.memory_space<vmem>>, vector<10x8x128xf32>
    %11 = arith.addf %9, %10 : vector<10x8x128xf32>
    %c0_17 = arith.constant 0 : index
    %c2 = arith.constant 2 : index
    %c0_18 = arith.constant 0 : index
    %12 = vector.load %arg6[%c0_17, %c2, %c0_18] : memref<10x10x128xf32, #tpu.memory_space<vmem>>, vector<10x8x128xf32>
    %13 = arith.addf %11, %12 : vector<10x8x128xf32>
    %14 = vector.extract_strided_slice %13 {offsets = [0, 0, 0], sizes = [8, 8, 128], strides = [1, 1, 1]} : vector<10x8x128xf32> to vector<8x8x128xf32>
    %15 = vector.extract_strided_slice %13 {offsets = [1, 0, 0], sizes = [8, 8, 128], strides = [1, 1, 1]} : vector<10x8x128xf32> to vector<8x8x128xf32>
    %16 = arith.addf %14, %15 : vector<8x8x128xf32>
    %17 = vector.extract_strided_slice %13 {offsets = [2, 0, 0], sizes = [8, 8, 128], strides = [1, 1, 1]} : vector<10x8x128xf32> to vector<8x8x128xf32>
    %18 = arith.addf %16, %17 : vector<8x8x128xf32>
    %cst_19 = arith.constant 0.111111112 : f32
    %19 = vector.broadcast %cst_19 : f32 to vector<8x8x128xf32>
    %20 = arith.mulf %18, %19 : vector<8x8x128xf32>
    %21 = vector.shape_cast %20 : vector<8x8x128xf32> to vector<64x128xf32>
    %c0_20 = arith.constant 0 : index
    %c0_21 = arith.constant 0 : index
    %22 = vector.load %arg3[%c0_20, %c0_21] : memref<1x128xf32, #tpu.memory_space<vmem>>, vector<1x128xf32>
    %23 = vector.broadcast %22 : vector<1x128xf32> to vector<64x128xf32>
    %24 = arith.mulf %21, %23 : vector<64x128xf32>
    %c0_22 = arith.constant 0 : index
    %c0_23 = arith.constant 0 : index
    %25 = vector.load %arg4[%c0_22, %c0_23] : memref<1x128xf32, #tpu.memory_space<vmem>>, vector<1x128xf32>
    %26 = vector.broadcast %25 : vector<1x128xf32> to vector<64x128xf32>
    %27 = arith.addf %24, %26 : vector<64x128xf32>
    %cst_24 = arith.constant 0.000000e+00 : f32
    %28 = vector.broadcast %cst_24 : f32 to vector<64x128xf32>
    %29 = arith.maximumf %27, %28 : vector<64x128xf32>
    %30 = arith.truncf %29 : vector<64x128xf32> to vector<64x128xbf16>
    %31 = vector.shape_cast %30 : vector<64x128xbf16> to vector<1x8x8x128xbf16>
    %c0_25 = arith.constant 0 : index
    %c0_26 = arith.constant 0 : index
    %c0_27 = arith.constant 0 : index
    %c0_28 = arith.constant 0 : index
    %32 = vector.load %arg5[%c0_25, %c0_26, %c0_27, %c0_28] : memref<1x8x8x128xbf16, #tpu.memory_space<vmem>>, vector<1x8x8x128xbf16>
    tpu.vector_store %arg5[%c0_25, %c0_26, %c0_27, %c0_28], %31 {strides = array<i32>} : memref<1x8x8x128xbf16, #tpu.memory_space<vmem>>, vector<1x8x8x128xbf16>,
    return
  }
  func.func @transform_0(%arg0: i32) -> (i32, i32, i32, i32) {
    %c0_i32 = arith.constant 0 : i32
    %c0_i32_0 = arith.constant 0 : i32
    %c0_i32_1 = arith.constant 0 : i32
    %c0_i32_2 = arith.constant 0 : i32
    return %arg0, %c0_i32, %c0_i32_0, %c0_i32_1 : i32, i32, i32, i32
  }
  func.func @transform_1(%arg0: i32) -> (i32, i32) {
    %c0_i32 = arith.constant 0 : i32
    %c0_i32_0 = arith.constant 0 : i32
    %c0_i32_1 = arith.constant 0 : i32
    return %c0_i32, %c0_i32_0 : i32, i32
  }
  func.func @transform_2(%arg0: i32) -> (i32, i32) {
    %c0_i32 = arith.constant 0 : i32
    %c0_i32_0 = arith.constant 0 : i32
    %c0_i32_1 = arith.constant 0 : i32
    return %c0_i32, %c0_i32_0 : i32, i32
  }
  func.func @transform_3(%arg0: i32) -> (i32, i32) {
    %c0_i32 = arith.constant 0 : i32
    %c0_i32_0 = arith.constant 0 : i32
    %c0_i32_1 = arith.constant 0 : i32
    return %c0_i32, %c0_i32_0 : i32, i32
  }
  func.func @transform_4(%arg0: i32) -> (i32, i32, i32, i32) {
    %c0_i32 = arith.constant 0 : i32
    %c0_i32_0 = arith.constant 0 : i32
    %c0_i32_1 = arith.constant 0 : i32
    %c0_i32_2 = arith.constant 0 : i32
    return %arg0, %c0_i32, %c0_i32_0, %c0_i32_1 : i32, i32, i32, i32
  }
}

</mosaic_0001>

<bundles_post_ra>
// kernel: _lambda_.8
= control target key start
LH: loop header
LB: loop body
LE: loop exit
PB: predicated region body
PF: predicated region fallthrough
CT: control target
= control target key end

     0   :  { %s1702_s21 = smov 0   ;;  %s2079_s0 = inlined_call_operand.vmem [shape: bf16[128,32], index: 0, kind: input, shape index: {}]   ;;  %s2080_s1 = inlined_call_operand.vmem [shape: bf16[32,192], index: 1, kind: input, shape index: {}]   ;;  %s2081_s2 = inlined_call_operand.vmem [shape: bf16[32,192], index: 2, kind: input, shape index: {}]   ;;  %s2082_s3 = inlined_call_operand.vmem [shape: bf16[32,384], index: 3, kind: input, shape index: {}]   ;;  %s2083_s4 = inlined_call_operand.vmem [shape: f32[1,192], index: 4, kind: input, shape index: {}]   ;;  %s2084_s5 = inlined_call_operand.vmem [shape: f32[1,192], index: 5, kind: input, shape index: {}]   ;;  %s2085_s6 = inlined_call_operand.vmem [shape: f32[1,384], index: 6, kind: input, shape index: {}]   ;;  %s2086_s7 = inlined_call_operand.vmem [shape: f32[1,192], index: 7, kind: input, shape index: {}]   ;;  %s2087_s8 = inlined_call_operand.vmem [shape: f32[1,192], index: 8, kind: input, shape index: {}]   ;;  %s2088_s9 = inlined_call_operand.vmem [shape: f32[1,384], index: 9, kind: input, shape index: {}]   ;;  %s2089_s10 = inlined_call_operand.vmem [shape: bf16[128,192], index: 10, kind: output, shape index: {0}]   ;;  %s2090_s11 = inlined_call_operand.vmem [shape: bf16[128,192], index: 11, kind: output, shape index: {1}]   ;;  %s2091_s12 = inlined_call_operand.vmem [shape: bf16[128,384], index: 12, kind: output, shape index: {2}]  }
   0x1 LB: > { %s1455_s22 = sadd.s32 4294967295, %s1634_s21   ;;  %p1459_p0 = scmp.ge.s32.totalorder %s1634_s21, 1  ;;  %s1634_s21 = sphi %s1702_s21, %s23_s21  }
   0x2   : > { %p368_p1 = scmp.lt.s32.totalorder %s1634_s21, 3 }
   0x4   : > { %p369_p2 = pnand %p1459_p0, %p368_p1 }
   0x5   : > { %v1604_v0 = vld [vmem:[%s2080_s1 + $0x4] ss:$8 sps:$4 sm:$0xff] (!%p369_p2)   ;;  %s1460_s25 = sshll.u32 (!%p369_p2), %s1455_s22, 3  ;;  %v1606_v1 = vld [vmem:[%s2080_s1] ss:$8 sps:$4 sm:$0xff] (!%p369_p2)   ;;  %v1636_v2 = vmov (!%p369_p2), 0   ;;  %v591_v19 = vlaneseq (!%p369_p2) }
   0x6   : > { %372 = sbr.rel (%p369_p2) target bundleno = 290 (0x122), region = 60  ;;  %548 = vmatprep.mubr.bf16.mxu0 (!%p369_p2), %v1636_v2  ;;  %578 = vmatprep.mubr.bf16.mxu1 (!%p369_p2), %v1636_v2  ;;  %p424_p3 = scmp.lt.s32.totalorder (!%p369_p2), %s1460_s25, 15  ;;  %v1607_v3 = vld [vmem:[%s2080_s1 + $0x14] ss:$8 sps:$4 sm:$0xff] (!%p369_p2)   ;;  %v1609_v4 = vld [vmem:[%s2080_s1 + $0x10] ss:$8 sps:$4 sm:$0xff] (!%p369_p2)  }
   0x7   : > { %516 = vmatprep.subr.bf16.mxu0 (!%p369_p2), %v1604_v0  ;;  %1590 = vmatprep.subr.bf16.mxu1 (!%p369_p2), %v1604_v0  ;;  %v1614_v5 = vld [vmem:[%s2081_s2 + $0x4] ss:$8 sps:$4 sm:$0xff] (!%p369_p2)   ;;  %v1612_v6 = vld [vmem:[%s2081_s2] ss:$8 sps:$4 sm:$0xff] (!%p369_p2)   ;;  %v1620_v9 = vld [vmem:[%s2081_s2 + $0x14] ss:$8 sps:$4 sm:$0xff] (!%p369_p2)  }
   0x8   : > { %517 = vmatpush1.bf16.msra.mxu0 (!%p369_p2), %v1606_v1  ;;  %1592 = vmatpush1.bf16.msra.mxu1 (!%p369_p2), %v1606_v1  ;;  %v1617_v7 = vld [vmem:[%s2082_s3 + $0x4] ss:$12 sps:$4 sm:$0xff] (!%p369_p2)   ;;  %v1615_v8 = vld [vmem:[%s2082_s3] ss:$12 sps:$4 sm:$0xff] (!%p369_p2)   ;;  %vm503_vm0 = vcmask (!%p369_p2), 261120   ;;  %v1792_v20 = vshrl.u32 (!%p369_p2), %v591_v19, 7 }
   0x9   : > { %518 = vmatprep.subr.bf16.mxu0 (!%p369_p2), %v1607_v3  ;;  %1591 = vmatprep.subr.bf16.mxu1 (!%p369_p2), %v1607_v3  ;;  %v1618_v12 = vld [vmem:[%s2081_s2 + $0x10] ss:$8 sps:$4 sm:$0xff] (!%p369_p2)   ;;  %v1625_v14 = vld [vmem:[%s2082_s3 + $0x1c] ss:$12 sps:$4 sm:$0xff] (!%p369_p2)   ;;  %v1627_v17 = vld [vmem:[%s2082_s3 + $0x20] ss:$12 sps:$4 sm:$0xff] (!%p369_p2)  }
   0xa   : > { %v1623_v13 = vld [vmem:[%s2082_s3 + $0x18] ss:$12 sps:$4 sm:$0xff] (!%p369_p2)   ;;  %v1622_v15 = vld [vmem:[%s2082_s3 + $0x8] ss:$12 sps:$4 sm:$0xff] (!%p369_p2)   ;;  %v1795_v21 = vsub.s32 (!%p369_p2), 0, %v1792_v20  ;;  %v1801_v23 = vsub.s32 (!%p369_p2), 1, %v1792_v20 }
   0xb   : > { %v589_v22 = vld [vmem:[%s2083_s4] sm:$0x3] (!%p369_p2)  ;;  %vm709_vm1 = vcmask (!%p369_p2), 1043456   ;;  %vm710_vm2 = vcmask (!%p369_p2), 523268  }
   0xc   : > { %519 = vmatpush1.bf16.msra.mxu0 (!%p369_p2), %v1609_v4  ;;  %1593 = vmatpush1.bf16.msra.mxu1 (!%p369_p2), %v1609_v4  ;;  %v617_v24 = vld [vmem:[%s2086_s7] sm:$0x3] (!%p369_p2)  ;;  %v1807_v25 = vrot.slane (!%p369_p2), %v589_v22, %v1795_v21  ;;  %v1810_v26 = vrot.slane (!%p369_p2), %v589_v22, %v1801_v23  ;;  %vm1856_vm3 = vmor (!%p369_p2), %vm710_vm2, %vm709_vm1 }
   0xd   : > { %s2095_s25 = smov (!%p424_p3, %s1460_s25), 15  ;;  %744 = vmatprep.subr.bf16.mxu1 %v1614_v5  ;;  %985 = vmatprep.subr.bf16.mxu0 %v1617_v7  ;;  %v817_v27 = vld [vmem:[%s2084_s5] sm:$0x3]  ;;  %v1816_v28 = vrot.slane %v617_v24, %v1795_v21  ;;  %v1819_v31 = vrot.slane %v617_v24, %v1801_v23 }
   0xe   : > { %s1461_s16 = sshll.u32 %s2095_s25, 2  ;;  %v1824_v36 = vrot.slane %v817_v27, %v1795_v21  ;;  %v1829_v41 = vrot.slane %v817_v27, %v1801_v23  ;;  %s1538_s30 = sshll.u32 %s2095_s25, 3  ;;  %v845_v52 = vld [vmem:[%s2087_s8] sm:$0x3] }
   0xf   : > { %s1739_s24 = scalar_lea.vmem %s2079_s0, %s1461_s16  ;;  %s1852_s17 = scalar_lea.vmem %s2089_s10, %s1538_s30  ;;  %v1861_v0 = vrot.slane %v845_v52, %v1795_v21  ;;  %v1864_v1 = vrot.slane %v845_v52, %v1801_v23 }
  0x10   : > { %v1610_v10 = vld [vmem:[%s1739_s24] sm:$0xff]   ;;  %v1611_v11 = vld [vmem:[%s1739_s24 + $0x18] sm:$0xff]   ;;  %v1621_v16 = vld [vmem:[%s1739_s24 + $0x8] sm:$0xff]   ;;  %s1904_s23 = scalar_lea.vmem %s2090_s11, %s1538_s30  ;;  %s1594_s27 = smul.u32 12, %s2095_s25 }
  0x11   : > { %1478 = vmatmul.mubr.msk.bf16.vlgmr.msra.gmra.mrb[0].mxu0 %vm503_vm0, %v1610_v10  ;;  %1481 = vmatmul.mubr.msk.bf16.vlgmr.msra.gmra.mrb[0].mxu1 %vm503_vm0, %v1611_v11  ;;  %v1626_v18 = vld [vmem:[%s1739_s24 + $0x10] sm:$0xff]  }
  0x12   : > { %745 = vmatpush1.bf16.msra.mxu1 %v1612_v6  ;;  %986 = vmatpush1.bf16.msra.mxu0 %v1615_v8  ;;  %s1988_s29 = scalar_lea.vmem %s2091_s12, %s1594_s27 }
  0x13   : > { %746 = vmatprep.subr.bf16.mxu1 %v1620_v9  ;;  %558 = vmatprep.mubr.bf16.mxu0 %v1636_v2 }
  0x14   : > { %776 = vmatprep.mubr.bf16.mxu1 %v1636_v2  ;;  %987 = vmatprep.subr.bf16.mxu0 %v1625_v14 }
  0x16   : > { %747 = vmatpush1.bf16.msra.mxu1 %v1618_v12  ;;  %988 = vmatpush1.bf16.msra.mxu0 %v1623_v13 }
  0x17   : > { %1578 = vmatprep.subr.bf16.mxu1 %v1622_v15 }
  0x19   : > { %1479 = vmatmul.mubr.msk.bf16.gmra.mrb[4].mxu0 %vm503_vm0, %v1621_v16  ;;  %1494 = vmatmul.mubr.msk.bf16.vlgmr.msra.gmra.mrb[4].mxu1 %vm503_vm0, %v1610_v10 }
  0x1a   : > { %1579 = vmatpush3.bf16.msra.mxu1 %v1622_v15  ;;  %568 = vmatprep.mubr.bf16.mxu0 %v1636_v2 }
  0x1b   : > { %786 = vmatprep.mubr.bf16.mxu1 %v1636_v2  ;;  %1580 = vmatprep.subr.bf16.mxu1 %v1627_v17 }
  0x1e   : > { %1581 = vmatpush3.bf16.msra.mxu1 %v1627_v17 }
  0x21   : > { %1480 = vmatmul.mubr.msk.bf16.gmra.mrb[8].mxu0 %vm503_vm0, %v1626_v18  ;;  %1495 = vmatmul.mubr.msk.bf16.gmra.mrb[8].mxu1 %vm503_vm0, %v1621_v16 }
  0x22   : > { %796 = vmatprep.mubr.bf16.mxu1 %v1636_v2  ;;  %1017 = vmatprep.mubr.bf16.mxu0 %v1636_v2 }
  0x29   : > { %1496 = vmatmul.mubr.msk.bf16.gmra.mrb[12].mxu1 %vm503_vm0, %v1626_v18  ;;  %1512 = vmatmul.mubr.msk.bf16.vlgmr.msra.gmra.mrb[12].mxu0 %vm503_vm0, %v1610_v10 }
  0x2a   : > { %806 = vmatprep.mubr.bf16.mxu1 %v1636_v2  ;;  %1027 = vmatprep.mubr.bf16.mxu0 %v1636_v2 }
  0x31   : > { %1497 = vmatmul.mubr.msk.bf16.gmra.mrb[16].mxu1 %vm503_vm0, %v1611_v11  ;;  %1513 = vmatmul.mubr.msk.bf16.gmra.mrb[16].mxu0 %vm503_vm0, %v1621_v16 }
  0x32   : > { %1037 = vmatprep.mubr.bf16.mxu0 %v1636_v2  ;;  %1582 = vmatprep.mubr.msk.bf16.mxu1 %vm503_vm0, %v1610_v10 }
  0x39   : > { %1514 = vmatmul.mubr.msk.bf16.gmra.mrb[20].mxu0 %vm503_vm0, %v1626_v18  ;;  %1583 = vmatmul.mubr.msk.bf16.vlgmr.msra.gmra.mrb[20].mxu1 %vm503_vm0, %v1621_v16 }
  0x3a   : > { %1047 = vmatprep.mubr.bf16.mxu0 %v1636_v2  ;;  %1586 = vmatprep.mubr.msk.bf16.mxu1 %vm503_vm0, %v1626_v18 }
  0x41   : > { %1515 = vmatmul.mubr.msk.bf16.gmra.mrb[24].mxu0 %vm503_vm0, %v1611_v11  ;;  %1587 = vmatmul.mubr.msk.bf16.gmra.mrb[24].mxu1 %vm503_vm0, %v1611_v11 }
  0xe4   : > { %v550_v29 = vpop.f32.mrb[0].mxu0  ;;  %v580_v30 = vpop.f32.mrb[0].mxu1 }
  0xe5   : > { %v601_v32 = vmul.f32 %v1807_v25, %v550_v29  ;;  %v613_v33 = vmul.f32 %v1807_v25, %v580_v30  ;;  %v552_v34 = vpop.f32.mrb[1].mxu0  ;;  %v582_v35 = vpop.f32.mrb[1].mxu1 }
  0xe6   : > { %v602_v37 = vmul.f32 %v1810_v26, %v552_v34  ;;  %v614_v38 = vmul.f32 %v1810_v26, %v582_v35  ;;  %v554_v39 = vpop.f32.mrb[2].mxu0  ;;  %v584_v40 = vpop.f32.mrb[2].mxu1 }
  0xe7   : > { %v629_v42 = vadd.f32 %v1816_v28, %v601_v32  ;;  %v641_v43 = vadd.f32 %v1816_v28, %v613_v33  ;;  %v603_v44 = vmul.f32 %v1807_v25, %v554_v39  ;;  %v615_v45 = vmul.f32 %v1807_v25, %v584_v40  ;;  %v556_v46 = vpop.f32.mrb[3].mxu0  ;;  %v586_v47 = vpop.f32.mrb[3].mxu1 }
  0xe8   : > { %v630_v48 = vadd.f32 %v1819_v31, %v602_v37  ;;  %v642_v49 = vadd.f32 %v1819_v31, %v614_v38  ;;  %v604_v50 = vmul.f32 %v1810_v26, %v556_v46  ;;  %v616_v51 = vmul.f32 %v1810_v26, %v586_v47 }
  0xe9   : > { %v645_v53 = vmax.f32 %v629_v42, 0.0  ;;  %v657_v54 = vmax.f32 %v641_v43, 0.0  ;;  %v631_v55 = vadd.f32 %v1816_v28, %v603_v44  ;;  %v643_v56 = vadd.f32 %v1816_v28, %v615_v45  ;;  %v1897_v45 = vld [vmem:[%s2085_s6] sm:$0x7] }
  0xea   : > { %v646_v57 = vmax.f32 %v630_v48, 0.0  ;;  %v658_v58 = vmax.f32 %v642_v49, 0.0  ;;  %v632_v59 = vadd.f32 %v1819_v31, %v604_v50  ;;  %v644_v60 = vadd.f32 %v1819_v31, %v616_v51 }
  0xeb   : > { %v647_v62 = vmax.f32 %v631_v55, 0.0  ;;  %v659_v63 = vmax.f32 %v643_v56, 0.0 }
  0xec   : > { %v1540_v2 = vpack.c.bf16 %v646_v57, %v645_v53  ;;  %v1546_v3 = vpack.c.bf16 %v658_v58, %v657_v54  ;;  %v648_v4 = vmax.f32 %v632_v59, 0.0  ;;  %v660_v5 = vmax.f32 %v644_v60, 0.0  ;;  %v560_v6 = vpop.f32.mrb[4].mxu0  ;;  %v778_v7 = vpop.f32.mrb[4].mxu1 }
  0xed   : > { %v605_v8 = vmul.f32 %v1807_v25, %v560_v6  ;;  %v829_v9 = vmul.f32 %v1824_v36, %v778_v7  ;;  %v562_v10 = vpop.f32.mrb[5].mxu0  ;;  %v780_v11 = vpop.f32.mrb[5].mxu1  ;;  %v1910_v58 = vrot.slane %v1897_v45, %v1795_v21  ;;  %v1914_v59 = vrot.slane %v1897_v45, %v1801_v23 }
  0xee   : > { %712 = vst.msk [vmem:[%s1852_s17] sm:$0xff] %vm1856_vm3, %v1540_v2  ;;  %718 = vst.msk [vmem:[%s1852_s17 + $0x30] sm:$0xff] %vm1856_vm3, %v1546_v3  ;;  %v1541_v12 = vpack.c.bf16 %v648_v4, %v647_v62  ;;  %v1547_v13 = vpack.c.bf16 %v660_v5, %v659_v63  ;;  %v606_v14 = vmul.f32 %v1810_v26, %v562_v10  ;;  %v564_v16 = vpop.f32.mrb[6].mxu0  ;;  %v782_v17 = vpop.f32.mrb[6].mxu1 }
  0xef   : > { %v830_v15 = vmul.f32 %v1829_v41, %v780_v11  ;;  %v633_v18 = vadd.f32 %v1816_v28, %v605_v8  ;;  %v857_v19 = vadd.f32 %v1861_v0, %v829_v9  ;;  %v607_v22 = vmul.f32 %v1807_v25, %v564_v16  ;;  %v566_v27 = vpop.f32.mrb[7].mxu0  ;;  %v784_v29 = vpop.f32.mrb[7].mxu1 }
  0xf0   : > { %v831_v24 = vmul.f32 %v1824_v36, %v782_v17  ;;  %713 = vst.msk [vmem:[%s1852_s17 + $0x8] sm:$0xff] %vm1856_vm3, %v1541_v12  ;;  %719 = vst.msk [vmem:[%s1852_s17 + $0x38] sm:$0xff] %vm1856_vm3, %v1547_v13  ;;  %v634_v30 = vadd.f32 %v1819_v31, %v606_v14  ;;  %v608_v33 = vmul.f32 %v1810_v26, %v566_v27 }
  0xf1   : > { %v858_v32 = vadd.f32 %v1864_v1, %v830_v15  ;;  %v832_v34 = vmul.f32 %v1829_v41, %v784_v29  ;;  %v649_v35 = vmax.f32 %v633_v18, 0.0  ;;  %v873_v37 = vmax.f32 %v857_v19, 0.0 }
  0xf2   : > { %v635_v38 = vadd.f32 %v1816_v28, %v607_v22  ;;  %v859_v39 = vadd.f32 %v1861_v0, %v831_v24  ;;  %v650_v40 = vmax.f32 %v634_v30, 0.0  ;;  %v636_v43 = vadd.f32 %v1819_v31, %v608_v33 }
  0xf3   : > { %v874_v42 = vmax.f32 %v858_v32, 0.0  ;;  %v860_v44 = vadd.f32 %v1864_v1, %v832_v34 }
  0xf4   : > { %v651_v46 = vmax.f32 %v635_v38, 0.0  ;;  %v875_v47 = vmax.f32 %v859_v39, 0.0  ;;  %v1542_v48 = vpack.c.bf16 %v650_v40, %v649_v35  ;;  %v652_v50 = vmax.f32 %v636_v43, 0.0  ;;  %v570_v52 = vpop.f32.mrb[8].mxu0  ;;  %v788_v53 = vpop.f32.mrb[8].mxu1 }
  0xf5   : > { %v1548_v49 = vpack.c.bf16 %v874_v42, %v873_v37  ;;  %v876_v51 = vmax.f32 %v860_v44, 0.0  ;;  %v609_v54 = vmul.f32 %v1807_v25, %v570_v52  ;;  %v833_v55 = vmul.f32 %v1824_v36, %v788_v53  ;;  %v572_v56 = vpop.f32.mrb[9].mxu0  ;;  %v790_v57 = vpop.f32.mrb[9].mxu1 }
  0xf6   : > { %714 = vst.msk [vmem:[%s1852_s17 + $0x10] sm:$0xff] %vm1856_vm3, %v1542_v48  ;;  %v1543_v60 = vpack.c.bf16 %v652_v50, %v651_v46  ;;  %v610_v63 = vmul.f32 %v1810_v26, %v572_v56  ;;  %v834_v2 = vmul.f32 %v1829_v41, %v790_v57  ;;  %v574_v3 = vpop.f32.mrb[10].mxu0  ;;  %v792_v4 = vpop.f32.mrb[10].mxu1 }
  0xf7   : > { %937 = vst.msk [vmem:[%s1904_s23] sm:$0xff] %vm1856_vm3, %v1548_v49  ;;  %v1549_v62 = vpack.c.bf16 %v876_v51, %v875_v47  ;;  %v637_v5 = vadd.f32 %v1816_v28, %v609_v54  ;;  %v861_v6 = vadd.f32 %v1861_v0, %v833_v55  ;;  %v611_v7 = vmul.f32 %v1807_v25, %v574_v3  ;;  %v576_v9 = vpop.f32.mrb[11].mxu0  ;;  %v794_v10 = vpop.f32.mrb[11].mxu1  ;;  %v1941_v25 = vld [vmem:[%s2088_s9] sm:$0x7] }
  0xf8   : > { %v835_v8 = vmul.f32 %v1824_v36, %v792_v4  ;;  %715 = vst.msk [vmem:[%s1852_s17 + $0x18] sm:$0xff] %vm1856_vm3, %v1543_v60  ;;  %v638_v11 = vadd.f32 %v1819_v31, %v610_v63  ;;  %v862_v12 = vadd.f32 %v1864_v1, %v834_v2  ;;  %v612_v13 = vmul.f32 %v1810_v26, %v576_v9 }
  0xf9   : > { %938 = vst.msk [vmem:[%s1904_s23 + $0x8] sm:$0xff] %vm1856_vm3, %v1549_v62  ;;  %v836_v14 = vmul.f32 %v1829_v41, %v794_v10  ;;  %v653_v15 = vmax.f32 %v637_v5, 0.0  ;;  %v877_v16 = vmax.f32 %v861_v6, 0.0  ;;  %v639_v17 = vadd.f32 %v1816_v28, %v611_v7 }
  0xfa   : > { %v863_v18 = vadd.f32 %v1861_v0, %v835_v8  ;;  %v654_v19 = vmax.f32 %v638_v11, 0.0  ;;  %v878_v22 = vmax.f32 %v862_v12, 0.0  ;;  %v640_v24 = vadd.f32 %v1819_v31, %v612_v13 }
  0xfb   : > { %v864_v27 = vadd.f32 %v1864_v1, %v836_v14  ;;  %v655_v26 = vmax.f32 %v639_v17, 0.0  ;;  %v1949_v30 = vrot.slane %v1941_v25, %v1795_v21  ;;  %v1953_v32 = vrot.slane %v1941_v25, %v1801_v23 }
  0xfc   : > { %v879_v29 = vmax.f32 %v863_v18, 0.0  ;;  %v1544_v28 = vpack.c.bf16 %v654_v19, %v653_v15  ;;  %v1550_v33 = vpack.c.bf16 %v878_v22, %v877_v16  ;;  %v656_v34 = vmax.f32 %v640_v24, 0.0  ;;  %v798_v31 = vpop.f32.mrb[12].mxu1  ;;  %v1019_v37 = vpop.f32.mrb[12].mxu0 }
  0xfd   : > { %v880_v35 = vmax.f32 %v864_v27, 0.0  ;;  %v837_v38 = vmul.f32 %v1824_v36, %v798_v31  ;;  %v1140_v39 = vmul.f32 %v1910_v58, %v1019_v37  ;;  %v800_v40 = vpop.f32.mrb[13].mxu1  ;;  %v1021_v42 = vpop.f32.mrb[13].mxu0  ;;  %v1135_v21 = vsub.s32 2, %v1792_v20 }
  0xfe   : > { %716 = vst.msk [vmem:[%s1852_s17 + $0x20] sm:$0xff] %vm1856_vm3, %v1544_v28  ;;  %939 = vst.msk [vmem:[%s1904_s23 + $0x10] sm:$0xff] %vm1856_vm3, %v1550_v33  ;;  %v1545_v23 = vpack.c.bf16 %v656_v34, %v655_v26  ;;  %v838_v44 = vmul.f32 %v1829_v41, %v800_v40  ;;  %v1141_v46 = vmul.f32 %v1914_v59, %v1021_v42  ;;  %v802_v47 = vpop.f32.mrb[14].mxu1  ;;  %v1023_v48 = vpop.f32.mrb[14].mxu0 }
  0xff   : > { %v1551_v43 = vpack.c.bf16 %v880_v35, %v879_v29  ;;  %v865_v49 = vadd.f32 %v1861_v0, %v837_v38  ;;  %v1181_v50 = vadd.f32 %v1949_v30, %v1140_v39  ;;  %v839_v51 = vmul.f32 %v1824_v36, %v802_v47  ;;  %v804_v53 = vpop.f32.mrb[15].mxu1  ;;  %v1025_v54 = vpop.f32.mrb[15].mxu0 }
 0x100   : > { %v1143_v52 = vmul.f32 %v1910_v58, %v1023_v48  ;;  %717 = vst.msk [vmem:[%s1852_s17 + $0x28] sm:$0xff] %vm1856_vm3, %v1545_v23  ;;  %v866_v55 = vadd.f32 %v1864_v1, %v838_v44  ;;  %v1182_v56 = vadd.f32 %v1953_v32, %v1141_v46  ;;  %v840_v57 = vmul.f32 %v1829_v41, %v804_v53 }
 0x101   : > { %940 = vst.msk [vmem:[%s1904_s23 + $0x18] sm:$0xff] %vm1856_vm3, %v1551_v43  ;;  %v1144_v60 = vmul.f32 %v1914_v59, %v1025_v54  ;;  %v881_v62 = vmax.f32 %v865_v49, 0.0  ;;  %v1205_v63 = vmax.f32 %v1181_v50, 0.0  ;;  %v867_v2 = vadd.f32 %v1861_v0, %v839_v51 }
 0x102   : > { %v1184_v3 = vadd.f32 %v1949_v30, %v1143_v52  ;;  %v882_v4 = vmax.f32 %v866_v55, 0.0  ;;  %v1206_v5 = vmax.f32 %v1182_v56, 0.0  ;;  %v868_v6 = vadd.f32 %v1864_v1, %v840_v57 }
 0x103   : > { %v1185_v7 = vadd.f32 %v1953_v32, %v1144_v60  ;;  %v883_v8 = vmax.f32 %v867_v2, 0.0  ;;  %v1995_v22 = vrot.slane %v1897_v45, %v1135_v21 }
 0x104   : > { %v1208_v9 = vmax.f32 %v1184_v3, 0.0  ;;  %v1552_v10 = vpack.c.bf16 %v882_v4, %v881_v62  ;;  %v1556_v11 = vpack.c.bf16 %v1206_v5, %v1205_v63  ;;  %v884_v12 = vmax.f32 %v868_v6, 0.0  ;;  %v808_v14 = vpop.f32.mrb[16].mxu1  ;;  %v1029_v15 = vpop.f32.mrb[16].mxu0 }
 0x105   : > { %v1209_v13 = vmax.f32 %v1185_v7, 0.0  ;;  %v841_v16 = vmul.f32 %v1824_v36, %v808_v14  ;;  %v1146_v17 = vmul.f32 %v1910_v58, %v1029_v15  ;;  %v810_v18 = vpop.f32.mrb[17].mxu1  ;;  %v1031_v19 = vpop.f32.mrb[17].mxu0 }
 0x106   : > { %941 = vst.msk [vmem:[%s1904_s23 + $0x20] sm:$0xff] %vm1856_vm3, %v1552_v10  ;;  %1309 = vst [vmem:[%s1988_s29] sm:$0xff] %v1556_v11  ;;  %v1553_v24 = vpack.c.bf16 %v884_v12, %v883_v8  ;;  %v842_v26 = vmul.f32 %v1829_v41, %v810_v18  ;;  %v1147_v29 = vmul.f32 %v1914_v59, %v1031_v19  ;;  %v812_v28 = vpop.f32.mrb[18].mxu1  ;;  %v1033_v33 = vpop.f32.mrb[18].mxu0 }
 0x107   : > { %v1558_v27 = vpack.c.bf16 %v1209_v13, %v1208_v9  ;;  %v869_v34 = vadd.f32 %v1861_v0, %v841_v16  ;;  %v1187_v35 = vadd.f32 %v1949_v30, %v1146_v17  ;;  %v843_v45 = vmul.f32 %v1824_v36, %v812_v28  ;;  %v814_v37 = vpop.f32.mrb[19].mxu1  ;;  %v1035_v38 = vpop.f32.mrb[19].mxu0 }
 0x108   : > { %v1149_v31 = vmul.f32 %v1910_v58, %v1033_v33  ;;  %942 = vst.msk [vmem:[%s1904_s23 + $0x28] sm:$0xff] %vm1856_vm3, %v1553_v24  ;;  %v870_v39 = vadd.f32 %v1864_v1, %v842_v26  ;;  %v1188_v40 = vadd.f32 %v1953_v32, %v1147_v29  ;;  %v844_v42 = vmul.f32 %v1829_v41, %v814_v37 }
 0x109   : > { %1311 = vst [vmem:[%s1988_s29 + $0xc] sm:$0xff] %v1558_v27  ;;  %v1150_v23 = vmul.f32 %v1914_v59, %v1035_v38  ;;  %v885_v43 = vmax.f32 %v869_v34, 0.0  ;;  %v1211_v44 = vmax.f32 %v1187_v35, 0.0  ;;  %v871_v36 = vadd.f32 %v1861_v0, %v843_v45 }
 0x10a   : > { %v1190_v46 = vadd.f32 %v1949_v30, %v1149_v31  ;;  %v886_v47 = vmax.f32 %v870_v39, 0.0  ;;  %v1212_v48 = vmax.f32 %v1188_v40, 0.0  ;;  %v872_v49 = vadd.f32 %v1864_v1, %v844_v42 }
 0x10b   : > { %v1191_v50 = vadd.f32 %v1953_v32, %v1150_v23  ;;  %v887_v51 = vmax.f32 %v871_v36, 0.0  ;;  %v2022_v41 = vrot.slane %v1941_v25, %v1135_v21 }
 0x10c   : > { %v1214_v52 = vmax.f32 %v1190_v46, 0.0  ;;  %v1554_v53 = vpack.c.bf16 %v886_v47, %v885_v43  ;;  %v1560_v54 = vpack.c.bf16 %v1212_v48, %v1211_v44  ;;  %v888_v0 = vmax.f32 %v872_v49, 0.0  ;;  %v1039_v56 = vpop.f32.mrb[20].mxu0  ;;  %v1584_v57 = vpop.f32.mrb[20].mxu1 }
 0x10d   : > { %v1215_v55 = vmax.f32 %v1191_v50, 0.0  ;;  %v1152_v60 = vmul.f32 %v1910_v58, %v1039_v56  ;;  %v1148_v1 = vmul.f32 %v1584_v57, %v1995_v22  ;;  %v1041_v62 = vpop.f32.mrb[21].mxu0  ;;  %v1092_v63 = vpop.f32.mrb[21].mxu1 }
 0x10e   : > { %943 = vst.msk [vmem:[%s1904_s23 + $0x30] sm:$0xff] %vm1856_vm3, %v1554_v53  ;;  %1313 = vst [vmem:[%s1988_s29 + $0x18] sm:$0xff] %v1560_v54  ;;  %v1555_v20 = vpack.c.bf16 %v888_v0, %v887_v51  ;;  %v1153_v21 = vmul.f32 %v1914_v59, %v1041_v62  ;;  %v1142_v2 = vmul.f32 %v1995_v22, %v1092_v63  ;;  %v1043_v3 = vpop.f32.mrb[22].mxu0  ;;  %v1585_v4 = vpop.f32.mrb[22].mxu1 }
 0x10f   : > { %v1562_v25 = vpack.c.bf16 %v1215_v55, %v1214_v52  ;;  %v1193_v5 = vadd.f32 %v1949_v30, %v1152_v60  ;;  %v1189_v6 = vadd.f32 %v2022_v41, %v1148_v1  ;;  %v1155_v7 = vmul.f32 %v1910_v58, %v1043_v3  ;;  %v1045_v9 = vpop.f32.mrb[23].mxu0  ;;  %v1095_v10 = vpop.f32.mrb[23].mxu1 }
 0x110   : > { %v1151_v8 = vmul.f32 %v1585_v4, %v1995_v22  ;;  %944 = vst.msk [vmem:[%s1904_s23 + $0x38] sm:$0xff] %vm1856_vm3, %v1555_v20  ;;  %v1194_v11 = vadd.f32 %v1953_v32, %v1153_v21  ;;  %v1183_v12 = vadd.f32 %v2022_v41, %v1142_v2  ;;  %v1156_v13 = vmul.f32 %v1914_v59, %v1045_v9 }
 0x111   : > { %1315 = vst [vmem:[%s1988_s29 + $0x24] sm:$0xff] %v1562_v25  ;;  %v1145_v14 = vmul.f32 %v1995_v22, %v1095_v10  ;;  %v1217_v15 = vmax.f32 %v1193_v5, 0.0  ;;  %v1213_v16 = vmax.f32 %v1189_v6, 0.0  ;;  %v1196_v17 = vadd.f32 %v1949_v30, %v1155_v7 }
 0x112   : > { %v1192_v18 = vadd.f32 %v2022_v41, %v1151_v8  ;;  %v1218_v19 = vmax.f32 %v1194_v11, 0.0  ;;  %v1207_v24 = vmax.f32 %v1183_v12, 0.0  ;;  %v1197_v61 = vadd.f32 %v1953_v32, %v1156_v13 }
 0x113   : > { %v1186_v27 = vadd.f32 %v2022_v41, %v1145_v14  ;;  %v1561_v26 = vpack.c.bf16 %v1213_v16, %v1213_v16  ;;  %v1220_v29 = vmax.f32 %v1196_v17, 0.0 }
 0x114   : > { %v1216_v28 = vmax.f32 %v1192_v18, 0.0  ;;  %v1564_v33 = vpack.c.bf16 %v1218_v19, %v1217_v15  ;;  %v1557_v34 = vpack.c.bf16 %v1207_v24, %v1207_v24  ;;  %v1221_v35 = vmax.f32 %v1197_v61, 0.0  ;;  %v1049_v31 = vpop.f32.mrb[24].mxu0  ;;  %v1588_v37 = vpop.f32.mrb[24].mxu1 }
 0x115   : > { %v1210_v45 = vmax.f32 %v1186_v27, 0.0  ;;  %1314 = vst [vmem:[%s1988_s29 + $0x20] sm:$0xf] %v1561_v26  ;;  %v1158_v39 = vmul.f32 %v1910_v58, %v1049_v31  ;;  %v1160_v40 = vmul.f32 %v1588_v37, %v1995_v22  ;;  %v1051_v42 = vpop.f32.mrb[25].mxu0  ;;  %v1108_v23 = vpop.f32.mrb[25].mxu1 }
 0x116   : > { %v1563_v38 = vpack.c.bf16 %v1216_v28, %v1216_v28  ;;  %1317 = vst [vmem:[%s1988_s29 + $0x30] sm:$0xff] %v1564_v33  ;;  %1310 = vst [vmem:[%s1988_s29 + $0x8] sm:$0xf] %v1557_v34  ;;  %v1566_v43 = vpack.c.bf16 %v1221_v35, %v1220_v29  ;;  %v1159_v36 = vmul.f32 %v1914_v59, %v1051_v42  ;;  %v1053_v47 = vpop.f32.mrb[26].mxu0  ;;  %v1589_v48 = vpop.f32.mrb[26].mxu1 }
 0x117   : > { %v1559_v44 = vpack.c.bf16 %v1210_v45, %v1210_v45  ;;  %v1154_v46 = vmul.f32 %v1995_v22, %v1108_v23  ;;  %v1199_v49 = vadd.f32 %v1949_v30, %v1158_v39  ;;  %v1201_v50 = vadd.f32 %v2022_v41, %v1160_v40  ;;  %v1055_v53 = vpop.f32.mrb[27].mxu0  ;;  %v1111_v54 = vpop.f32.mrb[27].mxu1 }
 0x118   : > { %1316 = vst [vmem:[%s1988_s29 + $0x2c] sm:$0xf] %v1563_v38  ;;  %v1161_v51 = vmul.f32 %v1910_v58, %v1053_v47  ;;  %v1163_v52 = vmul.f32 %v1589_v48, %v1995_v22  ;;  %1319 = vst [vmem:[%s1988_s29 + $0x3c] sm:$0xff] %v1566_v43  ;;  %v1200_v0 = vadd.f32 %v1953_v32, %v1159_v36 }
 0x119   : > { %1312 = vst [vmem:[%s1988_s29 + $0x14] sm:$0xf] %v1559_v44  ;;  %v1195_v55 = vadd.f32 %v2022_v41, %v1154_v46  ;;  %v1162_v56 = vmul.f32 %v1914_v59, %v1055_v53  ;;  %v1157_v57 = vmul.f32 %v1995_v22, %v1111_v54  ;;  %v1223_v60 = vmax.f32 %v1199_v49, 0.0 }
 0x11a   : > { %v1225_v1 = vmax.f32 %v1201_v50, 0.0  ;;  %v1202_v58 = vadd.f32 %v1949_v30, %v1161_v51  ;;  %v1204_v62 = vadd.f32 %v2022_v41, %v1163_v52  ;;  %v1224_v63 = vmax.f32 %v1200_v0, 0.0 }
 0x11b   : > { %v1219_v20 = vmax.f32 %v1195_v55, 0.0  ;;  %v1203_v25 = vadd.f32 %v1953_v32, %v1162_v56  ;;  %v1198_v21 = vadd.f32 %v2022_v41, %v1157_v57 }
 0x11c   : > { %v1569_v59 = vpack.c.bf16 %v1225_v1, %v1225_v1  ;;  %v1226_v22 = vmax.f32 %v1202_v58, 0.0  ;;  %v1228_v2 = vmax.f32 %v1204_v62, 0.0  ;;  %v1568_v3 = vpack.c.bf16 %v1224_v63, %v1223_v60 }
 0x11d   : > { %v1565_v4 = vpack.c.bf16 %v1219_v20, %v1219_v20  ;;  %v1227_v5 = vmax.f32 %v1203_v25, 0.0  ;;  %v1222_v6 = vmax.f32 %v1198_v21, 0.0 }
 0x11e   : > { %1322 = vst [vmem:[%s1988_s29 + $0x50] sm:$0xf] %v1569_v59  ;;  %v1571_v30 = vpack.c.bf16 %v1228_v2, %v1228_v2  ;;  %1321 = vst [vmem:[%s1988_s29 + $0x48] sm:$0xff] %v1568_v3 }
 0x11f   : > { %1318 = vst [vmem:[%s1988_s29 + $0x38] sm:$0xf] %v1565_v4  ;;  %v1570_v7 = vpack.c.bf16 %v1227_v5, %v1226_v22  ;;  %v1567_v8 = vpack.c.bf16 %v1222_v6, %v1222_v6 }
 0x120   : > { %1324 = vst [vmem:[%s1988_s29 + $0x5c] sm:$0xf] %v1571_v30 }
 0x121   : > { %1323 = vst [vmem:[%s1988_s29 + $0x54] sm:$0xff] %v1570_v7  ;;  %1320 = vst [vmem:[%s1988_s29 + $0x44] sm:$0xf] %v1567_v8 }
 0x122 PF: > { %s23_s21 = sadd.s32 1, %s1634_s21  }
 0x123   : > { %p20_p4 = scmp.ge.s32.totalorder %s23_s21, 4  }
 0x125   :  { %22 = sbr.rel (!%p20_p4) target bundleno = 1 (0x1), region = 114 }

// kernel: _lambda_.9
= control target key start
LH: loop header
LB: loop body
LE: loop exit
PB: predicated region body
PF: predicated region fallthrough
CT: control target
= control target key end

     0   :  { %s3268_s15 = smov 0   ;;  %s4115_s0 = inlined_call_operand.vmem [shape: bf16[2,8,8,192], index: 0, kind: input, shape index: {}]   ;;  %s4116_s1 = inlined_call_operand.vmem [shape: bf16[7,192,192], index: 1, kind: input, shape index: {}]   ;;  %s4117_s2 = inlined_call_operand.vmem [shape: f32[1,192], index: 2, kind: input, shape index: {}]   ;;  %s4118_s3 = inlined_call_operand.vmem [shape: f32[1,192], index: 3, kind: input, shape index: {}]   ;;  %s4119_s4 = inlined_call_operand.vmem [shape: bf16[2,8,8,192], index: 4, kind: output, shape index: {}]  }
   0x1 LB: > { %s2412_s16 = sadd.s32 4294967295, %s3240_s15   ;;  %p2416_p0 = scmp.ge.s32.totalorder %s3240_s15, 1  ;;  %s3240_s15 = sphi %s3268_s15, %s14_s15  }
   0x2   : > { %p162_p1 = scmp.lt.s32.totalorder %s3240_s15, 3 }
   0x4   : > { %p163_p2 = pnand %p2416_p0, %p162_p1 }
   0x5   : > { %v2966_v0 = vld [vmem:[%s4116_s1 + $0xc4] ss:$8 sps:$4 sm:$0xff] (!%p163_p2)   ;;  %v2970_v2 = vld [vmem:[%s4116_s1 + $0xc0] ss:$8 sps:$4 sm:$0xff] (!%p163_p2)   ;;  %v2972_v4 = vld [vmem:[%s4116_s1 + $0xd4] ss:$8 sps:$4 sm:$0xff] (!%p163_p2)  }
   0x6   : > { %166 = sbr.rel (%p163_p2) target bundleno = 435 (0x1b3), region = 36  ;;  %v2968_v1 = vld [vmem:[%s4116_s1 + $0x244] ss:$8 sps:$4 sm:$0xff] (!%p163_p2)   ;;  %461 = vmatprep.subr.bf16.mxu1 (!%p163_p2), %v2966_v0  ;;  %v2971_v3 = vld [vmem:[%s4116_s1 + $0x240] ss:$8 sps:$4 sm:$0xff] (!%p163_p2)   ;;  %p188_p3 = scmp.lt.s32.totalorder (!%p163_p2), %s2412_s16, 1 }
   0x7   : > { %1267 = vmatprep.subr.bf16.mxu0 (!%p163_p2), %v2968_v1  ;;  %462 = vmatpush1.bf16.msra.mxu1 (!%p163_p2), %v2970_v2  ;;  %v2974_v5 = vld [vmem:[%s4116_s1 + $0x254] ss:$8 sps:$4 sm:$0xff] (!%p163_p2)   ;;  %v2976_v6 = vld [vmem:[%s4116_s1 + $0xd0] ss:$8 sps:$4 sm:$0xff] (!%p163_p2)   ;;  %v2978_v8 = vld [vmem:[%s4116_s1 + $0xe4] ss:$8 sps:$4 sm:$0xff] (!%p163_p2)  }
   0x8   : > { %1268 = vmatpush1.bf16.msra.mxu0 (!%p163_p2), %v2971_v3  ;;  %463 = vmatprep.subr.bf16.mxu1 (!%p163_p2), %v2972_v4  ;;  %v2977_v7 = vld [vmem:[%s4116_s1 + $0x250] ss:$8 sps:$4 sm:$0xff] (!%p163_p2)   ;;  %v2980_v9 = vld [vmem:[%s4116_s1 + $0x264] ss:$8 sps:$4 sm:$0xff] (!%p163_p2)   ;;  %v2982_v10 = vld [vmem:[%s4116_s1 + $0xe0] ss:$8 sps:$4 sm:$0xff] (!%p163_p2)  }
   0x9   : > { %1269 = vmatprep.subr.bf16.mxu0 (!%p163_p2), %v2974_v5  ;;  %v2983_v11 = vld [vmem:[%s4116_s1 + $0x260] ss:$8 sps:$4 sm:$0xff] (!%p163_p2)   ;;  %v2984_v12 = vld [vmem:[%s4116_s1 + $0xf4] ss:$8 sps:$4 sm:$0xff] (!%p163_p2)   ;;  %v2988_v14 = vld [vmem:[%s4116_s1 + $0xf0] ss:$8 sps:$4 sm:$0xff] (!%p163_p2)  }
   0xa   : > { %v2986_v13 = vld [vmem:[%s4116_s1 + $0x274] ss:$8 sps:$4 sm:$0xff] (!%p163_p2)   ;;  %v2989_v15 = vld [vmem:[%s4116_s1 + $0x270] ss:$8 sps:$4 sm:$0xff] (!%p163_p2)   ;;  %v2990_v16 = vld [vmem:[%s4116_s1 + $0x104] ss:$8 sps:$4 sm:$0xff] (!%p163_p2)  }
   0xb   : > { %464 = vmatpush1.bf16.msra.mxu1 (!%p163_p2), %v2976_v6  ;;  %v2992_v17 = vld [vmem:[%s4116_s1 + $0x284] ss:$8 sps:$4 sm:$0xff] (!%p163_p2)   ;;  %v2994_v18 = vld [vmem:[%s4116_s1 + $0x100] ss:$8 sps:$4 sm:$0xff] (!%p163_p2)   ;;  %v2996_v20 = vld [vmem:[%s4116_s1 + $0x114] ss:$8 sps:$4 sm:$0xff] (!%p163_p2)  }
   0xc   : > { %1270 = vmatpush1.bf16.msra.mxu0 (!%p163_p2), %v2977_v7  ;;  %465 = vmatprep.subr.bf16.mxu1 (!%p163_p2), %v2978_v8  ;;  %v2995_v19 = vld [vmem:[%s4116_s1 + $0x280] ss:$8 sps:$4 sm:$0xff] (!%p163_p2)   ;;  %v2998_v21 = vld [vmem:[%s4116_s1 + $0x294] ss:$8 sps:$4 sm:$0xff] (!%p163_p2)   ;;  %v3000_v22 = vld [vmem:[%s4116_s1 + $0x110] ss:$8 sps:$4 sm:$0xff] (!%p163_p2)  }
   0xd   : > { %1271 = vmatprep.subr.bf16.mxu0 %v2980_v9  ;;  %v3001_v23 = vld [vmem:[%s4116_s1 + $0x290] ss:$8 sps:$4 sm:$0xff]   ;;  %v3002_v24 = vld [vmem:[%s4116_s1 + $0x124] ss:$8 sps:$4 sm:$0xff]   ;;  %v3006_v26 = vld [vmem:[%s4116_s1 + $0x120] ss:$8 sps:$4 sm:$0xff]  }
   0xe   : > { %v3004_v25 = vld [vmem:[%s4116_s1 + $0x2a4] ss:$8 sps:$4 sm:$0xff]   ;;  %v3007_v27 = vld [vmem:[%s4116_s1 + $0x2a0] ss:$8 sps:$4 sm:$0xff]   ;;  %s4123_s16 = smov (!%p188_p3, %s2412_s16), 1  ;;  %vm199_vm0 = vcmask 1043456  }
   0xf   : > { %466 = vmatpush1.bf16.msra.mxu1 %v2982_v10  ;;  %v3008_v28 = vld [vmem:[%s4116_s1 + $0x134] ss:$8 sps:$4 sm:$0xff]   ;;  %v3012_v30 = vld [vmem:[%s4116_s1 + $0x130] ss:$8 sps:$4 sm:$0xff]   ;;  %s2827_s5 = sshll.u32 %s4123_s16, 6  ;;  %vm200_vm1 = vcmask 523268  }
  0x10   : > { %1272 = vmatpush1.bf16.msra.mxu0 %v2983_v11  ;;  %467 = vmatprep.subr.bf16.mxu1 %v2984_v12  ;;  %v3010_v29 = vld [vmem:[%s4116_s1 + $0x2b4] ss:$8 sps:$4 sm:$0xff]   ;;  %v3013_v31 = vld [vmem:[%s4116_s1 + $0x2b0] ss:$8 sps:$4 sm:$0xff]   ;;  %v3014_v32 = vld [vmem:[%s4116_s1 + $0x144] ss:$8 sps:$4 sm:$0xff]   ;;  %s3390_s14 = scalar_lea.vmem %s4115_s0, %s2827_s5  ;;  %s4063_s18 = scalar_lea.vmem %s4119_s4, %s2827_s5 }
  0x11   : > { %1273 = vmatprep.subr.bf16.mxu0 %v2986_v13  ;;  %v3016_v33 = vld [vmem:[%s4116_s1 + $0x2c4] ss:$8 sps:$4 sm:$0xff]   ;;  %v3018_v34 = vld [vmem:[%s4116_s1 + $0x140] ss:$8 sps:$4 sm:$0xff]   ;;  %vm3398_vm2 = vmor %vm200_vm1, %vm199_vm0  ;;  %v3242_v39 = vmov 0   ;;  %vm448_vm3 = vcmask 523264  }
  0x12   : > { %v3019_v35 = vld [vmem:[%s4116_s1 + $0x2c0] ss:$8 sps:$4 sm:$0xff]   ;;  %v3020_v37 = vld [vmem:[%s4116_s1 + $0x154] ss:$8 sps:$4 sm:$0xff]   ;;  %203 = vst.msk [vmem:[#allocation2 + $0x8] sm:$0xff] %vm3398_vm2, %v3242_v39  ;;  %204 = vst.msk [vmem:[#allocation2 + $0x10] sm:$0xff] %vm3398_vm2, %v3242_v39 }
  0x13   : > { %468 = vmatpush1.bf16.msra.mxu1 %v2988_v14  ;;  %v3022_v38 = vld [vmem:[%s4116_s1 + $0x2d4] ss:$8 sps:$4 sm:$0xff]   ;;  %202 = vst.msk [vmem:[#allocation2] sm:$0xff] %vm3398_vm2, %v3242_v39  ;;  %206 = vst.msk [vmem:[#allocation2 + $0x58] sm:$0xff] %vm3398_vm2, %v3242_v39  ;;  %v209_v40 = vld [vmem:[%s3390_s14] sm:$0xff] }
  0x14   : > { %1274 = vmatpush1.bf16.msra.mxu0 %v2989_v15  ;;  %469 = vmatprep.subr.bf16.mxu1 %v2990_v16  ;;  %207 = vst.msk [vmem:[#allocation2 + $0x60] sm:$0xff] %vm3398_vm2, %v3242_v39  ;;  %208 = vst.msk [vmem:[#allocation2 + $0x68] sm:$0xff] %vm3398_vm2, %v3242_v39  ;;  %v210_v41 = vld [vmem:[%s3390_s14 + $0x8] sm:$0xff]  ;;  %v3024_v42 = vld [vmem:[%s4116_s1 + $0x150] ss:$8 sps:$4 sm:$0xff]  }
  0x15   : > { %1275 = vmatprep.subr.bf16.mxu0 %v2992_v17  ;;  %218 = vst.msk [vmem:[#allocation2 + $0x18] sm:$0xff] %vm3398_vm2, %v209_v40  ;;  %219 = vst.msk [vmem:[#allocation2 + $0x20] sm:$0xff] %vm3398_vm2, %v210_v41  ;;  %v3025_v43 = vld [vmem:[%s4116_s1 + $0x2d0] ss:$8 sps:$4 sm:$0xff]   ;;  %v3026_v44 = vld [vmem:[%s4116_s1 + $0x164] ss:$8 sps:$4 sm:$0xff]  }
  0x16   : > { %v3028_v45 = vld [vmem:[%s4116_s1 + $0x2e4] ss:$8 sps:$4 sm:$0xff]   ;;  %v3030_v46 = vld [vmem:[%s4116_s1 + $0x160] ss:$8 sps:$4 sm:$0xff]   ;;  %v3032_v50 = vld [vmem:[%s4116_s1 + $0x174] ss:$8 sps:$4 sm:$0xff]  }
  0x17   : > { %470 = vmatpush1.bf16.msra.mxu1 %v2994_v18  ;;  %v3031_v47 = vld [vmem:[%s4116_s1 + $0x2e0] ss:$8 sps:$4 sm:$0xff]   ;;  %v3034_v51 = vld [vmem:[%s4116_s1 + $0x2f4] ss:$8 sps:$4 sm:$0xff]   ;;  %v3036_v55 = vld [vmem:[%s4116_s1 + $0x170] ss:$8 sps:$4 sm:$0xff]  }
  0x18   : > { %1276 = vmatpush1.bf16.msra.mxu0 %v2995_v19  ;;  %471 = vmatprep.subr.bf16.mxu1 %v2996_v20  ;;  %v3037_v57 = vld [vmem:[%s4116_s1 + $0x2f0] ss:$8 sps:$4 sm:$0xff]   ;;  %v3042_v58 = vld [vmem:[%s4116_s1 + $0x4] ss:$8 sps:$4 sm:$0xff]   ;;  %v3040_v61 = vld [vmem:[%s4116_s1] ss:$8 sps:$4 sm:$0xff]  }
  0x19   : > { %1277 = vmatprep.subr.bf16.mxu0 %v2998_v21  ;;  %v3444_v48 = vld [vmem:[#allocation2 + $0x8] sm:$0xff]  ;;  %v3446_v49 = vld [vmem:[#allocation2 + $0x10] sm:$0xff]  ;;  %v212_v5 = vld [vmem:[%s3390_s14 + $0x18] sm:$0xff] }
  0x1a   : > { %v2446_v52 = vcombine.high %v3444_v48, %v3446_v49  ;;  %v3047_v59 = vld [vmem:[%s4116_s1 + $0x304] ss:$8 sps:$4 sm:$0xff]   ;;  %v2445_v60 = vcombine.low %v3444_v48, %v3446_v49  ;;  %v3045_v63 = vld [vmem:[%s4116_s1 + $0x300] ss:$8 sps:$4 sm:$0xff]   ;;  %v3050_v0 = vld [vmem:[%s4116_s1 + $0x14] ss:$8 sps:$4 sm:$0xff]  }
  0x1b   : > { %472 = vmatpush1.bf16.msra.mxu1 %v3000_v22  ;;  %v3053_v1 = vld [vmem:[%s4116_s1 + $0x314] ss:$8 sps:$4 sm:$0xff]   ;;  %v3048_v2 = vld [vmem:[%s4116_s1 + $0x10] ss:$8 sps:$4 sm:$0xff]   ;;  %v3056_v6 = vld [vmem:[%s4116_s1 + $0x24] ss:$8 sps:$4 sm:$0xff]  }
  0x1c   : > { %1278 = vmatpush1.bf16.msra.mxu0 %v3001_v23  ;;  %473 = vmatprep.subr.bf16.mxu1 %v3002_v24  ;;  %v3456_v53 = vld [vmem:[#allocation2 + $0x18] sm:$0xff]  ;;  %v3458_v54 = vld [vmem:[#allocation2 + $0x20] sm:$0xff]  ;;  %v211_v4 = vld [vmem:[%s3390_s14 + $0x10] sm:$0xff]  ;;  %221 = vst.msk [vmem:[#allocation2 + $0x30] sm:$0xff] %vm3398_vm2, %v212_v5 }
  0x1d   : > { %1279 = vmatprep.subr.bf16.mxu0 %v3004_v25  ;;  %2477 = vmatprep.mubr.msk.bf16.mxu1 %vm448_vm3, %v2446_v52  ;;  %v2602_v56 = vcombine.high %v3456_v53, %v3458_v54  ;;  %v2601_v62 = vcombine.low %v3456_v53, %v3458_v54  ;;  %v3051_v3 = vld [vmem:[%s4116_s1 + $0x310] ss:$8 sps:$4 sm:$0xff]   ;;  %220 = vst.msk [vmem:[#allocation2 + $0x28] sm:$0xff] %vm3398_vm2, %v211_v4  ;;  %v3059_v7 = vld [vmem:[%s4116_s1 + $0x324] ss:$8 sps:$4 sm:$0xff]  }
  0x1e   : > { %v3054_v8 = vld [vmem:[%s4116_s1 + $0x20] ss:$8 sps:$4 sm:$0xff]   ;;  %v3062_v10 = vld [vmem:[%s4116_s1 + $0x34] ss:$8 sps:$4 sm:$0xff]   ;;  %v3060_v14 = vld [vmem:[%s4116_s1 + $0x30] ss:$8 sps:$4 sm:$0xff]  }
  0x1f   : > { %474 = vmatpush1.bf16.msra.mxu1 %v3006_v26  ;;  %2633 = vmatprep.mubr.msk.bf16.mxu0 %vm448_vm3, %v2602_v56  ;;  %v3057_v9 = vld [vmem:[%s4116_s1 + $0x320] ss:$8 sps:$4 sm:$0xff]   ;;  %v3065_v11 = vld [vmem:[%s4116_s1 + $0x334] ss:$8 sps:$4 sm:$0xff]   ;;  %v3063_v15 = vld [vmem:[%s4116_s1 + $0x330] ss:$8 sps:$4 sm:$0xff]  }
  0x20   : > { %1280 = vmatpush1.bf16.msra.mxu0 %v3007_v27  ;;  %475 = vmatprep.subr.bf16.mxu1 %v3008_v28  ;;  %v213_v12 = vld [vmem:[%s3390_s14 + $0x20] sm:$0xff]  ;;  %v214_v13 = vld [vmem:[%s3390_s14 + $0x28] sm:$0xff]  ;;  %v3074_v24 = vld [vmem:[%s4116_s1 + $0x54] ss:$8 sps:$4 sm:$0xff]  }
  0x21   : > { %1281 = vmatprep.subr.bf16.mxu0 %v3010_v29  ;;  %222 = vst.msk [vmem:[#allocation2 + $0x38] sm:$0xff] %vm3398_vm2, %v213_v12  ;;  %223 = vst.msk [vmem:[#allocation2 + $0x40] sm:$0xff] %vm3398_vm2, %v214_v13  ;;  %v3068_v18 = vld [vmem:[%s4116_s1 + $0x44] ss:$8 sps:$4 sm:$0xff]   ;;  %v3066_v21 = vld [vmem:[%s4116_s1 + $0x40] ss:$8 sps:$4 sm:$0xff]  }
  0x22   : > { %v3071_v19 = vld [vmem:[%s4116_s1 + $0x344] ss:$8 sps:$4 sm:$0xff]   ;;  %v3069_v22 = vld [vmem:[%s4116_s1 + $0x340] ss:$8 sps:$4 sm:$0xff]   ;;  %v3077_v25 = vld [vmem:[%s4116_s1 + $0x354] ss:$8 sps:$4 sm:$0xff]  }
  0x23   : > { %476 = vmatpush1.bf16.msra.mxu1 %v3012_v30  ;;  %v3537_v17 = vld [vmem:[#allocation2 + $0x30] sm:$0xff]  ;;  %v216_v27 = vld [vmem:[%s3390_s14 + $0x38] sm:$0xff]  ;;  %v3611_v39 = vld [vmem:[#allocation2] sm:$0xff] }
  0x24   : > { %1282 = vmatpush1.bf16.msra.mxu0 %v3013_v31  ;;  %477 = vmatprep.subr.bf16.mxu1 %v3014_v32  ;;  %v3533_v16 = vld [vmem:[#allocation2 + $0x28] sm:$0xff]  ;;  %v215_v26 = vld [vmem:[%s3390_s14 + $0x30] sm:$0xff]  ;;  %225 = vst.msk [vmem:[#allocation2 + $0x50] sm:$0xff] %vm3398_vm2, %v216_v27 }
  0x25   : > { %1283 = vmatprep.subr.bf16.mxu0 %v3016_v33  ;;  %v3547_v20 = vcombine.high %v3533_v16, %v3537_v17  ;;  %v3557_v23 = vcombine.low %v3533_v16, %v3537_v17  ;;  %224 = vst.msk [vmem:[#allocation2 + $0x48] sm:$0xff] %vm3398_vm2, %v215_v26  ;;  %v3072_v30 = vld [vmem:[%s4116_s1 + $0x50] ss:$8 sps:$4 sm:$0xff]   ;;  %v3080_v33 = vld [vmem:[%s4116_s1 + $0x64] ss:$8 sps:$4 sm:$0xff]  }
  0x26   : > { %v3075_v32 = vld [vmem:[%s4116_s1 + $0x350] ss:$8 sps:$4 sm:$0xff]   ;;  %v3088_v40 = vld [vmem:[%s4116_s1 + $0x74] ss:$8 sps:$4 sm:$0xff]   ;;  %v3146_v27 = vld [vmem:[%s4116_s1 + $0x1c4] ss:$8 sps:$4 sm:$0xff]  }
  0x27   : > { %478 = vmatpush1.bf16.msra.mxu1 %v3018_v34  ;;  %v3084_v34 = vld [vmem:[%s4116_s1 + $0x364] ss:$8 sps:$4 sm:$0xff]   ;;  %v3114_v4 = vld [vmem:[%s4116_s1 + $0xb0] ss:$8 sps:$4 sm:$0xff]   ;;  %v3131_v12 = vld [vmem:[%s4116_s1 + $0x3d4] ss:$8 sps:$4 sm:$0xff]  }
  0x28   : > { %1284 = vmatpush1.bf16.msra.mxu0 %v3019_v35  ;;  %479 = vmatprep.subr.bf16.mxu1 %v3020_v37  ;;  %v3571_v28 = vld [vmem:[#allocation2 + $0x38] sm:$0xff]  ;;  %v3578_v29 = vld [vmem:[#allocation2 + $0x40] sm:$0xff] }
  0x29   : > { %1285 = vmatprep.subr.bf16.mxu0 %v3022_v38  ;;  %v3585_v31 = vcombine.high %v3571_v28, %v3578_v29  ;;  %v3078_v35 = vld [vmem:[%s4116_s1 + $0x60] ss:$8 sps:$4 sm:$0xff]   ;;  %v3607_v38 = vcombine.low %v3571_v28, %v3578_v29  ;;  %v3117_v5 = vld [vmem:[%s4116_s1 + $0x3b0] ss:$8 sps:$4 sm:$0xff]   ;;  %v3729_v13 = vcombine.high %v3537_v17, %v3571_v28 }
  0x2a   : > { %v3082_v37 = vld [vmem:[%s4116_s1 + $0x360] ss:$8 sps:$4 sm:$0xff]   ;;  %v3141_v26 = vld [vmem:[%s4116_s1 + $0x3f0] ss:$8 sps:$4 sm:$0xff]  }
  0x2b   : > { %480 = vmatpush1.bf16.msra.mxu1 %v3024_v42  ;;  %v3618_v42 = vld [vmem:[#allocation2 + $0x50] sm:$0xff] }
  0x2c   : > { %1286 = vmatpush1.bf16.msra.mxu0 %v3025_v43  ;;  %481 = vmatprep.subr.bf16.mxu1 %v3026_v44  ;;  %v3616_v41 = vld [vmem:[#allocation2 + $0x48] sm:$0xff]  ;;  %v3091_v43 = vld [vmem:[%s4116_s1 + $0x374] ss:$8 sps:$4 sm:$0xff]  }
  0x2d   : > { %1287 = vmatprep.subr.bf16.mxu0 %v3028_v45  ;;  %v3625_v44 = vcombine.high %v3616_v41, %v3618_v42  ;;  %v2482_v45 = vcombine.high %v3611_v39, %v3444_v48  ;;  %v3647_v52 = vcombine.low %v3616_v41, %v3618_v42 }
  0x2f   : > { %482 = vmatpush1.bf16.msra.mxu1 %v3030_v46  ;;  %v3086_v46 = vld [vmem:[%s4116_s1 + $0x70] ss:$8 sps:$4 sm:$0xff]  }
  0x30   : > { %1288 = vmatpush1.bf16.msra.mxu0 %v3031_v47  ;;  %483 = vmatprep.subr.bf16.mxu1 %v3032_v50  ;;  %v3089_v47 = vld [vmem:[%s4116_s1 + $0x370] ss:$8 sps:$4 sm:$0xff]   ;;  %v3094_v50 = vld [vmem:[%s4116_s1 + $0x84] ss:$8 sps:$4 sm:$0xff]  }
  0x31   : > { %1289 = vmatprep.subr.bf16.mxu0 %v3034_v51  ;;  %v3098_v51 = vld [vmem:[%s4116_s1 + $0x384] ss:$8 sps:$4 sm:$0xff]  }
  0x33   : > { %484 = vmatpush1.bf16.msra.mxu1 %v3036_v55  ;;  %v3092_v55 = vld [vmem:[%s4116_s1 + $0x80] ss:$8 sps:$4 sm:$0xff]  }
  0x34   : > { %1290 = vmatpush1.bf16.msra.mxu0 %v3037_v57  ;;  %702 = vmatprep.subr.bf16.mxu1 %v3042_v58  ;;  %v3658_v57 = vcombine.high %v3458_v54, %v3533_v16  ;;  %v3102_v58 = vld [vmem:[%s4116_s1 + $0x94] ss:$8 sps:$4 sm:$0xff]  }
  0x35   : > { %1558 = vmatprep.subr.bf16.mxu0 %v3047_v59  ;;  %v3105_v59 = vld [vmem:[%s4116_s1 + $0x394] ss:$8 sps:$4 sm:$0xff]  }
  0x36   : > { %494 = vmatmul.mubr.bf16.vlgmr.msra.gmra.mrb[0].mxu1 %v2445_v60  ;;  %v3100_v60 = vld [vmem:[%s4116_s1 + $0x90] ss:$8 sps:$4 sm:$0xff]  }
  0x37   : > { %1300 = vmatmul.mubr.bf16.vlgmr.msra.gmra.mrb[0].mxu0 %v2601_v62  ;;  %703 = vmatpush1.bf16.msra.mxu1 %v3040_v61  ;;  %v3103_v61 = vld [vmem:[%s4116_s1 + $0x390] ss:$8 sps:$4 sm:$0xff]  }
  0x38   : > { %1559 = vmatpush1.bf16.msra.mxu0 %v3045_v63  ;;  %704 = vmatprep.subr.bf16.mxu1 %v3050_v0  ;;  %v3112_v63 = vld [vmem:[%s4116_s1 + $0x3a4] ss:$8 sps:$4 sm:$0xff]   ;;  %v3106_v0 = vld [vmem:[%s4116_s1 + $0xa0] ss:$8 sps:$4 sm:$0xff]  }
  0x39   : > { %1560 = vmatprep.subr.bf16.mxu0 %v3053_v1  ;;  %2478 = vmatprep.mubr.msk.bf16.mxu1 %vm448_vm3, %v2602_v56  ;;  %v3096_v56 = vld [vmem:[%s4116_s1 + $0x380] ss:$8 sps:$4 sm:$0xff]  }
  0x3a   : > { %2634 = vmatprep.mubr.msk.bf16.mxu0 %vm448_vm3, %v3547_v20  ;;  %v3110_v1 = vld [vmem:[%s4116_s1 + $0x3a0] ss:$8 sps:$4 sm:$0xff]  }
  0x3b   : > { %705 = vmatpush1.bf16.msra.mxu1 %v3048_v2  ;;  %v3116_v2 = vld [vmem:[%s4116_s1 + $0xb4] ss:$8 sps:$4 sm:$0xff]  }
  0x3c   : > { %1561 = vmatpush1.bf16.msra.mxu0 %v3051_v3  ;;  %706 = vmatprep.subr.bf16.mxu1 %v3056_v6  ;;  %v3119_v3 = vld [vmem:[%s4116_s1 + $0x3b4] ss:$8 sps:$4 sm:$0xff]   ;;  %v3122_v6 = vld [vmem:[%s4116_s1 + $0x184] ss:$8 sps:$4 sm:$0xff]  }
  0x3d   : > { %1562 = vmatprep.subr.bf16.mxu0 %v3059_v7  ;;  %v3125_v7 = vld [vmem:[%s4116_s1 + $0x3c4] ss:$8 sps:$4 sm:$0xff]  }
  0x3e   : > { %504 = vmatmul.mubr.bf16.gmra.mrb[4].mxu1 %v2601_v62  ;;  %v3108_v62 = vld [vmem:[%s4116_s1 + $0xa4] ss:$8 sps:$4 sm:$0xff]  }
  0x3f   : > { %707 = vmatpush1.bf16.msra.mxu1 %v3054_v8  ;;  %2479 = vmatprep.mubr.msk.bf16.mxu1 %vm448_vm3, %v3547_v20  ;;  %v2481_v8 = vcombine.low %v3611_v39, %v3444_v48  ;;  %v3128_v48 = vld [vmem:[%s4116_s1 + $0x194] ss:$8 sps:$4 sm:$0xff]   ;;  %v3150_v39 = vld [vmem:[%s4116_s1 + $0x1d0] ss:$8 sps:$4 sm:$0xff]  }
  0x40   : > { %1563 = vmatpush1.bf16.msra.mxu0 %v3057_v9  ;;  %708 = vmatprep.subr.bf16.mxu1 %v3062_v10  ;;  %v3120_v9 = vld [vmem:[%s4116_s1 + $0x180] ss:$8 sps:$4 sm:$0xff]   ;;  %v3712_v10 = vcombine.low %v3458_v54, %v3533_v16  ;;  %v3725_v54 = vcombine.high %v3446_v49, %v3456_v53  ;;  %v3134_v16 = vld [vmem:[%s4116_s1 + $0x1a4] ss:$8 sps:$4 sm:$0xff]  }
  0x41   : > { %1564 = vmatprep.subr.bf16.mxu0 %v3065_v11  ;;  %1310 = vmatmul.mubr.bf16.gmra.mrb[4].mxu0 %v3557_v23  ;;  %v3123_v11 = vld [vmem:[%s4116_s1 + $0x3c0] ss:$8 sps:$4 sm:$0xff]  }
  0x42   : > { %2635 = vmatprep.mubr.msk.bf16.mxu0 %vm448_vm3, %v3585_v31 }
  0x43   : > { %709 = vmatpush1.bf16.msra.mxu1 %v3060_v14  ;;  %v3126_v14 = vld [vmem:[%s4116_s1 + $0x190] ss:$8 sps:$4 sm:$0xff]  }
  0x44   : > { %1565 = vmatpush1.bf16.msra.mxu0 %v3063_v15  ;;  %710 = vmatprep.subr.bf16.mxu1 %v3068_v18  ;;  %v3129_v15 = vld [vmem:[%s4116_s1 + $0x3d0] ss:$8 sps:$4 sm:$0xff]   ;;  %v3137_v18 = vld [vmem:[%s4116_s1 + $0x3e4] ss:$8 sps:$4 sm:$0xff]  }
  0x45   : > { %1566 = vmatprep.subr.bf16.mxu0 %v3071_v19  ;;  %v3132_v19 = vld [vmem:[%s4116_s1 + $0x1a0] ss:$8 sps:$4 sm:$0xff]  }
  0x46   : > { %514 = vmatmul.mubr.bf16.gmra.mrb[8].mxu1 %v3557_v23 }
  0x47   : > { %711 = vmatpush1.bf16.msra.mxu1 %v3066_v21  ;;  %2480 = vmatprep.mubr.msk.bf16.mxu1 %vm448_vm3, %v3585_v31  ;;  %v3753_v21 = vcombine.low %v3446_v49, %v3456_v53  ;;  %v3143_v49 = vld [vmem:[%s4116_s1 + $0x3f4] ss:$8 sps:$4 sm:$0xff]   ;;  %v3770_v53 = vcombine.high %v3578_v29, %v3616_v41 }
  0x48   : > { %1567 = vmatpush1.bf16.msra.mxu0 %v3069_v22  ;;  %712 = vmatprep.subr.bf16.mxu1 %v3074_v24  ;;  %v3757_v22 = vcombine.low %v3537_v17, %v3571_v28  ;;  %v3135_v24 = vld [vmem:[%s4116_s1 + $0x3e0] ss:$8 sps:$4 sm:$0xff]   ;;  %v3138_v17 = vld [vmem:[%s4116_s1 + $0x1b0] ss:$8 sps:$4 sm:$0xff]   ;;  %v3149_v28 = vld [vmem:[%s4116_s1 + $0x404] ss:$8 sps:$4 sm:$0xff]  }
  0x49   : > { %1568 = vmatprep.subr.bf16.mxu0 %v3077_v25  ;;  %1320 = vmatmul.mubr.bf16.gmra.mrb[8].mxu0 %v3607_v38  ;;  %v3140_v25 = vld [vmem:[%s4116_s1 + $0x1b4] ss:$8 sps:$4 sm:$0xff]  }
  0x4a   : > { %2636 = vmatprep.mubr.msk.bf16.mxu0 %vm448_vm3, %v3625_v44 }
  0x4b   : > { %713 = vmatpush1.bf16.msra.mxu1 %v3072_v30  ;;  %v3792_v30 = vcombine.low %v3578_v29, %v3616_v41  ;;  %v3155_v29 = vld [vmem:[%s4116_s1 + $0x414] ss:$8 sps:$4 sm:$0xff]   ;;  %v3158_v41 = vld [vmem:[%s4116_s1 + $0x1e4] ss:$8 sps:$4 sm:$0xff]  }
  0x4c   : > { %1569 = vmatpush1.bf16.msra.mxu0 %v3075_v32  ;;  %714 = vmatprep.subr.bf16.mxu1 %v3080_v33  ;;  %v3794_v32 = vld [vmem:[#allocation2 + $0x58] sm:$0xff]  ;;  %v3144_v33 = vld [vmem:[%s4116_s1 + $0x1c0] ss:$8 sps:$4 sm:$0xff]  }
  0x4d   : > { %1570 = vmatprep.subr.bf16.mxu0 %v3084_v34  ;;  %v3147_v34 = vld [vmem:[%s4116_s1 + $0x400] ss:$8 sps:$4 sm:$0xff]  }
  0x4e   : > { %524 = vmatmul.mubr.bf16.gmra.mrb[12].mxu1 %v3607_v38 }
  0x4f   : > { %715 = vmatpush1.bf16.msra.mxu1 %v3078_v35  ;;  %2513 = vmatprep.mubr.msk.bf16.mxu1 %vm448_vm3, %v2482_v45  ;;  %v3152_v35 = vld [vmem:[%s4116_s1 + $0x1d4] ss:$8 sps:$4 sm:$0xff]   ;;  %v3832_v45 = vcombine.low %v3618_v42, %v3794_v32 }
  0x50   : > { %1571 = vmatpush1.bf16.msra.mxu0 %v3082_v37  ;;  %716 = vmatprep.subr.bf16.mxu1 %v3088_v40  ;;  %v3810_v37 = vcombine.high %v3618_v42, %v3794_v32  ;;  %v3153_v40 = vld [vmem:[%s4116_s1 + $0x410] ss:$8 sps:$4 sm:$0xff]   ;;  %v3167_v42 = vld [vmem:[%s4116_s1 + $0x434] ss:$8 sps:$4 sm:$0xff]  }
  0x51   : > { %1572 = vmatprep.subr.bf16.mxu0 %v3091_v43  ;;  %1330 = vmatmul.mubr.bf16.gmra.mrb[12].mxu0 %v3647_v52  ;;  %v3161_v43 = vld [vmem:[%s4116_s1 + $0x424] ss:$8 sps:$4 sm:$0xff]  }
  0x52   : > { %2693 = vmatprep.mubr.msk.bf16.mxu0 %vm448_vm3, %v3658_v57 }
  0x53   : > { %717 = vmatpush1.bf16.msra.mxu1 %v3086_v46  ;;  %v3156_v46 = vld [vmem:[%s4116_s1 + $0x1e0] ss:$8 sps:$4 sm:$0xff]  }
  0x54   : > { %1573 = vmatpush1.bf16.msra.mxu0 %v3089_v47  ;;  %718 = vmatprep.subr.bf16.mxu1 %v3094_v50  ;;  %v3159_v47 = vld [vmem:[%s4116_s1 + $0x420] ss:$8 sps:$4 sm:$0xff]   ;;  %v3164_v50 = vld [vmem:[%s4116_s1 + $0x1f4] ss:$8 sps:$4 sm:$0xff]  }
  0x55   : > { %1574 = vmatprep.subr.bf16.mxu0 %v3098_v51  ;;  %v3162_v51 = vld [vmem:[%s4116_s1 + $0x1f0] ss:$8 sps:$4 sm:$0xff]  }
  0x57   : > { %719 = vmatpush1.bf16.msra.mxu1 %v3092_v55  ;;  %v3165_v55 = vld [vmem:[%s4116_s1 + $0x430] ss:$8 sps:$4 sm:$0xff]  }
  0x58   : > { %1575 = vmatpush1.bf16.msra.mxu0 %v3096_v56  ;;  %720 = vmatprep.subr.bf16.mxu1 %v3102_v58  ;;  %v3170_v56 = vld [vmem:[%s4116_s1 + $0x204] ss:$8 sps:$4 sm:$0xff]  }
  0x59   : > { %1576 = vmatprep.subr.bf16.mxu0 %v3105_v59  ;;  %v3173_v58 = vld [vmem:[%s4116_s1 + $0x444] ss:$8 sps:$4 sm:$0xff]   ;;  %v3168_v59 = vld [vmem:[%s4116_s1 + $0x200] ss:$8 sps:$4 sm:$0xff]  }
  0x5b   : > { %721 = vmatpush1.bf16.msra.mxu1 %v3100_v60  ;;  %v3171_v60 = vld [vmem:[%s4116_s1 + $0x440] ss:$8 sps:$4 sm:$0xff]  }
  0x5c   : > { %1577 = vmatpush1.bf16.msra.mxu0 %v3103_v61  ;;  %722 = vmatprep.subr.bf16.mxu1 %v3108_v62  ;;  %v3176_v61 = vld [vmem:[%s4116_s1 + $0x214] ss:$8 sps:$4 sm:$0xff]   ;;  %v3174_v62 = vld [vmem:[%s4116_s1 + $0x210] ss:$8 sps:$4 sm:$0xff]  }
  0x5d   : > { %1578 = vmatprep.subr.bf16.mxu0 %v3112_v63  ;;  %v3177_v63 = vld [vmem:[%s4116_s1 + $0x450] ss:$8 sps:$4 sm:$0xff]  }
  0x5f   : > { %723 = vmatpush1.bf16.msra.mxu1 %v3106_v0  ;;  %v3183_v0 = vld [vmem:[%s4116_s1 + $0x224] ss:$8 sps:$4 sm:$0xff]  }
  0x60   : > { %1579 = vmatpush1.bf16.msra.mxu0 %v3110_v1  ;;  %724 = vmatprep.subr.bf16.mxu1 %v3116_v2  ;;  %v3187_v1 = vld [vmem:[%s4116_s1 + $0x464] ss:$8 sps:$4 sm:$0xff]   ;;  %v3181_v2 = vld [vmem:[%s4116_s1 + $0x220] ss:$8 sps:$4 sm:$0xff]  }
  0x61   : > { %1580 = vmatprep.subr.bf16.mxu0 %v3119_v3  ;;  %v3185_v3 = vld [vmem:[%s4116_s1 + $0x460] ss:$8 sps:$4 sm:$0xff]  }
  0x63   : > { %725 = vmatpush1.bf16.msra.mxu1 %v3114_v4  ;;  %v3190_v4 = vld [vmem:[%s4116_s1 + $0x234] ss:$8 sps:$4 sm:$0xff]  }
  0x64   : > { %1581 = vmatpush1.bf16.msra.mxu0 %v3117_v5  ;;  %977 = vmatprep.subr.bf16.mxu1 %v3122_v6  ;;  %v3193_v5 = vld [vmem:[%s4116_s1 + $0x474] ss:$8 sps:$4 sm:$0xff]   ;;  %v3188_v6 = vld [vmem:[%s4116_s1 + $0x230] ss:$8 sps:$4 sm:$0xff]  }
  0x65   : > { %1849 = vmatprep.subr.bf16.mxu0 %v3125_v7  ;;  %v3191_v7 = vld [vmem:[%s4116_s1 + $0x470] ss:$8 sps:$4 sm:$0xff]  }
  0x66   : > { %735 = vmatmul.mubr.bf16.vlgmr.msra.gmra.mrb[0].mxu1 %v2481_v8  ;;  %v3196_v8 = vld [vmem:[%s4116_s1 + $0x484] ss:$8 sps:$4 sm:$0xff]  }
  0x67   : > { %1591 = vmatmul.mubr.bf16.vlgmr.msra.gmra.mrb[0].mxu0 %v3712_v10  ;;  %978 = vmatpush1.bf16.msra.mxu1 %v3120_v9  ;;  %v3194_v9 = vld [vmem:[%s4116_s1 + $0x480] ss:$8 sps:$4 sm:$0xff]  }
  0x68   : > { %1850 = vmatpush1.bf16.msra.mxu0 %v3123_v11  ;;  %979 = vmatprep.subr.bf16.mxu1 %v3128_v48  ;;  %v3199_v11 = vld [vmem:[%s4116_s1 + $0x494] ss:$8 sps:$4 sm:$0xff]   ;;  %v3197_v48 = vld [vmem:[%s4116_s1 + $0x490] ss:$8 sps:$4 sm:$0xff]  }
  0x69   : > { %1851 = vmatprep.subr.bf16.mxu0 %v3131_v12  ;;  %2514 = vmatprep.mubr.msk.bf16.mxu1 %vm448_vm3, %v3725_v54  ;;  %v3202_v12 = vld [vmem:[%s4116_s1 + $0x4a4] ss:$8 sps:$4 sm:$0xff]  }
  0x6a   : > { %2694 = vmatprep.mubr.msk.bf16.mxu0 %vm448_vm3, %v3729_v13 }
  0x6b   : > { %980 = vmatpush1.bf16.msra.mxu1 %v3126_v14  ;;  %v3211_v14 = vld [vmem:[%s4116_s1 + $0x4d4] ss:$8 sps:$4 sm:$0xff]  }
  0x6c   : > { %1852 = vmatpush1.bf16.msra.mxu0 %v3129_v15  ;;  %981 = vmatprep.subr.bf16.mxu1 %v3134_v16  ;;  %v3216_v16 = vld [vmem:[%s4116_s1 + $0x4e4] ss:$8 sps:$4 sm:$0xff]  }
  0x6d   : > { %1853 = vmatprep.subr.bf16.mxu0 %v3137_v18  ;;  %v3214_v18 = vld [vmem:[%s4116_s1 + $0x4e0] ss:$8 sps:$4 sm:$0xff]  }
  0x6e   : > { %745 = vmatmul.mubr.bf16.gmra.mrb[4].mxu1 %v3753_v21 }
  0x6f   : > { %1601 = vmatmul.mubr.bf16.gmra.mrb[4].mxu0 %v3757_v22  ;;  %982 = vmatpush1.bf16.msra.mxu1 %v3132_v19  ;;  %v3219_v19 = vld [vmem:[%s4116_s1 + $0x4f4] ss:$8 sps:$4 sm:$0xff]  }
  0x70   : > { %1854 = vmatpush1.bf16.msra.mxu0 %v3135_v24  ;;  %983 = vmatprep.subr.bf16.mxu1 %v3140_v25  ;;  %v3222_v24 = vld [vmem:[%s4116_s1 + $0x504] ss:$8 sps:$4 sm:$0xff]   ;;  %v3220_v25 = vld [vmem:[%s4116_s1 + $0x500] ss:$8 sps:$4 sm:$0xff]  }
  0x71   : > { %1855 = vmatprep.subr.bf16.mxu0 %v3143_v49  ;;  %2515 = vmatprep.mubr.msk.bf16.mxu1 %vm448_vm3, %v3658_v57  ;;  %v3225_v49 = vld [vmem:[%s4116_s1 + $0x514] ss:$8 sps:$4 sm:$0xff]  }
  0x72   : > { %2695 = vmatprep.mubr.msk.bf16.mxu0 %vm448_vm3, %v3770_v53 }
  0x73   : > { %984 = vmatpush1.bf16.msra.mxu1 %v3138_v17  ;;  %v3228_v17 = vld [vmem:[%s4116_s1 + $0x524] ss:$8 sps:$4 sm:$0xff]  }
  0x74   : > { %1856 = vmatpush1.bf16.msra.mxu0 %v3141_v26  ;;  %985 = vmatprep.subr.bf16.mxu1 %v3146_v27  ;;  %v3226_v26 = vld [vmem:[%s4116_s1 + $0x520] ss:$8 sps:$4 sm:$0xff]   ;;  %v3231_v27 = vld [vmem:[%s4116_s1 + $0x534] ss:$8 sps:$4 sm:$0xff]  }
  0x75   : > { %1857 = vmatprep.subr.bf16.mxu0 %v3149_v28  ;;  %v3229_v28 = vld [vmem:[%s4116_s1 + $0x530] ss:$8 sps:$4 sm:$0xff]  }
  0x76   : > { %755 = vmatmul.mubr.bf16.gmra.mrb[8].mxu1 %v3712_v10 }
  0x77   : > { %1611 = vmatmul.mubr.bf16.gmra.mrb[8].mxu0 %v3792_v30  ;;  %986 = vmatpush1.bf16.msra.mxu1 %v3144_v33 }
  0x78   : > { %1858 = vmatpush1.bf16.msra.mxu0 %v3147_v34  ;;  %987 = vmatprep.subr.bf16.mxu1 %v3152_v35 }
  0x79   : > { %1859 = vmatprep.subr.bf16.mxu0 %v3155_v29  ;;  %2516 = vmatprep.mubr.msk.bf16.mxu1 %vm448_vm3, %v3729_v13 }
  0x7a   : > { %2696 = vmatprep.mubr.msk.bf16.mxu0 %vm448_vm3, %v3810_v37 }
  0x7b   : > { %988 = vmatpush1.bf16.msra.mxu1 %v3150_v39 }
  0x7c   : > { %1860 = vmatpush1.bf16.msra.mxu0 %v3153_v40  ;;  %989 = vmatprep.subr.bf16.mxu1 %v3158_v41 }
  0x7d   : > { %1861 = vmatprep.subr.bf16.mxu0 %v3161_v43 }
  0x7e   : > { %765 = vmatmul.mubr.bf16.gmra.mrb[12].mxu1 %v3757_v22 }
  0x7f   : > { %1621 = vmatmul.mubr.bf16.gmra.mrb[12].mxu0 %v3832_v45  ;;  %990 = vmatpush1.bf16.msra.mxu1 %v3156_v46 }
  0x80   : > { %1862 = vmatpush1.bf16.msra.mxu0 %v3159_v47  ;;  %991 = vmatprep.subr.bf16.mxu1 %v3164_v50 }
  0x81   : > { %1863 = vmatprep.subr.bf16.mxu0 %v3167_v42  ;;  %2573 = vmatprep.mubr.msk.bf16.mxu1 %vm448_vm3, %v3725_v54  ;;  %v3205_v54 = vld [vmem:[%s4116_s1 + $0x4b4] ss:$8 sps:$4 sm:$0xff]  }
  0x82   : > { %2753 = vmatprep.mubr.msk.bf16.mxu0 %vm448_vm3, %v3547_v20  ;;  %v3179_v20 = vld [vmem:[%s4116_s1 + $0x454] ss:$8 sps:$4 sm:$0xff]  }
  0x83   : > { %992 = vmatpush1.bf16.msra.mxu1 %v3162_v51 }
  0x84   : > { %1864 = vmatpush1.bf16.msra.mxu0 %v3165_v55  ;;  %993 = vmatprep.subr.bf16.mxu1 %v3170_v56 }
  0x85   : > { %1865 = vmatprep.subr.bf16.mxu0 %v3173_v58 }
  0x87   : > { %994 = vmatpush1.bf16.msra.mxu1 %v3168_v59 }
  0x88   : > { %1866 = vmatpush1.bf16.msra.mxu0 %v3171_v60  ;;  %995 = vmatprep.subr.bf16.mxu1 %v3176_v61 }
  0x89   : > { %1867 = vmatprep.subr.bf16.mxu0 %v3179_v20 }
  0x8b   : > { %996 = vmatpush1.bf16.msra.mxu1 %v3174_v62 }
  0x8c   : > { %1868 = vmatpush1.bf16.msra.mxu0 %v3177_v63  ;;  %997 = vmatprep.subr.bf16.mxu1 %v3183_v0 }
  0x8d   : > { %1869 = vmatprep.subr.bf16.mxu0 %v3187_v1 }
  0x8f   : > { %998 = vmatpush1.bf16.msra.mxu1 %v3181_v2 }
  0x90   : > { %1870 = vmatpush1.bf16.msra.mxu0 %v3185_v3  ;;  %999 = vmatprep.subr.bf16.mxu1 %v3190_v4 }
  0x91   : > { %1871 = vmatprep.subr.bf16.mxu0 %v3193_v5 }
  0x93   : > { %1000 = vmatpush1.bf16.msra.mxu1 %v3188_v6 }
  0x94   : > { %1872 = vmatpush1.bf16.msra.mxu0 %v3191_v7  ;;  %2837 = vmatprep.subr.bf16.mxu1 %v3196_v8  ;;  %v2231_v7 = vlaneseq }
  0x95   : > { %2140 = vmatprep.subr.bf16.mxu0 %v3196_v8 }
  0x96   : > { %1010 = vmatmul.mubr.bf16.vlgmr.msra.gmra.mrb[0].mxu1 %v3753_v21  ;;  %v3217_v21 = vld [vmem:[%s4116_s1 + $0x4f0] ss:$8 sps:$4 sm:$0xff]   ;;  %v2232_v8 = vshrl.u32 %v2231_v7, 7 }
  0x97   : > { %1882 = vmatmul.mubr.bf16.vlgmr.msra.gmra.mrb[0].mxu0 %v3557_v23  ;;  %2849 = vmatpush1.bf16.msra.mxu1 %v3194_v9  ;;  %v3200_v23 = vld [vmem:[%s4116_s1 + $0x4a0] ss:$8 sps:$4 sm:$0xff]  }
  0x98   : > { %2141 = vmatpush1.bf16.msra.mxu0 %v3194_v9  ;;  %2838 = vmatprep.subr.bf16.mxu1 %v3199_v11  ;;  %v2233_v9 = vsub.s32 0, %v2232_v8 }
  0x99   : > { %2142 = vmatprep.subr.bf16.mxu0 %v3199_v11  ;;  %2574 = vmatprep.mubr.msk.bf16.mxu1 %vm448_vm3, %v3658_v57  ;;  %v3208_v57 = vld [vmem:[%s4116_s1 + $0x4c4] ss:$8 sps:$4 sm:$0xff]   ;;  %v2229_v11 = vld [vmem:[%s4117_s2] sm:$0x3] }
  0x9a   : > { %2754 = vmatprep.mubr.msk.bf16.mxu0 %vm448_vm3, %v3585_v31  ;;  %v3203_v31 = vld [vmem:[%s4116_s1 + $0x4b0] ss:$8 sps:$4 sm:$0xff]  }
  0x9b   : > { %2850 = vmatpush1.bf16.msra.mxu1 %v3197_v48 }
  0x9c   : > { %2143 = vmatpush1.bf16.msra.mxu0 %v3197_v48  ;;  %2839 = vmatprep.subr.bf16.mxu1 %v3202_v12  ;;  %v2237_v48 = vsub.s32 1, %v2232_v8 }
  0x9d   : > { %2144 = vmatprep.subr.bf16.mxu0 %v3202_v12  ;;  %v2257_v12 = vld [vmem:[%s4118_s3] sm:$0x3] }
  0x9e   : > { %1020 = vmatmul.mubr.bf16.gmra.mrb[4].mxu1 %v3712_v10  ;;  %v3945_v10 = vld [vmem:[#allocation2 + $0x60] sm:$0xff] }
  0x9f   : > { %1892 = vmatmul.mubr.bf16.gmra.mrb[4].mxu0 %v3607_v38  ;;  %2851 = vmatpush1.bf16.msra.mxu1 %v3200_v23  ;;  %v3206_v38 = vld [vmem:[%s4116_s1 + $0x4c0] ss:$8 sps:$4 sm:$0xff]   ;;  %v2728_v15 = vcombine.high %v3794_v32, %v3945_v10 }
  0xa0   : > { %2145 = vmatpush1.bf16.msra.mxu0 %v3200_v23  ;;  %2840 = vmatprep.subr.bf16.mxu1 %v3205_v54  ;;  %v4034_v23 = vrot.slane %v2229_v11, %v2233_v9 }
  0xa1   : > { %2146 = vmatprep.subr.bf16.mxu0 %v3205_v54  ;;  %2575 = vmatprep.mubr.msk.bf16.mxu1 %vm448_vm3, %v3729_v13 }
  0xa2   : > { %2755 = vmatprep.mubr.msk.bf16.mxu0 %vm448_vm3, %v3625_v44  ;;  %v3209_v44 = vld [vmem:[%s4116_s1 + $0x4d0] ss:$8 sps:$4 sm:$0xff]  }
  0xa3   : > { %2852 = vmatpush1.bf16.msra.mxu1 %v3203_v31 }
  0xa4   : > { %2147 = vmatpush1.bf16.msra.mxu0 %v3203_v31  ;;  %2841 = vmatprep.subr.bf16.mxu1 %v3208_v57 }
  0xa5   : > { %2148 = vmatprep.subr.bf16.mxu0 %v3208_v57  ;;  %v4036_v57 = vrot.slane %v2229_v11, %v2237_v48 }
  0xa6   : > { %1030 = vmatmul.mubr.bf16.gmra.mrb[8].mxu1 %v3757_v22 }
  0xa7   : > { %1902 = vmatmul.mubr.bf16.gmra.mrb[8].mxu0 %v3647_v52  ;;  %2853 = vmatpush1.bf16.msra.mxu1 %v3206_v38  ;;  %v2727_v52 = vcombine.low %v3794_v32, %v3945_v10  ;;  %v1946_v32 = vld [vmem:[#allocation2 + $0x68] sm:$0xff] }
  0xa8   : > { %2149 = vmatpush1.bf16.msra.mxu0 %v3206_v38  ;;  %2842 = vmatprep.subr.bf16.mxu1 %v3211_v14  ;;  %v2788_v33 = vcombine.high %v3945_v10, %v1946_v32  ;;  %v2787_v34 = vcombine.low %v3945_v10, %v1946_v32  ;;  %v4038_v38 = vrot.slane %v2257_v12, %v2233_v9 }
  0xa9   : > { %2150 = vmatprep.subr.bf16.mxu0 %v3211_v14  ;;  %2576 = vmatprep.mubr.msk.bf16.mxu1 %vm448_vm3, %v3770_v53 }
  0xaa   : > { %2756 = vmatprep.mubr.msk.bf16.mxu0 %vm448_vm3, %v2728_v15 }
  0xab   : > { %2854 = vmatpush1.bf16.msra.mxu1 %v3209_v44 }
  0xac   : > { %2151 = vmatpush1.bf16.msra.mxu0 %v3209_v44  ;;  %2843 = vmatprep.subr.bf16.mxu1 %v3216_v16 }
  0xad   : > { %2152 = vmatprep.subr.bf16.mxu0 %v3216_v16 }
  0xae   : > { %1040 = vmatmul.mubr.bf16.gmra.mrb[12].mxu1 %v3792_v30 }
  0xaf   : > { %1912 = vmatmul.mubr.bf16.gmra.mrb[12].mxu0 %v2727_v52  ;;  %2855 = vmatpush1.bf16.msra.mxu1 %v3214_v18  ;;  %v4040_v52 = vrot.slane %v2257_v12, %v2237_v48 }
  0xb0   : > { %2153 = vmatpush1.bf16.msra.mxu0 %v3214_v18  ;;  %2844 = vmatprep.subr.bf16.mxu1 %v3219_v19 }
  0xb1   : > { %2154 = vmatprep.subr.bf16.mxu0 %v3219_v19  ;;  %2813 = vmatprep.mubr.msk.bf16.mxu0 %vm448_vm3, %v3729_v13  ;;  %v3223_v13 = vld [vmem:[%s4116_s1 + $0x510] ss:$8 sps:$4 sm:$0xff]  }
  0xb2   : > { %2815 = vmatprep.mubr.msk.bf16.mxu1 %vm448_vm3, %v3810_v37 }
  0xb3   : > { %2856 = vmatpush1.bf16.msra.mxu1 %v3217_v21 }
  0xb4   : > { %2155 = vmatpush1.bf16.msra.mxu0 %v3217_v21  ;;  %2845 = vmatprep.subr.bf16.mxu1 %v3222_v24 }
  0xb5   : > { %2156 = vmatprep.subr.bf16.mxu0 %v3222_v24 }
  0xb7   : > { %2857 = vmatpush1.bf16.msra.mxu1 %v3220_v25 }
  0xb8   : > { %2157 = vmatpush1.bf16.msra.mxu0 %v3220_v25  ;;  %2846 = vmatprep.subr.bf16.mxu1 %v3225_v49 }
  0xb9   : > { %2158 = vmatprep.subr.bf16.mxu0 %v3225_v49 }
  0xbb   : > { %2858 = vmatpush1.bf16.msra.mxu1 %v3223_v13 }
  0xbc   : > { %2159 = vmatpush1.bf16.msra.mxu0 %v3223_v13  ;;  %2847 = vmatprep.subr.bf16.mxu1 %v3228_v17 }
  0xbd   : > { %2160 = vmatprep.subr.bf16.mxu0 %v3228_v17 }
  0xbf   : > { %2859 = vmatpush1.bf16.msra.mxu1 %v3226_v26 }
  0xc0   : > { %2161 = vmatpush1.bf16.msra.mxu0 %v3226_v26  ;;  %2848 = vmatprep.subr.bf16.mxu1 %v3231_v27 }
  0xc1   : > { %2162 = vmatprep.subr.bf16.mxu0 %v3231_v27 }
  0xc3   : > { %2860 = vmatpush1.bf16.msra.mxu1 %v3229_v28 }
  0xc4   : > { %2163 = vmatpush1.bf16.msra.mxu0 %v3229_v28 }
  0xc6   : > { %2193 = vmatmul.mubr.bf16.vlgmr.msra.gmra.mrb[16].mxu1 %v3832_v45 }
  0xc7   : > { %2173 = vmatmul.mubr.bf16.vlgmr.msra.gmra.mrb[0].mxu0 %v3757_v22  ;;  %2816 = vmatprep.mubr.msk.bf16.mxu1 %vm448_vm3, %v2788_v33 }
  0xc8   : > { %2814 = vmatprep.mubr.msk.bf16.mxu0 %vm448_vm3, %v3770_v53 }
  0xce   : > { %2203 = vmatmul.mubr.bf16.gmra.mrb[20].mxu1 %v2787_v34 }
  0xcf   : > { %2183 = vmatmul.mubr.bf16.gmra.mrb[4].mxu0 %v3792_v30 }
 0x169   : > { %v1011_v35 = vpop.f32.mrb[0].mxu1 }
 0x16a   : > { %v1013_v29 = vpop.f32.mrb[1].mxu1 }
 0x16b   : > { %v1015_v37 = vpop.f32.mrb[2].mxu1 }
 0x16c   : > { %v1017_v39 = vpop.f32.mrb[3].mxu1 }
 0x171   : > { %v4014_v40 = vpop.f32.mrb[4].mxu1 }
 0x172   : > { %v4016_v41 = vpop.f32.mrb[5].mxu1 }
 0x173   : > { %v4018_v22 = vpop.f32.mrb[6].mxu1 }
 0x174   : > { %v4020_v43 = vpop.f32.mrb[7].mxu1 }
 0x179   : > { %v1031_v53 = vpop.f32.mrb[8].mxu1 }
 0x17a   : > { %v1903_v45 = vpop.f32.mrb[8].mxu0  ;;  %v1033_v47 = vpop.f32.mrb[9].mxu1 }
 0x17b   : > { %v2869_v46 = vadd.f32 %v1903_v45, %v1031_v53  ;;  %v1905_v50 = vpop.f32.mrb[9].mxu0  ;;  %v1035_v30 = vpop.f32.mrb[10].mxu1 }
 0x17c   : > { %v2871_v42 = vadd.f32 %v1905_v50, %v1033_v47  ;;  %v1907_v51 = vpop.f32.mrb[10].mxu0  ;;  %v1037_v56 = vpop.f32.mrb[11].mxu1 }
 0x17d   : > { %v2873_v55 = vadd.f32 %v1907_v51, %v1035_v30  ;;  %v1909_v58 = vpop.f32.mrb[11].mxu0 }
 0x17e   : > { %v2875_v59 = vadd.f32 %v1909_v58, %v1037_v56 }
 0x181   : > { %v1041_v60 = vpop.f32.mrb[12].mxu1 }
 0x182   : > { %v1913_v61 = vpop.f32.mrb[12].mxu0  ;;  %v1043_v62 = vpop.f32.mrb[13].mxu1 }
 0x183   : > { %v2877_v20 = vadd.f32 %v1913_v61, %v1041_v60  ;;  %v1915_v63 = vpop.f32.mrb[13].mxu0  ;;  %v1045_v1 = vpop.f32.mrb[14].mxu1 }
 0x184   : > { %v4022_v0 = vadd.f32 %v1915_v63, %v1043_v62  ;;  %v1917_v2 = vpop.f32.mrb[14].mxu0  ;;  %v1047_v4 = vpop.f32.mrb[15].mxu1 }
 0x185   : > { %v4024_v3 = vadd.f32 %v1917_v2, %v1045_v1  ;;  %v1919_v5 = vpop.f32.mrb[15].mxu0 }
 0x186   : > { %v4026_v6 = vadd.f32 %v1919_v5, %v1047_v4 }
 0x199   : > { %v2194_v31 = vpop.f32.mrb[16].mxu1 }
 0x19a   : > { %v2174_v54 = vpop.f32.mrb[0].mxu0  ;;  %v2870_v14 = vadd.f32 %v2869_v46, %v2194_v31  ;;  %v2196_v44 = vpop.f32.mrb[17].mxu1 }
 0x19b   : > { %v2861_v10 = vadd.f32 %v2174_v54, %v1011_v35  ;;  %v2176_v15 = vpop.f32.mrb[1].mxu0  ;;  %v2872_v18 = vadd.f32 %v2871_v42, %v2196_v44  ;;  %v2198_v21 = vpop.f32.mrb[18].mxu1 }
 0x19c   : > { %v2862_v16 = vadd.f32 %v2176_v15, %v1013_v29  ;;  %v2178_v19 = vpop.f32.mrb[2].mxu0  ;;  %v2249_v25 = vmul.f32 %v2870_v14, %v4034_v23  ;;  %v2874_v13 = vadd.f32 %v2873_v55, %v2198_v21  ;;  %v2200_v26 = vpop.f32.mrb[19].mxu1 }
 0x19d   : > { %v2241_v24 = vmul.f32 %v2861_v10, %v4034_v23  ;;  %v2863_v49 = vadd.f32 %v2178_v19, %v1015_v37  ;;  %v2180_v17 = vpop.f32.mrb[3].mxu0  ;;  %v2250_v28 = vmul.f32 %v2872_v18, %v4036_v57  ;;  %v2876_v33 = vadd.f32 %v2875_v59, %v2200_v26 }
 0x19e   : > { %v2242_v27 = vmul.f32 %v2862_v16, %v4036_v57  ;;  %v2864_v32 = vadd.f32 %v2180_v17, %v1017_v39  ;;  %v2277_v35 = vadd.f32 %v4038_v38, %v2249_v25  ;;  %v2251_v53 = vmul.f32 %v2874_v13, %v4034_v23 }
 0x19f   : > { %v2269_v34 = vadd.f32 %v4038_v38, %v2241_v24  ;;  %v2243_v29 = vmul.f32 %v2863_v49, %v4034_v23  ;;  %v2278_v45 = vadd.f32 %v4040_v52, %v2250_v28  ;;  %v2252_v47 = vmul.f32 %v2876_v33, %v4036_v57 }
 0x1a0   : > { %v2270_v37 = vadd.f32 %v4040_v52, %v2242_v27  ;;  %v2244_v46 = vmul.f32 %v2864_v32, %v4036_v57  ;;  %v2293_v39 = vmax.f32 %v2277_v35, 0.0  ;;  %v2279_v30 = vadd.f32 %v4038_v38, %v2251_v53 }
 0x1a1   : > { %v2285_v50 = vmax.f32 %v2269_v34, 0.0  ;;  %v2271_v42 = vadd.f32 %v4038_v38, %v2243_v29  ;;  %v2294_v55 = vmax.f32 %v2278_v45, 0.0  ;;  %v2280_v58 = vadd.f32 %v4040_v52, %v2252_v47  ;;  %v2204_v60 = vpop.f32.mrb[20].mxu1 }
 0x1a2   : > { %v2286_v51 = vmax.f32 %v2270_v37, 0.0  ;;  %v2272_v56 = vadd.f32 %v4040_v52, %v2244_v46  ;;  %v2184_v59 = vpop.f32.mrb[4].mxu0  ;;  %v2295_v62 = vmax.f32 %v2279_v30, 0.0  ;;  %v2878_v1 = vadd.f32 %v2877_v20, %v2204_v60  ;;  %v2206_v4 = vpop.f32.mrb[21].mxu1 }
 0x1a3   : > { %v2287_v61 = vmax.f32 %v2271_v42, 0.0  ;;  %v2865_v63 = vadd.f32 %v2184_v59, %v4014_v40  ;;  %v2186_v2 = vpop.f32.mrb[5].mxu0  ;;  %v2833_v7 = vpack.c.bf16 %v2294_v55, %v2293_v39  ;;  %v2296_v9 = vmax.f32 %v2280_v58, 0.0  ;;  %v2208_v48 = vpop.f32.mrb[22].mxu1 }
 0x1a4   : > { %v2829_v5 = vpack.c.bf16 %v2286_v51, %v2285_v50  ;;  %v2288_v8 = vmax.f32 %v2272_v56, 0.0  ;;  %v2188_v11 = vpop.f32.mrb[6].mxu0  ;;  %v2253_v54 = vmul.f32 %v2878_v1, %v4034_v23  ;;  %v2866_v31 = vadd.f32 %v2186_v2, %v4016_v41  ;;  %v2210_v10 = vpop.f32.mrb[23].mxu1 }
 0x1a5   : > { %v2245_v12 = vmul.f32 %v2865_v63, %v4034_v23  ;;  %v2880_v40 = vadd.f32 %v4022_v0, %v2206_v4  ;;  %v2190_v20 = vpop.f32.mrb[7].mxu0  ;;  %2353 = vst.msk [vmem:[%s4063_s18 + $0x20] sm:$0xff] %vm3398_vm2, %v2833_v7  ;;  %v2834_v15 = vpack.c.bf16 %v2296_v9, %v2295_v62  ;;  %v2867_v44 = vadd.f32 %v2188_v11, %v4018_v22 }
 0x1a6   : > { %2349 = vst.msk [vmem:[%s4063_s18] sm:$0xff] %vm3398_vm2, %v2829_v5  ;;  %v2830_v14 = vpack.c.bf16 %v2288_v8, %v2287_v61  ;;  %v2882_v16 = vadd.f32 %v4024_v3, %v2208_v48  ;;  %v2281_v41 = vadd.f32 %v4038_v38, %v2253_v54  ;;  %v2246_v0 = vmul.f32 %v2866_v31, %v4036_v57 }
 0x1a7   : > { %v2273_v18 = vadd.f32 %v4038_v38, %v2245_v12  ;;  %v2254_v19 = vmul.f32 %v2880_v40, %v4036_v57  ;;  %2354 = vst.msk [vmem:[%s4063_s18 + $0x28] sm:$0xff] %vm3398_vm2, %v2834_v15  ;;  %v2247_v21 = vmul.f32 %v2867_v44, %v4034_v23  ;;  %v2868_v3 = vadd.f32 %v2190_v20, %v4020_v43 }
 0x1a8   : > { %2350 = vst.msk [vmem:[%s4063_s18 + $0x8] sm:$0xff] %vm3398_vm2, %v2830_v14  ;;  %v2255_v22 = vmul.f32 %v2882_v16, %v4034_v23  ;;  %v2884_v24 = vadd.f32 %v4026_v6, %v2210_v10  ;;  %v2297_v49 = vmax.f32 %v2281_v41, 0.0  ;;  %v2274_v13 = vadd.f32 %v4040_v52, %v2246_v0 }
 0x1a9   : > { %v2289_v25 = vmax.f32 %v2273_v18, 0.0  ;;  %v2282_v17 = vadd.f32 %v4040_v52, %v2254_v19  ;;  %v2275_v26 = vadd.f32 %v4038_v38, %v2247_v21  ;;  %v2248_v28 = vmul.f32 %v2868_v3, %v4036_v57 }
 0x1aa   : > { %v2283_v27 = vadd.f32 %v4038_v38, %v2255_v22  ;;  %v2256_v23 = vmul.f32 %v2884_v24, %v4036_v57  ;;  %v2290_v43 = vmax.f32 %v2274_v13, 0.0 }
 0x1ab   : > { %v2298_v6 = vmax.f32 %v2282_v17, 0.0  ;;  %v2291_v32 = vmax.f32 %v2275_v26, 0.0  ;;  %v2276_v34 = vadd.f32 %v4040_v52, %v2248_v28 }
 0x1ac   : > { %v2299_v33 = vmax.f32 %v2283_v27, 0.0  ;;  %v2284_v35 = vadd.f32 %v4040_v52, %v2256_v23  ;;  %v2831_v29 = vpack.c.bf16 %v2290_v43, %v2289_v25 }
 0x1ad   : > { %v2835_v53 = vpack.c.bf16 %v2298_v6, %v2297_v49  ;;  %v2292_v37 = vmax.f32 %v2276_v34, 0.0 }
 0x1ae   : > { %v2300_v45 = vmax.f32 %v2284_v35, 0.0  ;;  %2351 = vst.msk [vmem:[%s4063_s18 + $0x10] sm:$0xff] %vm3398_vm2, %v2831_v29 }
 0x1af   : > { %2355 = vst.msk [vmem:[%s4063_s18 + $0x30] sm:$0xff] %vm3398_vm2, %v2835_v53  ;;  %v2832_v57 = vpack.c.bf16 %v2292_v37, %v2291_v32 }
 0x1b0   : > { %v2836_v38 = vpack.c.bf16 %v2300_v45, %v2299_v33 }
 0x1b1   : > { %2352 = vst.msk [vmem:[%s4063_s18 + $0x18] sm:$0xff] %vm3398_vm2, %v2832_v57 }
 0x1b2   : > { %2356 = vst.msk [vmem:[%s4063_s18 + $0x38] sm:$0xff] %vm3398_vm2, %v2836_v38 }
 0x1b3 PF: > { %s14_s15 = sadd.s32 1, %s3240_s15  }
 0x1b4   : > { %p11_p4 = scmp.ge.s32.totalorder %s14_s15, 4  }
 0x1b6   :  { %13 = sbr.rel (!%p11_p4) target bundleno = 1 (0x1), region = 79 }

// kernel: _lambda_.10
= control target key start
LH: loop header
LB: loop body
LE: loop exit
PB: predicated region body
PF: predicated region fallthrough
CT: control target
= control target key end

     0   :  { %s3976_s15 = smov 0   ;;  %s5231_s0 = inlined_call_operand.vmem [shape: bf16[2,8,8,192], index: 0, kind: input, shape index: {}]   ;;  %s5232_s1 = inlined_call_operand.vmem [shape: bf16[7,192,224], index: 1, kind: input, shape index: {}]   ;;  %s5233_s2 = inlined_call_operand.vmem [shape: f32[1,224], index: 2, kind: input, shape index: {}]   ;;  %s5234_s3 = inlined_call_operand.vmem [shape: f32[1,224], index: 3, kind: input, shape index: {}]   ;;  %s5235_s4 = inlined_call_operand.vmem [shape: bf16[2,8,8,224], index: 4, kind: output, shape index: {}]  }
   0x1 LB: > { %s3106_s16 = sadd.s32 4294967295, %s3949_s15   ;;  %p3110_p0 = scmp.ge.s32.totalorder %s3949_s15, 1  ;;  %s3949_s15 = sphi %s3976_s15, %s14_s15  }
   0x2   : > { %p162_p1 = scmp.lt.s32.totalorder %s3949_s15, 3 }
   0x4   : > { %p163_p2 = pnand %p3110_p0, %p162_p1 }
   0x5   : > { %v3683_v0 = vld [vmem:[%s5232_s1 + $0xc4] ss:$8 sps:$4 sm:$0xff] (!%p163_p2)   ;;  %v3687_v2 = vld [vmem:[%s5232_s1 + $0xc0] ss:$8 sps:$4 sm:$0xff] (!%p163_p2)   ;;  %v3689_v4 = vld [vmem:[%s5232_s1 + $0xd4] ss:$8 sps:$4 sm:$0xff] (!%p163_p2)  }
   0x6   : > { %166 = sbr.rel (%p163_p2) target bundleno = 471 (0x1d7), region = 36  ;;  %v3685_v1 = vld [vmem:[%s5232_s1 + $0x244] ss:$8 sps:$4 sm:$0xff] (!%p163_p2)   ;;  %751 = vmatprep.subr.bf16.mxu1 (!%p163_p2), %v3683_v0  ;;  %v3688_v3 = vld [vmem:[%s5232_s1 + $0x240] ss:$8 sps:$4 sm:$0xff] (!%p163_p2)   ;;  %p188_p3 = scmp.lt.s32.totalorder (!%p163_p2), %s3106_s16, 1 }
   0x7   : > { %1738 = vmatprep.subr.bf16.mxu0 (!%p163_p2), %v3685_v1  ;;  %752 = vmatpush1.bf16.msra.mxu1 (!%p163_p2), %v3687_v2  ;;  %v3691_v5 = vld [vmem:[%s5232_s1 + $0x254] ss:$8 sps:$4 sm:$0xff] (!%p163_p2)   ;;  %v3693_v6 = vld [vmem:[%s5232_s1 + $0xd0] ss:$8 sps:$4 sm:$0xff] (!%p163_p2)   ;;  %v3695_v8 = vld [vmem:[%s5232_s1 + $0xe4] ss:$8 sps:$4 sm:$0xff] (!%p163_p2)  }
   0x8   : > { %1739 = vmatpush1.bf16.msra.mxu0 (!%p163_p2), %v3688_v3  ;;  %753 = vmatprep.subr.bf16.mxu1 (!%p163_p2), %v3689_v4  ;;  %v3694_v7 = vld [vmem:[%s5232_s1 + $0x250] ss:$8 sps:$4 sm:$0xff] (!%p163_p2)   ;;  %v3697_v9 = vld [vmem:[%s5232_s1 + $0x264] ss:$8 sps:$4 sm:$0xff] (!%p163_p2)   ;;  %v3699_v10 = vld [vmem:[%s5232_s1 + $0xe0] ss:$8 sps:$4 sm:$0xff] (!%p163_p2)  }
   0x9   : > { %1740 = vmatprep.subr.bf16.mxu0 (!%p163_p2), %v3691_v5  ;;  %v3700_v11 = vld [vmem:[%s5232_s1 + $0x260] ss:$8 sps:$4 sm:$0xff] (!%p163_p2)   ;;  %v3701_v12 = vld [vmem:[%s5232_s1 + $0xf4] ss:$8 sps:$4 sm:$0xff] (!%p163_p2)   ;;  %v3705_v14 = vld [vmem:[%s5232_s1 + $0xf0] ss:$8 sps:$4 sm:$0xff] (!%p163_p2)  }
   0xa   : > { %v3703_v13 = vld [vmem:[%s5232_s1 + $0x274] ss:$8 sps:$4 sm:$0xff] (!%p163_p2)   ;;  %v3706_v15 = vld [vmem:[%s5232_s1 + $0x270] ss:$8 sps:$4 sm:$0xff] (!%p163_p2)   ;;  %v3707_v16 = vld [vmem:[%s5232_s1 + $0x104] ss:$8 sps:$4 sm:$0xff] (!%p163_p2)  }
   0xb   : > { %754 = vmatpush1.bf16.msra.mxu1 (!%p163_p2), %v3693_v6  ;;  %v3709_v17 = vld [vmem:[%s5232_s1 + $0x284] ss:$8 sps:$4 sm:$0xff] (!%p163_p2)   ;;  %v3711_v18 = vld [vmem:[%s5232_s1 + $0x100] ss:$8 sps:$4 sm:$0xff] (!%p163_p2)   ;;  %v3713_v20 = vld [vmem:[%s5232_s1 + $0x114] ss:$8 sps:$4 sm:$0xff] (!%p163_p2)  }
   0xc   : > { %1741 = vmatpush1.bf16.msra.mxu0 (!%p163_p2), %v3694_v7  ;;  %755 = vmatprep.subr.bf16.mxu1 (!%p163_p2), %v3695_v8  ;;  %v3712_v19 = vld [vmem:[%s5232_s1 + $0x280] ss:$8 sps:$4 sm:$0xff] (!%p163_p2)   ;;  %v3715_v21 = vld [vmem:[%s5232_s1 + $0x294] ss:$8 sps:$4 sm:$0xff] (!%p163_p2)   ;;  %v3717_v22 = vld [vmem:[%s5232_s1 + $0x110] ss:$8 sps:$4 sm:$0xff] (!%p163_p2)  }
   0xd   : > { %1742 = vmatprep.subr.bf16.mxu0 %v3697_v9  ;;  %v3718_v23 = vld [vmem:[%s5232_s1 + $0x290] ss:$8 sps:$4 sm:$0xff]   ;;  %v3719_v24 = vld [vmem:[%s5232_s1 + $0x124] ss:$8 sps:$4 sm:$0xff]   ;;  %v3723_v26 = vld [vmem:[%s5232_s1 + $0x120] ss:$8 sps:$4 sm:$0xff]  }
   0xe   : > { %v3721_v25 = vld [vmem:[%s5232_s1 + $0x2a4] ss:$8 sps:$4 sm:$0xff]   ;;  %v3724_v27 = vld [vmem:[%s5232_s1 + $0x2a0] ss:$8 sps:$4 sm:$0xff]   ;;  %v3725_v28 = vld [vmem:[%s5232_s1 + $0x134] ss:$8 sps:$4 sm:$0xff]  }
   0xf   : > { %756 = vmatpush1.bf16.msra.mxu1 %v3699_v10  ;;  %s5259_s16 = smov (!%p188_p3, %s3106_s16), 1  ;;  %v3727_v29 = vld [vmem:[%s5232_s1 + $0x2b4] ss:$8 sps:$4 sm:$0xff]   ;;  %vm200_vm0 = vsmask.f32 1280  ;;  %vm199_vm1 = vcmask 1041408  }
  0x10   : > { %1743 = vmatpush1.bf16.msra.mxu0 %v3700_v11  ;;  %757 = vmatprep.subr.bf16.mxu1 %v3701_v12  ;;  %v3729_v30 = vld [vmem:[%s5232_s1 + $0x130] ss:$8 sps:$4 sm:$0xff]   ;;  %vm202_vm2 = vcmask 521220   ;;  %v3731_v32 = vld [vmem:[%s5232_s1 + $0x144] ss:$8 sps:$4 sm:$0xff]   ;;  %s3545_s9 = sshll.u32 %s5259_s16, 6  ;;  %vm201_vm5 = vmand %vm199_vm1, %vm200_vm0 }
  0x11   : > { %1744 = vmatprep.subr.bf16.mxu0 %v3703_v13  ;;  %v3730_v31 = vld [vmem:[%s5232_s1 + $0x2b0] ss:$8 sps:$4 sm:$0xff]   ;;  %v3733_v33 = vld [vmem:[%s5232_s1 + $0x2c4] ss:$8 sps:$4 sm:$0xff]   ;;  %vm203_vm3 = vsmask.f32 5376  ;;  %s4110_s24 = scalar_lea.vmem %s5231_s0, %s3545_s9  ;;  %s5169_s19 = scalar_lea.vmem %s5235_s4, %s3545_s9 }
  0x12   : > { %v3735_v34 = vld [vmem:[%s5232_s1 + $0x140] ss:$8 sps:$4 sm:$0xff]   ;;  %vm231_vm4 = vsmask.f32 7942  ;;  %v3737_v36 = vld [vmem:[%s5232_s1 + $0x154] ss:$8 sps:$4 sm:$0xff]   ;;  %vm204_vm8 = vmand %vm202_vm2, %vm203_vm3 }
  0x13   : > { %758 = vmatpush1.bf16.msra.mxu1 %v3705_v14  ;;  %v3736_v35 = vld [vmem:[%s5232_s1 + $0x2c0] ss:$8 sps:$4 sm:$0xff]   ;;  %v3739_v37 = vld [vmem:[%s5232_s1 + $0x2d4] ss:$8 sps:$4 sm:$0xff]   ;;  %vm230_vm6 = vcmask 1042433   ;;  %vm233_vm7 = vcmask 522245   ;;  %vm4122_vm10 = vmor %vm204_vm8, %vm201_vm5 }
  0x14   : > { %1745 = vmatpush1.bf16.msra.mxu0 %v3706_v15  ;;  %759 = vmatprep.subr.bf16.mxu1 %v3707_v16  ;;  %v206_v38 = vld [vmem:[#allocation2] sm:$0x33]  ;;  %v209_v39 = vld [vmem:[#allocation2 + $0x10] sm:$0x33]  ;;  %vm234_vm9 = vsmask.f32 7958  ;;  %vm232_vm13 = vmand %vm230_vm6, %vm231_vm4 }
  0x15   : > { %1746 = vmatprep.subr.bf16.mxu0 %v3709_v17  ;;  %v237_v40 = vld [vmem:[#allocation2 + $0x8] sm:$0x66]  ;;  %v240_v41 = vld [vmem:[#allocation2 + $0x18] sm:$0x66]  ;;  %v261_v45 = vld [vmem:[%s4110_s24] sm:$0xff]  ;;  %vm357_vm11 = vcmask 1043457  }
  0x16   : > { %v3741_v42 = vld [vmem:[%s5232_s1 + $0x150] ss:$8 sps:$4 sm:$0xff]   ;;  %v262_v46 = vld [vmem:[%s4110_s24 + $0x8] sm:$0xff]  ;;  %vm359_vm12 = vcmask 523269   ;;  %v207_v47 = vsel %vm4122_vm10, 0, %v206_v38  ;;  %v210_v48 = vsel %vm4122_vm10, 0, %v209_v39  ;;  %vm235_vm14 = vmand %vm233_vm7, %vm234_vm9 }
  0x17   : > { %760 = vmatpush1.bf16.msra.mxu1 %v3711_v18  ;;  %v3742_v43 = vld [vmem:[%s5232_s1 + $0x2d0] ss:$8 sps:$4 sm:$0xff]   ;;  %v270_v49 = vshrl.u32 %v261_v45, 16  ;;  %v273_v50 = vshll.u32 %v261_v45, 16  ;;  %v3743_v51 = vld [vmem:[%s5232_s1 + $0x164] ss:$8 sps:$4 sm:$0xff]   ;;  %vm4142_vm15 = vmor %vm235_vm14, %vm232_vm13 }
  0x18   : > { %1747 = vmatpush1.bf16.msra.mxu0 %v3712_v19  ;;  %761 = vmatprep.subr.bf16.mxu1 %v3713_v20  ;;  %v3745_v52 = vld [vmem:[%s5232_s1 + $0x2e4] ss:$8 sps:$4 sm:$0xff]   ;;  %208 = vst [vmem:[#allocation2] sm:$0x33] %v207_v47  ;;  %211 = vst [vmem:[#allocation2 + $0x10] sm:$0x33] %v210_v48 }
  0x19   : > { %1748 = vmatprep.subr.bf16.mxu0 %v3715_v21  ;;  %v279_v53 = vshrl.u32 %v262_v46, 16  ;;  %v282_v54 = vshll.u32 %v262_v46, 16  ;;  %v272_v56 = vrot.slane %v270_v49, 6  ;;  %v275_v57 = vrot.slane %v273_v50, 7  ;;  %vm358_vm2 = vmand %vm357_vm11, %vm231_vm4  ;;  %v3747_v62 = vld [vmem:[%s5232_s1 + $0x160] ss:$8 sps:$4 sm:$0xff]  }
  0x1a   : > { %v238_v58 = vsel %vm4142_vm15, 0, %v237_v40  ;;  %v241_v59 = vsel %vm4142_vm15, 0, %v240_v41  ;;  %vm360_vm3 = vmand %vm359_vm12, %vm234_vm9  ;;  %v3748_v0 = vld [vmem:[%s5232_s1 + $0x2e0] ss:$8 sps:$4 sm:$0xff]   ;;  %v3749_v1 = vld [vmem:[%s5232_s1 + $0x174] ss:$8 sps:$4 sm:$0xff]  }
  0x1b   : > { %762 = vmatpush1.bf16.msra.mxu1 %v3717_v22  ;;  %v281_v60 = vrot.slane %v279_v53, 6  ;;  %v284_v61 = vrot.slane %v282_v54, 7  ;;  %239 = vst [vmem:[#allocation2 + $0x8] sm:$0x66] %v238_v58  ;;  %242 = vst [vmem:[#allocation2 + $0x18] sm:$0x66] %v241_v59  ;;  %v276_v63 = vor.u32 %v275_v57, %v272_v56 }
  0x1c   : > { %1749 = vmatpush1.bf16.msra.mxu0 %v3718_v23  ;;  %763 = vmatprep.subr.bf16.mxu1 %v3719_v24  ;;  %v3751_v3 = vld [vmem:[%s5232_s1 + $0x2f4] ss:$8 sps:$4 sm:$0xff]   ;;  %vm4166_vm4 = vmor %vm360_vm3, %vm358_vm2  ;;  %v3753_v5 = vld [vmem:[%s5232_s1 + $0x170] ss:$8 sps:$4 sm:$0xff]   ;;  %vm450_vm5 = vsmask.f32 3328 }
  0x1d   : > { %1750 = vmatprep.subr.bf16.mxu0 %v3721_v25  ;;  %v285_v2 = vor.u32 %v284_v61, %v281_v60  ;;  %v3754_v6 = vld [vmem:[%s5232_s1 + $0x2f0] ss:$8 sps:$4 sm:$0xff]   ;;  %v277_v7 = vrot.slane %v276_v63, 4  ;;  %v3757_v13 = vld [vmem:[%s5232_s1 + $0x4] ss:$8 sps:$4 sm:$0xff]   ;;  %vm738_vm8 = vcmask 523264  }
  0x1e   : > { %v3760_v14 = vld [vmem:[%s5232_s1 + $0x304] ss:$8 sps:$4 sm:$0xff]   ;;  %vm451_vm6 = vsmask.f32 7440  ;;  %vm1406_vm7 = vsmask.f32 2304 }
  0x1f   : > { %764 = vmatpush1.bf16.msra.mxu1 %v3723_v26  ;;  %v286_v8 = vrot.slane %v285_v2, 4  ;;  %v362_v9 = vld [vmem:[#allocation2] sm:$0xee]  ;;  %v368_v10 = vld [vmem:[#allocation2 + $0x10] sm:$0xee]  ;;  %vm4222_vm11 = vmor %vm450_vm5, %vm451_vm6  ;;  %vm1851_vm13 = vcmask 1045508  }
  0x20   : > { %1751 = vmatpush1.bf16.msra.mxu0 %v3724_v27  ;;  %765 = vmatprep.subr.bf16.mxu1 %v3725_v28  ;;  %v363_v11 = vsel %vm4166_vm4, %v276_v63, %v362_v9  ;;  %v369_v12 = vsel %vm4166_vm4, %v285_v2, %v368_v10  ;;  %vm1407_vm9 = vsmask.f32 6416  ;;  %v3755_v61 = vld [vmem:[%s5232_s1] ss:$8 sps:$4 sm:$0xff]   ;;  %vm4520_vm14 = vmor %vm199_vm1, %vm1851_vm13  ;;  %vm1089_vm1 = vcmask 1042432  }
  0x21   : > { %1752 = vmatprep.subr.bf16.mxu0 %v3727_v29  ;;  %364 = vst [vmem:[#allocation2] sm:$0xee] %v363_v11  ;;  %370 = vst [vmem:[#allocation2 + $0x10] sm:$0xee] %v369_v12  ;;  %vm2167_vm2 = vsmask.f32 5392 }
  0x22   : > { %v365_v15 = vld [vmem:[#allocation2 + $0x8] sm:$0x33]  ;;  %v371_v16 = vld [vmem:[#allocation2 + $0x18] sm:$0x33]  ;;  %vm4239_vm12 = vmor %vm1406_vm7, %vm1407_vm9  ;;  %vm3040_vm6 = vcmask 1043456   ;;  %vm3041_vm7 = vcmask 785412  }
  0x23   : > { %766 = vmatpush1.bf16.msra.mxu1 %v3729_v30  ;;  %v366_v17 = vsel %vm4122_vm10, %v277_v7, %v365_v15  ;;  %v372_v18 = vsel %vm4122_vm10, %v286_v8, %v371_v16  ;;  %v3763_v7 = vld [vmem:[%s5232_s1 + $0x14] ss:$8 sps:$4 sm:$0xff]   ;;  %v212_v8 = vld [vmem:[#allocation2 + $0x20] sm:$0x33]  ;;  %vm4818_vm3 = vmor %vm200_vm0, %vm2167_vm2  ;;  %vm2611_vm0 = vcmask 1040384  }
  0x24   : > { %1753 = vmatpush1.bf16.msra.mxu0 %v3730_v31  ;;  %767 = vmatprep.subr.bf16.mxu1 %v3731_v32  ;;  %367 = vst [vmem:[#allocation2 + $0x8] sm:$0x33] %v366_v17  ;;  %373 = vst [vmem:[#allocation2 + $0x18] sm:$0x33] %v372_v18  ;;  %v263_v15 = vld [vmem:[%s4110_s24 + $0x10] sm:$0xff]  ;;  %v213_v17 = vsel %vm4122_vm10, 0, %v212_v8 }
  0x25   : > { %1754 = vmatprep.subr.bf16.mxu0 %v3733_v33  ;;  %214 = vst [vmem:[#allocation2 + $0x20] sm:$0x33] %v213_v17 }
  0x27   : > { %768 = vmatpush1.bf16.msra.mxu1 %v3735_v34 }
  0x28   : > { %1755 = vmatpush1.bf16.msra.mxu0 %v3736_v35  ;;  %769 = vmatprep.subr.bf16.mxu1 %v3737_v36  ;;  %v4190_v19 = vld [vmem:[#allocation2] sm:$0xff]  ;;  %v4192_v20 = vld [vmem:[#allocation2 + $0x10] sm:$0xff] }
  0x29   : > { %1756 = vmatprep.subr.bf16.mxu0 %v3739_v37  ;;  %v4194_v21 = vld [vmem:[#allocation2] sm:$0xee]  ;;  %v454_v22 = vshrl.u32 %v4190_v19, 16  ;;  %v457_v23 = vshll.u32 %v4190_v19, 16  ;;  %v468_v24 = vshrl.u32 %v4192_v20, 16  ;;  %v471_v25 = vshll.u32 %v4192_v20, 16 }
  0x2a   : > { %v4200_v26 = vld [vmem:[#allocation2 + $0x10] sm:$0xee]  ;;  %v1410_v27 = vshrl.u32 %v4194_v21, 16  ;;  %v1413_v28 = vshll.u32 %v4194_v21, 16  ;;  %v3176_v35 = vcombine.high %v4190_v19, %v4192_v20  ;;  %v3175_v36 = vcombine.low %v4190_v19, %v4192_v20 }
  0x2b   : > { %770 = vmatpush1.bf16.msra.mxu1 %v3741_v42  ;;  %v1428_v29 = vshrl.u32 %v4200_v26, 16  ;;  %v1431_v30 = vshll.u32 %v4200_v26, 16  ;;  %v4206_v31 = vld [vmem:[#allocation2 + $0x8] sm:$0x11]  ;;  %v4208_v32 = vld [vmem:[#allocation2 + $0x18] sm:$0x11] }
  0x2c   : > { %1757 = vmatpush1.bf16.msra.mxu0 %v3742_v43  ;;  %771 = vmatprep.subr.bf16.mxu1 %v3743_v51  ;;  %v456_v33 = vrot.slane %v454_v22, 4  ;;  %v459_v34 = vrot.slane %v457_v23, 5  ;;  %v463_v37 = vshll.u32 %v4206_v31, 16  ;;  %v470_v38 = vrot.slane %v468_v24, 4  ;;  %v4216_v41 = vld [vmem:[#allocation2 + $0x8] sm:$0x33] }
  0x2d   : > { %1758 = vmatprep.subr.bf16.mxu0 %v3745_v52  ;;  %v473_v39 = vrot.slane %v471_v25, 5  ;;  %v477_v40 = vshll.u32 %v4208_v32, 16  ;;  %v4218_v43 = vld [vmem:[#allocation2 + $0x18] sm:$0x33]  ;;  %v1412_v45 = vrot.slane %v1410_v27, 5  ;;  %v1415_v50 = vrot.slane %v1413_v28, 6 }
  0x2e   : > { %v460_v42 = vor.u32 %v459_v34, %v456_v33  ;;  %v465_v47 = vrot.slane %v463_v37, 5  ;;  %v1419_v52 = vshrl.u32 %v4216_v41, 16  ;;  %v1422_v53 = vshll.u32 %v4216_v41, 16  ;;  %v246_v23 = vld [vmem:[#allocation2 + $0x38] sm:$0x66] }
  0x2f   : > { %772 = vmatpush1.bf16.msra.mxu1 %v3747_v62  ;;  %v474_v48 = vor.u32 %v473_v39, %v470_v38  ;;  %v479_v49 = vrot.slane %v477_v40, 5  ;;  %v1430_v54 = vrot.slane %v1428_v29, 5  ;;  %v1416_v57 = vor.u32 %v1415_v50, %v1412_v45  ;;  %v264_v28 = vld [vmem:[%s4110_s24 + $0x18] sm:$0xff]  ;;  %v3758_v38 = vld [vmem:[%s5232_s1 + $0x300] ss:$8 sps:$4 sm:$0xff]  }
  0x30   : > { %1759 = vmatpush1.bf16.msra.mxu0 %v3748_v0  ;;  %773 = vmatprep.subr.bf16.mxu1 %v3749_v1  ;;  %v461_v51 = vrot.slane %v460_v42, 4  ;;  %v1433_v58 = vrot.slane %v1431_v30, 6  ;;  %v1437_v59 = vshrl.u32 %v4218_v43, 16  ;;  %v1421_v62 = vrot.slane %v1419_v52, 5  ;;  %v3761_v39 = vld [vmem:[%s5232_s1 + $0x10] ss:$8 sps:$4 sm:$0xff]  }
  0x31   : > { %1760 = vmatprep.subr.bf16.mxu0 %v3751_v3  ;;  %v475_v56 = vrot.slane %v474_v48, 4  ;;  %v1424_v63 = vrot.slane %v1422_v53, 6  ;;  %v1440_v0 = vshll.u32 %v4218_v43, 16  ;;  %v1417_v3 = vrot.slane %v1416_v57, 4  ;;  %v3766_v50 = vld [vmem:[%s5232_s1 + $0x314] ss:$8 sps:$4 sm:$0xff]  }
  0x32   : > { %v466_v60 = vsel %vm4222_vm11, %v461_v51, %v465_v47  ;;  %v247_v27 = vsel %vm4142_vm15, 0, %v246_v23  ;;  %v288_v29 = vshrl.u32 %v263_v15, 16  ;;  %v291_v30 = vshll.u32 %v263_v15, 16  ;;  %v3769_v47 = vld [vmem:[%s5232_s1 + $0x24] ss:$8 sps:$4 sm:$0xff]  }
  0x33   : > { %774 = vmatpush1.bf16.msra.mxu1 %v3753_v5  ;;  %v480_v1 = vsel %vm4222_vm11, %v475_v56, %v479_v49  ;;  %v1434_v5 = vor.u32 %v1433_v58, %v1430_v54  ;;  %v1425_v11 = vor.u32 %v1424_v63, %v1421_v62  ;;  %v1442_v12 = vrot.slane %v1440_v0, 6  ;;  %248 = vst [vmem:[#allocation2 + $0x38] sm:$0x66] %v247_v27  ;;  %v3764_v52 = vld [vmem:[%s5232_s1 + $0x310] ss:$8 sps:$4 sm:$0xff]   ;;  %v266_v15 = vld [vmem:[%s4110_s24 + $0x28] sm:$0xff] }
  0x34   : > { %1761 = vmatpush1.bf16.msra.mxu0 %v3754_v6  ;;  %992 = vmatprep.subr.bf16.mxu1 %v3757_v13  ;;  %v1439_v6 = vrot.slane %v1437_v59, 5  ;;  %v3139_v9 = vcombine.low %v466_v60, %v480_v1  ;;  %v3140_v10 = vcombine.high %v466_v60, %v480_v1  ;;  %v215_v13 = vld [vmem:[#allocation2 + $0x30] sm:$0x33]  ;;  %v297_v33 = vshrl.u32 %v264_v28, 16  ;;  %v3767_v53 = vld [vmem:[%s5232_s1 + $0x20] ss:$8 sps:$4 sm:$0xff]  }
  0x35   : > { %2070 = vmatprep.subr.bf16.mxu0 %v3760_v14  ;;  %v243_v14 = vld [vmem:[#allocation2 + $0x28] sm:$0x66]  ;;  %v1435_v16 = vrot.slane %v1434_v5, 4  ;;  %v216_v18 = vsel %vm4122_vm10, 0, %v215_v13  ;;  %v1426_v24 = vsel %vm4239_vm12, %v1417_v3, %v1425_v11  ;;  %v300_v34 = vshll.u32 %v264_v28, 16 }
  0x36   : > { %v244_v22 = vsel %vm4142_vm15, 0, %v243_v14  ;;  %3171 = vmatprep.mubr.msk.bf16.mxu1 %vm738_vm8, %v3140_v10  ;;  %v1443_v25 = vor.u32 %v1442_v12, %v1439_v6  ;;  %217 = vst [vmem:[#allocation2 + $0x30] sm:$0x33] %v216_v18  ;;  %v290_v40 = vrot.slane %v288_v29, 6  ;;  %v293_v48 = vrot.slane %v291_v30, 7  ;;  %v265_v14 = vld [vmem:[%s4110_s24 + $0x20] sm:$0xff] }
  0x37   : > { %245 = vst [vmem:[#allocation2 + $0x28] sm:$0x66] %v244_v22  ;;  %784 = vmatmul.mubr.bf16.vlgmr.msra.gmra.mrb[0].mxu1 %v3139_v9  ;;  %v299_v49 = vrot.slane %v297_v33, 6  ;;  %v302_v51 = vrot.slane %v300_v34, 7  ;;  %v3775_v54 = vld [vmem:[%s5232_s1 + $0x34] ss:$8 sps:$4 sm:$0xff]  }
  0x38   : > { %v1444_v37 = vsel %vm4239_vm12, %v1435_v16, %v1443_v25  ;;  %993 = vmatpush1.bf16.msra.mxu1 %v3755_v61  ;;  %v294_v56 = vor.u32 %v293_v48, %v290_v40  ;;  %v3772_v57 = vld [vmem:[%s5232_s1 + $0x324] ss:$8 sps:$4 sm:$0xff]   ;;  %v221_v60 = vld [vmem:[#allocation2 + $0x50] sm:$0x33]  ;;  %v252_v13 = vld [vmem:[#allocation2 + $0x58] sm:$0x66] }
  0x39   : > { %v3303_v42 = vcombine.low %v1426_v24, %v1444_v37  ;;  %v3304_v45 = vcombine.high %v1426_v24, %v1444_v37  ;;  %994 = vmatprep.subr.bf16.mxu1 %v3763_v7  ;;  %v303_v58 = vor.u32 %v302_v51, %v299_v49  ;;  %v218_v59 = vld [vmem:[#allocation2 + $0x40] sm:$0x33]  ;;  %v249_v61 = vld [vmem:[#allocation2 + $0x48] sm:$0x66]  ;;  %v3773_v3 = vld [vmem:[%s5232_s1 + $0x30] ss:$8 sps:$4 sm:$0xff]  }
  0x3a   : > { %v295_v62 = vrot.slane %v294_v56, 4  ;;  %v374_v63 = vld [vmem:[#allocation2 + $0x20] sm:$0xee]  ;;  %v219_v1 = vsel %vm4122_vm10, 0, %v218_v59  ;;  %v383_v8 = vld [vmem:[#allocation2 + $0x38] sm:$0x33] }
  0x3b   : > { %3335 = vmatprep.mubr.msk.bf16.mxu0 %vm738_vm8, %v3304_v45  ;;  %v304_v5 = vrot.slane %v303_v58, 4  ;;  %v375_v6 = vsel %vm4166_vm4, %v294_v56, %v374_v63  ;;  %220 = vst [vmem:[#allocation2 + $0x40] sm:$0x33] %v219_v1  ;;  %v222_v9 = vsel %vm4122_vm10, 0, %v221_v60  ;;  %v250_v12 = vsel %vm4142_vm15, 0, %v249_v61 }
  0x3c   : > { %1771 = vmatmul.mubr.bf16.vlgmr.msra.gmra.mrb[0].mxu0 %v3303_v42  ;;  %995 = vmatpush1.bf16.msra.mxu1 %v3761_v39  ;;  %376 = vst [vmem:[#allocation2 + $0x20] sm:$0xee] %v375_v6  ;;  %223 = vst [vmem:[#allocation2 + $0x50] sm:$0x33] %v222_v9  ;;  %v253_v17 = vsel %vm4142_vm15, 0, %v252_v13  ;;  %v306_v18 = vshrl.u32 %v265_v14, 16 }
  0x3d   : > { %2071 = vmatpush1.bf16.msra.mxu0 %v3758_v38  ;;  %996 = vmatprep.subr.bf16.mxu1 %v3769_v47  ;;  %v380_v7 = vld [vmem:[#allocation2 + $0x30] sm:$0xee]  ;;  %v384_v16 = vsel %vm4122_vm10, %v304_v5, %v383_v8  ;;  %251 = vst [vmem:[#allocation2 + $0x48] sm:$0x66] %v250_v12  ;;  %v309_v22 = vshll.u32 %v265_v14, 16  ;;  %v315_v25 = vshrl.u32 %v266_v15, 16 }
  0x3e   : > { %v377_v0 = vld [vmem:[#allocation2 + $0x28] sm:$0x33]  ;;  %2072 = vmatprep.subr.bf16.mxu0 %v3766_v50  ;;  %v381_v11 = vsel %vm4166_vm4, %v303_v58, %v380_v7  ;;  %385 = vst [vmem:[#allocation2 + $0x38] sm:$0x33] %v384_v16  ;;  %254 = vst [vmem:[#allocation2 + $0x58] sm:$0x66] %v253_v17 }
  0x3f   : > { %v378_v10 = vsel %vm4122_vm10, %v295_v62, %v377_v0  ;;  %382 = vst [vmem:[#allocation2 + $0x30] sm:$0xee] %v381_v11  ;;  %v3770_v23 = vld [vmem:[%s5232_s1 + $0x320] ss:$8 sps:$4 sm:$0xff]   ;;  %v3781_v24 = vld [vmem:[%s5232_s1 + $0x44] ss:$8 sps:$4 sm:$0xff]  }
  0x40   : > { %997 = vmatpush1.bf16.msra.mxu1 %v3767_v53  ;;  %379 = vst [vmem:[#allocation2 + $0x28] sm:$0x33] %v378_v10  ;;  %v318_v27 = vshll.u32 %v266_v15, 16  ;;  %v3778_v28 = vld [vmem:[%s5232_s1 + $0x334] ss:$8 sps:$4 sm:$0xff]   ;;  %v308_v29 = vrot.slane %v306_v18, 6 }
  0x41   : > { %2073 = vmatpush1.bf16.msra.mxu0 %v3764_v52  ;;  %998 = vmatprep.subr.bf16.mxu1 %v3775_v54  ;;  %v311_v30 = vrot.slane %v309_v22, 7  ;;  %v3776_v33 = vld [vmem:[%s5232_s1 + $0x330] ss:$8 sps:$4 sm:$0xff]   ;;  %v317_v34 = vrot.slane %v315_v25, 6  ;;  %v3779_v38 = vld [vmem:[%s5232_s1 + $0x40] ss:$8 sps:$4 sm:$0xff]  }
  0x42   : > { %2074 = vmatprep.subr.bf16.mxu0 %v3772_v57  ;;  %v320_v37 = vrot.slane %v318_v27, 7  ;;  %v3784_v39 = vld [vmem:[%s5232_s1 + $0x344] ss:$8 sps:$4 sm:$0xff]   ;;  %v3787_v42 = vld [vmem:[%s5232_s1 + $0x54] ss:$8 sps:$4 sm:$0xff]   ;;  %v1855_v48 = vrot.slane %v4216_v41, 6 }
  0x43   : > { %v4325_v40 = vor.u32 %v311_v30, %v308_v29  ;;  %v386_v47 = vld [vmem:[#allocation2 + $0x40] sm:$0xee]  ;;  %v1859_v49 = vrot.slane %v4218_v43, 6  ;;  %v3785_v50 = vld [vmem:[%s5232_s1 + $0x50] ss:$8 sps:$4 sm:$0xff]   ;;  %v1098_v4 = vrot.slane %v4208_v32, 5 }
  0x44   : > { %999 = vmatpush1.bf16.msra.mxu1 %v3773_v3  ;;  %v4330_v45 = vor.u32 %v320_v37, %v317_v34  ;;  %v4337_v51 = vld [vmem:[#allocation2 + $0x20] sm:$0xff]  ;;  %v392_v56 = vld [vmem:[#allocation2 + $0x50] sm:$0xee] }
  0x45   : > { %2075 = vmatpush1.bf16.msra.mxu0 %v3770_v23  ;;  %1000 = vmatprep.subr.bf16.mxu1 %v3781_v24  ;;  %v4339_v52 = vld [vmem:[#allocation2 + $0x20] sm:$0xee]  ;;  %v313_v53 = vrot.slane %v4325_v40, 4  ;;  %v387_v54 = vsel %vm4166_vm4, %v4325_v40, %v386_v47  ;;  %v482_v60 = vshrl.u32 %v4337_v51, 16  ;;  %v485_v61 = vshll.u32 %v4337_v51, 16 }
  0x46   : > { %2076 = vmatprep.subr.bf16.mxu0 %v3778_v28  ;;  %v3782_v57 = vld [vmem:[%s5232_s1 + $0x340] ss:$8 sps:$4 sm:$0xff]   ;;  %v4348_v58 = vld [vmem:[#allocation2 + $0x30] sm:$0xff]  ;;  %v3793_v62 = vld [vmem:[%s5232_s1 + $0x64] ss:$8 sps:$4 sm:$0xff]   ;;  %v1446_v63 = vshrl.u32 %v4339_v52, 16  ;;  %v393_v0 = vsel %vm4166_vm4, %v4330_v45, %v392_v56 }
  0x47   : > { %v4350_v59 = vld [vmem:[#allocation2 + $0x28] sm:$0x11]  ;;  %388 = vst [vmem:[#allocation2 + $0x40] sm:$0xee] %v387_v54  ;;  %v3790_v1 = vld [vmem:[%s5232_s1 + $0x354] ss:$8 sps:$4 sm:$0xff]  }
  0x48   : > { %1001 = vmatpush1.bf16.msra.mxu1 %v3779_v38  ;;  %v4364_v3 = vld [vmem:[#allocation2 + $0x38] sm:$0x11]  ;;  %v491_v5 = vshll.u32 %v4350_v59, 16  ;;  %v496_v6 = vshrl.u32 %v4348_v58, 16  ;;  %v499_v7 = vshll.u32 %v4348_v58, 16  ;;  %v1449_v8 = vshll.u32 %v4339_v52, 16 }
  0x49   : > { %394 = vst [vmem:[#allocation2 + $0x50] sm:$0xee] %v393_v0  ;;  %2077 = vmatpush1.bf16.msra.mxu0 %v3776_v33  ;;  %1002 = vmatprep.subr.bf16.mxu1 %v3787_v42  ;;  %v484_v9 = vrot.slane %v482_v60, 4  ;;  %v487_v10 = vrot.slane %v485_v61, 5  ;;  %v505_v11 = vshll.u32 %v4364_v3, 16  ;;  %v1448_v13 = vrot.slane %v1446_v63, 5 }
  0x4a   : > { %v4371_v12 = vld [vmem:[#allocation2 + $0x30] sm:$0xee]  ;;  %2078 = vmatprep.subr.bf16.mxu0 %v3784_v39  ;;  %v493_v14 = vrot.slane %v491_v5, 5  ;;  %v498_v15 = vrot.slane %v496_v6, 4  ;;  %v501_v16 = vrot.slane %v499_v7, 5  ;;  %v1451_v18 = vrot.slane %v1449_v8, 6 }
  0x4b   : > { %v4373_v17 = vld [vmem:[#allocation2 + $0x28] sm:$0x33]  ;;  %v3788_v22 = vld [vmem:[%s5232_s1 + $0x350] ss:$8 sps:$4 sm:$0xff]   ;;  %v488_v23 = vor.u32 %v487_v10, %v484_v9  ;;  %v507_v24 = vrot.slane %v505_v11, 5  ;;  %v1464_v34 = vshrl.u32 %v4371_v12, 16 }
  0x4c   : > { %v4378_v25 = vld [vmem:[#allocation2 + $0x38] sm:$0x33]  ;;  %v1455_v27 = vshrl.u32 %v4373_v17, 16  ;;  %v1458_v28 = vshll.u32 %v4373_v17, 16  ;;  %1003 = vmatpush1.bf16.msra.mxu1 %v3785_v50  ;;  %v502_v29 = vor.u32 %v501_v16, %v498_v15  ;;  %v3791_v30 = vld [vmem:[%s5232_s1 + $0x60] ss:$8 sps:$4 sm:$0xff]   ;;  %v1452_v33 = vor.u32 %v1451_v18, %v1448_v13 }
  0x4d   : > { %v1467_v37 = vshll.u32 %v4371_v12, 16  ;;  %v3799_v38 = vld [vmem:[%s5232_s1 + $0x74] ss:$8 sps:$4 sm:$0xff]   ;;  %2079 = vmatpush1.bf16.msra.mxu0 %v3782_v57  ;;  %v489_v39 = vrot.slane %v488_v23, 4  ;;  %1004 = vmatprep.subr.bf16.mxu1 %v3793_v62  ;;  %v1473_v50 = vshrl.u32 %v4378_v25, 16  ;;  %v1466_v61 = vrot.slane %v1464_v34, 5 }
  0x4e   : > { %v1457_v42 = vrot.slane %v1455_v27, 5  ;;  %v1460_v47 = vrot.slane %v1458_v28, 6  ;;  %v389_v54 = vld [vmem:[#allocation2 + $0x48] sm:$0x33]  ;;  %2080 = vmatprep.subr.bf16.mxu0 %v3790_v1  ;;  %v503_v56 = vrot.slane %v502_v29, 4  ;;  %v1453_v60 = vrot.slane %v1452_v33, 4 }
  0x4f   : > { %v1469_v63 = vrot.slane %v1467_v37, 6  ;;  %v3796_v0 = vld [vmem:[%s5232_s1 + $0x364] ss:$8 sps:$4 sm:$0xff]   ;;  %v494_v5 = vsel %vm4222_vm11, %v489_v39, %v493_v14  ;;  %v1475_v6 = vrot.slane %v1473_v50, 5  ;;  %v1476_v62 = vshll.u32 %v4378_v25, 16 }
  0x50   : > { %v1461_v57 = vor.u32 %v1460_v47, %v1457_v42  ;;  %v3794_v7 = vld [vmem:[%s5232_s1 + $0x360] ss:$8 sps:$4 sm:$0xff]   ;;  %v3797_v1 = vld [vmem:[%s5232_s1 + $0x70] ss:$8 sps:$4 sm:$0xff]   ;;  %v508_v10 = vsel %vm4222_vm11, %v503_v56, %v507_v24  ;;  %1005 = vmatpush1.bf16.msra.mxu1 %v3791_v30  ;;  %v322_v13 = vrot.slane %v4330_v45, 4  ;;  %v390_v14 = vsel %vm4122_vm10, %v313_v53, %v389_v54 }
  0x51   : > { %v395_v8 = vld [vmem:[#allocation2 + $0x58] sm:$0x33]  ;;  %v4403_v9 = vld [vmem:[#allocation2 + $0x40] sm:$0xff]  ;;  %v1470_v11 = vor.u32 %v1469_v63, %v1466_v61  ;;  %v4412_v15 = vld [vmem:[#allocation2 + $0x50] sm:$0xff]  ;;  %2081 = vmatpush1.bf16.msra.mxu0 %v3788_v22  ;;  %v3142_v18 = vcombine.high %v494_v5, %v508_v10  ;;  %v1478_v27 = vrot.slane %v1476_v62, 6  ;;  %v3141_v24 = vcombine.low %v494_v5, %v508_v10  ;;  %1006 = vmatprep.subr.bf16.mxu1 %v3799_v38 }
  0x52   : > { %v4414_v16 = vld [vmem:[#allocation2 + $0x40] sm:$0xee]  ;;  %v1462_v23 = vsel %vm4239_vm12, %v1453_v60, %v1461_v57  ;;  %v3802_v45 = vld [vmem:[%s5232_s1 + $0x374] ss:$8 sps:$4 sm:$0xff]   ;;  %391 = vst [vmem:[#allocation2 + $0x48] sm:$0x33] %v390_v14  ;;  %2082 = vmatprep.subr.bf16.mxu0 %v3796_v0  ;;  %v396_v28 = vsel %vm4122_vm10, %v322_v13, %v395_v8 }
  0x53   : > { %v4421_v40 = vld [vmem:[#allocation2 + $0x50] sm:$0xee]  ;;  %v1471_v53 = vrot.slane %v1470_v11, 4  ;;  %v510_v22 = vshrl.u32 %v4403_v9, 16  ;;  %v513_v29 = vshll.u32 %v4403_v9, 16  ;;  %3172 = vmatprep.mubr.msk.bf16.mxu1 %vm738_vm8, %v3142_v18  ;;  %v1479_v33 = vor.u32 %v1478_v27, %v1475_v6 }
  0x54   : > { %v3805_v30 = vld [vmem:[%s5232_s1 + $0x84] ss:$8 sps:$4 sm:$0xff]   ;;  %397 = vst [vmem:[#allocation2 + $0x58] sm:$0x33] %v396_v28  ;;  %v524_v34 = vshrl.u32 %v4412_v15, 16  ;;  %v527_v37 = vshll.u32 %v4412_v15, 16  ;;  %794 = vmatmul.mubr.bf16.gmra.mrb[4].mxu1 %v3141_v24 }
  0x55   : > { %v3803_v38 = vld [vmem:[%s5232_s1 + $0x80] ss:$8 sps:$4 sm:$0xff]   ;;  %v1482_v39 = vshrl.u32 %v4414_v16, 16  ;;  %v3800_v42 = vld [vmem:[%s5232_s1 + $0x370] ss:$8 sps:$4 sm:$0xff]   ;;  %v512_v47 = vrot.slane %v510_v22, 4  ;;  %v1480_v61 = vsel %vm4239_vm12, %v1471_v53, %v1479_v33  ;;  %2083 = vmatpush1.bf16.msra.mxu0 %v3794_v7  ;;  %1007 = vmatpush1.bf16.msra.mxu1 %v3797_v1 }
  0x56   : > { %v515_v50 = vrot.slane %v513_v29, 5  ;;  %v1485_v54 = vshll.u32 %v4414_v16, 16  ;;  %v1500_v56 = vshrl.u32 %v4421_v40, 16  ;;  %v224_v60 = vld [vmem:[#allocation2 + $0x60] sm:$0x33]  ;;  %v526_v63 = vrot.slane %v524_v34, 4  ;;  %2084 = vmatprep.subr.bf16.mxu0 %v3802_v45  ;;  %1008 = vmatprep.subr.bf16.mxu1 %v3805_v30 }
  0x57   : > { %v529_v0 = vrot.slane %v527_v37, 5  ;;  %v1484_v5 = vrot.slane %v1482_v39, 5  ;;  %v227_v57 = vld [vmem:[#allocation2 + $0x70] sm:$0x33]  ;;  %v3306_v6 = vcombine.high %v1462_v23, %v1480_v61  ;;  %v3305_v62 = vcombine.low %v1462_v23, %v1480_v61  ;;  %v3808_v11 = vld [vmem:[%s5232_s1 + $0x384] ss:$8 sps:$4 sm:$0xff]  }
  0x58   : > { %v516_v8 = vor.u32 %v515_v50, %v512_v47  ;;  %v1487_v10 = vrot.slane %v1485_v54, 6  ;;  %v3811_v13 = vld [vmem:[%s5232_s1 + $0x94] ss:$8 sps:$4 sm:$0xff]   ;;  %v1502_v1 = vrot.slane %v1500_v56, 5  ;;  %v1503_v14 = vshll.u32 %v4421_v40, 16 }
  0x59   : > { %v530_v7 = vor.u32 %v529_v0, %v526_v63  ;;  %v3809_v18 = vld [vmem:[%s5232_s1 + $0x90] ss:$8 sps:$4 sm:$0xff]   ;;  %v225_v23 = vsel %vm4122_vm10, 0, %v224_v60  ;;  %v255_v27 = vld [vmem:[#allocation2 + $0x68] sm:$0x66]  ;;  %3336 = vmatprep.mubr.msk.bf16.mxu0 %vm738_vm8, %v3306_v6  ;;  %v228_v29 = vsel %vm4122_vm10, 0, %v227_v57  ;;  %1009 = vmatpush1.bf16.msra.mxu1 %v3803_v38 }
  0x5a   : > { %v4457_v24 = vld [vmem:[#allocation2 + $0x48] sm:$0x11]  ;;  %v517_v45 = vrot.slane %v516_v8, 4  ;;  %v1488_v28 = vor.u32 %v1487_v10, %v1484_v5  ;;  %226 = vst [vmem:[#allocation2 + $0x60] sm:$0x33] %v225_v23  ;;  %1781 = vmatmul.mubr.bf16.gmra.mrb[4].mxu0 %v3305_v62  ;;  %v267_v50 = vld [vmem:[%s4110_s24 + $0x30] sm:$0xff]  ;;  %1010 = vmatprep.subr.bf16.mxu1 %v3811_v13 }
  0x5b   : > { %v4459_v53 = vld [vmem:[#allocation2 + $0x48] sm:$0x33]  ;;  %v258_v30 = vld [vmem:[#allocation2 + $0x78] sm:$0x66]  ;;  %v519_v33 = vshll.u32 %v4457_v24, 16  ;;  %v531_v34 = vrot.slane %v530_v7, 4  ;;  %2085 = vmatpush1.bf16.msra.mxu0 %v3800_v42 }
  0x5c   : > { %v3806_v22 = vld [vmem:[%s5232_s1 + $0x380] ss:$8 sps:$4 sm:$0xff]   ;;  %v1491_v37 = vshrl.u32 %v4459_v53, 16  ;;  %v1494_v39 = vshll.u32 %v4459_v53, 16  ;;  %v3814_v47 = vld [vmem:[%s5232_s1 + $0x394] ss:$8 sps:$4 sm:$0xff]   ;;  %2086 = vmatprep.subr.bf16.mxu0 %v3808_v11 }
  0x5d   : > { %229 = vst [vmem:[#allocation2 + $0x70] sm:$0x33] %v228_v29  ;;  %v3817_v54 = vld [vmem:[%s5232_s1 + $0xa4] ss:$8 sps:$4 sm:$0xff]   ;;  %v4476_v56 = vld [vmem:[#allocation2 + $0x58] sm:$0x11]  ;;  %1011 = vmatpush1.bf16.msra.mxu1 %v3809_v18 }
  0x5e   : > { %v4478_v60 = vld [vmem:[#allocation2 + $0x58] sm:$0x33]  ;;  %v1489_v61 = vrot.slane %v1488_v28, 4  ;;  %v1505_v63 = vrot.slane %v1503_v14, 6  ;;  %v521_v0 = vrot.slane %v519_v33, 5  ;;  %v533_v5 = vshll.u32 %v4476_v56, 16  ;;  %1012 = vmatprep.subr.bf16.mxu1 %v3817_v54 }
  0x5f   : > { %v1493_v57 = vrot.slane %v1491_v37, 5  ;;  %v1496_v6 = vrot.slane %v1494_v39, 6  ;;  %v1509_v42 = vshrl.u32 %v4478_v60, 16  ;;  %v1512_v8 = vshll.u32 %v4478_v60, 16  ;;  %v3812_v10 = vld [vmem:[%s5232_s1 + $0x390] ss:$8 sps:$4 sm:$0xff]   ;;  %2087 = vmatpush1.bf16.msra.mxu0 %v3806_v22 }
  0x60   : > { %v1506_v62 = vor.u32 %v1505_v63, %v1502_v1  ;;  %v256_v13 = vsel %vm4142_vm15, 0, %v255_v27  ;;  %v268_v7 = vld [vmem:[%s4110_s24 + $0x38] sm:$0xff]  ;;  %v522_v14 = vsel %vm4222_vm11, %v517_v45, %v521_v0  ;;  %v535_v23 = vrot.slane %v533_v5, 5  ;;  %v3815_v1 = vld [vmem:[%s5232_s1 + $0xa0] ss:$8 sps:$4 sm:$0xff]   ;;  %2088 = vmatprep.subr.bf16.mxu0 %v3814_v47 }
  0x61   : > { %v1497_v28 = vor.u32 %v1496_v6, %v1493_v57  ;;  %257 = vst [vmem:[#allocation2 + $0x68] sm:$0x66] %v256_v13  ;;  %v259_v11 = vsel %vm4142_vm15, 0, %v258_v30  ;;  %v3820_v29 = vld [vmem:[%s5232_s1 + $0x3a4] ss:$8 sps:$4 sm:$0xff]   ;;  %v1511_v33 = vrot.slane %v1509_v42, 5  ;;  %1013 = vmatpush1.bf16.msra.mxu1 %v3815_v1 }
  0x62   : > { %v1507_v27 = vrot.slane %v1506_v62, 4  ;;  %v1514_v37 = vrot.slane %v1512_v8, 6  ;;  %260 = vst [vmem:[#allocation2 + $0x78] sm:$0x66] %v259_v11  ;;  %v324_v45 = vshrl.u32 %v267_v50, 16  ;;  %v536_v55 = vsel %vm4222_vm11, %v531_v34, %v535_v23 }
  0x63   : > { %v4501_v18 = vld [vmem:[#allocation2] sm:$0xcc]  ;;  %v1498_v30 = vsel %vm4239_vm12, %v1489_v61, %v1497_v28  ;;  %v327_v39 = vshll.u32 %v267_v50, 16  ;;  %v333_v63 = vshrl.u32 %v268_v7, 16  ;;  %v4507_v0 = vld [vmem:[#allocation2 + $0x10] sm:$0xcc]  ;;  %v3144_v5 = vcombine.high %v522_v14, %v536_v55  ;;  %2089 = vmatpush1.bf16.msra.mxu0 %v3812_v10 }
  0x64   : > { %v1515_v57 = vor.u32 %v1514_v37, %v1511_v33  ;;  %v3143_v6 = vcombine.low %v522_v14, %v536_v55  ;;  %v326_v22 = vrot.slane %v324_v45, 6  ;;  %v3823_v54 = vld [vmem:[%s5232_s1 + $0xb4] ss:$8 sps:$4 sm:$0xff]   ;;  %v336_v8 = vshll.u32 %v268_v7, 16  ;;  %v3818_v34 = vld [vmem:[%s5232_s1 + $0x3a0] ss:$8 sps:$4 sm:$0xff]   ;;  %2090 = vmatprep.subr.bf16.mxu0 %v3820_v29 }
  0x65   : > { %v329_v62 = vrot.slane %v327_v39, 7  ;;  %v335_v42 = vrot.slane %v333_v63, 6  ;;  %v3821_v47 = vld [vmem:[%s5232_s1 + $0xb0] ss:$8 sps:$4 sm:$0xff]   ;;  %v3339_v61 = vrot.slane %v4501_v18, 10  ;;  %3173 = vmatprep.mubr.msk.bf16.mxu1 %vm738_vm8, %v3144_v5  ;;  %v3340_v23 = vrot.slane %v4507_v0, 10  ;;  %1014 = vmatprep.subr.bf16.mxu1 %v3823_v54 }
  0x66   : > { %v1516_v13 = vsel %vm4239_vm12, %v1507_v27, %v1515_v57  ;;  %v398_v7 = vld [vmem:[#allocation2 + $0x60] sm:$0xee]  ;;  %804 = vmatmul.mubr.bf16.gmra.mrb[8].mxu1 %v3143_v6  ;;  %v338_v33 = vrot.slane %v336_v8, 7  ;;  %v404_v37 = vld [vmem:[#allocation2 + $0x70] sm:$0xee]  ;;  %v1094_v54 = vrot.slane %v4206_v31, 5 }
  0x67   : > { %v3830_v14 = vld [vmem:[%s5232_s1 + $0x184] ss:$8 sps:$4 sm:$0xff]   ;;  %v3308_v28 = vcombine.high %v1498_v30, %v1516_v13  ;;  %v3307_v11 = vcombine.low %v1498_v30, %v1516_v13  ;;  %v330_v1 = vor.u32 %v329_v62, %v326_v22  ;;  %v3826_v45 = vld [vmem:[%s5232_s1 + $0x3b4] ss:$8 sps:$4 sm:$0xff]   ;;  %v4539_v10 = vsel %vm4520_vm14, %v3339_v61, %v1855_v48  ;;  %1015 = vmatpush1.bf16.msra.mxu1 %v3821_v47  ;;  %v3824_v57 = vld [vmem:[%s5232_s1 + $0x3b0] ss:$8 sps:$4 sm:$0xff]  }
  0x68   : > { %v401_v27 = vld [vmem:[#allocation2 + $0x68] sm:$0x33]  ;;  %v4545_v55 = vsel %vm4520_vm14, %v3340_v23, %v1859_v49  ;;  %v339_v30 = vor.u32 %v338_v33, %v335_v42  ;;  %1309 = vmatprep.subr.bf16.mxu1 %v3830_v14  ;;  %2091 = vmatpush1.bf16.msra.mxu0 %v3818_v34  ;;  %vm1090_vm15 = vcmask 1046532   ;;  %v3211_v62 = vrot.slane %v4194_v21, 9  ;;  %v4677_v19 = vld [vmem:[#allocation2 + $0x50] sm:$0xcc] }
  0x69   : > { %3337 = vmatprep.mubr.msk.bf16.mxu0 %vm738_vm8, %v3308_v28  ;;  %v331_v29 = vrot.slane %v330_v1, 4  ;;  %v399_v39 = vsel %vm4166_vm4, %v330_v1, %v398_v7  ;;  %v407_v48 = vld [vmem:[#allocation2 + $0x78] sm:$0x33]  ;;  %v3372_v43 = vcombine.high %v4539_v10, %v4545_v55  ;;  %2092 = vmatprep.subr.bf16.mxu0 %v3826_v45  ;;  %v3833_v6 = vld [vmem:[%s5232_s1 + $0x3c4] ss:$8 sps:$4 sm:$0xff]   ;;  %v3212_v42 = vrot.slane %v4200_v26, 9 }
  0x6a   : > { %1791 = vmatmul.mubr.bf16.gmra.mrb[8].mxu0 %v3307_v11  ;;  %400 = vst [vmem:[#allocation2 + $0x60] sm:$0xee] %v399_v39  ;;  %v340_v49 = vrot.slane %v339_v30, 4  ;;  %v405_v5 = vsel %vm4166_vm4, %v339_v30, %v404_v37  ;;  %v3859_v50 = vld [vmem:[%s5232_s1 + $0x1d0] ss:$8 sps:$4 sm:$0xff]   ;;  %vm2612_vm4 = vcmask 1044484  }
  0x6b   : > { %v402_v63 = vsel %vm4122_vm10, %v331_v29, %v401_v27  ;;  %406 = vst [vmem:[#allocation2 + $0x70] sm:$0xee] %v405_v5  ;;  %v3883_v32 = vld [vmem:[%s5232_s1 + $0x204] ss:$8 sps:$4 sm:$0xff]   ;;  %vm5039_vm5 = vmor %vm2611_vm0, %vm2612_vm4 }
  0x6c   : > { %403 = vst [vmem:[#allocation2 + $0x68] sm:$0x33] %v402_v63  ;;  %v408_v22 = vsel %vm4122_vm10, %v340_v49, %v407_v48  ;;  %2093 = vmatpush1.bf16.msra.mxu0 %v3824_v57  ;;  %vm4577_vm10 = vmor %vm1089_vm1, %vm1090_vm15 }
  0x6d   : > { %409 = vst [vmem:[#allocation2 + $0x78] sm:$0x33] %v408_v22  ;;  %2498 = vmatprep.subr.bf16.mxu0 %v3833_v6  ;;  %v4588_v13 = vsel %vm4577_vm10, %v3211_v62, %v1094_v54  ;;  %v4592_v7 = vsel %vm4577_vm10, %v3212_v42, %v1098_v4 }
  0x71   : > { %v4570_v8 = vld [vmem:[#allocation2 + $0x60] sm:$0xff] }
  0x72   : > { %v4572_v34 = vld [vmem:[#allocation2 + $0x60] sm:$0xee]  ;;  %v538_v44 = vshrl.u32 %v4570_v8, 16  ;;  %v541_v47 = vshll.u32 %v4570_v8, 16  ;;  %v4581_v61 = vld [vmem:[#allocation2 + $0x70] sm:$0xff] }
  0x73   : > { %v1518_v31 = vshrl.u32 %v4572_v34, 16  ;;  %v4583_v21 = vld [vmem:[#allocation2 + $0x68] sm:$0x11]  ;;  %v1521_v26 = vshll.u32 %v4572_v34, 16  ;;  %v552_v11 = vshrl.u32 %v4581_v61, 16  ;;  %v555_v37 = vshll.u32 %v4581_v61, 16 }
  0x74   : > { %v540_v14 = vrot.slane %v538_v44, 4  ;;  %v543_v23 = vrot.slane %v541_v47, 5  ;;  %v547_v28 = vshll.u32 %v4583_v21, 16  ;;  %v4596_v1 = vld [vmem:[#allocation2 + $0x68] sm:$0x33] }
  0x75   : > { %v4598_v33 = vld [vmem:[#allocation2 + $0x78] sm:$0x11]  ;;  %v4601_v45 = vld [vmem:[#allocation2 + $0x70] sm:$0xee]  ;;  %v1520_v27 = vrot.slane %v1518_v31, 5  ;;  %v554_v39 = vrot.slane %v552_v11, 4 }
  0x76   : > { %v544_v29 = vor.u32 %v543_v23, %v540_v14  ;;  %v549_v30 = vrot.slane %v547_v28, 5  ;;  %v561_v48 = vshll.u32 %v4598_v33, 16  ;;  %v4604_v49 = vld [vmem:[#allocation2 + $0x78] sm:$0x33]  ;;  %v557_v63 = vrot.slane %v555_v37, 5 }
  0x77   : > { %v1523_v5 = vrot.slane %v1521_v26, 6  ;;  %v1527_v57 = vshrl.u32 %v4596_v1, 16  ;;  %v1530_v6 = vshll.u32 %v4596_v1, 16  ;;  %v1536_v4 = vshrl.u32 %v4601_v45, 16 }
  0x78   : > { %v545_v22 = vrot.slane %v544_v29, 4  ;;  %v563_v54 = vrot.slane %v561_v48, 5  ;;  %v1539_v62 = vshll.u32 %v4601_v45, 16  ;;  %v558_v42 = vor.u32 %v557_v63, %v554_v39 }
  0x79   : > { %v1524_v44 = vor.u32 %v1523_v5, %v1520_v27  ;;  %v1529_v47 = vrot.slane %v1527_v57, 5  ;;  %v1532_v31 = vrot.slane %v1530_v6, 6  ;;  %v1538_v23 = vrot.slane %v1536_v4, 5 }
  0x7a   : > { %v550_v14 = vsel %vm4222_vm11, %v545_v22, %v549_v30  ;;  %v1541_v28 = vrot.slane %v1539_v62, 6  ;;  %v1545_v26 = vshrl.u32 %v4604_v49, 16  ;;  %v559_v11 = vrot.slane %v558_v42, 4 }
  0x7b   : > { %v1525_v37 = vrot.slane %v1524_v44, 4  ;;  %v1533_v38 = vor.u32 %v1532_v31, %v1529_v47  ;;  %v1548_v29 = vshll.u32 %v4604_v49, 16  ;;  %v3243_v63 = vcombine.low %v4588_v13, %v4592_v7 }
  0x7c   : > { %v1542_v48 = vor.u32 %v1541_v28, %v1538_v23  ;;  %v1547_v41 = vrot.slane %v1545_v26, 5  ;;  %v564_v39 = vsel %vm4222_vm11, %v559_v11, %v563_v54  ;;  %v3244_v4 = vcombine.high %v4588_v13, %v4592_v7  ;;  %v4625_v54 = vld [vmem:[#allocation2 + $0x20] sm:$0xcc]  ;;  %v3840_v26 = vld [vmem:[%s5232_s1 + $0x3d4] ss:$8 sps:$4 sm:$0xff]  }
  0x7d   : > { %v1550_v27 = vrot.slane %v1548_v29, 6  ;;  %v3146_v5 = vcombine.high %v550_v14, %v564_v39  ;;  %v3145_v57 = vcombine.low %v550_v14, %v564_v39  ;;  %v1534_v6 = vsel %vm4239_vm12, %v1525_v37, %v1533_v38  ;;  %v4631_v38 = vld [vmem:[#allocation2 + $0x30] sm:$0xcc]  ;;  %v3841_v39 = vld [vmem:[%s5232_s1 + $0x1a0] ss:$8 sps:$4 sm:$0xff]  }
  0x7e   : > { %v1543_v30 = vrot.slane %v1542_v48, 4  ;;  %v3213_v44 = vrot.slane %v4339_v52, 9  ;;  %v3341_v2 = vrot.slane %v4625_v54, 10  ;;  %v3342_v47 = vrot.slane %v4631_v38, 10  ;;  %v3838_v48 = vld [vmem:[%s5232_s1 + $0x3d0] ss:$8 sps:$4 sm:$0xff]  }
  0x7f   : > { %v1551_v22 = vor.u32 %v1550_v27, %v1547_v41  ;;  %3174 = vmatprep.mubr.msk.bf16.mxu1 %vm738_vm8, %v3146_v5  ;;  %v1863_v41 = vrot.slane %v4373_v17, 6  ;;  %v1867_v31 = vrot.slane %v4378_v25, 6  ;;  %v1102_v14 = vrot.slane %v4350_v59, 5  ;;  %v3837_v17 = vld [vmem:[%s5232_s1 + $0x194] ss:$8 sps:$4 sm:$0xff]  }
  0x80   : > { %814 = vmatmul.mubr.bf16.gmra.mrb[12].mxu1 %v3145_v57  ;;  %v3178_v52 = vcombine.high %v4337_v51, %v4348_v58  ;;  %v3831_v59 = vld [vmem:[%s5232_s1 + $0x3c0] ss:$8 sps:$4 sm:$0xff]   ;;  %v3214_v23 = vrot.slane %v4371_v12, 9  ;;  %v1106_v28 = vrot.slane %v4364_v3, 5  ;;  %v5250_v5 = vcombine.low %v4539_v10, %v4545_v55 }
  0x81   : > { %v1552_v46 = vsel %vm4239_vm12, %v1543_v30, %v1551_v22  ;;  %3207 = vmatprep.mubr.msk.bf16.mxu1 %vm738_vm8, %v3176_v35  ;;  %v3828_v35 = vld [vmem:[%s5232_s1 + $0x180] ss:$8 sps:$4 sm:$0xff]   ;;  %v4654_v25 = vsel %vm4577_vm10, %v3213_v44, %v1102_v14  ;;  %v1864_v11 = vsel %vm4520_vm14, %v3341_v2, %v1863_v41  ;;  %v1868_v12 = vsel %vm4520_vm14, %v3342_v47, %v1867_v31  ;;  %v3847_v41 = vld [vmem:[%s5232_s1 + $0x1b0] ss:$8 sps:$4 sm:$0xff]  }
  0x82   : > { %v3310_v62 = vcombine.high %v1534_v6, %v1552_v46  ;;  %v3309_v42 = vcombine.low %v1534_v6, %v1552_v46  ;;  %v4675_v3 = vld [vmem:[#allocation2 + $0x40] sm:$0xcc]  ;;  %v4681_v20 = vsel %vm4577_vm10, %v3214_v23, %v1106_v28  ;;  %v3374_v27 = vcombine.high %v1864_v11, %v1868_v12  ;;  %v4724_v2 = vld [vmem:[#allocation2 + $0x70] sm:$0xcc] }
  0x83   : > { %v3246_v37 = vcombine.high %v4654_v25, %v4681_v20  ;;  %v3245_v29 = vcombine.low %v4654_v25, %v4681_v20  ;;  %v3343_v30 = vrot.slane %v4675_v3, 10  ;;  %v1871_v57 = vrot.slane %v4459_v53, 6  ;;  %v3846_v46 = vld [vmem:[%s5232_s1 + $0x3e4] ss:$8 sps:$4 sm:$0xff]   ;;  %v3849_v53 = vld [vmem:[%s5232_s1 + $0x1b4] ss:$8 sps:$4 sm:$0xff]  }
  0x84   : > { %3338 = vmatprep.mubr.msk.bf16.mxu0 %vm738_vm8, %v3310_v62  ;;  %v3344_v6 = vrot.slane %v4677_v19, 10  ;;  %v1875_v22 = vrot.slane %v4478_v60, 6  ;;  %v2170_v62 = vshrl.u32 %v4501_v18, 16  ;;  %v2188_v10 = vshrl.u32 %v4507_v0, 16  ;;  %v3844_v55 = vld [vmem:[%s5232_s1 + $0x3e0] ss:$8 sps:$4 sm:$0xff]  }
  0x85   : > { %1801 = vmatmul.mubr.bf16.gmra.mrb[12].mxu0 %v3309_v42  ;;  %v2173_v42 = vshll.u32 %v4501_v18, 16  ;;  %v2191_v60 = vshll.u32 %v4507_v0, 16  ;;  %v3180_v18 = vcombine.high %v4403_v9, %v4412_v15  ;;  %v4722_v44 = vld [vmem:[#allocation2 + $0x60] sm:$0xcc]  ;;  %v3852_v0 = vld [vmem:[%s5232_s1 + $0x3f4] ss:$8 sps:$4 sm:$0xff]   ;;  %v5251_v47 = vcombine.low %v4337_v51, %v4348_v58 }
  0x86   : > { %3403 = vmatprep.mubr.msk.bf16.mxu0 %vm738_vm8, %v3372_v43  ;;  %v3835_v43 = vld [vmem:[%s5232_s1 + $0x190] ss:$8 sps:$4 sm:$0xff]   ;;  %v3373_v31 = vcombine.low %v1864_v11, %v1868_v12  ;;  %v4734_v14 = vsel %vm4520_vm14, %v3343_v30, %v1871_v57  ;;  %v3179_v51 = vcombine.low %v4403_v9, %v4412_v15  ;;  %v1879_v28 = vrot.slane %v4596_v1, 6  ;;  %v3853_v1 = vld [vmem:[%s5232_s1 + $0x1c0] ss:$8 sps:$4 sm:$0xff]  }
  0x87   : > { %v4747_v58 = vld [vmem:[#allocation2 + $0x18] sm:$0x77]  ;;  %v2175_v23 = vrot.slane %v2173_v42, 7  ;;  %v2193_v11 = vrot.slane %v2191_v60, 7  ;;  %v3345_v15 = vrot.slane %v4722_v44, 10  ;;  %v3182_v30 = vcombine.high %v4570_v8, %v4581_v61 }
  0x88   : > { %1025 = vmatmul.mubr.bf16.vlgmr.msra.gmra.mrb[0].mxu1 %v3175_v36  ;;  %v3843_v36 = vld [vmem:[%s5232_s1 + $0x1a4] ss:$8 sps:$4 sm:$0xff]   ;;  %v3850_v12 = vld [vmem:[%s5232_s1 + $0x3f0] ss:$8 sps:$4 sm:$0xff]   ;;  %v1110_v57 = vrot.slane %v4457_v24, 5 }
  0x89   : > { %1310 = vmatpush1.bf16.msra.mxu1 %v3828_v35  ;;  %3208 = vmatprep.mubr.msk.bf16.mxu1 %vm738_vm8, %v3178_v52  ;;  %v4738_v35 = vsel %vm4520_vm14, %v3344_v6, %v1875_v22  ;;  %v4740_v52 = vld [vmem:[#allocation2 + $0x8] sm:$0x77]  ;;  %v3216_v6 = vrot.slane %v4421_v40, 9  ;;  %v1880_v40 = vsel %vm4520_vm14, %v3345_v15, %v1879_v28  ;;  %v3875_v15 = vld [vmem:[%s5232_s1 + $0x1f4] ss:$8 sps:$4 sm:$0xff]  }
  0x8a   : > { %1311 = vmatprep.subr.bf16.mxu1 %v3837_v17  ;;  %v3855_v17 = vld [vmem:[%s5232_s1 + $0x1c4] ss:$8 sps:$4 sm:$0xff]   ;;  %v3376_v9 = vcombine.high %v4734_v14, %v4738_v35 }
  0x8b   : > { %v3858_v22 = vld [vmem:[%s5232_s1 + $0x404] ss:$8 sps:$4 sm:$0xff]  }
  0x8c   : > { %v3921_v25 = vld [vmem:[%s5232_s1 + $0x4c4] ss:$8 sps:$4 sm:$0xff]  }
  0x8d   : > { %2103 = vmatmul.mubr.bf16.vlgmr.msra.gmra.mrb[0].mxu0 %v5250_v5  ;;  %1312 = vmatpush1.bf16.msra.mxu1 %v3835_v43  ;;  %v1883_v43 = vrot.slane %v4604_v49, 6  ;;  %v2182_v49 = vshll.u32 %v4740_v52, 16  ;;  %v3215_v5 = vrot.slane %v4414_v16, 9  ;;  %v3861_v16 = vld [vmem:[%s5232_s1 + $0x1d4] ss:$8 sps:$4 sm:$0xff]  }
  0x8e   : > { %2499 = vmatpush1.bf16.msra.mxu0 %v3831_v59  ;;  %1313 = vmatprep.subr.bf16.mxu1 %v3843_v36  ;;  %v2172_v59 = vrot.slane %v2170_v62, 6  ;;  %v3346_v36 = vrot.slane %v4724_v2, 10 }
  0x8f   : > { %2500 = vmatprep.subr.bf16.mxu0 %v3840_v26  ;;  %3404 = vmatprep.mubr.msk.bf16.mxu0 %vm738_vm8, %v3374_v27  ;;  %v2190_v26 = vrot.slane %v2188_v10, 6  ;;  %v2200_v27 = vshll.u32 %v4747_v58, 16  ;;  %v4787_v60 = vsel %vm4577_vm10, %v3215_v5, %v1110_v57  ;;  %v2209_v57 = vshll.u32 %v4625_v54, 16 }
  0x90   : > { %1035 = vmatmul.mubr.bf16.gmra.mrb[4].mxu1 %v5251_v47  ;;  %v2176_v62 = vor.u32 %v2175_v23, %v2172_v59  ;;  %v1884_v24 = vsel %vm4520_vm14, %v3346_v36, %v1883_v43  ;;  %v3864_v47 = vld [vmem:[%s5232_s1 + $0x414] ss:$8 sps:$4 sm:$0xff]   ;;  %v3867_v59 = vld [vmem:[%s5232_s1 + $0x1e0] ss:$8 sps:$4 sm:$0xff]   ;;  %v3218_v36 = vrot.slane %v4601_v45, 9 }
  0x91   : > { %1314 = vmatpush1.bf16.msra.mxu1 %v3841_v39  ;;  %3209 = vmatprep.mubr.msk.bf16.mxu1 %vm738_vm8, %v3180_v18  ;;  %v2197_v39 = vshrl.u32 %v4747_v58, 16  ;;  %v2194_v42 = vor.u32 %v2193_v11, %v2190_v26  ;;  %v2202_v18 = vrot.slane %v2200_v27, 7  ;;  %v3878_v27 = vld [vmem:[%s5232_s1 + $0x434] ss:$8 sps:$4 sm:$0xff]  }
  0x92   : > { %2501 = vmatpush1.bf16.msra.mxu0 %v3838_v48  ;;  %1315 = vmatprep.subr.bf16.mxu1 %v3849_v53  ;;  %v2179_v48 = vshrl.u32 %v4740_v52, 16  ;;  %v1114_v53 = vrot.slane %v4476_v56, 5  ;;  %v2177_v28 = vrot.slane %v2176_v62, 4  ;;  %v4883_v62 = vld [vmem:[#allocation2 + $0x38] sm:$0x77] }
  0x93   : > { %2502 = vmatprep.subr.bf16.mxu0 %v3846_v46  ;;  %v3375_v46 = vcombine.low %v4734_v14, %v4738_v35  ;;  %v2199_v56 = vrot.slane %v2197_v39, 6  ;;  %v3869_v14 = vld [vmem:[%s5232_s1 + $0x1e4] ss:$8 sps:$4 sm:$0xff]   ;;  %v3378_v35 = vcombine.high %v1880_v40, %v1884_v24  ;;  %v2195_v26 = vrot.slane %v2194_v42, 4  ;;  %v3873_v39 = vld [vmem:[%s5232_s1 + $0x1f0] ss:$8 sps:$4 sm:$0xff]  }
  0x94   : > { %v2181_v10 = vrot.slane %v2179_v48, 6  ;;  %v1122_v48 = vrot.slane %v4598_v33, 5 }
  0x95   : > { %2113 = vmatmul.mubr.bf16.gmra.mrb[4].mxu0 %v3373_v31  ;;  %1316 = vmatpush1.bf16.msra.mxu1 %v3847_v41  ;;  %v2184_v41 = vrot.slane %v2182_v49, 7  ;;  %v2203_v11 = vor.u32 %v2202_v18, %v2199_v56  ;;  %v2233_v18 = vshrl.u32 %v4883_v62, 16 }
  0x96   : > { %2503 = vmatpush1.bf16.msra.mxu0 %v3844_v55  ;;  %1317 = vmatprep.subr.bf16.mxu1 %v3855_v17  ;;  %v3856_v55 = vld [vmem:[%s5232_s1 + $0x400] ss:$8 sps:$4 sm:$0xff]   ;;  %v3181_v17 = vcombine.low %v4570_v8, %v4581_v61  ;;  %v3872_v8 = vld [vmem:[%s5232_s1 + $0x424] ss:$8 sps:$4 sm:$0xff]   ;;  %v4852_v33 = vsel %vm4577_vm10, %v3218_v36, %v1122_v48  ;;  %v2260_v48 = vshrl.u32 %v4677_v19, 16 }
  0x97   : > { %2504 = vmatprep.subr.bf16.mxu0 %v3852_v0  ;;  %3405 = vmatprep.mubr.msk.bf16.mxu0 %vm738_vm8, %v3376_v9  ;;  %v4794_v0 = vsel %vm4577_vm10, %v3216_v6, %v1114_v53  ;;  %v2185_v43 = vor.u32 %v2184_v41, %v2181_v10  ;;  %v1118_v9 = vrot.slane %v4583_v21, 5  ;;  %v3377_v21 = vcombine.low %v1880_v40, %v1884_v24  ;;  %v3889_v53 = vld [vmem:[%s5232_s1 + $0x214] ss:$8 sps:$4 sm:$0xff]   ;;  %v3895_v36 = vld [vmem:[%s5232_s1 + $0x220] ss:$8 sps:$4 sm:$0xff]  }
  0x98   : > { %1045 = vmatmul.mubr.bf16.gmra.mrb[8].mxu1 %v3179_v51  ;;  %v3248_v31 = vcombine.high %v4787_v60, %v4794_v0  ;;  %v3862_v51 = vld [vmem:[%s5232_s1 + $0x410] ss:$8 sps:$4 sm:$0xff]   ;;  %v3247_v61 = vcombine.low %v4787_v60, %v4794_v0  ;;  %v4848_v45 = vsel %vm4818_vm3, %v2195_v26, %v2203_v11  ;;  %v2211_v24 = vrot.slane %v2209_v57, 7  ;;  %v3927_v0 = vld [vmem:[%s5232_s1 + $0x4e4] ss:$8 sps:$4 sm:$0xff]  }
  0x99   : > { %1318 = vmatpush1.bf16.msra.mxu1 %v3853_v1  ;;  %3210 = vmatprep.mubr.msk.bf16.mxu1 %vm738_vm8, %v3182_v30  ;;  %v4844_v49 = vsel %vm4818_vm3, %v2177_v28, %v2185_v43  ;;  %v2206_v30 = vshrl.u32 %v4625_v54, 16  ;;  %v3876_v54 = vld [vmem:[%s5232_s1 + $0x430] ss:$8 sps:$4 sm:$0xff]   ;;  %v2235_v26 = vrot.slane %v2233_v18, 6 }
  0x9a   : > { %2505 = vmatpush1.bf16.msra.mxu0 %v3850_v12  ;;  %1319 = vmatprep.subr.bf16.mxu1 %v3861_v16  ;;  %v3217_v12 = vrot.slane %v4572_v34, 9  ;;  %v3870_v34 = vld [vmem:[%s5232_s1 + $0x420] ss:$8 sps:$4 sm:$0xff]   ;;  %v3432_v6 = vcombine.high %v4844_v49, %v4848_v45  ;;  %v2227_v16 = vshll.u32 %v4631_v38, 16 }
  0x9b   : > { %2506 = vmatprep.subr.bf16.mxu0 %v3858_v22  ;;  %v2224_v22 = vshrl.u32 %v4631_v38, 16  ;;  %v3886_v38 = vld [vmem:[%s5232_s1 + $0x444] ss:$8 sps:$4 sm:$0xff]   ;;  %v2208_v40 = vrot.slane %v2206_v30, 6 }
  0x9c   : > { %v4837_v1 = vsel %vm4577_vm10, %v3217_v12, %v1118_v9  ;;  %v2229_v56 = vrot.slane %v2227_v16, 7  ;;  %v2242_v12 = vshrl.u32 %v4675_v3, 16  ;;  %v2245_v9 = vshll.u32 %v4675_v3, 16  ;;  %v3900_v3 = vld [vmem:[%s5232_s1 + $0x464] ss:$8 sps:$4 sm:$0xff]  }
  0x9d   : > { %2123 = vmatmul.mubr.bf16.gmra.mrb[8].mxu0 %v3375_v46  ;;  %1320 = vmatpush1.bf16.msra.mxu1 %v3859_v50  ;;  %v3250_v5 = vcombine.high %v4837_v1, %v4852_v33  ;;  %v4875_v46 = vld [vmem:[#allocation2 + $0x28] sm:$0x77]  ;;  %v3249_v42 = vcombine.low %v4837_v1, %v4852_v33  ;;  %v2226_v41 = vrot.slane %v2224_v22, 6  ;;  %v2236_v50 = vshll.u32 %v4883_v62, 16 }
  0x9e   : > { %2507 = vmatpush1.bf16.msra.mxu0 %v3856_v55  ;;  %1321 = vmatprep.subr.bf16.mxu1 %v3869_v14  ;;  %v2215_v10 = vshrl.u32 %v4875_v46, 16  ;;  %v2218_v55 = vshll.u32 %v4875_v46, 16  ;;  %v3887_v14 = vld [vmem:[%s5232_s1 + $0x210] ss:$8 sps:$4 sm:$0xff]   ;;  %v2244_v22 = vrot.slane %v2242_v12, 6  ;;  %v2247_v16 = vrot.slane %v2245_v9, 7 }
  0x9f   : > { %2508 = vmatprep.subr.bf16.mxu0 %v3864_v47  ;;  %3406 = vmatprep.mubr.msk.bf16.mxu0 %vm738_vm8, %v3378_v35  ;;  %v3884_v47 = vld [vmem:[%s5232_s1 + $0x440] ss:$8 sps:$4 sm:$0xff]   ;;  %v3892_v35 = vld [vmem:[%s5232_s1 + $0x454] ss:$8 sps:$4 sm:$0xff]   ;;  %v2230_v43 = vor.u32 %v2229_v56, %v2226_v41  ;;  %v2238_v11 = vrot.slane %v2236_v50, 7  ;;  %v2296_v12 = vshrl.u32 %v4724_v2, 16 }
  0xa0   : > { %1055 = vmatmul.mubr.bf16.gmra.mrb[12].mxu1 %v3181_v17  ;;  %v3897_v17 = vld [vmem:[%s5232_s1 + $0x224] ss:$8 sps:$4 sm:$0xff]   ;;  %v2220_v28 = vrot.slane %v2218_v55, 7  ;;  %v3904_v41 = vld [vmem:[%s5232_s1 + $0x470] ss:$8 sps:$4 sm:$0xff]   ;;  %v2248_v50 = vor.u32 %v2247_v16, %v2244_v22  ;;  %v2299_v9 = vshll.u32 %v4724_v2, 16 }
  0xa1   : > { %1322 = vmatpush1.bf16.msra.mxu1 %v3867_v59  ;;  %3275 = vmatprep.mubr.msk.bf16.mxu1 %vm738_vm8, %v3244_v4  ;;  %v3881_v4 = vld [vmem:[%s5232_s1 + $0x200] ss:$8 sps:$4 sm:$0xff]   ;;  %v2217_v59 = vrot.slane %v2215_v10, 6  ;;  %v2231_v30 = vrot.slane %v2230_v43, 4  ;;  %v3906_v10 = vld [vmem:[%s5232_s1 + $0x474] ss:$8 sps:$4 sm:$0xff]  }
  0xa2   : > { %2509 = vmatpush1.bf16.msra.mxu0 %v3862_v51  ;;  %1323 = vmatprep.subr.bf16.mxu1 %v3875_v15  ;;  %v2212_v51 = vor.u32 %v2211_v24, %v2208_v40  ;;  %v3890_v15 = vld [vmem:[%s5232_s1 + $0x450] ss:$8 sps:$4 sm:$0xff]   ;;  %v3909_v55 = vld [vmem:[%s5232_s1 + $0x484] ss:$8 sps:$4 sm:$0xff]   ;;  %v2278_v43 = vshrl.u32 %v4722_v44, 16 }
  0xa3   : > { %2510 = vmatprep.subr.bf16.mxu0 %v3872_v8  ;;  %v4910_v8 = vld [vmem:[#allocation2 + $0x48] sm:$0x77] }
  0xa4   : > { %v2251_v57 = vshrl.u32 %v4910_v8, 16  ;;  %v3933_v1 = vld [vmem:[%s5232_s1 + $0x504] ss:$8 sps:$4 sm:$0xff]  }
  0xa5   : > { %2133 = vmatmul.mubr.bf16.gmra.mrb[12].mxu0 %v3377_v21  ;;  %1324 = vmatpush1.bf16.msra.mxu1 %v3873_v39  ;;  %v3903_v21 = vld [vmem:[%s5232_s1 + $0x234] ss:$8 sps:$4 sm:$0xff]  }
  0xa6   : > { %2511 = vmatpush1.bf16.msra.mxu0 %v3870_v34  ;;  %1325 = vmatprep.subr.bf16.mxu1 %v3883_v32  ;;  %v2263_v34 = vshll.u32 %v4677_v19, 16  ;;  %v4928_v39 = vld [vmem:[#allocation2 + $0x58] sm:$0x77]  ;;  %v2221_v32 = vor.u32 %v2220_v28, %v2217_v59  ;;  %v3898_v19 = vld [vmem:[%s5232_s1 + $0x460] ss:$8 sps:$4 sm:$0xff]  }
  0xa7   : > { %2512 = vmatprep.subr.bf16.mxu0 %v3878_v27  ;;  %3463 = vmatprep.mubr.msk.bf16.mxu0 %vm738_vm8, %v3432_v6  ;;  %v2213_v27 = vrot.slane %v2212_v51, 4  ;;  %v2239_v6 = vor.u32 %v2238_v11, %v2235_v26  ;;  %v2269_v40 = vshrl.u32 %v4928_v39, 16  ;;  %v2272_v24 = vshll.u32 %v4928_v39, 16  ;;  %v3912_v28 = vld [vmem:[%s5232_s1 + $0x494] ss:$8 sps:$4 sm:$0xff]  }
  0xa8   : > { %v2281_v26 = vshll.u32 %v4722_v44, 16  ;;  %v4965_v11 = vld [vmem:[#allocation2 + $0x68] sm:$0x77]  ;;  %v3910_v44 = vld [vmem:[%s5232_s1 + $0x490] ss:$8 sps:$4 sm:$0xff]  }
  0xa9   : > { %1326 = vmatpush1.bf16.msra.mxu1 %v3881_v4  ;;  %v3901_v4 = vld [vmem:[%s5232_s1 + $0x230] ss:$8 sps:$4 sm:$0xff]   ;;  %v4951_v56 = vsel %vm4818_vm3, %v2213_v27, %v2221_v32  ;;  %v4955_v18 = vsel %vm4818_vm3, %v2231_v30, %v2239_v6  ;;  %v2271_v51 = vrot.slane %v2269_v40, 6  ;;  %v2274_v59 = vrot.slane %v2272_v24, 7 }
  0xaa   : > { %2513 = vmatpush1.bf16.msra.mxu0 %v3876_v54  ;;  %1327 = vmatprep.subr.bf16.mxu1 %v3889_v53  ;;  %v2254_v54 = vshll.u32 %v4910_v8, 16  ;;  %v2265_v53 = vrot.slane %v2263_v34, 7  ;;  %v2249_v34 = vrot.slane %v2248_v50, 4  ;;  %v2283_v13 = vrot.slane %v2281_v26, 7  ;;  %v2591_v50 = vld [vmem:[#allocation2 + $0x40] sm:$0x88] }
  0xab   : > { %2514 = vmatprep.subr.bf16.mxu0 %v3886_v38  ;;  %v2262_v38 = vrot.slane %v2260_v48, 6  ;;  %v4976_v48 = vld [vmem:[#allocation2 + $0x78] sm:$0x77]  ;;  %v2287_v7 = vshrl.u32 %v4965_v11, 16  ;;  %v2298_v27 = vrot.slane %v2296_v12, 6  ;;  %v2301_v32 = vrot.slane %v2299_v9, 7 }
  0xac   : > { %v2305_v30 = vshrl.u32 %v4976_v48, 16  ;;  %v3433_v24 = vcombine.low %v4951_v56, %v4955_v18  ;;  %v2636_v26 = vrot.slane %v4928_v39, 7  ;;  %v3922_v12 = vld [vmem:[%s5232_s1 + $0x4d0] ss:$8 sps:$4 sm:$0xff]  }
  0xad   : > { %1328 = vmatpush1.bf16.msra.mxu1 %v3887_v14  ;;  %v3907_v14 = vld [vmem:[%s5232_s1 + $0x480] ss:$8 sps:$4 sm:$0xff]   ;;  %v2588_v9 = vld [vmem:[#allocation2 + $0x10] sm:$0x88] }
  0xae   : > { %2515 = vmatpush1.bf16.msra.mxu0 %v3884_v47  ;;  %1329 = vmatprep.subr.bf16.mxu1 %v3897_v17  ;;  %v2253_v47 = vrot.slane %v2251_v57, 6  ;;  %v2266_v17 = vor.u32 %v2265_v53, %v2262_v38  ;;  %v2308_v57 = vshll.u32 %v4976_v48, 16  ;;  %v2302_v38 = vor.u32 %v2301_v32, %v2298_v27  ;;  %v3937_v27 = vld [vmem:[%s5232_s1 + $0x520] ss:$8 sps:$4 sm:$0xff]   ;;  %v3942_v32 = vld [vmem:[%s5232_s1 + $0x534] ss:$8 sps:$4 sm:$0xff]  }
  0xaf   : > { %2516 = vmatprep.subr.bf16.mxu0 %v3892_v35  ;;  %v2256_v35 = vrot.slane %v2254_v54, 7  ;;  %v2289_v54 = vrot.slane %v2287_v7, 6  ;;  %v2307_v53 = vrot.slane %v2305_v30, 6  ;;  %v3468_v39 = vrot.slane %v2588_v9, 11  ;;  %v3939_v7 = vld [vmem:[%s5232_s1 + $0x524] ss:$8 sps:$4 sm:$0xff]  }
  0xb0   : > { %v2310_v40 = vrot.slane %v2308_v57, 7  ;;  %v2589_v30 = vld [vmem:[#allocation2 + $0x20] sm:$0x88] }
  0xb1   : > { %1330 = vmatpush1.bf16.msra.mxu1 %v3895_v36  ;;  %v3434_v36 = vcombine.high %v4951_v56, %v4955_v18  ;;  %v2257_v2 = vor.u32 %v2256_v35, %v2253_v47  ;;  %v3919_v18 = vld [vmem:[%s5232_s1 + $0x4c0] ss:$8 sps:$4 sm:$0xff]   ;;  %v2592_v47 = vld [vmem:[#allocation2 + $0x50] sm:$0x88] }
  0xb2   : > { %2517 = vmatpush1.bf16.msra.mxu0 %v3890_v15  ;;  %1331 = vmatprep.subr.bf16.mxu1 %v3903_v21  ;;  %v3431_v15 = vcombine.low %v4844_v49, %v4848_v45  ;;  %v2275_v21 = vor.u32 %v2274_v59, %v2271_v51  ;;  %v2280_v49 = vrot.slane %v2278_v43, 6  ;;  %v3915_v45 = vld [vmem:[%s5232_s1 + $0x4a4] ss:$8 sps:$4 sm:$0xff]   ;;  %v2311_v56 = vor.u32 %v2310_v40, %v2307_v53 }
  0xb3   : > { %2518 = vmatprep.subr.bf16.mxu0 %v3900_v3  ;;  %v2267_v3 = vrot.slane %v2266_v17, 4  ;;  %v2258_v6 = vsel %vm4818_vm3, %v2249_v34, %v2257_v2  ;;  %v2587_v51 = vld [vmem:[#allocation2] sm:$0x88]  ;;  %v3471_v59 = vrot.slane %v2591_v50, 11  ;;  %v3472_v43 = vrot.slane %v2592_v47, 11 }
  0xb4   : > { %v2284_v16 = vor.u32 %v2283_v13, %v2280_v49  ;;  %v3936_v49 = vld [vmem:[%s5232_s1 + $0x514] ss:$8 sps:$4 sm:$0xff]   ;;  %v3934_v13 = vld [vmem:[%s5232_s1 + $0x510] ss:$8 sps:$4 sm:$0xff]   ;;  %v2628_v53 = vrot.slane %v4883_v62, 7 }
  0xb5   : > { %1332 = vmatpush1.bf16.msra.mxu1 %v3901_v4  ;;  %v2276_v22 = vsel %vm4818_vm3, %v2267_v3, %v2275_v21  ;;  %v3928_v21 = vld [vmem:[%s5232_s1 + $0x4f0] ss:$8 sps:$4 sm:$0xff]  }
  0xb6   : > { %2519 = vmatpush1.bf16.msra.mxu0 %v3898_v19  ;;  %3555 = vmatprep.subr.bf16.mxu1 %v3909_v55  ;;  %v3913_v19 = vld [vmem:[%s5232_s1 + $0x4a0] ss:$8 sps:$4 sm:$0xff]   ;;  %v2285_v20 = vrot.slane %v2284_v16, 4  ;;  %v3940_v16 = vld [vmem:[%s5232_s1 + $0x530] ss:$8 sps:$4 sm:$0xff]  }
  0xb7   : > { %2520 = vmatprep.subr.bf16.mxu0 %v3906_v10  ;;  %v3916_v10 = vld [vmem:[%s5232_s1 + $0x4b0] ss:$8 sps:$4 sm:$0xff]  }
  0xb8   : > { %1342 = vmatmul.mubr.bf16.vlgmr.msra.gmra.mrb[0].mxu1 %v3243_v63  ;;  %v2290_v63 = vshll.u32 %v4965_v11, 16 }
  0xb9   : > { %3567 = vmatpush1.bf16.msra.mxu1 %v3907_v14  ;;  %3276 = vmatprep.mubr.msk.bf16.mxu1 %vm738_vm8, %v3246_v37  ;;  %v3918_v37 = vld [vmem:[%s5232_s1 + $0x4b4] ss:$8 sps:$4 sm:$0xff]  }
  0xba   : > { %2521 = vmatpush1.bf16.msra.mxu0 %v3904_v41  ;;  %3556 = vmatprep.subr.bf16.mxu1 %v3912_v28  ;;  %v2292_v4 = vrot.slane %v2290_v63, 7  ;;  %v2303_v41 = vrot.slane %v2302_v38, 4  ;;  %v2593_v63 = vld [vmem:[#allocation2 + $0x60] sm:$0x88] }
  0xbb   : > { %2831 = vmatprep.subr.bf16.mxu0 %v3909_v55  ;;  %v3436_v55 = vcombine.high %v2258_v6, %v2276_v22  ;;  %v3473_v57 = vrot.slane %v2593_v63, 11 }
  0xbc   : > { %v2312_v17 = vsel %vm4818_vm3, %v2303_v41, %v2311_v56 }
  0xbd   : > { %2531 = vmatmul.mubr.bf16.vlgmr.msra.gmra.mrb[0].mxu0 %v3431_v15  ;;  %3568 = vmatpush1.bf16.msra.mxu1 %v3910_v44  ;;  %v2620_v15 = vrot.slane %v4747_v58, 7 }
  0xbe   : > { %2832 = vmatpush1.bf16.msra.mxu0 %v3907_v14  ;;  %3464 = vmatprep.mubr.msk.bf16.mxu0 %vm738_vm8, %v3434_v36  ;;  %v3435_v14 = vcombine.low %v2258_v6, %v2276_v22  ;;  %v2644_v6 = vrot.slane %v4976_v48, 7  ;;  %v2590_v22 = vld [vmem:[#allocation2 + $0x30] sm:$0x88] }
  0xbf   : > { %2833 = vmatprep.subr.bf16.mxu0 %v3912_v28  ;;  %3557 = vmatprep.subr.bf16.mxu1 %v3915_v45  ;;  %v2632_v28 = vrot.slane %v4910_v8, 7  ;;  %v2616_v8 = vrot.slane %v4740_v52, 7  ;;  %v3930_v52 = vld [vmem:[%s5232_s1 + $0x4f4] ss:$8 sps:$4 sm:$0xff]   ;;  %v2621_v3 = vsel %vm5039_vm5, %v3468_v39, %v2620_v15  ;;  %v3470_v38 = vrot.slane %v2590_v22, 11 }
  0xc0   : > { %1352 = vmatmul.mubr.bf16.gmra.mrb[4].mxu1 %v3245_v29  ;;  %v2293_v29 = vor.u32 %v2292_v4, %v2289_v54  ;;  %v3469_v54 = vrot.slane %v2589_v30, 11  ;;  %v2624_v4 = vrot.slane %v4875_v46, 7 }
  0xc1   : > { %3569 = vmatpush1.bf16.msra.mxu1 %v3913_v19  ;;  %3277 = vmatprep.mubr.msk.bf16.mxu1 %vm738_vm8, %v3248_v31  ;;  %v3924_v31 = vld [vmem:[%s5232_s1 + $0x4d4] ss:$8 sps:$4 sm:$0xff]   ;;  %v5054_v36 = vsel %vm5039_vm5, %v3471_v59, %v2632_v28 }
  0xc2   : > { %2834 = vmatpush1.bf16.msra.mxu0 %v3910_v44  ;;  %3558 = vmatprep.subr.bf16.mxu1 %v3918_v37  ;;  %v2294_v35 = vsel %vm4818_vm3, %v2285_v20, %v2293_v29  ;;  %v5058_v44 = vsel %vm5039_vm5, %v3472_v43, %v2636_v26  ;;  %v2625_v46 = vsel %vm5039_vm5, %v3469_v54, %v2624_v4 }
  0xc3   : > { %2835 = vmatprep.subr.bf16.mxu0 %v3915_v45  ;;  %v3438_v60 = vcombine.high %v2294_v35, %v2312_v17  ;;  %v3504_v58 = vcombine.high %v5054_v36, %v5058_v44  ;;  %v3437_v34 = vcombine.low %v2294_v35, %v2312_v17  ;;  %v2594_v45 = vld [vmem:[#allocation2 + $0x70] sm:$0x88]  ;;  %v3503_v40 = vcombine.low %v5054_v36, %v5058_v44 }
  0xc5   : > { %2541 = vmatmul.mubr.bf16.gmra.mrb[4].mxu0 %v3433_v24  ;;  %3570 = vmatpush1.bf16.msra.mxu1 %v3916_v10 }
  0xc6   : > { %2836 = vmatpush1.bf16.msra.mxu0 %v3913_v19  ;;  %3465 = vmatprep.mubr.msk.bf16.mxu0 %vm738_vm8, %v3436_v55  ;;  %v2640_v19 = vrot.slane %v4965_v11, 7 }
  0xc7   : > { %2837 = vmatprep.subr.bf16.mxu0 %v3918_v37  ;;  %3559 = vmatprep.subr.bf16.mxu1 %v3921_v25  ;;  %v3474_v37 = vrot.slane %v2594_v45, 11 }
  0xc8   : > { %1362 = vmatmul.mubr.bf16.gmra.mrb[8].mxu1 %v3247_v61  ;;  %v3467_v61 = vrot.slane %v2587_v51, 11  ;;  %v2641_v11 = vsel %vm5039_vm5, %v3473_v57, %v2640_v19 }
  0xc9   : > { %3571 = vmatpush1.bf16.msra.mxu1 %v3919_v18  ;;  %3278 = vmatprep.mubr.msk.bf16.mxu1 %vm738_vm8, %v3250_v5  ;;  %v3925_v5 = vld [vmem:[%s5232_s1 + $0x4e0] ss:$8 sps:$4 sm:$0xff]   ;;  %v2645_v48 = vsel %vm5039_vm5, %v3474_v37, %v2644_v6 }
  0xca   : > { %2838 = vmatpush1.bf16.msra.mxu0 %v3916_v10  ;;  %3560 = vmatprep.subr.bf16.mxu1 %v3924_v31  ;;  %v2617_v2 = vsel %vm5039_vm5, %v3467_v61, %v2616_v8  ;;  %v3506_v24 = vcombine.high %v2641_v11, %v2645_v48  ;;  %v2629_v10 = vsel %vm5039_vm5, %v3470_v38, %v2628_v53 }
  0xcb   : > { %2839 = vmatprep.subr.bf16.mxu0 %v3921_v25  ;;  %v3500_v33 = vcombine.high %v2617_v2, %v2621_v3  ;;  %v3499_v62 = vcombine.low %v2617_v2, %v2621_v3  ;;  %v3502_v55 = vcombine.high %v2625_v46, %v2629_v10  ;;  %v3505_v25 = vcombine.low %v2641_v11, %v2645_v48 }
  0xcc   : > { %v3501_v20 = vcombine.low %v2625_v46, %v2629_v10 }
  0xcd   : > { %2551 = vmatmul.mubr.bf16.gmra.mrb[8].mxu0 %v3435_v14  ;;  %3572 = vmatpush1.bf16.msra.mxu1 %v3922_v12 }
  0xce   : > { %2840 = vmatpush1.bf16.msra.mxu0 %v3919_v18  ;;  %3466 = vmatprep.mubr.msk.bf16.mxu0 %vm738_vm8, %v3438_v60 }
  0xcf   : > { %2841 = vmatprep.subr.bf16.mxu0 %v3924_v31  ;;  %3561 = vmatprep.subr.bf16.mxu1 %v3927_v0 }
  0xd0   : > { %1372 = vmatmul.mubr.bf16.gmra.mrb[12].mxu1 %v3249_v42  ;;  %v3931_v42 = vld [vmem:[%s5232_s1 + $0x500] ss:$8 sps:$4 sm:$0xff]  }
  0xd1   : > { %3573 = vmatpush1.bf16.msra.mxu1 %v3925_v5  ;;  %3533 = vmatprep.mubr.msk.bf16.mxu1 %vm738_vm8, %v3504_v58 }
  0xd2   : > { %2842 = vmatpush1.bf16.msra.mxu0 %v3922_v12  ;;  %3562 = vmatprep.subr.bf16.mxu1 %v3930_v52 }
  0xd3   : > { %2843 = vmatprep.subr.bf16.mxu0 %v3927_v0 }
  0xd5   : > { %2561 = vmatmul.mubr.bf16.gmra.mrb[12].mxu0 %v3437_v34  ;;  %3574 = vmatpush1.bf16.msra.mxu1 %v3928_v21 }
  0xd6   : > { %2844 = vmatpush1.bf16.msra.mxu0 %v3925_v5  ;;  %3563 = vmatprep.subr.bf16.mxu1 %v3933_v1 }
  0xd7   : > { %2845 = vmatprep.subr.bf16.mxu0 %v3930_v52  ;;  %3531 = vmatprep.mubr.msk.bf16.mxu0 %vm738_vm8, %v3500_v33 }
  0xd9   : > { %3575 = vmatpush1.bf16.msra.mxu1 %v3931_v42 }
  0xda   : > { %2846 = vmatpush1.bf16.msra.mxu0 %v3928_v21  ;;  %3564 = vmatprep.subr.bf16.mxu1 %v3936_v49  ;;  %v2922_v21 = vlaneseq }
  0xdb   : > { %2847 = vmatprep.subr.bf16.mxu0 %v3933_v1 }
  0xdc   : > { %v2923_v1 = vshrl.u32 %v2922_v21, 7 }
  0xdd   : > { %3576 = vmatpush1.bf16.msra.mxu1 %v3934_v13 }
  0xde   : > { %2848 = vmatpush1.bf16.msra.mxu0 %v3931_v42  ;;  %3565 = vmatprep.subr.bf16.mxu1 %v3939_v7  ;;  %v2924_v33 = vsub.s32 0, %v2923_v1  ;;  %v2920_v42 = vld [vmem:[%s5233_s2] sm:$0x3] }
  0xdf   : > { %2849 = vmatprep.subr.bf16.mxu0 %v3936_v49  ;;  %v2928_v49 = vsub.s32 1, %v2923_v1 }
  0xe1   : > { %3577 = vmatpush1.bf16.msra.mxu1 %v3937_v27  ;;  %v5145_v45 = vrot.slane %v2920_v42, %v2928_v49 }
  0xe2   : > { %2850 = vmatpush1.bf16.msra.mxu0 %v3934_v13  ;;  %3566 = vmatprep.subr.bf16.mxu1 %v3942_v32  ;;  %v2948_v13 = vld [vmem:[%s5234_s3] sm:$0x3] }
  0xe3   : > { %2851 = vmatprep.subr.bf16.mxu0 %v3939_v7  ;;  %v5143_v7 = vrot.slane %v2920_v42, %v2924_v33  ;;  %v5149_v57 = vrot.slane %v2948_v13, %v2928_v49 }
  0xe5   : > { %3578 = vmatpush1.bf16.msra.mxu1 %v3940_v16 }
  0xe6   : > { %2852 = vmatpush1.bf16.msra.mxu0 %v3937_v27  ;;  %v5147_v27 = vrot.slane %v2948_v13, %v2924_v33 }
  0xe7   : > { %2853 = vmatprep.subr.bf16.mxu0 %v3942_v32 }
  0xe8   : > { %2884 = vmatmul.mubr.bf16.vlgmr.msra.gmra.mrb[16].mxu1 %v3503_v40 }
  0xe9   : > { %3534 = vmatprep.mubr.msk.bf16.mxu1 %vm738_vm8, %v3506_v24 }
  0xea   : > { %2854 = vmatpush1.bf16.msra.mxu0 %v3940_v16 }
  0xed   : > { %2864 = vmatmul.mubr.bf16.vlgmr.msra.gmra.mrb[0].mxu0 %v3499_v62 }
  0xee   : > { %3532 = vmatprep.mubr.msk.bf16.mxu0 %vm738_vm8, %v3502_v55  ;;  %vm5173_vm8 = vmor %vm3041_vm7, %vm3040_vm6 }
  0xf0   : > { %2894 = vmatmul.mubr.bf16.gmra.mrb[20].mxu1 %v3505_v25 }
  0xf5   : > { %2874 = vmatmul.mubr.bf16.gmra.mrb[4].mxu0 %v3501_v20 }
 0x18b   : > { %v1343_v29 = vpop.f32.mrb[0].mxu1 }
 0x18c   : > { %v1345_v41 = vpop.f32.mrb[1].mxu1 }
 0x18d   : > { %v5121_v56 = vpop.f32.mrb[2].mxu1 }
 0x18e   : > { %v5123_v18 = vpop.f32.mrb[3].mxu1 }
 0x193   : > { %v5125_v50 = vpop.f32.mrb[4].mxu1 }
 0x194   : > { %v5127_v47 = vpop.f32.mrb[5].mxu1 }
 0x195   : > { %v5129_v31 = vpop.f32.mrb[6].mxu1 }
 0x196   : > { %v5131_v14 = vpop.f32.mrb[7].mxu1 }
 0x19b   : > { %v1363_v35 = vpop.f32.mrb[8].mxu1 }
 0x19c   : > { %v1365_v17 = vpop.f32.mrb[9].mxu1 }
 0x19d   : > { %v1367_v51 = vpop.f32.mrb[10].mxu1 }
 0x19e   : > { %v1369_v59 = vpop.f32.mrb[11].mxu1 }
 0x1a0   : > { %v2552_v28 = vpop.f32.mrb[8].mxu0 }
 0x1a1   : > { %v3587_v43 = vadd.f32 %v2552_v28, %v1363_v35  ;;  %v2554_v26 = vpop.f32.mrb[9].mxu0 }
 0x1a2   : > { %v3589_v12 = vadd.f32 %v2554_v26, %v1365_v17  ;;  %v2556_v9 = vpop.f32.mrb[10].mxu0 }
 0x1a3   : > { %v3591_v23 = vadd.f32 %v2556_v9, %v1367_v51  ;;  %v2558_v60 = vpop.f32.mrb[11].mxu0  ;;  %v1373_v61 = vpop.f32.mrb[12].mxu1 }
 0x1a4   : > { %v3593_v0 = vadd.f32 %v2558_v60, %v1369_v59  ;;  %v1375_v8 = vpop.f32.mrb[13].mxu1 }
 0x1a5   : > { %v1377_v39 = vpop.f32.mrb[14].mxu1 }
 0x1a6   : > { %v1379_v15 = vpop.f32.mrb[15].mxu1 }
 0x1a8   : > { %v2562_v36 = vpop.f32.mrb[12].mxu0 }
 0x1a9   : > { %v3595_v44 = vadd.f32 %v2562_v36, %v1373_v61  ;;  %v2564_v5 = vpop.f32.mrb[13].mxu0 }
 0x1aa   : > { %v3597_v52 = vadd.f32 %v2564_v5, %v1375_v8  ;;  %v2566_v58 = vpop.f32.mrb[14].mxu0 }
 0x1ab   : > { %v5133_v34 = vadd.f32 %v2566_v58, %v1377_v39  ;;  %v2568_v2 = vpop.f32.mrb[15].mxu0 }
 0x1ac   : > { %v5135_v3 = vadd.f32 %v2568_v2, %v1379_v15 }
 0x1bb   : > { %v2885_v63 = vpop.f32.mrb[16].mxu1 }
 0x1bc   : > { %v3588_v32 = vadd.f32 %v3587_v43, %v2885_v63  ;;  %v2887_v30 = vpop.f32.mrb[17].mxu1 }
 0x1bd   : > { %v3590_v19 = vadd.f32 %v3589_v12, %v2887_v30  ;;  %v2889_v37 = vpop.f32.mrb[18].mxu1 }
 0x1be   : > { %v2940_v6 = vmul.f32 %v3588_v32, %v5143_v7  ;;  %v3592_v22 = vadd.f32 %v3591_v23, %v2889_v37  ;;  %v2891_v16 = vpop.f32.mrb[19].mxu1 }
 0x1bf   : > { %v2941_v4 = vmul.f32 %v3590_v19, %v5145_v45  ;;  %v3594_v38 = vadd.f32 %v3593_v0, %v2891_v16 }
 0x1c0   : > { %v2865_v54 = vpop.f32.mrb[0].mxu0  ;;  %v2968_v11 = vadd.f32 %v5147_v27, %v2940_v6  ;;  %v2942_v40 = vmul.f32 %v3592_v22, %v5143_v7 }
 0x1c1   : > { %v3579_v53 = vadd.f32 %v2865_v54, %v1343_v29  ;;  %v2867_v48 = vpop.f32.mrb[1].mxu0  ;;  %v2969_v46 = vadd.f32 %v5149_v57, %v2941_v4  ;;  %v2943_v62 = vmul.f32 %v3594_v38, %v5145_v45 }
 0x1c2   : > { %v3580_v24 = vadd.f32 %v2867_v48, %v1345_v41  ;;  %v2869_v10 = vpop.f32.mrb[2].mxu0  ;;  %v2984_v25 = vmax.f32 %v2968_v11, 0.0  ;;  %v2970_v29 = vadd.f32 %v5147_v27, %v2942_v40 }
 0x1c3   : > { %v2932_v55 = vmul.f32 %v3579_v53, %v5143_v7  ;;  %v3581_v20 = vadd.f32 %v2869_v10, %v5121_v56  ;;  %v2871_v35 = vpop.f32.mrb[3].mxu0  ;;  %v2985_v51 = vmax.f32 %v2969_v46, 0.0  ;;  %v2971_v59 = vadd.f32 %v5149_v57, %v2943_v62  ;;  %v2895_v28 = vpop.f32.mrb[20].mxu1 }
 0x1c4   : > { %v2933_v17 = vmul.f32 %v3580_v24, %v5145_v45  ;;  %v3582_v41 = vadd.f32 %v2871_v35, %v5123_v18  ;;  %v2986_v26 = vmax.f32 %v2970_v29, 0.0  ;;  %v3596_v12 = vadd.f32 %v3595_v44, %v2895_v28  ;;  %v2897_v9 = vpop.f32.mrb[21].mxu1 }
 0x1c5   : > { %v2960_v43 = vadd.f32 %v5147_v27, %v2932_v55  ;;  %v2934_v18 = vmul.f32 %v3581_v20, %v5143_v7  ;;  %v3551_v60 = vpack.c.bf16 %v2985_v51, %v2984_v25  ;;  %v2987_v61 = vmax.f32 %v2971_v59, 0.0  ;;  %v2899_v8 = vpop.f32.mrb[22].mxu1 }
 0x1c6   : > { %v2961_v23 = vadd.f32 %v5149_v57, %v2933_v17  ;;  %v2935_v0 = vmul.f32 %v3582_v41, %v5145_v45  ;;  %v2944_v36 = vmul.f32 %v3596_v12, %v5143_v7  ;;  %v3598_v5 = vadd.f32 %v3597_v52, %v2897_v9  ;;  %v2901_v58 = vpop.f32.mrb[23].mxu1 }
 0x1c7   : > { %v2976_v39 = vmax.f32 %v2960_v43, 0.0  ;;  %v2962_v15 = vadd.f32 %v5147_v27, %v2934_v18  ;;  %3047 = vst.msk [vmem:[%s5169_s19 + $0x20] sm:$0xff] %vm5173_vm8, %v3551_v60  ;;  %v3552_v21 = vpack.c.bf16 %v2987_v61, %v2986_v26  ;;  %v3600_v33 = vadd.f32 %v5133_v34, %v2899_v8 }
 0x1c8   : > { %v2977_v2 = vmax.f32 %v2961_v23, 0.0  ;;  %v2963_v44 = vadd.f32 %v5149_v57, %v2935_v0  ;;  %v2875_v1 = vpop.f32.mrb[4].mxu0  ;;  %v2972_v13 = vadd.f32 %v5147_v27, %v2944_v36  ;;  %v2945_v52 = vmul.f32 %v3598_v5, %v5145_v45 }
 0x1c9   : > { %v2978_v42 = vmax.f32 %v2962_v15, 0.0  ;;  %v3583_v49 = vadd.f32 %v2875_v1, %v5125_v50  ;;  %v2877_v63 = vpop.f32.mrb[5].mxu0  ;;  %3048 = vst.msk [vmem:[%s5169_s19 + $0x28] sm:$0xff] %vm5173_vm8, %v3552_v21  ;;  %v2946_v34 = vmul.f32 %v3600_v33, %v5143_v7  ;;  %v3602_v24 = vadd.f32 %v5135_v3, %v2901_v58 }
 0x1ca   : > { %v3547_v32 = vpack.c.bf16 %v2977_v2, %v2976_v39  ;;  %v2979_v30 = vmax.f32 %v2963_v44, 0.0  ;;  %v3584_v19 = vadd.f32 %v2877_v63, %v5127_v47  ;;  %v2879_v37 = vpop.f32.mrb[6].mxu0  ;;  %v2988_v22 = vmax.f32 %v2972_v13, 0.0 }
 0x1cb   : > { %v2936_v6 = vmul.f32 %v3583_v49, %v5143_v7  ;;  %v2973_v50 = vadd.f32 %v5149_v57, %v2945_v52  ;;  %v3585_v16 = vadd.f32 %v2879_v37, %v5129_v31  ;;  %v2881_v54 = vpop.f32.mrb[7].mxu0  ;;  %v2974_v47 = vadd.f32 %v5147_v27, %v2946_v34 }
 0x1cc   : > { %3043 = vst.msk [vmem:[%s5169_s19] sm:$0xff] %vm5173_vm8, %v3547_v32  ;;  %v3548_v4 = vpack.c.bf16 %v2979_v30, %v2978_v42  ;;  %v2937_v38 = vmul.f32 %v3584_v19, %v5145_v45  ;;  %v3586_v53 = vadd.f32 %v2881_v54, %v5131_v14  ;;  %v2947_v55 = vmul.f32 %v3602_v24, %v5145_v45 }
 0x1cd   : > { %v2964_v11 = vadd.f32 %v5147_v27, %v2936_v6  ;;  %v2989_v48 = vmax.f32 %v2973_v50, 0.0  ;;  %v2938_v40 = vmul.f32 %v3585_v16, %v5143_v7  ;;  %v2990_v20 = vmax.f32 %v2974_v47, 0.0 }
 0x1ce   : > { %3044 = vst.msk [vmem:[%s5169_s19 + $0x8] sm:$0xff] %vm5173_vm8, %v3548_v4  ;;  %v2965_v31 = vadd.f32 %v5149_v57, %v2937_v38  ;;  %v2939_v46 = vmul.f32 %v3586_v53, %v5145_v45  ;;  %v2975_v29 = vadd.f32 %v5149_v57, %v2947_v55 }
 0x1cf   : > { %v2980_v10 = vmax.f32 %v2964_v11, 0.0  ;;  %v3553_v62 = vpack.c.bf16 %v2989_v48, %v2988_v22  ;;  %v2966_v14 = vadd.f32 %v5147_v27, %v2938_v40 }
 0x1d0   : > { %v2981_v25 = vmax.f32 %v2965_v31, 0.0  ;;  %v2967_v7 = vadd.f32 %v5149_v57, %v2939_v46  ;;  %v2991_v51 = vmax.f32 %v2975_v29, 0.0 }
 0x1d1   : > { %3049 = vst.msk [vmem:[%s5169_s19 + $0x30] sm:$0xff] %vm5173_vm8, %v3553_v62  ;;  %v2982_v3 = vmax.f32 %v2966_v14, 0.0 }
 0x1d2   : > { %v3549_v35 = vpack.c.bf16 %v2981_v25, %v2980_v10  ;;  %v2983_v17 = vmax.f32 %v2967_v7, 0.0  ;;  %v3554_v27 = vpack.c.bf16 %v2991_v51, %v2990_v20 }
 0x1d4   : > { %3045 = vst.msk [vmem:[%s5169_s19 + $0x10] sm:$0xff] %vm5173_vm8, %v3549_v35  ;;  %v3550_v41 = vpack.c.bf16 %v2983_v17, %v2982_v3  ;;  %3050 = vst.msk [vmem:[%s5169_s19 + $0x38] sm:$0xff] %vm5173_vm8, %v3554_v27 }
 0x1d6   : > { %3046 = vst.msk [vmem:[%s5169_s19 + $0x18] sm:$0xff] %vm5173_vm8, %v3550_v41 }
 0x1d7 PF: > { %s14_s15 = sadd.s32 1, %s3949_s15  }
 0x1d8   : > { %p11_p4 = scmp.ge.s32.totalorder %s14_s15, 4  }
 0x1da   :  { %13 = sbr.rel (!%p11_p4) target bundleno = 1 (0x1), region = 72 }

// kernel: _lambda_.11
= control target key start
LH: loop header
LB: loop body
LE: loop exit
PB: predicated region body
PF: predicated region fallthrough
CT: control target
= control target key end

     0   :  { %s3534_s15 = smov 0   ;;  %s4453_s0 = inlined_call_operand.vmem [shape: bf16[2,8,8,224], index: 0, kind: input, shape index: {}]   ;;  %s4454_s1 = inlined_call_operand.vmem [shape: bf16[7,224,224], index: 1, kind: input, shape index: {}]   ;;  %s4455_s2 = inlined_call_operand.vmem [shape: f32[1,224], index: 2, kind: input, shape index: {}]   ;;  %s4456_s3 = inlined_call_operand.vmem [shape: f32[1,224], index: 3, kind: input, shape index: {}]   ;;  %s4457_s4 = inlined_call_operand.vmem [shape: bf16[2,8,8,224], index: 4, kind: output, shape index: {}]  }
   0x1 LB: > { %s2580_s16 = sadd.s32 4294967295, %s3506_s15   ;;  %p2584_p0 = scmp.ge.s32.totalorder %s3506_s15, 1  ;;  %s3506_s15 = sphi %s3534_s15, %s14_s15  }
   0x2   : > { %p162_p1 = scmp.lt.s32.totalorder %s3506_s15, 3 }
   0x4   : > { %p163_p2 = pnand %p2584_p0, %p162_p1 }
   0x5   : > { %v3190_v0 = vld [vmem:[%s4454_s1 + $0xe4] ss:$8 sps:$4 sm:$0xff] (!%p163_p2)   ;;  %v3194_v2 = vld [vmem:[%s4454_s1 + $0xe0] ss:$8 sps:$4 sm:$0xff] (!%p163_p2)   ;;  %v3196_v4 = vld [vmem:[%s4454_s1 + $0xf4] ss:$8 sps:$4 sm:$0xff] (!%p163_p2)  }
   0x6   : > { %166 = sbr.rel (%p163_p2) target bundleno = 467 (0x1d3), region = 36  ;;  %v3192_v1 = vld [vmem:[%s4454_s1 + $0x2a4] ss:$8 sps:$4 sm:$0xff] (!%p163_p2)   ;;  %489 = vmatprep.subr.bf16.mxu1 (!%p163_p2), %v3190_v0  ;;  %v3195_v3 = vld [vmem:[%s4454_s1 + $0x2a0] ss:$8 sps:$4 sm:$0xff] (!%p163_p2)   ;;  %p188_p3 = scmp.lt.s32.totalorder (!%p163_p2), %s2580_s16, 1 }
   0x7   : > { %1363 = vmatprep.subr.bf16.mxu0 (!%p163_p2), %v3192_v1  ;;  %490 = vmatpush1.bf16.msra.mxu1 (!%p163_p2), %v3194_v2  ;;  %v3198_v5 = vld [vmem:[%s4454_s1 + $0x2b4] ss:$8 sps:$4 sm:$0xff] (!%p163_p2)   ;;  %v3200_v6 = vld [vmem:[%s4454_s1 + $0xf0] ss:$8 sps:$4 sm:$0xff] (!%p163_p2)   ;;  %v3202_v8 = vld [vmem:[%s4454_s1 + $0x104] ss:$8 sps:$4 sm:$0xff] (!%p163_p2)  }
   0x8   : > { %1364 = vmatpush1.bf16.msra.mxu0 (!%p163_p2), %v3195_v3  ;;  %491 = vmatprep.subr.bf16.mxu1 (!%p163_p2), %v3196_v4  ;;  %v3201_v7 = vld [vmem:[%s4454_s1 + $0x2b0] ss:$8 sps:$4 sm:$0xff] (!%p163_p2)   ;;  %v3204_v9 = vld [vmem:[%s4454_s1 + $0x2c4] ss:$8 sps:$4 sm:$0xff] (!%p163_p2)   ;;  %v3206_v10 = vld [vmem:[%s4454_s1 + $0x100] ss:$8 sps:$4 sm:$0xff] (!%p163_p2)  }
   0x9   : > { %1365 = vmatprep.subr.bf16.mxu0 (!%p163_p2), %v3198_v5  ;;  %v3207_v11 = vld [vmem:[%s4454_s1 + $0x2c0] ss:$8 sps:$4 sm:$0xff] (!%p163_p2)   ;;  %v3208_v12 = vld [vmem:[%s4454_s1 + $0x114] ss:$8 sps:$4 sm:$0xff] (!%p163_p2)   ;;  %v3212_v14 = vld [vmem:[%s4454_s1 + $0x110] ss:$8 sps:$4 sm:$0xff] (!%p163_p2)  }
   0xa   : > { %v3210_v13 = vld [vmem:[%s4454_s1 + $0x2d4] ss:$8 sps:$4 sm:$0xff] (!%p163_p2)   ;;  %v3213_v15 = vld [vmem:[%s4454_s1 + $0x2d0] ss:$8 sps:$4 sm:$0xff] (!%p163_p2)   ;;  %v3214_v16 = vld [vmem:[%s4454_s1 + $0x124] ss:$8 sps:$4 sm:$0xff] (!%p163_p2)  }
   0xb   : > { %492 = vmatpush1.bf16.msra.mxu1 (!%p163_p2), %v3200_v6  ;;  %v3216_v17 = vld [vmem:[%s4454_s1 + $0x2e4] ss:$8 sps:$4 sm:$0xff] (!%p163_p2)   ;;  %v3218_v18 = vld [vmem:[%s4454_s1 + $0x120] ss:$8 sps:$4 sm:$0xff] (!%p163_p2)   ;;  %v3220_v20 = vld [vmem:[%s4454_s1 + $0x134] ss:$8 sps:$4 sm:$0xff] (!%p163_p2)  }
   0xc   : > { %1366 = vmatpush1.bf16.msra.mxu0 (!%p163_p2), %v3201_v7  ;;  %493 = vmatprep.subr.bf16.mxu1 (!%p163_p2), %v3202_v8  ;;  %v3219_v19 = vld [vmem:[%s4454_s1 + $0x2e0] ss:$8 sps:$4 sm:$0xff] (!%p163_p2)   ;;  %v3222_v21 = vld [vmem:[%s4454_s1 + $0x2f4] ss:$8 sps:$4 sm:$0xff] (!%p163_p2)   ;;  %v3224_v22 = vld [vmem:[%s4454_s1 + $0x130] ss:$8 sps:$4 sm:$0xff] (!%p163_p2)  }
   0xd   : > { %1367 = vmatprep.subr.bf16.mxu0 %v3204_v9  ;;  %v3225_v23 = vld [vmem:[%s4454_s1 + $0x2f0] ss:$8 sps:$4 sm:$0xff]   ;;  %v3226_v24 = vld [vmem:[%s4454_s1 + $0x144] ss:$8 sps:$4 sm:$0xff]   ;;  %v3230_v26 = vld [vmem:[%s4454_s1 + $0x140] ss:$8 sps:$4 sm:$0xff]  }
   0xe   : > { %v3228_v25 = vld [vmem:[%s4454_s1 + $0x304] ss:$8 sps:$4 sm:$0xff]   ;;  %v3231_v27 = vld [vmem:[%s4454_s1 + $0x300] ss:$8 sps:$4 sm:$0xff]   ;;  %v3232_v28 = vld [vmem:[%s4454_s1 + $0x154] ss:$8 sps:$4 sm:$0xff]  }
   0xf   : > { %494 = vmatpush1.bf16.msra.mxu1 %v3206_v10  ;;  %v3234_v29 = vld [vmem:[%s4454_s1 + $0x314] ss:$8 sps:$4 sm:$0xff]   ;;  %v3236_v30 = vld [vmem:[%s4454_s1 + $0x150] ss:$8 sps:$4 sm:$0xff]   ;;  %v3238_v32 = vld [vmem:[%s4454_s1 + $0x164] ss:$8 sps:$4 sm:$0xff]  }
  0x10   : > { %1368 = vmatpush1.bf16.msra.mxu0 %v3207_v11  ;;  %495 = vmatprep.subr.bf16.mxu1 %v3208_v12  ;;  %v3237_v31 = vld [vmem:[%s4454_s1 + $0x310] ss:$8 sps:$4 sm:$0xff]   ;;  %v3240_v33 = vld [vmem:[%s4454_s1 + $0x324] ss:$8 sps:$4 sm:$0xff]   ;;  %s4461_s16 = smov (!%p188_p3, %s2580_s16), 1  ;;  %vm199_vm0 = vcmask 1043456  }
  0x11   : > { %1369 = vmatprep.subr.bf16.mxu0 %v3210_v13  ;;  %v3242_v34 = vld [vmem:[%s4454_s1 + $0x160] ss:$8 sps:$4 sm:$0xff]   ;;  %v3244_v36 = vld [vmem:[%s4454_s1 + $0x174] ss:$8 sps:$4 sm:$0xff]   ;;  %s3047_s21 = sshll.u32 %s4461_s16, 6  ;;  %vm200_vm1 = vcmask 785412  }
  0x12   : > { %v3243_v35 = vld [vmem:[%s4454_s1 + $0x320] ss:$8 sps:$4 sm:$0xff]   ;;  %v3246_v37 = vld [vmem:[%s4454_s1 + $0x334] ss:$8 sps:$4 sm:$0xff]   ;;  %v3248_v38 = vld [vmem:[%s4454_s1 + $0x170] ss:$8 sps:$4 sm:$0xff]   ;;  %s3677_s30 = scalar_lea.vmem %s4453_s0, %s3047_s21  ;;  %s4401_s27 = scalar_lea.vmem %s4457_s4, %s3047_s21 }
  0x13   : > { %496 = vmatpush1.bf16.msra.mxu1 %v3212_v14  ;;  %v3249_v39 = vld [vmem:[%s4454_s1 + $0x330] ss:$8 sps:$4 sm:$0xff]   ;;  %v3250_v40 = vld [vmem:[%s4454_s1 + $0x184] ss:$8 sps:$4 sm:$0xff]   ;;  %vm3682_vm2 = vmor %vm200_vm1, %vm199_vm0  ;;  %v3508_v44 = vmov 0   ;;  %vm476_vm3 = vcmask 785408  }
  0x14   : > { %1370 = vmatpush1.bf16.msra.mxu0 %v3213_v15  ;;  %497 = vmatprep.subr.bf16.mxu1 %v3214_v16  ;;  %v3252_v41 = vld [vmem:[%s4454_s1 + $0x344] ss:$8 sps:$4 sm:$0xff]   ;;  %v3254_v43 = vld [vmem:[%s4454_s1 + $0x180] ss:$8 sps:$4 sm:$0xff]   ;;  %203 = vst.msk [vmem:[#allocation2 + $0x8] sm:$0xff] %vm3682_vm2, %v3508_v44  ;;  %204 = vst.msk [vmem:[#allocation2 + $0x10] sm:$0xff] %vm3682_vm2, %v3508_v44 }
  0x15   : > { %1371 = vmatprep.subr.bf16.mxu0 %v3216_v17  ;;  %202 = vst.msk [vmem:[#allocation2] sm:$0xff] %vm3682_vm2, %v3508_v44  ;;  %206 = vst.msk [vmem:[#allocation2 + $0x58] sm:$0xff] %vm3682_vm2, %v3508_v44  ;;  %v209_v45 = vld [vmem:[%s3677_s30] sm:$0xff]  ;;  %v210_v46 = vld [vmem:[%s3677_s30 + $0x8] sm:$0xff] }
  0x16   : > { %207 = vst.msk [vmem:[#allocation2 + $0x60] sm:$0xff] %vm3682_vm2, %v3508_v44  ;;  %208 = vst.msk [vmem:[#allocation2 + $0x68] sm:$0xff] %vm3682_vm2, %v3508_v44  ;;  %v3255_v47 = vld [vmem:[%s4454_s1 + $0x340] ss:$8 sps:$4 sm:$0xff]   ;;  %v3256_v48 = vld [vmem:[%s4454_s1 + $0x194] ss:$8 sps:$4 sm:$0xff]  }
  0x17   : > { %498 = vmatpush1.bf16.msra.mxu1 %v3218_v18  ;;  %218 = vst.msk [vmem:[#allocation2 + $0x18] sm:$0xff] %vm3682_vm2, %v209_v45  ;;  %219 = vst.msk [vmem:[#allocation2 + $0x20] sm:$0xff] %vm3682_vm2, %v210_v46  ;;  %v3258_v49 = vld [vmem:[%s4454_s1 + $0x354] ss:$8 sps:$4 sm:$0xff]   ;;  %v3260_v50 = vld [vmem:[%s4454_s1 + $0x190] ss:$8 sps:$4 sm:$0xff]  }
  0x18   : > { %1372 = vmatpush1.bf16.msra.mxu0 %v3219_v19  ;;  %499 = vmatprep.subr.bf16.mxu1 %v3220_v20  ;;  %v3261_v51 = vld [vmem:[%s4454_s1 + $0x350] ss:$8 sps:$4 sm:$0xff]   ;;  %v3262_v52 = vld [vmem:[%s4454_s1 + $0x1a4] ss:$8 sps:$4 sm:$0xff]   ;;  %v3266_v56 = vld [vmem:[%s4454_s1 + $0x1a0] ss:$8 sps:$4 sm:$0xff]  }
  0x19   : > { %1373 = vmatprep.subr.bf16.mxu0 %v3222_v21  ;;  %v3264_v53 = vld [vmem:[%s4454_s1 + $0x364] ss:$8 sps:$4 sm:$0xff]   ;;  %v3267_v60 = vld [vmem:[%s4454_s1 + $0x360] ss:$8 sps:$4 sm:$0xff]   ;;  %v3268_v61 = vld [vmem:[%s4454_s1 + $0x1b4] ss:$8 sps:$4 sm:$0xff]  }
  0x1a   : > { %v3270_v0 = vld [vmem:[%s4454_s1 + $0x374] ss:$8 sps:$4 sm:$0xff]   ;;  %v3272_v2 = vld [vmem:[%s4454_s1 + $0x1b0] ss:$8 sps:$4 sm:$0xff]   ;;  %v3278_v4 = vld [vmem:[%s4454_s1 + $0x4] ss:$8 sps:$4 sm:$0xff]  }
  0x1b   : > { %500 = vmatpush1.bf16.msra.mxu1 %v3224_v22  ;;  %v3728_v54 = vld [vmem:[#allocation2 + $0x8] sm:$0xff]  ;;  %v264_v55 = vld [vmem:[#allocation2 + $0x10] sm:$0xff]  ;;  %v212_v17 = vld [vmem:[%s3677_s30 + $0x18] sm:$0xff] }
  0x1c   : > { %1374 = vmatpush1.bf16.msra.mxu0 %v3225_v23  ;;  %501 = vmatprep.subr.bf16.mxu1 %v3226_v24  ;;  %v2618_v57 = vcombine.high %v3728_v54, %v264_v55  ;;  %v3273_v3 = vld [vmem:[%s4454_s1 + $0x370] ss:$8 sps:$4 sm:$0xff]   ;;  %v3283_v5 = vld [vmem:[%s4454_s1 + $0x384] ss:$8 sps:$4 sm:$0xff]   ;;  %v2617_v6 = vcombine.low %v3728_v54, %v264_v55  ;;  %v3276_v7 = vld [vmem:[%s4454_s1] ss:$8 sps:$4 sm:$0xff]  }
  0x1d   : > { %1375 = vmatprep.subr.bf16.mxu0 %v3228_v25  ;;  %v3281_v9 = vld [vmem:[%s4454_s1 + $0x380] ss:$8 sps:$4 sm:$0xff]   ;;  %v3286_v10 = vld [vmem:[%s4454_s1 + $0x14] ss:$8 sps:$4 sm:$0xff]   ;;  %v3284_v12 = vld [vmem:[%s4454_s1 + $0x10] ss:$8 sps:$4 sm:$0xff]  }
  0x1e   : > { %v1138_v58 = vld [vmem:[#allocation2 + $0x18] sm:$0xff]  ;;  %v3734_v59 = vld [vmem:[#allocation2 + $0x20] sm:$0xff]  ;;  %2653 = vmatprep.mubr.msk.bf16.mxu1 %vm476_vm3, %v2618_v57  ;;  %v211_v16 = vld [vmem:[%s3677_s30 + $0x10] sm:$0xff]  ;;  %221 = vst.msk [vmem:[#allocation2 + $0x30] sm:$0xff] %vm3682_vm2, %v212_v17 }
  0x1f   : > { %502 = vmatpush1.bf16.msra.mxu1 %v3230_v26  ;;  %v2794_v62 = vcombine.high %v1138_v58, %v3734_v59  ;;  %v3743_v63 = vcombine.high %v264_v55, %v1138_v58  ;;  %v3748_v1 = vcombine.low %v264_v55, %v1138_v58  ;;  %v2793_v8 = vcombine.low %v1138_v58, %v3734_v59  ;;  %v3289_v11 = vld [vmem:[%s4454_s1 + $0x394] ss:$8 sps:$4 sm:$0xff]   ;;  %v3287_v13 = vld [vmem:[%s4454_s1 + $0x390] ss:$8 sps:$4 sm:$0xff]   ;;  %v3292_v14 = vld [vmem:[%s4454_s1 + $0x24] ss:$8 sps:$4 sm:$0xff]  }
  0x20   : > { %1376 = vmatpush1.bf16.msra.mxu0 %v3231_v27  ;;  %503 = vmatprep.subr.bf16.mxu1 %v3232_v28  ;;  %v3295_v15 = vld [vmem:[%s4454_s1 + $0x3a4] ss:$8 sps:$4 sm:$0xff]   ;;  %v3290_v18 = vld [vmem:[%s4454_s1 + $0x20] ss:$8 sps:$4 sm:$0xff]   ;;  %220 = vst.msk [vmem:[#allocation2 + $0x28] sm:$0xff] %vm3682_vm2, %v211_v16 }
  0x21   : > { %1377 = vmatprep.subr.bf16.mxu0 %v3234_v29  ;;  %2829 = vmatprep.mubr.msk.bf16.mxu0 %vm476_vm3, %v2794_v62  ;;  %v3293_v19 = vld [vmem:[%s4454_s1 + $0x3a0] ss:$8 sps:$4 sm:$0xff]   ;;  %v3298_v20 = vld [vmem:[%s4454_s1 + $0x34] ss:$8 sps:$4 sm:$0xff]   ;;  %v3296_v22 = vld [vmem:[%s4454_s1 + $0x30] ss:$8 sps:$4 sm:$0xff]  }
  0x22   : > { %v3301_v21 = vld [vmem:[%s4454_s1 + $0x3b4] ss:$8 sps:$4 sm:$0xff]   ;;  %v3299_v23 = vld [vmem:[%s4454_s1 + $0x3b0] ss:$8 sps:$4 sm:$0xff]   ;;  %v3304_v24 = vld [vmem:[%s4454_s1 + $0x44] ss:$8 sps:$4 sm:$0xff]  }
  0x23   : > { %504 = vmatpush1.bf16.msra.mxu1 %v3236_v30  ;;  %v213_v25 = vld [vmem:[%s3677_s30 + $0x20] sm:$0xff]  ;;  %v214_v26 = vld [vmem:[%s3677_s30 + $0x28] sm:$0xff]  ;;  %v3323_v55 = vld [vmem:[%s4454_s1 + $0x3f0] ss:$8 sps:$4 sm:$0xff]  }
  0x24   : > { %1378 = vmatpush1.bf16.msra.mxu0 %v3237_v31  ;;  %505 = vmatprep.subr.bf16.mxu1 %v3238_v32  ;;  %v3307_v27 = vld [vmem:[%s4454_s1 + $0x3c4] ss:$8 sps:$4 sm:$0xff]   ;;  %222 = vst.msk [vmem:[#allocation2 + $0x38] sm:$0xff] %vm3682_vm2, %v213_v25  ;;  %223 = vst.msk [vmem:[#allocation2 + $0x40] sm:$0xff] %vm3682_vm2, %v214_v26  ;;  %v3302_v30 = vld [vmem:[%s4454_s1 + $0x40] ss:$8 sps:$4 sm:$0xff]  }
  0x25   : > { %1379 = vmatprep.subr.bf16.mxu0 %v3240_v33  ;;  %v3829_v29 = vld [vmem:[#allocation2 + $0x30] sm:$0xff]  ;;  %v3305_v33 = vld [vmem:[%s4454_s1 + $0x3c0] ss:$8 sps:$4 sm:$0xff]   ;;  %v3319_v44 = vld [vmem:[%s4454_s1 + $0x3e4] ss:$8 sps:$4 sm:$0xff]  }
  0x26   : > { %v3314_v46 = vld [vmem:[%s4454_s1 + $0x60] ss:$8 sps:$4 sm:$0xff]   ;;  %v3328_v58 = vld [vmem:[%s4454_s1 + $0x84] ss:$8 sps:$4 sm:$0xff]  }
  0x27   : > { %506 = vmatpush1.bf16.msra.mxu1 %v3242_v34  ;;  %v3827_v28 = vld [vmem:[#allocation2 + $0x28] sm:$0xff]  ;;  %v3310_v34 = vld [vmem:[%s4454_s1 + $0x54] ss:$8 sps:$4 sm:$0xff]  }
  0x28   : > { %1380 = vmatpush1.bf16.msra.mxu0 %v3243_v35  ;;  %507 = vmatprep.subr.bf16.mxu1 %v3244_v36  ;;  %v3836_v31 = vcombine.high %v3827_v28, %v3829_v29  ;;  %v3840_v32 = vcombine.low %v3827_v28, %v3829_v29  ;;  %v3313_v35 = vld [vmem:[%s4454_s1 + $0x3d4] ss:$8 sps:$4 sm:$0xff]   ;;  %v3308_v36 = vld [vmem:[%s4454_s1 + $0x50] ss:$8 sps:$4 sm:$0xff]   ;;  %v3356_v16 = vld [vmem:[%s4454_s1 + $0xc4] ss:$8 sps:$4 sm:$0xff]  }
  0x29   : > { %1381 = vmatprep.subr.bf16.mxu0 %v3246_v37  ;;  %v3311_v37 = vld [vmem:[%s4454_s1 + $0x3d0] ss:$8 sps:$4 sm:$0xff]   ;;  %v3360_v17 = vld [vmem:[%s4454_s1 + $0x444] ss:$8 sps:$4 sm:$0xff]  }
  0x2a   : > { %v3373_v25 = vld [vmem:[%s4454_s1 + $0x464] ss:$8 sps:$4 sm:$0xff]  }
  0x2b   : > { %508 = vmatpush1.bf16.msra.mxu1 %v3248_v38  ;;  %v215_v38 = vld [vmem:[%s3677_s30 + $0x30] sm:$0xff] }
  0x2c   : > { %1382 = vmatpush1.bf16.msra.mxu0 %v3249_v39  ;;  %509 = vmatprep.subr.bf16.mxu1 %v3250_v40  ;;  %v216_v39 = vld [vmem:[%s3677_s30 + $0x38] sm:$0xff]  ;;  %224 = vst.msk [vmem:[#allocation2 + $0x48] sm:$0xff] %vm3682_vm2, %v215_v38  ;;  %v3380_v38 = vld [vmem:[%s4454_s1 + $0x1e0] ss:$8 sps:$4 sm:$0xff]  }
  0x2d   : > { %1383 = vmatprep.subr.bf16.mxu0 %v3252_v41  ;;  %v3865_v40 = vld [vmem:[#allocation2 + $0x38] sm:$0xff]  ;;  %v3867_v41 = vld [vmem:[#allocation2 + $0x40] sm:$0xff]  ;;  %225 = vst.msk [vmem:[#allocation2 + $0x50] sm:$0xff] %vm3682_vm2, %v216_v39 }
  0x2e   : > { %v3881_v45 = vcombine.high %v3865_v40, %v3867_v41  ;;  %v4059_v39 = vcombine.low %v3829_v29, %v3865_v40 }
  0x2f   : > { %510 = vmatpush1.bf16.msra.mxu1 %v3254_v43  ;;  %v3316_v43 = vld [vmem:[%s4454_s1 + $0x64] ss:$8 sps:$4 sm:$0xff]  }
  0x30   : > { %1384 = vmatpush1.bf16.msra.mxu0 %v3255_v47  ;;  %511 = vmatprep.subr.bf16.mxu1 %v3256_v48  ;;  %v3890_v47 = vcombine.low %v3865_v40, %v3867_v41  ;;  %v3317_v48 = vld [vmem:[%s4454_s1 + $0x3e0] ss:$8 sps:$4 sm:$0xff]  }
  0x31   : > { %1385 = vmatprep.subr.bf16.mxu0 %v3258_v49  ;;  %v3897_v49 = vld [vmem:[#allocation2] sm:$0xff] }
  0x32   : > { %v2657_v26 = vcombine.low %v3897_v49, %v3728_v54 }
  0x33   : > { %512 = vmatpush1.bf16.msra.mxu1 %v3260_v50  ;;  %v3322_v50 = vld [vmem:[%s4454_s1 + $0x74] ss:$8 sps:$4 sm:$0xff]  }
  0x34   : > { %1386 = vmatpush1.bf16.msra.mxu0 %v3261_v51  ;;  %513 = vmatprep.subr.bf16.mxu1 %v3262_v52  ;;  %v3325_v51 = vld [vmem:[%s4454_s1 + $0x3f4] ss:$8 sps:$4 sm:$0xff]   ;;  %v3320_v52 = vld [vmem:[%s4454_s1 + $0x70] ss:$8 sps:$4 sm:$0xff]  }
  0x35   : > { %1387 = vmatprep.subr.bf16.mxu0 %v3264_v53  ;;  %v2658_v53 = vcombine.high %v3897_v49, %v3728_v54  ;;  %v3916_v57 = vld [vmem:[#allocation2 + $0x50] sm:$0xff]  ;;  %v3394_v49 = vld [vmem:[%s4454_s1 + $0x204] ss:$8 sps:$4 sm:$0xff]  }
  0x36   : > { %v3376_v54 = vld [vmem:[%s4454_s1 + $0x1d4] ss:$8 sps:$4 sm:$0xff]  }
  0x37   : > { %514 = vmatpush1.bf16.msra.mxu1 %v3266_v56  ;;  %v3914_v56 = vld [vmem:[#allocation2 + $0x48] sm:$0xff] }
  0x38   : > { %1388 = vmatpush1.bf16.msra.mxu0 %v3267_v60  ;;  %515 = vmatprep.subr.bf16.mxu1 %v3268_v61  ;;  %v3924_v60 = vcombine.high %v3914_v56, %v3916_v57  ;;  %v3332_v61 = vld [vmem:[%s4454_s1 + $0x404] ss:$8 sps:$4 sm:$0xff]  }
  0x39   : > { %1389 = vmatprep.subr.bf16.mxu0 %v3270_v0  ;;  %v3330_v0 = vld [vmem:[%s4454_s1 + $0x400] ss:$8 sps:$4 sm:$0xff]  }
  0x3b   : > { %516 = vmatpush1.bf16.msra.mxu1 %v3272_v2  ;;  %v3940_v2 = vcombine.low %v3914_v56, %v3916_v57 }
  0x3c   : > { %1390 = vmatpush1.bf16.msra.mxu0 %v3273_v3  ;;  %750 = vmatprep.subr.bf16.mxu1 %v3278_v4  ;;  %v3336_v3 = vld [vmem:[%s4454_s1 + $0x94] ss:$8 sps:$4 sm:$0xff]  }
  0x3d   : > { %1678 = vmatprep.subr.bf16.mxu0 %v3283_v5  ;;  %v3339_v4 = vld [vmem:[%s4454_s1 + $0x414] ss:$8 sps:$4 sm:$0xff]   ;;  %v3950_v5 = vcombine.high %v3734_v59, %v3827_v28 }
  0x3e   : > { %522 = vmatmul.mubr.bf16.vlgmr.msra.gmra.mrb[0].mxu1 %v2617_v6  ;;  %v3334_v6 = vld [vmem:[%s4454_s1 + $0x90] ss:$8 sps:$4 sm:$0xff]  }
  0x3f   : > { %1396 = vmatmul.mubr.bf16.vlgmr.msra.gmra.mrb[0].mxu0 %v2793_v8  ;;  %751 = vmatpush1.bf16.msra.mxu1 %v3276_v7  ;;  %v3337_v7 = vld [vmem:[%s4454_s1 + $0x410] ss:$8 sps:$4 sm:$0xff]  }
  0x40   : > { %1679 = vmatpush1.bf16.msra.mxu0 %v3281_v9  ;;  %752 = vmatprep.subr.bf16.mxu1 %v3286_v10  ;;  %v3346_v9 = vld [vmem:[%s4454_s1 + $0x424] ss:$8 sps:$4 sm:$0xff]   ;;  %v3340_v10 = vld [vmem:[%s4454_s1 + $0xa0] ss:$8 sps:$4 sm:$0xff]  }
  0x41   : > { %1680 = vmatprep.subr.bf16.mxu0 %v3289_v11  ;;  %2654 = vmatprep.mubr.msk.bf16.mxu1 %vm476_vm3, %v2794_v62  ;;  %v3326_v62 = vld [vmem:[%s4454_s1 + $0x80] ss:$8 sps:$4 sm:$0xff]  }
  0x42   : > { %2830 = vmatprep.mubr.msk.bf16.mxu0 %vm476_vm3, %v3836_v31  ;;  %v3344_v11 = vld [vmem:[%s4454_s1 + $0x420] ss:$8 sps:$4 sm:$0xff]  }
  0x43   : > { %753 = vmatpush1.bf16.msra.mxu1 %v3284_v12  ;;  %v3350_v12 = vld [vmem:[%s4454_s1 + $0xb4] ss:$8 sps:$4 sm:$0xff]  }
  0x44   : > { %1681 = vmatpush1.bf16.msra.mxu0 %v3287_v13  ;;  %754 = vmatprep.subr.bf16.mxu1 %v3292_v14  ;;  %v3353_v13 = vld [vmem:[%s4454_s1 + $0x434] ss:$8 sps:$4 sm:$0xff]   ;;  %v3348_v14 = vld [vmem:[%s4454_s1 + $0xb0] ss:$8 sps:$4 sm:$0xff]  }
  0x45   : > { %1682 = vmatprep.subr.bf16.mxu0 %v3295_v15  ;;  %v3351_v15 = vld [vmem:[%s4454_s1 + $0x430] ss:$8 sps:$4 sm:$0xff]  }
  0x46   : > { %532 = vmatmul.mubr.bf16.gmra.mrb[4].mxu1 %v2793_v8  ;;  %v3342_v8 = vld [vmem:[%s4454_s1 + $0xa4] ss:$8 sps:$4 sm:$0xff]  }
  0x47   : > { %755 = vmatpush1.bf16.msra.mxu1 %v3290_v18  ;;  %2655 = vmatprep.mubr.msk.bf16.mxu1 %vm476_vm3, %v3836_v31  ;;  %v3354_v18 = vld [vmem:[%s4454_s1 + $0xc0] ss:$8 sps:$4 sm:$0xff]  }
  0x48   : > { %1683 = vmatpush1.bf16.msra.mxu0 %v3293_v19  ;;  %756 = vmatprep.subr.bf16.mxu1 %v3298_v20  ;;  %v3358_v19 = vld [vmem:[%s4454_s1 + $0x440] ss:$8 sps:$4 sm:$0xff]   ;;  %v3364_v20 = vld [vmem:[%s4454_s1 + $0xd4] ss:$8 sps:$4 sm:$0xff]  }
  0x49   : > { %1684 = vmatprep.subr.bf16.mxu0 %v3301_v21  ;;  %1406 = vmatmul.mubr.bf16.gmra.mrb[4].mxu0 %v3840_v32  ;;  %v3367_v21 = vld [vmem:[%s4454_s1 + $0x454] ss:$8 sps:$4 sm:$0xff]  }
  0x4a   : > { %2831 = vmatprep.mubr.msk.bf16.mxu0 %vm476_vm3, %v3881_v45 }
  0x4b   : > { %757 = vmatpush1.bf16.msra.mxu1 %v3296_v22  ;;  %v3362_v22 = vld [vmem:[%s4454_s1 + $0xd0] ss:$8 sps:$4 sm:$0xff]  }
  0x4c   : > { %1685 = vmatpush1.bf16.msra.mxu0 %v3299_v23  ;;  %758 = vmatprep.subr.bf16.mxu1 %v3304_v24  ;;  %v3365_v23 = vld [vmem:[%s4454_s1 + $0x450] ss:$8 sps:$4 sm:$0xff]   ;;  %v3370_v24 = vld [vmem:[%s4454_s1 + $0x1c4] ss:$8 sps:$4 sm:$0xff]  }
  0x4d   : > { %1686 = vmatprep.subr.bf16.mxu0 %v3307_v27  ;;  %v3368_v27 = vld [vmem:[%s4454_s1 + $0x1c0] ss:$8 sps:$4 sm:$0xff]  }
  0x4e   : > { %542 = vmatmul.mubr.bf16.gmra.mrb[8].mxu1 %v3840_v32 }
  0x4f   : > { %759 = vmatpush1.bf16.msra.mxu1 %v3302_v30  ;;  %2656 = vmatprep.mubr.msk.bf16.mxu1 %vm476_vm3, %v3881_v45  ;;  %v4022_v30 = vcombine.low %v3734_v59, %v3827_v28  ;;  %v4035_v59 = vcombine.high %v3829_v29, %v3865_v40  ;;  %v3374_v28 = vld [vmem:[%s4454_s1 + $0x1d0] ss:$8 sps:$4 sm:$0xff]   ;;  %v4072_v29 = vcombine.high %v3867_v41, %v3914_v56 }
  0x50   : > { %1687 = vmatpush1.bf16.msra.mxu0 %v3305_v33  ;;  %760 = vmatprep.subr.bf16.mxu1 %v3310_v34  ;;  %v3371_v33 = vld [vmem:[%s4454_s1 + $0x460] ss:$8 sps:$4 sm:$0xff]   ;;  %v3379_v34 = vld [vmem:[%s4454_s1 + $0x474] ss:$8 sps:$4 sm:$0xff]   ;;  %v3386_v40 = vld [vmem:[%s4454_s1 + $0x1f0] ss:$8 sps:$4 sm:$0xff]  }
  0x51   : > { %1688 = vmatprep.subr.bf16.mxu0 %v3313_v35  ;;  %1416 = vmatmul.mubr.bf16.gmra.mrb[8].mxu0 %v3890_v47  ;;  %v3377_v35 = vld [vmem:[%s4454_s1 + $0x470] ss:$8 sps:$4 sm:$0xff]  }
  0x52   : > { %2832 = vmatprep.mubr.msk.bf16.mxu0 %vm476_vm3, %v3924_v60 }
  0x53   : > { %761 = vmatpush1.bf16.msra.mxu1 %v3308_v36  ;;  %v3382_v36 = vld [vmem:[%s4454_s1 + $0x1e4] ss:$8 sps:$4 sm:$0xff]  }
  0x54   : > { %1689 = vmatpush1.bf16.msra.mxu0 %v3311_v37  ;;  %762 = vmatprep.subr.bf16.mxu1 %v3316_v43  ;;  %v3385_v37 = vld [vmem:[%s4454_s1 + $0x484] ss:$8 sps:$4 sm:$0xff]   ;;  %v3383_v43 = vld [vmem:[%s4454_s1 + $0x480] ss:$8 sps:$4 sm:$0xff]  }
  0x55   : > { %1690 = vmatprep.subr.bf16.mxu0 %v3319_v44  ;;  %v3388_v44 = vld [vmem:[%s4454_s1 + $0x1f4] ss:$8 sps:$4 sm:$0xff]  }
  0x56   : > { %552 = vmatmul.mubr.bf16.gmra.mrb[12].mxu1 %v3890_v47 }
  0x57   : > { %763 = vmatpush1.bf16.msra.mxu1 %v3314_v46  ;;  %2693 = vmatprep.mubr.msk.bf16.mxu1 %vm476_vm3, %v2658_v53  ;;  %v3391_v46 = vld [vmem:[%s4454_s1 + $0x494] ss:$8 sps:$4 sm:$0xff]   ;;  %v3392_v53 = vld [vmem:[%s4454_s1 + $0x200] ss:$8 sps:$4 sm:$0xff]  }
  0x58   : > { %1691 = vmatpush1.bf16.msra.mxu0 %v3317_v48  ;;  %764 = vmatprep.subr.bf16.mxu1 %v3322_v50  ;;  %v3389_v48 = vld [vmem:[%s4454_s1 + $0x490] ss:$8 sps:$4 sm:$0xff]   ;;  %v3397_v50 = vld [vmem:[%s4454_s1 + $0x4a4] ss:$8 sps:$4 sm:$0xff]  }
  0x59   : > { %1692 = vmatprep.subr.bf16.mxu0 %v3325_v51  ;;  %1426 = vmatmul.mubr.bf16.gmra.mrb[12].mxu0 %v3940_v2  ;;  %v4094_v51 = vcombine.low %v3867_v41, %v3914_v56  ;;  %v3403_v41 = vld [vmem:[%s4454_s1 + $0x4b4] ss:$8 sps:$4 sm:$0xff]  }
  0x5a   : > { %2897 = vmatprep.mubr.msk.bf16.mxu0 %vm476_vm3, %v3950_v5 }
  0x5b   : > { %765 = vmatpush1.bf16.msra.mxu1 %v3320_v52  ;;  %v4096_v52 = vld [vmem:[#allocation2 + $0x58] sm:$0xff] }
  0x5c   : > { %1693 = vmatpush1.bf16.msra.mxu0 %v3323_v55  ;;  %766 = vmatprep.subr.bf16.mxu1 %v3328_v58  ;;  %v3395_v55 = vld [vmem:[%s4454_s1 + $0x4a0] ss:$8 sps:$4 sm:$0xff]   ;;  %v3400_v58 = vld [vmem:[%s4454_s1 + $0x214] ss:$8 sps:$4 sm:$0xff]   ;;  %v4112_v56 = vcombine.high %v3916_v57, %v4096_v52 }
  0x5d   : > { %1694 = vmatprep.subr.bf16.mxu0 %v3332_v61  ;;  %v3398_v61 = vld [vmem:[%s4454_s1 + $0x210] ss:$8 sps:$4 sm:$0xff]  }
  0x5f   : > { %767 = vmatpush1.bf16.msra.mxu1 %v3326_v62  ;;  %v3401_v62 = vld [vmem:[%s4454_s1 + $0x4b0] ss:$8 sps:$4 sm:$0xff]  }
  0x60   : > { %1695 = vmatpush1.bf16.msra.mxu0 %v3330_v0  ;;  %768 = vmatprep.subr.bf16.mxu1 %v3336_v3  ;;  %v3406_v0 = vld [vmem:[%s4454_s1 + $0x224] ss:$8 sps:$4 sm:$0xff]  }
  0x61   : > { %1696 = vmatprep.subr.bf16.mxu0 %v3339_v4  ;;  %v3409_v3 = vld [vmem:[%s4454_s1 + $0x4c4] ss:$8 sps:$4 sm:$0xff]   ;;  %v4134_v4 = vcombine.low %v3916_v57, %v4096_v52  ;;  %v3415_v57 = vld [vmem:[%s4454_s1 + $0x4d4] ss:$8 sps:$4 sm:$0xff]  }
  0x63   : > { %769 = vmatpush1.bf16.msra.mxu1 %v3334_v6  ;;  %v3404_v6 = vld [vmem:[%s4454_s1 + $0x220] ss:$8 sps:$4 sm:$0xff]  }
  0x64   : > { %1697 = vmatpush1.bf16.msra.mxu0 %v3337_v7  ;;  %770 = vmatprep.subr.bf16.mxu1 %v3342_v8  ;;  %v3407_v7 = vld [vmem:[%s4454_s1 + $0x4c0] ss:$8 sps:$4 sm:$0xff]   ;;  %v3412_v8 = vld [vmem:[%s4454_s1 + $0x234] ss:$8 sps:$4 sm:$0xff]  }
  0x65   : > { %1698 = vmatprep.subr.bf16.mxu0 %v3346_v9  ;;  %v3410_v9 = vld [vmem:[%s4454_s1 + $0x230] ss:$8 sps:$4 sm:$0xff]  }
  0x67   : > { %771 = vmatpush1.bf16.msra.mxu1 %v3340_v10  ;;  %v3413_v10 = vld [vmem:[%s4454_s1 + $0x4d0] ss:$8 sps:$4 sm:$0xff]  }
  0x68   : > { %1699 = vmatpush1.bf16.msra.mxu0 %v3344_v11  ;;  %772 = vmatprep.subr.bf16.mxu1 %v3350_v12  ;;  %v3418_v11 = vld [vmem:[%s4454_s1 + $0x244] ss:$8 sps:$4 sm:$0xff]  }
  0x69   : > { %1700 = vmatprep.subr.bf16.mxu0 %v3353_v13  ;;  %v3421_v12 = vld [vmem:[%s4454_s1 + $0x4e4] ss:$8 sps:$4 sm:$0xff]   ;;  %v3416_v13 = vld [vmem:[%s4454_s1 + $0x240] ss:$8 sps:$4 sm:$0xff]  }
  0x6b   : > { %773 = vmatpush1.bf16.msra.mxu1 %v3348_v14  ;;  %v3419_v14 = vld [vmem:[%s4454_s1 + $0x4e0] ss:$8 sps:$4 sm:$0xff]  }
  0x6c   : > { %1701 = vmatpush1.bf16.msra.mxu0 %v3351_v15  ;;  %774 = vmatprep.subr.bf16.mxu1 %v3356_v16  ;;  %v3424_v15 = vld [vmem:[%s4454_s1 + $0x254] ss:$8 sps:$4 sm:$0xff]   ;;  %v3425_v16 = vld [vmem:[%s4454_s1 + $0x4f0] ss:$8 sps:$4 sm:$0xff]  }
  0x6d   : > { %1702 = vmatprep.subr.bf16.mxu0 %v3360_v17  ;;  %v3430_v17 = vld [vmem:[%s4454_s1 + $0x264] ss:$8 sps:$4 sm:$0xff]  }
  0x6f   : > { %775 = vmatpush1.bf16.msra.mxu1 %v3354_v18  ;;  %v3433_v18 = vld [vmem:[%s4454_s1 + $0x504] ss:$8 sps:$4 sm:$0xff]  }
  0x70   : > { %1703 = vmatpush1.bf16.msra.mxu0 %v3358_v19  ;;  %776 = vmatprep.subr.bf16.mxu1 %v3364_v20  ;;  %v3428_v19 = vld [vmem:[%s4454_s1 + $0x260] ss:$8 sps:$4 sm:$0xff]  }
  0x71   : > { %1704 = vmatprep.subr.bf16.mxu0 %v3367_v21  ;;  %v3431_v20 = vld [vmem:[%s4454_s1 + $0x500] ss:$8 sps:$4 sm:$0xff]   ;;  %v3436_v21 = vld [vmem:[%s4454_s1 + $0x274] ss:$8 sps:$4 sm:$0xff]  }
  0x73   : > { %777 = vmatpush1.bf16.msra.mxu1 %v3362_v22  ;;  %v3439_v22 = vld [vmem:[%s4454_s1 + $0x514] ss:$8 sps:$4 sm:$0xff]  }
  0x74   : > { %1705 = vmatpush1.bf16.msra.mxu0 %v3365_v23  ;;  %1049 = vmatprep.subr.bf16.mxu1 %v3370_v24  ;;  %v3434_v23 = vld [vmem:[%s4454_s1 + $0x270] ss:$8 sps:$4 sm:$0xff]  }
  0x75   : > { %1993 = vmatprep.subr.bf16.mxu0 %v3373_v25  ;;  %v3437_v24 = vld [vmem:[%s4454_s1 + $0x510] ss:$8 sps:$4 sm:$0xff]   ;;  %v3443_v25 = vld [vmem:[%s4454_s1 + $0x284] ss:$8 sps:$4 sm:$0xff]  }
  0x76   : > { %783 = vmatmul.mubr.bf16.vlgmr.msra.gmra.mrb[0].mxu1 %v2657_v26  ;;  %v3447_v26 = vld [vmem:[%s4454_s1 + $0x524] ss:$8 sps:$4 sm:$0xff]  }
  0x77   : > { %1711 = vmatmul.mubr.bf16.vlgmr.msra.gmra.mrb[0].mxu0 %v4022_v30  ;;  %1050 = vmatpush1.bf16.msra.mxu1 %v3368_v27  ;;  %v3441_v27 = vld [vmem:[%s4454_s1 + $0x280] ss:$8 sps:$4 sm:$0xff]  }
  0x78   : > { %1994 = vmatpush1.bf16.msra.mxu0 %v3371_v33  ;;  %1051 = vmatprep.subr.bf16.mxu1 %v3376_v54  ;;  %v3445_v33 = vld [vmem:[%s4454_s1 + $0x520] ss:$8 sps:$4 sm:$0xff]   ;;  %v3450_v54 = vld [vmem:[%s4454_s1 + $0x294] ss:$8 sps:$4 sm:$0xff]  }
  0x79   : > { %1995 = vmatprep.subr.bf16.mxu0 %v3379_v34  ;;  %2694 = vmatprep.mubr.msk.bf16.mxu1 %vm476_vm3, %v3743_v63  ;;  %v3453_v34 = vld [vmem:[%s4454_s1 + $0x534] ss:$8 sps:$4 sm:$0xff]  }
  0x7a   : > { %2898 = vmatprep.mubr.msk.bf16.mxu0 %vm476_vm3, %v4035_v59 }
  0x7b   : > { %1052 = vmatpush1.bf16.msra.mxu1 %v3374_v28  ;;  %v3448_v28 = vld [vmem:[%s4454_s1 + $0x290] ss:$8 sps:$4 sm:$0xff]  }
  0x7c   : > { %1996 = vmatpush1.bf16.msra.mxu0 %v3377_v35  ;;  %1053 = vmatprep.subr.bf16.mxu1 %v3382_v36  ;;  %v3451_v35 = vld [vmem:[%s4454_s1 + $0x530] ss:$8 sps:$4 sm:$0xff]   ;;  %v3456_v36 = vld [vmem:[%s4454_s1 + $0x544] ss:$8 sps:$4 sm:$0xff]  }
  0x7d   : > { %1997 = vmatprep.subr.bf16.mxu0 %v3385_v37  ;;  %v3454_v37 = vld [vmem:[%s4454_s1 + $0x540] ss:$8 sps:$4 sm:$0xff]  }
  0x7e   : > { %793 = vmatmul.mubr.bf16.gmra.mrb[4].mxu1 %v3748_v1 }
  0x7f   : > { %1721 = vmatmul.mubr.bf16.gmra.mrb[4].mxu0 %v4059_v39  ;;  %1054 = vmatpush1.bf16.msra.mxu1 %v3380_v38  ;;  %v3459_v38 = vld [vmem:[%s4454_s1 + $0x554] ss:$8 sps:$4 sm:$0xff]  }
  0x80   : > { %1998 = vmatpush1.bf16.msra.mxu0 %v3383_v43  ;;  %1055 = vmatprep.subr.bf16.mxu1 %v3388_v44  ;;  %v3457_v43 = vld [vmem:[%s4454_s1 + $0x550] ss:$8 sps:$4 sm:$0xff]   ;;  %v3462_v44 = vld [vmem:[%s4454_s1 + $0x564] ss:$8 sps:$4 sm:$0xff]  }
  0x81   : > { %1999 = vmatprep.subr.bf16.mxu0 %v3391_v46  ;;  %2695 = vmatprep.mubr.msk.bf16.mxu1 %vm476_vm3, %v3950_v5  ;;  %v3471_v46 = vld [vmem:[%s4454_s1 + $0x594] ss:$8 sps:$4 sm:$0xff]  }
  0x82   : > { %2899 = vmatprep.mubr.msk.bf16.mxu0 %vm476_vm3, %v4072_v29 }
  0x83   : > { %1056 = vmatpush1.bf16.msra.mxu1 %v3386_v40 }
  0x84   : > { %2000 = vmatpush1.bf16.msra.mxu0 %v3389_v48  ;;  %1057 = vmatprep.subr.bf16.mxu1 %v3394_v49  ;;  %v3476_v48 = vld [vmem:[%s4454_s1 + $0x5a4] ss:$8 sps:$4 sm:$0xff]   ;;  %v3474_v49 = vld [vmem:[%s4454_s1 + $0x5a0] ss:$8 sps:$4 sm:$0xff]  }
  0x85   : > { %2001 = vmatprep.subr.bf16.mxu0 %v3397_v50  ;;  %v3479_v50 = vld [vmem:[%s4454_s1 + $0x5b4] ss:$8 sps:$4 sm:$0xff]  }
  0x86   : > { %803 = vmatmul.mubr.bf16.gmra.mrb[8].mxu1 %v4022_v30 }
  0x87   : > { %1731 = vmatmul.mubr.bf16.gmra.mrb[8].mxu0 %v4094_v51  ;;  %1058 = vmatpush1.bf16.msra.mxu1 %v3392_v53  ;;  %v3482_v53 = vld [vmem:[%s4454_s1 + $0x5c4] ss:$8 sps:$4 sm:$0xff]  }
  0x88   : > { %2002 = vmatpush1.bf16.msra.mxu0 %v3395_v55  ;;  %1059 = vmatprep.subr.bf16.mxu1 %v3400_v58  ;;  %v3480_v55 = vld [vmem:[%s4454_s1 + $0x5c0] ss:$8 sps:$4 sm:$0xff]   ;;  %v3485_v58 = vld [vmem:[%s4454_s1 + $0x5d4] ss:$8 sps:$4 sm:$0xff]  }
  0x89   : > { %2003 = vmatprep.subr.bf16.mxu0 %v3403_v41  ;;  %2696 = vmatprep.mubr.msk.bf16.mxu1 %vm476_vm3, %v4035_v59  ;;  %v3488_v41 = vld [vmem:[%s4454_s1 + $0x5e4] ss:$8 sps:$4 sm:$0xff]  }
  0x8a   : > { %2900 = vmatprep.mubr.msk.bf16.mxu0 %vm476_vm3, %v4112_v56 }
  0x8b   : > { %1060 = vmatpush1.bf16.msra.mxu1 %v3398_v61  ;;  %v3491_v61 = vld [vmem:[%s4454_s1 + $0x5f4] ss:$8 sps:$4 sm:$0xff]  }
  0x8c   : > { %2004 = vmatpush1.bf16.msra.mxu0 %v3401_v62  ;;  %1061 = vmatprep.subr.bf16.mxu1 %v3406_v0  ;;  %v3489_v62 = vld [vmem:[%s4454_s1 + $0x5f0] ss:$8 sps:$4 sm:$0xff]   ;;  %v3494_v0 = vld [vmem:[%s4454_s1 + $0x604] ss:$8 sps:$4 sm:$0xff]  }
  0x8d   : > { %2005 = vmatprep.subr.bf16.mxu0 %v3409_v3  ;;  %v3492_v3 = vld [vmem:[%s4454_s1 + $0x600] ss:$8 sps:$4 sm:$0xff]  }
  0x8e   : > { %813 = vmatmul.mubr.bf16.gmra.mrb[12].mxu1 %v4059_v39 }
  0x8f   : > { %1741 = vmatmul.mubr.bf16.gmra.mrb[12].mxu0 %v4134_v4  ;;  %1062 = vmatpush1.bf16.msra.mxu1 %v3404_v6  ;;  %v3497_v6 = vld [vmem:[%s4454_s1 + $0x614] ss:$8 sps:$4 sm:$0xff]  }
  0x90   : > { %2006 = vmatpush1.bf16.msra.mxu0 %v3407_v7  ;;  %1063 = vmatprep.subr.bf16.mxu1 %v3412_v8  ;;  %v3495_v7 = vld [vmem:[%s4454_s1 + $0x610] ss:$8 sps:$4 sm:$0xff]   ;;  %v2090_v8 = vld [vmem:[#allocation2 + $0x68] sm:$0xff] }
  0x91   : > { %2007 = vmatprep.subr.bf16.mxu0 %v3415_v57  ;;  %2761 = vmatprep.mubr.msk.bf16.mxu1 %vm476_vm3, %v3743_v63  ;;  %v3427_v63 = vld [vmem:[%s4454_s1 + $0x4f4] ss:$8 sps:$4 sm:$0xff]  }
  0x92   : > { %2965 = vmatprep.mubr.msk.bf16.mxu0 %vm476_vm3, %v3836_v31  ;;  %v3422_v31 = vld [vmem:[%s4454_s1 + $0x250] ss:$8 sps:$4 sm:$0xff]  }
  0x93   : > { %1064 = vmatpush1.bf16.msra.mxu1 %v3410_v9 }
  0x94   : > { %2008 = vmatpush1.bf16.msra.mxu0 %v3413_v10  ;;  %1065 = vmatprep.subr.bf16.mxu1 %v3418_v11 }
  0x95   : > { %2009 = vmatprep.subr.bf16.mxu0 %v3421_v12 }
  0x97   : > { %1066 = vmatpush1.bf16.msra.mxu1 %v3416_v13 }
  0x98   : > { %2010 = vmatpush1.bf16.msra.mxu0 %v3419_v14  ;;  %1067 = vmatprep.subr.bf16.mxu1 %v3424_v15 }
  0x99   : > { %2011 = vmatprep.subr.bf16.mxu0 %v3427_v63 }
  0x9b   : > { %1068 = vmatpush1.bf16.msra.mxu1 %v3422_v31 }
  0x9c   : > { %2012 = vmatpush1.bf16.msra.mxu0 %v3425_v16  ;;  %1069 = vmatprep.subr.bf16.mxu1 %v3430_v17 }
  0x9d   : > { %2013 = vmatprep.subr.bf16.mxu0 %v3433_v18 }
  0x9f   : > { %1070 = vmatpush1.bf16.msra.mxu1 %v3428_v19 }
  0xa0   : > { %2014 = vmatpush1.bf16.msra.mxu0 %v3431_v20  ;;  %1071 = vmatprep.subr.bf16.mxu1 %v3436_v21 }
  0xa1   : > { %2015 = vmatprep.subr.bf16.mxu0 %v3439_v22 }
  0xa3   : > { %1072 = vmatpush1.bf16.msra.mxu1 %v3434_v23 }
  0xa4   : > { %2016 = vmatpush1.bf16.msra.mxu0 %v3437_v24  ;;  %1073 = vmatprep.subr.bf16.mxu1 %v3443_v25 }
  0xa5   : > { %2017 = vmatprep.subr.bf16.mxu0 %v3447_v26 }
  0xa7   : > { %1074 = vmatpush1.bf16.msra.mxu1 %v3441_v27 }
  0xa8   : > { %2018 = vmatpush1.bf16.msra.mxu0 %v3445_v33  ;;  %1075 = vmatprep.subr.bf16.mxu1 %v3450_v54 }
  0xa9   : > { %2019 = vmatprep.subr.bf16.mxu0 %v3453_v34 }
  0xab   : > { %1076 = vmatpush1.bf16.msra.mxu1 %v3448_v28 }
  0xac   : > { %2020 = vmatpush1.bf16.msra.mxu0 %v3451_v35  ;;  %3057 = vmatprep.subr.bf16.mxu1 %v3456_v36 }
  0xad   : > { %2308 = vmatprep.subr.bf16.mxu0 %v3456_v36 }
  0xae   : > { %1082 = vmatmul.mubr.bf16.vlgmr.msra.gmra.mrb[0].mxu1 %v3748_v1  ;;  %v3460_v1 = vld [vmem:[%s4454_s1 + $0x560] ss:$8 sps:$4 sm:$0xff]  }
  0xaf   : > { %2026 = vmatmul.mubr.bf16.vlgmr.msra.gmra.mrb[0].mxu0 %v3840_v32  ;;  %3071 = vmatpush1.bf16.msra.mxu1 %v3454_v37  ;;  %v3465_v32 = vld [vmem:[%s4454_s1 + $0x574] ss:$8 sps:$4 sm:$0xff]  }
  0xb0   : > { %2309 = vmatpush1.bf16.msra.mxu0 %v3454_v37  ;;  %3058 = vmatprep.subr.bf16.mxu1 %v3459_v38 }
  0xb1   : > { %2310 = vmatprep.subr.bf16.mxu0 %v3459_v38  ;;  %2762 = vmatprep.mubr.msk.bf16.mxu1 %vm476_vm3, %v3950_v5  ;;  %v3468_v5 = vld [vmem:[%s4454_s1 + $0x584] ss:$8 sps:$4 sm:$0xff]  }
  0xb2   : > { %2966 = vmatprep.mubr.msk.bf16.mxu0 %vm476_vm3, %v3881_v45  ;;  %v3463_v45 = vld [vmem:[%s4454_s1 + $0x570] ss:$8 sps:$4 sm:$0xff]  }
  0xb3   : > { %3072 = vmatpush1.bf16.msra.mxu1 %v3457_v43 }
  0xb4   : > { %2311 = vmatpush1.bf16.msra.mxu0 %v3457_v43  ;;  %3059 = vmatprep.subr.bf16.mxu1 %v3462_v44  ;;  %v2399_v43 = vlaneseq }
  0xb5   : > { %2312 = vmatprep.subr.bf16.mxu0 %v3462_v44 }
  0xb6   : > { %1092 = vmatmul.mubr.bf16.gmra.mrb[4].mxu1 %v4022_v30  ;;  %v4271_v30 = vld [vmem:[#allocation2 + $0x60] sm:$0xff]  ;;  %v2400_v44 = vshrl.u32 %v2399_v43, 7 }
  0xb7   : > { %2036 = vmatmul.mubr.bf16.gmra.mrb[4].mxu0 %v3890_v47  ;;  %3073 = vmatpush1.bf16.msra.mxu1 %v3460_v1  ;;  %v3466_v47 = vld [vmem:[%s4454_s1 + $0x580] ss:$8 sps:$4 sm:$0xff]   ;;  %v2936_v40 = vcombine.high %v4096_v52, %v4271_v30  ;;  %v3004_v57 = vcombine.high %v4271_v30, %v2090_v8  ;;  %v3003_v9 = vcombine.low %v4271_v30, %v2090_v8 }
  0xb8   : > { %2313 = vmatpush1.bf16.msra.mxu0 %v3460_v1  ;;  %3060 = vmatprep.subr.bf16.mxu1 %v3465_v32  ;;  %v2401_v1 = vsub.s32 0, %v2400_v44 }
  0xb9   : > { %2314 = vmatprep.subr.bf16.mxu0 %v3465_v32  ;;  %2763 = vmatprep.mubr.msk.bf16.mxu1 %vm476_vm3, %v4035_v59  ;;  %v2397_v32 = vld [vmem:[%s4455_s2] sm:$0x3] }
  0xba   : > { %2967 = vmatprep.mubr.msk.bf16.mxu0 %vm476_vm3, %v3924_v60  ;;  %v3469_v60 = vld [vmem:[%s4454_s1 + $0x590] ss:$8 sps:$4 sm:$0xff]  }
  0xbb   : > { %3074 = vmatpush1.bf16.msra.mxu1 %v3463_v45 }
  0xbc   : > { %2315 = vmatpush1.bf16.msra.mxu0 %v3463_v45  ;;  %3061 = vmatprep.subr.bf16.mxu1 %v3468_v5  ;;  %v2405_v45 = vsub.s32 1, %v2400_v44 }
  0xbd   : > { %2316 = vmatprep.subr.bf16.mxu0 %v3468_v5  ;;  %v2425_v5 = vld [vmem:[%s4456_s3] sm:$0x3] }
  0xbe   : > { %1102 = vmatmul.mubr.bf16.gmra.mrb[8].mxu1 %v4059_v39 }
  0xbf   : > { %2046 = vmatmul.mubr.bf16.gmra.mrb[8].mxu0 %v3940_v2  ;;  %3075 = vmatpush1.bf16.msra.mxu1 %v3466_v47  ;;  %v2935_v2 = vcombine.low %v4096_v52, %v4271_v30  ;;  %v3477_v52 = vld [vmem:[%s4454_s1 + $0x5b0] ss:$8 sps:$4 sm:$0xff]   ;;  %v4372_v30 = vrot.slane %v2397_v32, %v2401_v1 }
  0xc0   : > { %2317 = vmatpush1.bf16.msra.mxu0 %v3466_v47  ;;  %3062 = vmatprep.subr.bf16.mxu1 %v3471_v46 }
  0xc1   : > { %2318 = vmatprep.subr.bf16.mxu0 %v3471_v46  ;;  %2764 = vmatprep.mubr.msk.bf16.mxu1 %vm476_vm3, %v4072_v29 }
  0xc2   : > { %2968 = vmatprep.mubr.msk.bf16.mxu0 %vm476_vm3, %v2936_v40  ;;  %v4374_v40 = vrot.slane %v2397_v32, %v2405_v45 }
  0xc3   : > { %3076 = vmatpush1.bf16.msra.mxu1 %v3469_v60 }
  0xc4   : > { %2319 = vmatpush1.bf16.msra.mxu0 %v3469_v60  ;;  %3063 = vmatprep.subr.bf16.mxu1 %v3476_v48 }
  0xc5   : > { %2320 = vmatprep.subr.bf16.mxu0 %v3476_v48  ;;  %v4376_v48 = vrot.slane %v2425_v5, %v2401_v1 }
  0xc6   : > { %1112 = vmatmul.mubr.bf16.gmra.mrb[12].mxu1 %v4094_v51 }
  0xc7   : > { %2056 = vmatmul.mubr.bf16.gmra.mrb[12].mxu0 %v2935_v2  ;;  %3077 = vmatpush1.bf16.msra.mxu1 %v3474_v49 }
  0xc8   : > { %2321 = vmatpush1.bf16.msra.mxu0 %v3474_v49  ;;  %3064 = vmatprep.subr.bf16.mxu1 %v3479_v50 }
  0xc9   : > { %2322 = vmatprep.subr.bf16.mxu0 %v3479_v50  ;;  %3033 = vmatprep.mubr.msk.bf16.mxu0 %vm476_vm3, %v4035_v59  ;;  %v3483_v59 = vld [vmem:[%s4454_s1 + $0x5d0] ss:$8 sps:$4 sm:$0xff]  }
  0xca   : > { %3035 = vmatprep.mubr.msk.bf16.mxu1 %vm476_vm3, %v4112_v56  ;;  %v3486_v56 = vld [vmem:[%s4454_s1 + $0x5e0] ss:$8 sps:$4 sm:$0xff]  }
  0xcb   : > { %3078 = vmatpush1.bf16.msra.mxu1 %v3477_v52 }
  0xcc   : > { %2323 = vmatpush1.bf16.msra.mxu0 %v3477_v52  ;;  %3065 = vmatprep.subr.bf16.mxu1 %v3482_v53 }
  0xcd   : > { %2324 = vmatprep.subr.bf16.mxu0 %v3482_v53  ;;  %v4378_v53 = vrot.slane %v2425_v5, %v2405_v45 }
  0xcf   : > { %3079 = vmatpush1.bf16.msra.mxu1 %v3480_v55 }
  0xd0   : > { %2325 = vmatpush1.bf16.msra.mxu0 %v3480_v55  ;;  %3066 = vmatprep.subr.bf16.mxu1 %v3485_v58 }
  0xd1   : > { %2326 = vmatprep.subr.bf16.mxu0 %v3485_v58 }
  0xd3   : > { %3080 = vmatpush1.bf16.msra.mxu1 %v3483_v59 }
  0xd4   : > { %2327 = vmatpush1.bf16.msra.mxu0 %v3483_v59  ;;  %3067 = vmatprep.subr.bf16.mxu1 %v3488_v41 }
  0xd5   : > { %2328 = vmatprep.subr.bf16.mxu0 %v3488_v41 }
  0xd7   : > { %3081 = vmatpush1.bf16.msra.mxu1 %v3486_v56 }
  0xd8   : > { %2329 = vmatpush1.bf16.msra.mxu0 %v3486_v56  ;;  %3068 = vmatprep.subr.bf16.mxu1 %v3491_v61 }
  0xd9   : > { %2330 = vmatprep.subr.bf16.mxu0 %v3491_v61 }
  0xdb   : > { %3082 = vmatpush1.bf16.msra.mxu1 %v3489_v62 }
  0xdc   : > { %2331 = vmatpush1.bf16.msra.mxu0 %v3489_v62  ;;  %3069 = vmatprep.subr.bf16.mxu1 %v3494_v0 }
  0xdd   : > { %2332 = vmatprep.subr.bf16.mxu0 %v3494_v0 }
  0xdf   : > { %3083 = vmatpush1.bf16.msra.mxu1 %v3492_v3 }
  0xe0   : > { %2333 = vmatpush1.bf16.msra.mxu0 %v3492_v3  ;;  %3070 = vmatprep.subr.bf16.mxu1 %v3497_v6 }
  0xe1   : > { %2334 = vmatprep.subr.bf16.mxu0 %v3497_v6 }
  0xe3   : > { %3084 = vmatpush1.bf16.msra.mxu1 %v3495_v7 }
  0xe4   : > { %2335 = vmatpush1.bf16.msra.mxu0 %v3495_v7 }
  0xe6   : > { %2361 = vmatmul.mubr.bf16.vlgmr.msra.gmra.mrb[16].mxu1 %v4134_v4 }
  0xe7   : > { %2341 = vmatmul.mubr.bf16.vlgmr.msra.gmra.mrb[0].mxu0 %v4059_v39  ;;  %3036 = vmatprep.mubr.msk.bf16.mxu1 %vm476_vm3, %v3004_v57 }
  0xe8   : > { %3034 = vmatprep.mubr.msk.bf16.mxu0 %vm476_vm3, %v4072_v29 }
  0xee   : > { %2371 = vmatmul.mubr.bf16.gmra.mrb[20].mxu1 %v3003_v9 }
  0xef   : > { %2351 = vmatmul.mubr.bf16.gmra.mrb[4].mxu0 %v4094_v51 }
 0x181   : > { %v1083_v10 = vpop.f32.mrb[0].mxu1 }
 0x182   : > { %v1085_v11 = vpop.f32.mrb[1].mxu1 }
 0x183   : > { %v1087_v12 = vpop.f32.mrb[2].mxu1 }
 0x184   : > { %v1089_v13 = vpop.f32.mrb[3].mxu1 }
 0x189   : > { %v4352_v14 = vpop.f32.mrb[4].mxu1 }
 0x18a   : > { %v4354_v15 = vpop.f32.mrb[5].mxu1 }
 0x18b   : > { %v4356_v39 = vpop.f32.mrb[6].mxu1 }
 0x18c   : > { %v4358_v4 = vpop.f32.mrb[7].mxu1 }
 0x191   : > { %v1103_v29 = vpop.f32.mrb[8].mxu1 }
 0x192   : > { %v2047_v63 = vpop.f32.mrb[8].mxu0  ;;  %v1105_v16 = vpop.f32.mrb[9].mxu1 }
 0x193   : > { %v3093_v31 = vadd.f32 %v2047_v63, %v1103_v29  ;;  %v2049_v17 = vpop.f32.mrb[9].mxu0  ;;  %v1107_v51 = vpop.f32.mrb[10].mxu1 }
 0x194   : > { %v3095_v18 = vadd.f32 %v2049_v17, %v1105_v16  ;;  %v2051_v19 = vpop.f32.mrb[10].mxu0  ;;  %v1109_v21 = vpop.f32.mrb[11].mxu1 }
 0x195   : > { %v3097_v20 = vadd.f32 %v2051_v19, %v1107_v51  ;;  %v2053_v22 = vpop.f32.mrb[11].mxu0 }
 0x196   : > { %v3099_v23 = vadd.f32 %v2053_v22, %v1109_v21 }
 0x199   : > { %v1113_v24 = vpop.f32.mrb[12].mxu1 }
 0x19a   : > { %v2057_v25 = vpop.f32.mrb[12].mxu0  ;;  %v1115_v27 = vpop.f32.mrb[13].mxu1 }
 0x19b   : > { %v3101_v26 = vadd.f32 %v2057_v25, %v1113_v24  ;;  %v2059_v33 = vpop.f32.mrb[13].mxu0  ;;  %v1117_v34 = vpop.f32.mrb[14].mxu1 }
 0x19c   : > { %v4360_v54 = vadd.f32 %v2059_v33, %v1115_v27  ;;  %v2061_v28 = vpop.f32.mrb[14].mxu0  ;;  %v1119_v36 = vpop.f32.mrb[15].mxu1 }
 0x19d   : > { %v4362_v35 = vadd.f32 %v2061_v28, %v1117_v34  ;;  %v2063_v37 = vpop.f32.mrb[15].mxu0 }
 0x19e   : > { %v4364_v38 = vadd.f32 %v2063_v37, %v1119_v36 }
 0x1b9   : > { %v2362_v46 = vpop.f32.mrb[16].mxu1 }
 0x1ba   : > { %v2342_v47 = vpop.f32.mrb[0].mxu0  ;;  %v3094_v2 = vadd.f32 %v3093_v31, %v2362_v46  ;;  %v2364_v50 = vpop.f32.mrb[17].mxu1 }
 0x1bb   : > { %v3085_v60 = vadd.f32 %v2342_v47, %v1083_v10  ;;  %v2344_v49 = vpop.f32.mrb[1].mxu0  ;;  %v3096_v55 = vadd.f32 %v3095_v18, %v2364_v50  ;;  %v2366_v59 = vpop.f32.mrb[18].mxu1 }
 0x1bc   : > { %v3086_v52 = vadd.f32 %v2344_v49, %v1085_v11  ;;  %v2346_v58 = vpop.f32.mrb[2].mxu0  ;;  %v2417_v56 = vmul.f32 %v3094_v2, %v4372_v30  ;;  %v3098_v62 = vadd.f32 %v3097_v20, %v2366_v59  ;;  %v2368_v3 = vpop.f32.mrb[19].mxu1 }
 0x1bd   : > { %v2409_v41 = vmul.f32 %v3085_v60, %v4372_v30  ;;  %v3087_v61 = vadd.f32 %v2346_v58, %v1087_v12  ;;  %v2348_v0 = vpop.f32.mrb[3].mxu0  ;;  %v2418_v7 = vmul.f32 %v3096_v55, %v4374_v40  ;;  %v3100_v57 = vadd.f32 %v3099_v23, %v2368_v3 }
 0x1be   : > { %v2410_v6 = vmul.f32 %v3086_v52, %v4374_v40  ;;  %v3088_v8 = vadd.f32 %v2348_v0, %v1089_v13  ;;  %v2445_v10 = vadd.f32 %v4376_v48, %v2417_v56  ;;  %v2419_v29 = vmul.f32 %v3098_v62, %v4372_v30 }
 0x1bf   : > { %v2437_v9 = vadd.f32 %v4376_v48, %v2409_v41  ;;  %v2411_v11 = vmul.f32 %v3087_v61, %v4372_v30  ;;  %v2446_v63 = vadd.f32 %v4378_v53, %v2418_v7  ;;  %v2420_v16 = vmul.f32 %v3100_v57, %v4374_v40 }
 0x1c0   : > { %v2438_v12 = vadd.f32 %v4378_v53, %v2410_v6  ;;  %v2412_v31 = vmul.f32 %v3088_v8, %v4374_v40  ;;  %v2461_v13 = vmax.f32 %v2445_v10, 0.0  ;;  %v2447_v51 = vadd.f32 %v4376_v48, %v2419_v29 }
 0x1c1   : > { %v2453_v17 = vmax.f32 %v2437_v9, 0.0  ;;  %v2439_v18 = vadd.f32 %v4376_v48, %v2411_v11  ;;  %v2462_v20 = vmax.f32 %v2446_v63, 0.0  ;;  %v2448_v22 = vadd.f32 %v4378_v53, %v2420_v16  ;;  %v2372_v24 = vpop.f32.mrb[20].mxu1 }
 0x1c2   : > { %v2454_v19 = vmax.f32 %v2438_v12, 0.0  ;;  %v2440_v21 = vadd.f32 %v4378_v53, %v2412_v31  ;;  %v2352_v23 = vpop.f32.mrb[4].mxu0  ;;  %v2463_v27 = vmax.f32 %v2447_v51, 0.0  ;;  %v3102_v34 = vadd.f32 %v3101_v26, %v2372_v24  ;;  %v2374_v36 = vpop.f32.mrb[21].mxu1 }
 0x1c3   : > { %v2455_v25 = vmax.f32 %v2439_v18, 0.0  ;;  %v3089_v33 = vadd.f32 %v2352_v23, %v4352_v14  ;;  %v2354_v28 = vpop.f32.mrb[5].mxu0  ;;  %v3053_v43 = vpack.c.bf16 %v2462_v20, %v2461_v13  ;;  %v2464_v1 = vmax.f32 %v2448_v22, 0.0  ;;  %v2376_v45 = vpop.f32.mrb[22].mxu1 }
 0x1c4   : > { %v3049_v37 = vpack.c.bf16 %v2454_v19, %v2453_v17  ;;  %v2456_v44 = vmax.f32 %v2440_v21, 0.0  ;;  %v2356_v32 = vpop.f32.mrb[6].mxu0  ;;  %v2421_v47 = vmul.f32 %v3102_v34, %v4372_v30  ;;  %v3090_v46 = vadd.f32 %v2354_v28, %v4354_v15  ;;  %v2378_v60 = vpop.f32.mrb[23].mxu1 }
 0x1c5   : > { %v2413_v5 = vmul.f32 %v3089_v33, %v4372_v30  ;;  %v3104_v14 = vadd.f32 %v4360_v54, %v2374_v36  ;;  %v2358_v26 = vpop.f32.mrb[7].mxu0  ;;  %2521 = vst.msk [vmem:[%s4401_s27 + $0x20] sm:$0xff] %vm3682_vm2, %v3053_v43  ;;  %v3054_v49 = vpack.c.bf16 %v2464_v1, %v2463_v27  ;;  %v3091_v50 = vadd.f32 %v2356_v32, %v4356_v39 }
 0x1c6   : > { %2517 = vst.msk [vmem:[%s4401_s27] sm:$0xff] %vm3682_vm2, %v3049_v37  ;;  %v3050_v2 = vpack.c.bf16 %v2456_v44, %v2455_v25  ;;  %v3106_v52 = vadd.f32 %v4362_v35, %v2376_v45  ;;  %v2449_v15 = vadd.f32 %v4376_v48, %v2421_v47  ;;  %v2414_v54 = vmul.f32 %v3090_v46, %v4374_v40 }
 0x1c7   : > { %v2441_v55 = vadd.f32 %v4376_v48, %v2413_v5  ;;  %v2422_v58 = vmul.f32 %v3104_v14, %v4374_v40  ;;  %2522 = vst.msk [vmem:[%s4401_s27 + $0x28] sm:$0xff] %vm3682_vm2, %v3054_v49  ;;  %v2415_v59 = vmul.f32 %v3091_v50, %v4372_v30  ;;  %v3092_v35 = vadd.f32 %v2358_v26, %v4358_v4 }
 0x1c8   : > { %2518 = vst.msk [vmem:[%s4401_s27 + $0x8] sm:$0xff] %vm3682_vm2, %v3050_v2  ;;  %v2423_v39 = vmul.f32 %v3106_v52, %v4372_v30  ;;  %v3108_v41 = vadd.f32 %v4364_v38, %v2378_v60  ;;  %v2465_v61 = vmax.f32 %v2449_v15, 0.0  ;;  %v2442_v62 = vadd.f32 %v4378_v53, %v2414_v54 }
 0x1c9   : > { %v2457_v56 = vmax.f32 %v2441_v55, 0.0  ;;  %v2450_v0 = vadd.f32 %v4378_v53, %v2422_v58  ;;  %v2443_v3 = vadd.f32 %v4376_v48, %v2415_v59  ;;  %v2416_v7 = vmul.f32 %v3092_v35, %v4374_v40 }
 0x1ca   : > { %v2451_v6 = vadd.f32 %v4376_v48, %v2423_v39  ;;  %v2424_v30 = vmul.f32 %v3108_v41, %v4374_v40  ;;  %v2458_v4 = vmax.f32 %v2442_v62, 0.0 }
 0x1cb   : > { %v2466_v38 = vmax.f32 %v2450_v0, 0.0  ;;  %v2459_v8 = vmax.f32 %v2443_v3, 0.0  ;;  %v2444_v9 = vadd.f32 %v4378_v53, %v2416_v7 }
 0x1cc   : > { %v2467_v57 = vmax.f32 %v2451_v6, 0.0  ;;  %v2452_v10 = vadd.f32 %v4378_v53, %v2424_v30  ;;  %v3051_v11 = vpack.c.bf16 %v2458_v4, %v2457_v56 }
 0x1cd   : > { %v3055_v29 = vpack.c.bf16 %v2466_v38, %v2465_v61  ;;  %v2460_v12 = vmax.f32 %v2444_v9, 0.0 }
 0x1ce   : > { %v2468_v63 = vmax.f32 %v2452_v10, 0.0  ;;  %2519 = vst.msk [vmem:[%s4401_s27 + $0x10] sm:$0xff] %vm3682_vm2, %v3051_v11 }
 0x1cf   : > { %2523 = vst.msk [vmem:[%s4401_s27 + $0x30] sm:$0xff] %vm3682_vm2, %v3055_v29  ;;  %v3052_v40 = vpack.c.bf16 %v2460_v12, %v2459_v8 }
 0x1d0   : > { %v3056_v48 = vpack.c.bf16 %v2468_v63, %v2467_v57 }
 0x1d1   : > { %2520 = vst.msk [vmem:[%s4401_s27 + $0x18] sm:$0xff] %vm3682_vm2, %v3052_v40 }
 0x1d2   : > { %2524 = vst.msk [vmem:[%s4401_s27 + $0x38] sm:$0xff] %vm3682_vm2, %v3056_v48 }
 0x1d3 PF: > { %s14_s15 = sadd.s32 1, %s3506_s15  }
 0x1d4   : > { %p11_p4 = scmp.ge.s32.totalorder %s14_s15, 4  }
 0x1d6   :  { %13 = sbr.rel (!%p11_p4) target bundleno = 1 (0x1), region = 79 }

// kernel: _lambda_.15
= control target key start
LH: loop header
LB: loop body
LE: loop exit
PB: predicated region body
PF: predicated region fallthrough
CT: control target
= control target key end

     0   :  { %s692_s15 = smov 0   ;;  %s728_s0 = inlined_call_operand.vmem [shape: bf16[2,8,8,32], index: 0, kind: input, shape index: {}]   ;;  %s729_s1 = inlined_call_operand.vmem [shape: bf16[32,128], index: 1, kind: input, shape index: {}]   ;;  %s730_s2 = inlined_call_operand.vmem [shape: f32[1,128], index: 2, kind: input, shape index: {}]   ;;  %s731_s3 = inlined_call_operand.vmem [shape: f32[1,128], index: 3, kind: input, shape index: {}]   ;;  %s732_s4 = inlined_call_operand.vmem [shape: bf16[2,8,8,128], index: 4, kind: output, shape index: {}]  }
   0x1 LB: > { %s557_s16 = sadd.s32 4294967295, %s664_s15   ;;  %p561_p0 = scmp.ge.s32.totalorder %s664_s15, 1  ;;  %s664_s15 = sphi %s692_s15, %s14_s15  }
   0x2   : > { %p162_p1 = scmp.lt.s32.totalorder %s664_s15, 3 }
   0x4   : > { %p163_p2 = pnand %p561_p0, %p162_p1 }
   0x5   : > { %v652_v0 = vld [vmem:[%s729_s1] sm:$0xff] (!%p163_p2)   ;;  %p188_p3 = scmp.lt.s32.totalorder (!%p163_p2), %s557_s16, 1  ;;  %v653_v1 = vld [vmem:[%s729_s1 + $0x8] sm:$0xff] (!%p163_p2)   ;;  %vm243_vm0 = vcmask (!%p163_p2), 261120   ;;  %v666_v6 = vmov (!%p163_p2), 0.0  }
   0x6   : > { %166 = sbr.rel (%p163_p2) target bundleno = 264 (0x108), region = 36  ;;  %627 = vmatprep.subr.bf16.mxu0 (!%p163_p2), %v652_v0  ;;  %639 = vmatprep.subr.bf16.mxu1 (!%p163_p2), %v652_v0  ;;  %327 = vst [vmem:[#allocation2 + $0x30] sm:$0xff] (!%p163_p2), %v666_v6  ;;  %328 = vst [vmem:[#allocation2 + $0x38] sm:$0x3] (!%p163_p2), %v666_v6  ;;  %v576_v61 = vld [vmem:[%s730_s2] ss:$0 sm:$0xff] (!%p163_p2) }
   0x7   : > { %628 = vmatpush3.bf16.msra.mxu0 (!%p163_p2), %v652_v0  ;;  %641 = vmatpush3.bf16.msra.mxu1 (!%p163_p2), %v652_v0  ;;  %321 = vst [vmem:[#allocation2] sm:$0xff] (!%p163_p2), %v666_v6  ;;  %322 = vst [vmem:[#allocation2 + $0x8] sm:$0x3] (!%p163_p2), %v666_v6 }
   0x8   : > { %629 = vmatprep.subr.bf16.mxu0 (!%p163_p2), %v653_v1  ;;  %640 = vmatprep.subr.bf16.mxu1 (!%p163_p2), %v653_v1  ;;  %323 = vst [vmem:[#allocation2 + $0x10] sm:$0xff] (!%p163_p2), %v666_v6  ;;  %324 = vst [vmem:[#allocation2 + $0x18] sm:$0x3] (!%p163_p2), %v666_v6 }
   0x9   : > { %325 = vst [vmem:[#allocation2 + $0x20] sm:$0xff] (!%p163_p2), %v666_v6  ;;  %326 = vst [vmem:[#allocation2 + $0x28] sm:$0x3] (!%p163_p2), %v666_v6 }
   0xa   : > { %329 = vst [vmem:[#allocation2 + $0x40] sm:$0xff] (!%p163_p2), %v666_v6  ;;  %330 = vst [vmem:[#allocation2 + $0x48] sm:$0x3] (!%p163_p2), %v666_v6 }
   0xb   : > { %630 = vmatpush3.bf16.msra.mxu0 (!%p163_p2), %v653_v1  ;;  %642 = vmatpush3.bf16.msra.mxu1 (!%p163_p2), %v653_v1  ;;  %331 = vst [vmem:[#allocation2 + $0x50] sm:$0xff] (!%p163_p2), %v666_v6  ;;  %332 = vst [vmem:[#allocation2 + $0x58] sm:$0x3] (!%p163_p2), %v666_v6 }
   0xc   : > { %333 = vst [vmem:[#allocation2 + $0x60] sm:$0xff] (!%p163_p2), %v666_v6  ;;  %334 = vst [vmem:[#allocation2 + $0x68] sm:$0x3] (!%p163_p2), %v666_v6 }
   0xd   : > { %s734_s16 = smov (!%p188_p3, %s557_s16), 1  ;;  %335 = vst [vmem:[#allocation2 + $0x70] sm:$0xff] %v666_v6  ;;  %336 = vst [vmem:[#allocation2 + $0x78] sm:$0x3] %v666_v6 }
   0xe   : > { %s588_s21 = sshll.u32 %s734_s16, 5  ;;  %337 = vst [vmem:[#allocation2 + $0x80] sm:$0xff] %v666_v6  ;;  %338 = vst [vmem:[#allocation2 + $0x88] sm:$0x3] %v666_v6  ;;  %v360_v12 = vld [vmem:[#allocation2 + $0x1] sm:$0xff] }
   0xf   : > { %s192_s24 = scalar_lea.vmem %s728_s0, %s588_s21  ;;  %339 = vst [vmem:[#allocation2 + $0x90] sm:$0xff] %v666_v6  ;;  %340 = vst [vmem:[#allocation2 + $0x98] sm:$0x3] %v666_v6  ;;  %v380_v17 = vld [vmem:[#allocation2 + $0x2] sm:$0xff]  ;;  %v577_v6 = vld [vmem:[%s731_s3] ss:$0 sm:$0xff]  ;;  %s197_s5 = scalar_lea.vmem %s732_s4, %s588_s21 }
  0x10   : > { %v654_v2 = vld [vmem:[%s192_s24] sm:$0xff]   ;;  %v655_v3 = vld [vmem:[%s192_s24 + $0x10] sm:$0xff]   ;;  %v656_v4 = vld [vmem:[%s192_s24 + $0x8] sm:$0xff]   ;;  %v390_v26 = vadd.f32 %v380_v17, %v360_v12 }
  0x11   : > { %631 = vmatprep.mubr.msk.bf16.mxu0 %vm243_vm0, %v654_v2  ;;  %635 = vmatprep.mubr.msk.bf16.mxu1 %vm243_vm0, %v655_v3  ;;  %v657_v5 = vld [vmem:[%s192_s24 + $0x18] sm:$0xff]  }
  0x12   : > { %632 = vmatmul.mubr.msk.bf16.vlgmr.msra.gmra.mrb[0].mxu0 %vm243_vm0, %v656_v4  ;;  %636 = vmatmul.mubr.msk.bf16.vlgmr.msra.gmra.mrb[0].mxu1 %vm243_vm0, %v657_v5 }
  0x16   : > { %v369_v16 = vld [vmem:[#allocation2 + $0x91] sm:$0xff] }
  0x17   : > { %v389_v22 = vld [vmem:[#allocation2 + $0x92] sm:$0xff] }
  0x18   : > { %v399_v37 = vadd.f32 %v389_v22, %v369_v16 }
  0xe5   : > { %v633_v7 = vpop.f32.mrb[0].mxu0  ;;  %v637_v8 = vpop.f32.mrb[0].mxu1 }
  0xe6   : > { %344 = vst [vmem:[#allocation2 + $0x31] sm:$0xff] %v633_v7  ;;  %v290_v9 = vpop.f32.mrb[1].mxu0  ;;  %348 = vst [vmem:[#allocation2 + $0x71] sm:$0xff] %v637_v8  ;;  %v306_v10 = vpop.f32.mrb[1].mxu1 }
  0xe7   : > { %342 = vst [vmem:[#allocation2 + $0x11] sm:$0xff] %v290_v9  ;;  %v634_v11 = vpop.f32.mrb[2].mxu0  ;;  %346 = vst [vmem:[#allocation2 + $0x51] sm:$0xff] %v306_v10  ;;  %v638_v13 = vpop.f32.mrb[2].mxu1 }
  0xe8   : > { %345 = vst [vmem:[#allocation2 + $0x41] sm:$0xff] %v634_v11  ;;  %v293_v14 = vpop.f32.mrb[3].mxu0  ;;  %349 = vst [vmem:[#allocation2 + $0x81] sm:$0xff] %v638_v13  ;;  %v309_v15 = vpop.f32.mrb[3].mxu1 }
  0xe9   : > { %343 = vst [vmem:[#allocation2 + $0x21] sm:$0xff] %v293_v14  ;;  %347 = vst [vmem:[#allocation2 + $0x61] sm:$0xff] %v309_v15 }
  0xed   : > { %v353_v18 = vld [vmem:[#allocation2 + $0x30] sm:$0xff] }
  0xee   : > { %v373_v19 = vadd.f32 %v633_v7, %v353_v18  ;;  %v357_v20 = vld [vmem:[#allocation2 + $0x70] sm:$0xff] }
  0xef   : > { %v351_v21 = vld [vmem:[#allocation2 + $0x10] sm:$0xff]  ;;  %v377_v24 = vadd.f32 %v637_v8, %v357_v20  ;;  %v354_v30 = vld [vmem:[#allocation2 + $0x40] sm:$0xff] }
  0xf0   : > { %v383_v23 = vld [vmem:[#allocation2 + $0x32] sm:$0xff]  ;;  %v371_v25 = vadd.f32 %v351_v21, %v290_v9  ;;  %v358_v31 = vld [vmem:[#allocation2 + $0x80] sm:$0xff]  ;;  %v374_v35 = vadd.f32 %v634_v11, %v354_v30 }
  0xf1   : > { %v355_v27 = vld [vmem:[#allocation2 + $0x50] sm:$0xff]  ;;  %v378_v36 = vadd.f32 %v638_v13, %v358_v31  ;;  %v352_v38 = vld [vmem:[#allocation2 + $0x20] sm:$0xff]  ;;  %v393_v39 = vadd.f32 %v383_v23, %v373_v19 }
  0xf2   : > { %v381_v28 = vld [vmem:[#allocation2 + $0x12] sm:$0xff]  ;;  %v375_v29 = vadd.f32 %v355_v27, %v306_v10  ;;  %v384_v42 = vld [vmem:[#allocation2 + $0x42] sm:$0xff]  ;;  %v372_v44 = vadd.f32 %v352_v38, %v293_v14 }
  0xf3   : > { %v387_v32 = vld [vmem:[#allocation2 + $0x72] sm:$0xff]  ;;  %v391_v33 = vadd.f32 %v381_v28, %v371_v25  ;;  %v388_v43 = vld [vmem:[#allocation2 + $0x82] sm:$0xff]  ;;  %v394_v47 = vadd.f32 %v384_v42, %v374_v35 }
  0xf4   : > { %v385_v34 = vld [vmem:[#allocation2 + $0x52] sm:$0xff]  ;;  %v397_v40 = vadd.f32 %v387_v32, %v377_v24  ;;  %v356_v45 = vld [vmem:[#allocation2 + $0x60] sm:$0xff]  ;;  %v398_v48 = vadd.f32 %v388_v43, %v378_v36 }
  0xf5   : > { %v395_v41 = vadd.f32 %v385_v34, %v375_v29  ;;  %v400_v46 = vadd.f32 %v391_v33, %v390_v26  ;;  %v382_v49 = vld [vmem:[#allocation2 + $0x22] sm:$0xff]  ;;  %v376_v50 = vadd.f32 %v356_v45, %v309_v15  ;;  %v403_v53 = vadd.f32 %v394_v47, %v393_v39 }
  0xf6   : > { %v392_v51 = vadd.f32 %v382_v49, %v372_v44  ;;  %v386_v52 = vld [vmem:[#allocation2 + $0x62] sm:$0xff]  ;;  %v407_v55 = vadd.f32 %v398_v48, %v397_v40 }
  0xf7   : > { %v404_v54 = vadd.f32 %v395_v41, %v394_v47  ;;  %v396_v56 = vadd.f32 %v386_v52, %v376_v50  ;;  %v411_v60 = vadd.f32 %v403_v53, %v395_v41 }
  0xf8   : > { %v401_v57 = vadd.f32 %v392_v51, %v391_v33  ;;  %v402_v58 = vadd.f32 %v393_v39, %v392_v51  ;;  %v408_v59 = vadd.f32 %v400_v46, %v392_v51  ;;  %v415_v62 = vadd.f32 %v407_v55, %v399_v37 }
  0xf9   : > { %v405_v63 = vadd.f32 %v396_v56, %v395_v41  ;;  %v406_v0 = vadd.f32 %v397_v40, %v396_v56  ;;  %v412_v4 = vadd.f32 %v404_v54, %v396_v56  ;;  %v419_v5 = vmul.f32 0.11111111, %v411_v60 }
  0xfa   : > { %v409_v1 = vadd.f32 %v401_v57, %v393_v39  ;;  %v410_v2 = vadd.f32 %v402_v58, %v394_v47  ;;  %v416_v3 = vmul.f32 0.11111111, %v408_v59  ;;  %v423_v7 = vmul.f32 0.11111111, %v415_v62 }
  0xfb   : > { %v413_v8 = vadd.f32 %v405_v63, %v397_v40  ;;  %v414_v9 = vadd.f32 %v406_v0, %v398_v48  ;;  %v420_v13 = vmul.f32 0.11111111, %v412_v4  ;;  %v434_v14 = vmul.f32 %v576_v61, %v419_v5 }
  0xfc   : > { %v417_v10 = vmul.f32 0.11111111, %v409_v1  ;;  %v418_v11 = vmul.f32 0.11111111, %v410_v2  ;;  %v431_v12 = vmul.f32 %v576_v61, %v416_v3  ;;  %v438_v15 = vmul.f32 %v576_v61, %v423_v7 }
  0xfd   : > { %v421_v16 = vmul.f32 0.11111111, %v413_v8  ;;  %v422_v17 = vmul.f32 0.11111111, %v414_v9  ;;  %v435_v21 = vmul.f32 %v576_v61, %v420_v13  ;;  %v449_v22 = vadd.f32 %v577_v6, %v434_v14 }
  0xfe   : > { %v432_v18 = vmul.f32 %v576_v61, %v417_v10  ;;  %v433_v19 = vmul.f32 %v576_v61, %v418_v11  ;;  %v446_v20 = vadd.f32 %v577_v6, %v431_v12  ;;  %v453_v23 = vadd.f32 %v577_v6, %v438_v15 }
  0xff   : > { %v436_v24 = vmul.f32 %v576_v61, %v421_v16  ;;  %v437_v25 = vmul.f32 %v576_v61, %v422_v17  ;;  %v450_v28 = vadd.f32 %v577_v6, %v435_v21  ;;  %v457_v29 = vmax.f32 %v449_v22, 0.0 }
 0x100   : > { %v447_v26 = vadd.f32 %v577_v6, %v432_v18  ;;  %v448_v27 = vadd.f32 %v577_v6, %v433_v19  ;;  %v461_v30 = vmax.f32 %v453_v23, 0.0  ;;  %v454_v33 = vmax.f32 %v446_v20, 0.0 }
 0x101   : > { %v451_v31 = vadd.f32 %v577_v6, %v436_v24  ;;  %v452_v32 = vadd.f32 %v577_v6, %v437_v25  ;;  %v458_v36 = vmax.f32 %v450_v28, 0.0 }
 0x102   : > { %v455_v34 = vmax.f32 %v447_v26, 0.0  ;;  %v456_v35 = vmax.f32 %v448_v27, 0.0 }
 0x103   : > { %v459_v37 = vmax.f32 %v451_v31, 0.0  ;;  %v460_v38 = vmax.f32 %v452_v32, 0.0 }
 0x104   : > { %v601_v39 = vpack.c.bf16 %v455_v34, %v454_v33  ;;  %v606_v40 = vpack.c.bf16 %v457_v29, %v456_v35 }
 0x105   : > { %v611_v41 = vpack.c.bf16 %v459_v37, %v458_v36  ;;  %v616_v42 = vpack.c.bf16 %v461_v30, %v460_v38 }
 0x106   : > { %602 = vst [vmem:[%s197_s5] sm:$0xff] %v601_v39   ;;  %618 = vst [vmem:[%s197_s5 + $0x8] sm:$0xff] %v606_v40  }
 0x107   : > { %619 = vst [vmem:[%s197_s5 + $0x10] sm:$0xff] %v611_v41   ;;  %620 = vst [vmem:[%s197_s5 + $0x18] sm:$0xff] %v616_v42  }
 0x108 PF: > { %s14_s15 = sadd.s32 1, %s664_s15  }
 0x109   : > { %p11_p4 = scmp.ge.s32.totalorder %s14_s15, 4  }
 0x10b   :  { %13 = sbr.rel (!%p11_p4) target bundleno = 1 (0x1), region = 67 }

// kernel: _lambda_.12
= control target key start
LH: loop header
LB: loop body
LE: loop exit
PB: predicated region body
PF: predicated region fallthrough
CT: control target
= control target key end

     0   :  { %s4239_s15 = smov 0   ;;  %s5587_s0 = inlined_call_operand.vmem [shape: bf16[2,8,8,224], index: 0, kind: input, shape index: {}]   ;;  %s5588_s1 = inlined_call_operand.vmem [shape: bf16[7,224,256], index: 1, kind: input, shape index: {}]   ;;  %s5589_s2 = inlined_call_operand.vmem [shape: f32[1,256], index: 2, kind: input, shape index: {}]   ;;  %s5590_s3 = inlined_call_operand.vmem [shape: f32[1,256], index: 3, kind: input, shape index: {}]   ;;  %s5591_s4 = inlined_call_operand.vmem [shape: bf16[2,8,8,256], index: 4, kind: output, shape index: {}]  }
   0x1 LB: > { %s3271_s16 = sadd.s32 4294967295, %s4212_s15   ;;  %p3275_p0 = scmp.ge.s32.totalorder %s4212_s15, 1  ;;  %s4212_s15 = sphi %s4239_s15, %s14_s15  }
   0x2   : > { %p162_p1 = scmp.lt.s32.totalorder %s4212_s15, 3 }
   0x4   : > { %p163_p2 = pnand %p3275_p0, %p162_p1 }
   0x5   : > { %v3904_v0 = vld [vmem:[%s5588_s1 + $0xe4] ss:$8 sps:$4 sm:$0xff] (!%p163_p2)   ;;  %v3908_v2 = vld [vmem:[%s5588_s1 + $0xe0] ss:$8 sps:$4 sm:$0xff] (!%p163_p2)   ;;  %v3910_v4 = vld [vmem:[%s5588_s1 + $0xf4] ss:$8 sps:$4 sm:$0xff] (!%p163_p2)  }
   0x6   : > { %166 = sbr.rel (%p163_p2) target bundleno = 490 (0x1ea), region = 36  ;;  %v3906_v1 = vld [vmem:[%s5588_s1 + $0x2a4] ss:$8 sps:$4 sm:$0xff] (!%p163_p2)   ;;  %779 = vmatprep.subr.bf16.mxu1 (!%p163_p2), %v3904_v0  ;;  %v3909_v3 = vld [vmem:[%s5588_s1 + $0x2a0] ss:$8 sps:$4 sm:$0xff] (!%p163_p2)   ;;  %p188_p3 = scmp.lt.s32.totalorder (!%p163_p2), %s3271_s16, 1 }
   0x7   : > { %1834 = vmatprep.subr.bf16.mxu0 (!%p163_p2), %v3906_v1  ;;  %780 = vmatpush1.bf16.msra.mxu1 (!%p163_p2), %v3908_v2  ;;  %v3912_v5 = vld [vmem:[%s5588_s1 + $0x2b4] ss:$8 sps:$4 sm:$0xff] (!%p163_p2)   ;;  %v3914_v6 = vld [vmem:[%s5588_s1 + $0xf0] ss:$8 sps:$4 sm:$0xff] (!%p163_p2)   ;;  %v3916_v8 = vld [vmem:[%s5588_s1 + $0x104] ss:$8 sps:$4 sm:$0xff] (!%p163_p2)  }
   0x8   : > { %1835 = vmatpush1.bf16.msra.mxu0 (!%p163_p2), %v3909_v3  ;;  %781 = vmatprep.subr.bf16.mxu1 (!%p163_p2), %v3910_v4  ;;  %v3915_v7 = vld [vmem:[%s5588_s1 + $0x2b0] ss:$8 sps:$4 sm:$0xff] (!%p163_p2)   ;;  %v3918_v9 = vld [vmem:[%s5588_s1 + $0x2c4] ss:$8 sps:$4 sm:$0xff] (!%p163_p2)   ;;  %v3920_v10 = vld [vmem:[%s5588_s1 + $0x100] ss:$8 sps:$4 sm:$0xff] (!%p163_p2)  }
   0x9   : > { %1836 = vmatprep.subr.bf16.mxu0 (!%p163_p2), %v3912_v5  ;;  %v3921_v11 = vld [vmem:[%s5588_s1 + $0x2c0] ss:$8 sps:$4 sm:$0xff] (!%p163_p2)   ;;  %v3922_v12 = vld [vmem:[%s5588_s1 + $0x114] ss:$8 sps:$4 sm:$0xff] (!%p163_p2)   ;;  %v3926_v14 = vld [vmem:[%s5588_s1 + $0x110] ss:$8 sps:$4 sm:$0xff] (!%p163_p2)  }
   0xa   : > { %v3924_v13 = vld [vmem:[%s5588_s1 + $0x2d4] ss:$8 sps:$4 sm:$0xff] (!%p163_p2)   ;;  %v3927_v15 = vld [vmem:[%s5588_s1 + $0x2d0] ss:$8 sps:$4 sm:$0xff] (!%p163_p2)   ;;  %v3928_v16 = vld [vmem:[%s5588_s1 + $0x124] ss:$8 sps:$4 sm:$0xff] (!%p163_p2)  }
   0xb   : > { %782 = vmatpush1.bf16.msra.mxu1 (!%p163_p2), %v3914_v6  ;;  %v3930_v17 = vld [vmem:[%s5588_s1 + $0x2e4] ss:$8 sps:$4 sm:$0xff] (!%p163_p2)   ;;  %v3932_v18 = vld [vmem:[%s5588_s1 + $0x120] ss:$8 sps:$4 sm:$0xff] (!%p163_p2)   ;;  %v3934_v20 = vld [vmem:[%s5588_s1 + $0x134] ss:$8 sps:$4 sm:$0xff] (!%p163_p2)  }
   0xc   : > { %1837 = vmatpush1.bf16.msra.mxu0 (!%p163_p2), %v3915_v7  ;;  %783 = vmatprep.subr.bf16.mxu1 (!%p163_p2), %v3916_v8  ;;  %v3933_v19 = vld [vmem:[%s5588_s1 + $0x2e0] ss:$8 sps:$4 sm:$0xff] (!%p163_p2)   ;;  %v3936_v21 = vld [vmem:[%s5588_s1 + $0x2f4] ss:$8 sps:$4 sm:$0xff] (!%p163_p2)   ;;  %v3938_v22 = vld [vmem:[%s5588_s1 + $0x130] ss:$8 sps:$4 sm:$0xff] (!%p163_p2)  }
   0xd   : > { %1838 = vmatprep.subr.bf16.mxu0 %v3918_v9  ;;  %v3939_v23 = vld [vmem:[%s5588_s1 + $0x2f0] ss:$8 sps:$4 sm:$0xff]   ;;  %v3940_v24 = vld [vmem:[%s5588_s1 + $0x144] ss:$8 sps:$4 sm:$0xff]   ;;  %v3944_v26 = vld [vmem:[%s5588_s1 + $0x140] ss:$8 sps:$4 sm:$0xff]  }
   0xe   : > { %v3942_v25 = vld [vmem:[%s5588_s1 + $0x304] ss:$8 sps:$4 sm:$0xff]   ;;  %v3945_v27 = vld [vmem:[%s5588_s1 + $0x300] ss:$8 sps:$4 sm:$0xff]   ;;  %v3946_v28 = vld [vmem:[%s5588_s1 + $0x154] ss:$8 sps:$4 sm:$0xff]  }
   0xf   : > { %784 = vmatpush1.bf16.msra.mxu1 %v3920_v10  ;;  %v3948_v29 = vld [vmem:[%s5588_s1 + $0x314] ss:$8 sps:$4 sm:$0xff]   ;;  %v3950_v30 = vld [vmem:[%s5588_s1 + $0x150] ss:$8 sps:$4 sm:$0xff]   ;;  %v3952_v32 = vld [vmem:[%s5588_s1 + $0x164] ss:$8 sps:$4 sm:$0xff]  }
  0x10   : > { %1839 = vmatpush1.bf16.msra.mxu0 %v3921_v11  ;;  %785 = vmatprep.subr.bf16.mxu1 %v3922_v12  ;;  %v3951_v31 = vld [vmem:[%s5588_s1 + $0x310] ss:$8 sps:$4 sm:$0xff]   ;;  %v3954_v33 = vld [vmem:[%s5588_s1 + $0x324] ss:$8 sps:$4 sm:$0xff]   ;;  %s5616_s16 = smov (!%p188_p3, %s3271_s16), 1  ;;  %vm199_vm0 = vcmask 1041408  }
  0x11   : > { %1840 = vmatprep.subr.bf16.mxu0 %v3924_v13  ;;  %v3956_v34 = vld [vmem:[%s5588_s1 + $0x160] ss:$8 sps:$4 sm:$0xff]   ;;  %v3958_v36 = vld [vmem:[%s5588_s1 + $0x174] ss:$8 sps:$4 sm:$0xff]   ;;  %s3762_s21 = sshll.u32 %s5616_s16, 6  ;;  %vm202_vm2 = vcmask 783364  }
  0x12   : > { %v3957_v35 = vld [vmem:[%s5588_s1 + $0x320] ss:$8 sps:$4 sm:$0xff]   ;;  %v3960_v37 = vld [vmem:[%s5588_s1 + $0x334] ss:$8 sps:$4 sm:$0xff]   ;;  %vm200_vm1 = vsmask.f32 1280  ;;  %s4382_s30 = scalar_lea.vmem %s5587_s0, %s3762_s21  ;;  %s5548_s28 = scalar_lea.vmem %s5591_s4, %s3762_s21 }
  0x13   : > { %786 = vmatpush1.bf16.msra.mxu1 %v3926_v14  ;;  %vm203_vm3 = vsmask.f32 5376  ;;  %v3962_v38 = vld [vmem:[%s5588_s1 + $0x170] ss:$8 sps:$4 sm:$0xff]   ;;  %vm231_vm4 = vsmask.f32 7942  ;;  %vm201_vm5 = vmand %vm199_vm0, %vm200_vm1 }
  0x14   : > { %1841 = vmatpush1.bf16.msra.mxu0 %v3927_v15  ;;  %787 = vmatprep.subr.bf16.mxu1 %v3928_v16  ;;  %v3963_v39 = vld [vmem:[%s5588_s1 + $0x330] ss:$8 sps:$4 sm:$0xff]   ;;  %v3964_v40 = vld [vmem:[%s5588_s1 + $0x184] ss:$8 sps:$4 sm:$0xff]   ;;  %vm230_vm6 = vcmask 1042433   ;;  %vm233_vm7 = vcmask 784389   ;;  %vm204_vm8 = vmand %vm202_vm2, %vm203_vm3 }
  0x15   : > { %1842 = vmatprep.subr.bf16.mxu0 %v3930_v17  ;;  %v3966_v41 = vld [vmem:[%s5588_s1 + $0x344] ss:$8 sps:$4 sm:$0xff]   ;;  %v3968_v43 = vld [vmem:[%s5588_s1 + $0x180] ss:$8 sps:$4 sm:$0xff]   ;;  %v209_v45 = vld [vmem:[#allocation2 + $0x10] sm:$0x33] }
  0x16   : > { %v206_v42 = vld [vmem:[#allocation2] sm:$0x33]  ;;  %vm234_vm9 = vsmask.f32 7958  ;;  %v237_v46 = vld [vmem:[#allocation2 + $0x8] sm:$0x66]  ;;  %vm4400_vm10 = vmor %vm204_vm8, %vm201_vm5 }
  0x17   : > { %788 = vmatpush1.bf16.msra.mxu1 %v3932_v18  ;;  %v3969_v44 = vld [vmem:[%s5588_s1 + $0x340] ss:$8 sps:$4 sm:$0xff]   ;;  %v3970_v47 = vld [vmem:[%s5588_s1 + $0x194] ss:$8 sps:$4 sm:$0xff]   ;;  %vm357_vm11 = vcmask 1043457   ;;  %v207_v51 = vsel %vm4400_vm10, 0, %v206_v42  ;;  %vm232_vm12 = vmand %vm230_vm6, %vm231_vm4 }
  0x18   : > { %1843 = vmatpush1.bf16.msra.mxu0 %v3933_v19  ;;  %789 = vmatprep.subr.bf16.mxu1 %v3934_v20  ;;  %v240_v49 = vld [vmem:[#allocation2 + $0x18] sm:$0x66]  ;;  %v261_v50 = vld [vmem:[%s4382_s30] sm:$0xff]  ;;  %v210_v52 = vsel %vm4400_vm10, 0, %v209_v45  ;;  %v262_v53 = vld [vmem:[%s4382_s30 + $0x8] sm:$0xff]  ;;  %vm359_vm14 = vcmask 785413  }
  0x19   : > { %1844 = vmatprep.subr.bf16.mxu0 %v3936_v21  ;;  %v270_v54 = vshrl.u32 %v261_v50, 16  ;;  %v273_v55 = vshll.u32 %v261_v50, 16  ;;  %v3972_v56 = vld [vmem:[%s5588_s1 + $0x354] ss:$8 sps:$4 sm:$0xff]   ;;  %208 = vst [vmem:[#allocation2] sm:$0x33] %v207_v51  ;;  %vm235_vm13 = vmand %vm233_vm7, %vm234_vm9 }
  0x1a   : > { %211 = vst [vmem:[#allocation2 + $0x10] sm:$0x33] %v210_v52  ;;  %v279_v57 = vshrl.u32 %v262_v53, 16  ;;  %v282_v58 = vshll.u32 %v262_v53, 16  ;;  %vm4417_vm15 = vmor %vm235_vm13, %vm232_vm12  ;;  %v3974_v3 = vld [vmem:[%s5588_s1 + $0x190] ss:$8 sps:$4 sm:$0xff]  }
  0x1b   : > { %790 = vmatpush1.bf16.msra.mxu1 %v3938_v22  ;;  %v272_v60 = vrot.slane %v270_v54, 6  ;;  %v275_v61 = vrot.slane %v273_v55, 7  ;;  %v238_v62 = vsel %vm4417_vm15, 0, %v237_v46  ;;  %v241_v63 = vsel %vm4417_vm15, 0, %v240_v49  ;;  %vm4427_vm2 = vmand %vm357_vm11, %vm231_vm4  ;;  %v3975_v4 = vld [vmem:[%s5588_s1 + $0x350] ss:$8 sps:$4 sm:$0xff]  }
  0x1c   : > { %1845 = vmatpush1.bf16.msra.mxu0 %v3939_v23  ;;  %791 = vmatprep.subr.bf16.mxu1 %v3940_v24  ;;  %v281_v0 = vrot.slane %v279_v57, 6  ;;  %v284_v1 = vrot.slane %v282_v58, 7  ;;  %239 = vst [vmem:[#allocation2 + $0x8] sm:$0x66] %v238_v62  ;;  %242 = vst [vmem:[#allocation2 + $0x18] sm:$0x66] %v241_v63 }
  0x1d   : > { %1846 = vmatprep.subr.bf16.mxu0 %v3942_v25  ;;  %v276_v5 = vor.u32 %v275_v61, %v272_v60  ;;  %vm360_vm3 = vmand %vm359_vm14, %vm234_vm9  ;;  %v3976_v6 = vld [vmem:[%s5588_s1 + $0x1a4] ss:$8 sps:$4 sm:$0xff]   ;;  %v3980_v9 = vld [vmem:[%s5588_s1 + $0x1a0] ss:$8 sps:$4 sm:$0xff]   ;;  %vm454_vm5 = vsmask.f32 3328 }
  0x1e   : > { %v3978_v7 = vld [vmem:[%s5588_s1 + $0x364] ss:$8 sps:$4 sm:$0xff]   ;;  %v285_v8 = vor.u32 %v284_v1, %v281_v0  ;;  %vm4450_vm4 = vmor %vm360_vm3, %vm4427_vm2  ;;  %v3981_v11 = vld [vmem:[%s5588_s1 + $0x360] ss:$8 sps:$4 sm:$0xff]   ;;  %vm455_vm6 = vsmask.f32 7440 }
  0x1f   : > { %792 = vmatpush1.bf16.msra.mxu1 %v3944_v26  ;;  %v3982_v12 = vld [vmem:[%s5588_s1 + $0x1b4] ss:$8 sps:$4 sm:$0xff]   ;;  %v277_v13 = vrot.slane %v276_v5, 4  ;;  %v3986_v20 = vld [vmem:[%s5588_s1 + $0x1b0] ss:$8 sps:$4 sm:$0xff]   ;;  %vm766_vm8 = vcmask 785408   ;;  %vm4515_vm11 = vmor %vm454_vm5, %vm455_vm6 }
  0x20   : > { %1847 = vmatpush1.bf16.msra.mxu0 %v3945_v27  ;;  %793 = vmatprep.subr.bf16.mxu1 %v3946_v28  ;;  %v286_v14 = vrot.slane %v285_v8, 4  ;;  %v362_v15 = vld [vmem:[#allocation2] sm:$0xee]  ;;  %v3984_v17 = vld [vmem:[%s5588_s1 + $0x374] ss:$8 sps:$4 sm:$0xff]   ;;  %vm1137_vm13 = vcmask 1042432  }
  0x21   : > { %1848 = vmatprep.subr.bf16.mxu0 %v3948_v29  ;;  %v368_v16 = vld [vmem:[#allocation2 + $0x10] sm:$0xee]  ;;  %v363_v18 = vsel %vm4450_vm4, %v276_v5, %v362_v15  ;;  %v3990_v26 = vld [vmem:[%s5588_s1 + $0x4] ss:$8 sps:$4 sm:$0xff]   ;;  %vm1478_vm7 = vsmask.f32 2304 }
  0x22   : > { %v369_v19 = vsel %vm4450_vm4, %v285_v8, %v368_v16  ;;  %364 = vst [vmem:[#allocation2] sm:$0xee] %v363_v18  ;;  %v3987_v23 = vld [vmem:[%s5588_s1 + $0x370] ss:$8 sps:$4 sm:$0xff]   ;;  %v3993_v27 = vld [vmem:[%s5588_s1 + $0x384] ss:$8 sps:$4 sm:$0xff]  }
  0x23   : > { %794 = vmatpush1.bf16.msra.mxu1 %v3950_v30  ;;  %370 = vst [vmem:[#allocation2 + $0x10] sm:$0xee] %v369_v19  ;;  %v365_v21 = vld [vmem:[#allocation2 + $0x8] sm:$0x33]  ;;  %v371_v22 = vld [vmem:[#allocation2 + $0x18] sm:$0x33] }
  0x24   : > { %1849 = vmatpush1.bf16.msra.mxu0 %v3951_v31  ;;  %795 = vmatprep.subr.bf16.mxu1 %v3952_v32  ;;  %v366_v24 = vsel %vm4400_vm10, %v277_v13, %v365_v21  ;;  %v372_v25 = vsel %vm4400_vm10, %v286_v14, %v371_v22  ;;  %vm1479_vm9 = vsmask.f32 6416  ;;  %v3996_v21 = vld [vmem:[%s5588_s1 + $0x14] ss:$8 sps:$4 sm:$0xff]   ;;  %vm1138_vm14 = vcmask 1046532  }
  0x25   : > { %1850 = vmatprep.subr.bf16.mxu0 %v3954_v33  ;;  %367 = vst [vmem:[#allocation2 + $0x8] sm:$0x33] %v366_v24  ;;  %373 = vst [vmem:[#allocation2 + $0x18] sm:$0x33] %v372_v25  ;;  %v3991_v24 = vld [vmem:[%s5588_s1 + $0x380] ss:$8 sps:$4 sm:$0xff]  }
  0x26   : > { %vm4529_vm12 = vmor %vm1478_vm7, %vm1479_vm9  ;;  %v3994_v25 = vld [vmem:[%s5588_s1 + $0x10] ss:$8 sps:$4 sm:$0xff]   ;;  %vm1947_vm3 = vcmask 1045508   ;;  %v4048_v59 = vld [vmem:[%s5588_s1 + $0xa0] ss:$8 sps:$4 sm:$0xff]  }
  0x27   : > { %796 = vmatpush1.bf16.msra.mxu1 %v3956_v34  ;;  %vm4597_vm2 = vmor %vm1137_vm13, %vm1138_vm14  ;;  %v4063_v10 = vld [vmem:[%s5588_s1 + $0x440] ss:$8 sps:$4 sm:$0xff]   ;;  %v4069_v48 = vld [vmem:[%s5588_s1 + $0x450] ss:$8 sps:$4 sm:$0xff]  }
  0x28   : > { %1851 = vmatpush1.bf16.msra.mxu0 %v3957_v35  ;;  %797 = vmatprep.subr.bf16.mxu1 %v3958_v36 }
  0x29   : > { %1852 = vmatprep.subr.bf16.mxu0 %v3960_v37  ;;  %v4483_v28 = vld [vmem:[#allocation2] sm:$0xff] }
  0x2a   : > { %v4485_v29 = vld [vmem:[#allocation2 + $0x10] sm:$0xff]  ;;  %v4487_v30 = vld [vmem:[#allocation2] sm:$0xee]  ;;  %v458_v31 = vshrl.u32 %v4483_v28, 16  ;;  %v461_v32 = vshll.u32 %v4483_v28, 16 }
  0x2b   : > { %798 = vmatpush1.bf16.msra.mxu1 %v3962_v38  ;;  %v472_v33 = vshrl.u32 %v4485_v29, 16  ;;  %v475_v34 = vshll.u32 %v4485_v29, 16  ;;  %v4493_v35 = vld [vmem:[#allocation2 + $0x10] sm:$0xee]  ;;  %v1482_v36 = vshrl.u32 %v4487_v30, 16  ;;  %v1485_v37 = vshll.u32 %v4487_v30, 16 }
  0x2c   : > { %1853 = vmatpush1.bf16.msra.mxu0 %v3963_v39  ;;  %799 = vmatprep.subr.bf16.mxu1 %v3964_v40  ;;  %v1500_v38 = vshrl.u32 %v4493_v35, 16  ;;  %v1503_v39 = vshll.u32 %v4493_v35, 16  ;;  %v4499_v40 = vld [vmem:[#allocation2 + $0x8] sm:$0x11]  ;;  %v460_v42 = vrot.slane %v458_v31, 4  ;;  %v3348_v45 = vcombine.low %v4483_v28, %v4485_v29 }
  0x2d   : > { %1854 = vmatprep.subr.bf16.mxu0 %v3966_v41  ;;  %v4501_v41 = vld [vmem:[#allocation2 + $0x18] sm:$0x11]  ;;  %v467_v46 = vshll.u32 %v4499_v40, 16  ;;  %v477_v49 = vrot.slane %v475_v34, 5  ;;  %v4509_v51 = vld [vmem:[#allocation2 + $0x8] sm:$0x33] }
  0x2e   : > { %v481_v50 = vshll.u32 %v4501_v41, 16  ;;  %v4511_v53 = vld [vmem:[#allocation2 + $0x18] sm:$0x33]  ;;  %v1484_v54 = vrot.slane %v1482_v36, 5  ;;  %v1487_v60 = vrot.slane %v1485_v37, 6  ;;  %v1491_v62 = vshrl.u32 %v4509_v51, 16 }
  0x2f   : > { %800 = vmatpush1.bf16.msra.mxu1 %v3968_v43  ;;  %v463_v43 = vrot.slane %v461_v32, 5  ;;  %v1494_v63 = vshll.u32 %v4509_v51, 16  ;;  %v1502_v0 = vrot.slane %v1500_v38, 5  ;;  %v1512_v8 = vshll.u32 %v4511_v53, 16  ;;  %v4002_v31 = vld [vmem:[%s5588_s1 + $0x24] ss:$8 sps:$4 sm:$0xff]  }
  0x30   : > { %1855 = vmatpush1.bf16.msra.mxu0 %v3969_v44  ;;  %801 = vmatprep.subr.bf16.mxu1 %v3970_v47  ;;  %v3349_v44 = vcombine.high %v4483_v28, %v4485_v29  ;;  %v474_v47 = vrot.slane %v472_v33, 4  ;;  %v483_v58 = vrot.slane %v481_v50, 5  ;;  %v1488_v2 = vor.u32 %v1487_v60, %v1484_v54  ;;  %v212_v32 = vld [vmem:[#allocation2 + $0x20] sm:$0x33]  ;;  %v215_v37 = vld [vmem:[#allocation2 + $0x30] sm:$0x33] }
  0x31   : > { %1856 = vmatprep.subr.bf16.mxu0 %v3972_v56  ;;  %v464_v52 = vor.u32 %v463_v43, %v460_v42  ;;  %v469_v56 = vrot.slane %v467_v46, 5  ;;  %v1514_v19 = vrot.slane %v1512_v8, 6  ;;  %v213_v36 = vsel %vm4400_vm10, 0, %v212_v32  ;;  %v243_v38 = vld [vmem:[#allocation2 + $0x28] sm:$0x66] }
  0x32   : > { %v478_v57 = vor.u32 %v477_v49, %v474_v47  ;;  %214 = vst [vmem:[#allocation2 + $0x20] sm:$0x33] %v213_v36  ;;  %v216_v42 = vsel %vm4400_vm10, 0, %v215_v37  ;;  %v244_v43 = vsel %vm4417_vm15, 0, %v243_v38  ;;  %v246_v46 = vld [vmem:[#allocation2 + $0x38] sm:$0x66] }
  0x33   : > { %802 = vmatpush1.bf16.msra.mxu1 %v3974_v3  ;;  %v465_v61 = vrot.slane %v464_v52, 4  ;;  %v1505_v3 = vrot.slane %v1503_v39, 6  ;;  %v263_v39 = vld [vmem:[%s4382_s30 + $0x10] sm:$0xff]  ;;  %v264_v47 = vld [vmem:[%s4382_s30 + $0x18] sm:$0xff]  ;;  %217 = vst [vmem:[#allocation2 + $0x30] sm:$0x33] %v216_v42 }
  0x34   : > { %1857 = vmatpush1.bf16.msra.mxu0 %v3975_v4  ;;  %803 = vmatprep.subr.bf16.mxu1 %v3976_v6  ;;  %v479_v1 = vrot.slane %v478_v57, 4  ;;  %v1509_v4 = vshrl.u32 %v4511_v53, 16  ;;  %v1493_v6 = vrot.slane %v1491_v62, 5  ;;  %v288_v49 = vshrl.u32 %v263_v39, 16  ;;  %v3997_v50 = vld [vmem:[%s5588_s1 + $0x390] ss:$8 sps:$4 sm:$0xff]  }
  0x35   : > { %1858 = vmatprep.subr.bf16.mxu0 %v3978_v7  ;;  %v470_v5 = vsel %vm4515_vm11, %v465_v61, %v469_v56  ;;  %v1496_v7 = vrot.slane %v1494_v63, 6  ;;  %v1506_v13 = vor.u32 %v1505_v3, %v1502_v0  ;;  %245 = vst [vmem:[#allocation2 + $0x28] sm:$0x66] %v244_v43  ;;  %v247_v52 = vsel %vm4417_vm15, 0, %v246_v46  ;;  %v4005_v60 = vld [vmem:[%s5588_s1 + $0x3a4] ss:$8 sps:$4 sm:$0xff]  }
  0x36   : > { %v1511_v14 = vrot.slane %v1509_v4, 5  ;;  %v291_v54 = vshll.u32 %v263_v39, 16  ;;  %v297_v56 = vshrl.u32 %v264_v47, 16  ;;  %v300_v57 = vshll.u32 %v264_v47, 16  ;;  %248 = vst [vmem:[#allocation2 + $0x38] sm:$0x66] %v247_v52 }
  0x37   : > { %804 = vmatpush1.bf16.msra.mxu1 %v3980_v9  ;;  %v484_v9 = vsel %vm4515_vm11, %v479_v1, %v483_v58  ;;  %v1497_v18 = vor.u32 %v1496_v7, %v1493_v6  ;;  %v4000_v58 = vld [vmem:[%s5588_s1 + $0x20] ss:$8 sps:$4 sm:$0xff]   ;;  %v290_v61 = vrot.slane %v288_v49, 6  ;;  %v4008_v62 = vld [vmem:[%s5588_s1 + $0x34] ss:$8 sps:$4 sm:$0xff]   ;;  %v1146_v3 = vrot.slane %v4501_v41, 5 }
  0x38   : > { %1859 = vmatpush1.bf16.msra.mxu0 %v3981_v11  ;;  %805 = vmatprep.subr.bf16.mxu1 %v3982_v12  ;;  %v1489_v12 = vrot.slane %v1488_v2, 4  ;;  %v3308_v15 = vcombine.low %v470_v5, %v484_v9  ;;  %v3309_v16 = vcombine.high %v470_v5, %v484_v9  ;;  %v293_v63 = vrot.slane %v291_v54, 7  ;;  %v4003_v4 = vld [vmem:[%s5588_s1 + $0x3a0] ss:$8 sps:$4 sm:$0xff]   ;;  %v4006_v5 = vld [vmem:[%s5588_s1 + $0x30] ss:$8 sps:$4 sm:$0xff]  }
  0x39   : > { %1860 = vmatprep.subr.bf16.mxu0 %v3984_v17  ;;  %v3988_v17 = vld [vmem:[%s5588_s1] ss:$8 sps:$4 sm:$0xff]   ;;  %v299_v0 = vrot.slane %v297_v56, 6  ;;  %v302_v1 = vrot.slane %v300_v57, 7  ;;  %v1142_v2 = vrot.slane %v4499_v40, 5  ;;  %v3388_v8 = vrot.slane %v4487_v30, 9 }
  0x3a   : > { %3344 = vmatprep.mubr.msk.bf16.mxu1 %vm766_vm8, %v3309_v16  ;;  %v1498_v22 = vsel %vm4529_vm12, %v1489_v12, %v1497_v18  ;;  %v294_v6 = vor.u32 %v293_v63, %v290_v61  ;;  %v4011_v40 = vld [vmem:[%s5588_s1 + $0x3b4] ss:$8 sps:$4 sm:$0xff]   ;;  %v4014_v41 = vld [vmem:[%s5588_s1 + $0x44] ss:$8 sps:$4 sm:$0xff]   ;;  %v3389_v9 = vrot.slane %v4493_v35, 9 }
  0x3b   : > { %806 = vmatpush1.bf16.msra.mxu1 %v3986_v20  ;;  %v1507_v20 = vrot.slane %v1506_v13, 4  ;;  %v303_v7 = vor.u32 %v302_v1, %v299_v0  ;;  %v4012_v16 = vld [vmem:[%s5588_s1 + $0x40] ss:$8 sps:$4 sm:$0xff]   ;;  %v380_v18 = vld [vmem:[#allocation2 + $0x30] sm:$0xee]  ;;  %v1951_v1 = vrot.slane %v4509_v51, 6 }
  0x3c   : > { %1861 = vmatpush1.bf16.msra.mxu0 %v3987_v23  ;;  %1040 = vmatprep.subr.bf16.mxu1 %v3990_v26  ;;  %v1515_v23 = vor.u32 %v1514_v19, %v1511_v14  ;;  %v295_v12 = vrot.slane %v294_v6, 4  ;;  %v374_v14 = vld [vmem:[#allocation2 + $0x20] sm:$0xee]  ;;  %v249_v32 = vld [vmem:[#allocation2 + $0x48] sm:$0x66] }
  0x3d   : > { %2190 = vmatprep.subr.bf16.mxu0 %v3993_v27  ;;  %v3999_v27 = vld [vmem:[%s5588_s1 + $0x394] ss:$8 sps:$4 sm:$0xff]   ;;  %v304_v13 = vrot.slane %v303_v7, 4  ;;  %v375_v35 = vsel %vm4450_vm4, %v294_v6, %v374_v14  ;;  %v250_v38 = vsel %vm4417_vm15, 0, %v249_v32  ;;  %v266_v42 = vld [vmem:[%s4382_s30 + $0x28] sm:$0xff] }
  0x3e   : > { %812 = vmatmul.mubr.bf16.vlgmr.msra.gmra.mrb[0].mxu1 %v3308_v15  ;;  %v1516_v26 = vsel %vm4529_vm12, %v1507_v20, %v1515_v23  ;;  %v218_v15 = vld [vmem:[#allocation2 + $0x40] sm:$0x33]  ;;  %v4009_v23 = vld [vmem:[%s5588_s1 + $0x3b0] ss:$8 sps:$4 sm:$0xff]   ;;  %376 = vst [vmem:[#allocation2 + $0x20] sm:$0xee] %v375_v35 }
  0x3f   : > { %1041 = vmatpush1.bf16.msra.mxu1 %v3988_v17  ;;  %v3492_v33 = vcombine.low %v1498_v22, %v1516_v26  ;;  %v3493_v34 = vcombine.high %v1498_v22, %v1516_v26  ;;  %v377_v17 = vld [vmem:[#allocation2 + $0x28] sm:$0x33]  ;;  %v219_v19 = vsel %vm4400_vm10, 0, %v218_v15  ;;  %v265_v20 = vld [vmem:[%s4382_s30 + $0x20] sm:$0xff]  ;;  %v4615_v22 = vsel %vm4597_vm2, %v3389_v9, %v1146_v3  ;;  %v252_v39 = vld [vmem:[#allocation2 + $0x58] sm:$0x66] }
  0x40   : > { %1042 = vmatprep.subr.bf16.mxu1 %v3996_v21  ;;  %v4611_v21 = vsel %vm4597_vm2, %v3388_v8, %v1142_v2  ;;  %v381_v26 = vsel %vm4450_vm4, %v303_v7, %v380_v18  ;;  %220 = vst [vmem:[#allocation2 + $0x40] sm:$0x33] %v219_v19  ;;  %v306_v43 = vshrl.u32 %v265_v20, 16  ;;  %251 = vst [vmem:[#allocation2 + $0x48] sm:$0x66] %v250_v38  ;;  %v253_v46 = vsel %vm4417_vm15, 0, %v252_v39 }
  0x41   : > { %3528 = vmatprep.mubr.msk.bf16.mxu0 %vm766_vm8, %v3493_v34  ;;  %382 = vst [vmem:[#allocation2 + $0x30] sm:$0xee] %v381_v26  ;;  %v309_v47 = vshll.u32 %v265_v20, 16  ;;  %v315_v49 = vshrl.u32 %v266_v42, 16  ;;  %v4017_v52 = vld [vmem:[%s5588_s1 + $0x3c4] ss:$8 sps:$4 sm:$0xff]  }
  0x42   : > { %1867 = vmatmul.mubr.bf16.vlgmr.msra.gmra.mrb[0].mxu0 %v3492_v33  ;;  %254 = vst [vmem:[#allocation2 + $0x58] sm:$0x66] %v253_v46  ;;  %v308_v54 = vrot.slane %v306_v43, 6  ;;  %v4015_v56 = vld [vmem:[%s5588_s1 + $0x3c0] ss:$8 sps:$4 sm:$0xff]   ;;  %v1955_v7 = vrot.slane %v4511_v53, 6 }
  0x43   : > { %1043 = vmatpush1.bf16.msra.mxu1 %v3994_v25  ;;  %2191 = vmatpush1.bf16.msra.mxu0 %v3991_v24  ;;  %v4020_v24 = vld [vmem:[%s5588_s1 + $0x54] ss:$8 sps:$4 sm:$0xff]   ;;  %v378_v25 = vsel %vm4400_vm10, %v295_v12, %v377_v17  ;;  %v311_v57 = vrot.slane %v309_v47, 7  ;;  %v4018_v61 = vld [vmem:[%s5588_s1 + $0x50] ss:$8 sps:$4 sm:$0xff]  }
  0x44   : > { %1044 = vmatprep.subr.bf16.mxu1 %v4002_v31  ;;  %2192 = vmatprep.subr.bf16.mxu0 %v3999_v27  ;;  %v383_v27 = vld [vmem:[#allocation2 + $0x38] sm:$0x33]  ;;  %v221_v31 = vld [vmem:[#allocation2 + $0x50] sm:$0x33]  ;;  %379 = vst [vmem:[#allocation2 + $0x28] sm:$0x33] %v378_v25 }
  0x45   : > { %v384_v36 = vsel %vm4400_vm10, %v304_v13, %v383_v27  ;;  %v222_v37 = vsel %vm4400_vm10, 0, %v221_v31  ;;  %v4026_v63 = vld [vmem:[%s5588_s1 + $0x64] ss:$8 sps:$4 sm:$0xff]   ;;  %v4655_v0 = vor.u32 %v311_v57, %v308_v54  ;;  %v4024_v2 = vld [vmem:[%s5588_s1 + $0x60] ss:$8 sps:$4 sm:$0xff]  }
  0x46   : > { %385 = vst [vmem:[#allocation2 + $0x38] sm:$0x33] %v384_v36  ;;  %223 = vst [vmem:[#allocation2 + $0x50] sm:$0x33] %v222_v37  ;;  %v4661_v3 = vld [vmem:[#allocation2 + $0x20] sm:$0xff] }
  0x47   : > { %1045 = vmatpush1.bf16.msra.mxu1 %v4000_v58  ;;  %2193 = vmatpush1.bf16.msra.mxu0 %v3997_v50  ;;  %v318_v50 = vshll.u32 %v266_v42, 16  ;;  %v317_v58 = vrot.slane %v315_v49, 6  ;;  %v386_v6 = vld [vmem:[#allocation2 + $0x40] sm:$0xee]  ;;  %v4021_v8 = vld [vmem:[%s5588_s1 + $0x3d0] ss:$8 sps:$4 sm:$0xff]  }
  0x48   : > { %1046 = vmatprep.subr.bf16.mxu1 %v4008_v62  ;;  %2194 = vmatprep.subr.bf16.mxu0 %v4005_v60  ;;  %v4023_v62 = vld [vmem:[%s5588_s1 + $0x3d4] ss:$8 sps:$4 sm:$0xff]   ;;  %v486_v12 = vshrl.u32 %v4661_v3, 16  ;;  %v489_v13 = vshll.u32 %v4661_v3, 16  ;;  %v387_v15 = vsel %vm4450_vm4, %v4655_v0, %v386_v6  ;;  %v4030_v31 = vld [vmem:[%s5588_s1 + $0x70] ss:$8 sps:$4 sm:$0xff]  }
  0x49   : > { %v320_v60 = vrot.slane %v318_v50, 7  ;;  %388 = vst [vmem:[#allocation2 + $0x40] sm:$0xee] %v387_v15  ;;  %v4694_v26 = vld [vmem:[#allocation2 + $0x30] sm:$0xee] }
  0x4a   : > { %v4027_v42 = vld [vmem:[%s5588_s1 + $0x3e0] ss:$8 sps:$4 sm:$0xff]   ;;  %v4078_v53 = vld [vmem:[%s5588_s1 + $0x464] ss:$8 sps:$4 sm:$0xff]  }
  0x4b   : > { %1047 = vmatpush1.bf16.msra.mxu1 %v4006_v5  ;;  %2195 = vmatpush1.bf16.msra.mxu0 %v4003_v4  ;;  %v4663_v4 = vld [vmem:[#allocation2 + $0x20] sm:$0xee]  ;;  %v4665_v5 = vor.u32 %v320_v60, %v317_v58  ;;  %v4676_v9 = vld [vmem:[#allocation2 + $0x28] sm:$0x11]  ;;  %v1536_v58 = vshrl.u32 %v4694_v26, 16  ;;  %v1539_v60 = vshll.u32 %v4694_v26, 16 }
  0x4c   : > { %1048 = vmatprep.subr.bf16.mxu1 %v4014_v41  ;;  %2196 = vmatprep.subr.bf16.mxu0 %v4011_v40  ;;  %v4032_v40 = vld [vmem:[%s5588_s1 + $0x74] ss:$8 sps:$4 sm:$0xff]   ;;  %v1518_v14 = vshrl.u32 %v4663_v4, 16  ;;  %v495_v17 = vshll.u32 %v4676_v9, 16  ;;  %v1521_v20 = vshll.u32 %v4663_v4, 16  ;;  %v1150_v55 = vrot.slane %v4676_v9, 5 }
  0x4d   : > { %v4674_v41 = vld [vmem:[#allocation2 + $0x30] sm:$0xff]  ;;  %v4687_v35 = vld [vmem:[#allocation2 + $0x38] sm:$0x11]  ;;  %v4699_v38 = vld [vmem:[#allocation2 + $0x28] sm:$0x33]  ;;  %v1541_v15 = vrot.slane %v1539_v60, 6 }
  0x4e   : > { %v500_v18 = vshrl.u32 %v4674_v41, 16  ;;  %v503_v19 = vshll.u32 %v4674_v41, 16  ;;  %v509_v25 = vshll.u32 %v4687_v35, 16  ;;  %v1520_v27 = vrot.slane %v1518_v14, 5  ;;  %v4704_v47 = vld [vmem:[#allocation2 + $0x38] sm:$0x33] }
  0x4f   : > { %1049 = vmatpush1.bf16.msra.mxu1 %v4012_v16  ;;  %2197 = vmatpush1.bf16.msra.mxu0 %v4009_v23  ;;  %v4029_v16 = vld [vmem:[%s5588_s1 + $0x3e4] ss:$8 sps:$4 sm:$0xff]   ;;  %v488_v23 = vrot.slane %v486_v12, 4  ;;  %v497_v32 = vrot.slane %v495_v17, 5  ;;  %v1523_v39 = vrot.slane %v1521_v20, 6  ;;  %v1527_v49 = vshrl.u32 %v4699_v38, 16 }
  0x50   : > { %1050 = vmatprep.subr.bf16.mxu1 %v4020_v24  ;;  %2198 = vmatprep.subr.bf16.mxu0 %v4017_v52  ;;  %v491_v24 = vrot.slane %v489_v13, 5  ;;  %v502_v36 = vrot.slane %v500_v18, 4  ;;  %v505_v37 = vrot.slane %v503_v19, 5  ;;  %v511_v46 = vrot.slane %v509_v25, 5  ;;  %v4035_v52 = vld [vmem:[%s5588_s1 + $0x3f4] ss:$8 sps:$4 sm:$0xff]  }
  0x51   : > { %v1530_v50 = vshll.u32 %v4699_v38, 16  ;;  %v1524_v57 = vor.u32 %v1523_v39, %v1520_v27  ;;  %v389_v6 = vld [vmem:[#allocation2 + $0x48] sm:$0x33]  ;;  %v1538_v14 = vrot.slane %v1536_v58, 5  ;;  %v392_v17 = vld [vmem:[#allocation2 + $0x50] sm:$0xee] }
  0x52   : > { %v492_v43 = vor.u32 %v491_v24, %v488_v23  ;;  %v506_v54 = vor.u32 %v505_v37, %v502_v36  ;;  %v4033_v18 = vld [vmem:[%s5588_s1 + $0x3f0] ss:$8 sps:$4 sm:$0xff]   ;;  %v4726_v24 = vld [vmem:[#allocation2 + $0x40] sm:$0xff]  ;;  %v313_v36 = vrot.slane %v4655_v0, 4  ;;  %v322_v37 = vrot.slane %v4665_v5, 4 }
  0x53   : > { %1051 = vmatpush1.bf16.msra.mxu1 %v4018_v61  ;;  %2199 = vmatpush1.bf16.msra.mxu0 %v4015_v56  ;;  %v4038_v56 = vld [vmem:[%s5588_s1 + $0x84] ss:$8 sps:$4 sm:$0xff]   ;;  %v1525_v13 = vrot.slane %v1524_v57, 4  ;;  %v395_v23 = vld [vmem:[#allocation2 + $0x58] sm:$0x33]  ;;  %v1542_v27 = vor.u32 %v1541_v15, %v1538_v14  ;;  %v267_v15 = vld [vmem:[%s4382_s30 + $0x30] sm:$0xff] }
  0x54   : > { %1052 = vmatprep.subr.bf16.mxu1 %v4026_v63  ;;  %2200 = vmatprep.subr.bf16.mxu0 %v4023_v62  ;;  %v493_v61 = vrot.slane %v492_v43, 4  ;;  %v1529_v62 = vrot.slane %v1527_v49, 5  ;;  %v1532_v63 = vrot.slane %v1530_v50, 6  ;;  %v507_v12 = vrot.slane %v506_v54, 4  ;;  %v4735_v39 = vld [vmem:[#allocation2 + $0x40] sm:$0xee] }
  0x55   : > { %v224_v43 = vld [vmem:[#allocation2 + $0x60] sm:$0x33]  ;;  %v227_v54 = vld [vmem:[#allocation2 + $0x70] sm:$0x33]  ;;  %v255_v57 = vld [vmem:[#allocation2 + $0x68] sm:$0x66]  ;;  %v390_v60 = vsel %vm4400_vm10, %v313_v36, %v389_v6 }
  0x56   : > { %v1533_v19 = vor.u32 %v1532_v63, %v1529_v62  ;;  %v512_v25 = vsel %vm4515_vm11, %v507_v12, %v511_v46  ;;  %v1543_v58 = vrot.slane %v1542_v27, 4  ;;  %v4044_v0 = vld [vmem:[%s5588_s1 + $0x94] ss:$8 sps:$4 sm:$0xff]   ;;  %391 = vst [vmem:[#allocation2 + $0x48] sm:$0x33] %v390_v60  ;;  %v517_v62 = vshll.u32 %v4726_v24, 16 }
  0x57   : > { %1053 = vmatpush1.bf16.msra.mxu1 %v4024_v2  ;;  %2201 = vmatpush1.bf16.msra.mxu0 %v4021_v8  ;;  %v1545_v2 = vshrl.u32 %v4704_v47, 16  ;;  %v498_v8 = vsel %vm4515_vm11, %v493_v61, %v497_v32  ;;  %v4041_v32 = vld [vmem:[%s5588_s1 + $0x404] ss:$8 sps:$4 sm:$0xff]   ;;  %v514_v61 = vshrl.u32 %v4726_v24, 16  ;;  %v1554_v63 = vshrl.u32 %v4735_v39, 16 }
  0x58   : > { %1054 = vmatprep.subr.bf16.mxu1 %v4032_v40  ;;  %2202 = vmatprep.subr.bf16.mxu0 %v4029_v16  ;;  %v4036_v40 = vld [vmem:[%s5588_s1 + $0x80] ss:$8 sps:$4 sm:$0xff]   ;;  %v1548_v16 = vshll.u32 %v4704_v47, 16  ;;  %v3311_v49 = vcombine.high %v498_v8, %v512_v25  ;;  %v3310_v46 = vcombine.low %v498_v8, %v512_v25  ;;  %v1557_v6 = vshll.u32 %v4735_v39, 16  ;;  %v4056_v60 = vld [vmem:[%s5588_s1 + $0xb4] ss:$8 sps:$4 sm:$0xff]  }
  0x59   : > { %v1547_v20 = vrot.slane %v1545_v2, 5  ;;  %v258_v2 = vld [vmem:[#allocation2 + $0x78] sm:$0x66]  ;;  %v225_v12 = vsel %vm4400_vm10, 0, %v224_v43  ;;  %v256_v14 = vsel %vm4417_vm15, 0, %v255_v57 }
  0x5a   : > { %v1550_v50 = vrot.slane %v1548_v16, 6  ;;  %3345 = vmatprep.mubr.msk.bf16.mxu1 %vm766_vm8, %v3311_v49  ;;  %v519_v16 = vrot.slane %v517_v62, 5  ;;  %226 = vst [vmem:[#allocation2 + $0x60] sm:$0x33] %v225_v12  ;;  %257 = vst [vmem:[#allocation2 + $0x68] sm:$0x66] %v256_v14 }
  0x5b   : > { %1055 = vmatpush1.bf16.msra.mxu1 %v4030_v31  ;;  %2203 = vmatpush1.bf16.msra.mxu0 %v4027_v42  ;;  %v1534_v31 = vsel %vm4529_vm12, %v1525_v13, %v1533_v19  ;;  %v393_v42 = vsel %vm4450_vm4, %v4665_v5, %v392_v17  ;;  %v4039_v5 = vld [vmem:[%s5588_s1 + $0x400] ss:$8 sps:$4 sm:$0xff]   ;;  %v228_v13 = vsel %vm4400_vm10, 0, %v227_v54  ;;  %v4765_v17 = vld [vmem:[%s4382_s30 + $0x38] sm:$0xff]  ;;  %v1559_v36 = vrot.slane %v1557_v6, 6 }
  0x5c   : > { %1056 = vmatprep.subr.bf16.mxu1 %v4038_v56  ;;  %2204 = vmatprep.subr.bf16.mxu0 %v4035_v52  ;;  %v396_v56 = vsel %vm4400_vm10, %v322_v37, %v395_v23  ;;  %v1551_v52 = vor.u32 %v1550_v50, %v1547_v20  ;;  %394 = vst [vmem:[#allocation2 + $0x50] sm:$0xee] %v393_v42  ;;  %v4042_v19 = vld [vmem:[%s5588_s1 + $0x90] ss:$8 sps:$4 sm:$0xff]   ;;  %v516_v20 = vrot.slane %v514_v61, 4  ;;  %v1556_v23 = vrot.slane %v1554_v63, 5 }
  0x5d   : > { %397 = vst [vmem:[#allocation2 + $0x58] sm:$0x33] %v396_v56  ;;  %822 = vmatmul.mubr.bf16.gmra.mrb[4].mxu1 %v3310_v46  ;;  %229 = vst [vmem:[#allocation2 + $0x70] sm:$0x33] %v228_v13  ;;  %v4047_v37 = vld [vmem:[%s5588_s1 + $0x414] ss:$8 sps:$4 sm:$0xff]  }
  0x5e   : > { %v1552_v8 = vsel %vm4529_vm12, %v1543_v58, %v1551_v52  ;;  %v520_v43 = vor.u32 %v519_v16, %v516_v20  ;;  %v324_v49 = vshrl.u32 %v267_v15, 16  ;;  %v327_v50 = vshll.u32 %v267_v15, 16  ;;  %v4801_v62 = vld [vmem:[#allocation2 + $0x48] sm:$0x11]  ;;  %v4961_v11 = vld [vmem:[#allocation2 + $0x20] sm:$0xcc] }
  0x5f   : > { %2205 = vmatpush1.bf16.msra.mxu0 %v4033_v18  ;;  %1057 = vmatpush1.bf16.msra.mxu1 %v4036_v40  ;;  %v3495_v25 = vcombine.high %v1534_v31, %v1552_v8  ;;  %v3494_v27 = vcombine.low %v1534_v31, %v1552_v8  ;;  %v4050_v18 = vld [vmem:[%s5588_s1 + $0xa4] ss:$8 sps:$4 sm:$0xff]   ;;  %v259_v40 = vsel %vm4417_vm15, 0, %v258_v2  ;;  %v4045_v31 = vld [vmem:[%s5588_s1 + $0x410] ss:$8 sps:$4 sm:$0xff]   ;;  %v1560_v46 = vor.u32 %v1559_v36, %v1556_v23  ;;  %vm4845_vm15 = vmor %vm199_vm0, %vm1947_vm3 }
  0x60   : > { %2206 = vmatprep.subr.bf16.mxu0 %v4041_v32  ;;  %1058 = vmatprep.subr.bf16.mxu1 %v4044_v0  ;;  %260 = vst [vmem:[#allocation2 + $0x78] sm:$0x66] %v259_v40  ;;  %v333_v32 = vshrl.u32 %v4765_v17, 16  ;;  %v336_v54 = vshll.u32 %v4765_v17, 16  ;;  %v521_v58 = vrot.slane %v520_v43, 4  ;;  %v326_v42 = vrot.slane %v324_v49, 6 }
  0x61   : > { %3529 = vmatprep.mubr.msk.bf16.mxu0 %vm766_vm8, %v3495_v25  ;;  %v4053_v0 = vld [vmem:[%s5588_s1 + $0x424] ss:$8 sps:$4 sm:$0xff]   ;;  %v329_v56 = vrot.slane %v327_v50, 7  ;;  %v4805_v2 = vrot.slane %v1560_v46, 4  ;;  %v523_v6 = vshll.u32 %v4801_v62, 16  ;;  %v2326_v30 = vshrl.u32 %v4961_v11, 16 }
  0x62   : > { %1877 = vmatmul.mubr.bf16.gmra.mrb[4].mxu0 %v3494_v27  ;;  %v4797_v52 = vrot.slane %v333_v32, 6  ;;  %v4816_v17 = vld [vmem:[#allocation2 + $0x48] sm:$0x33]  ;;  %v4059_v40 = vld [vmem:[%s5588_s1 + $0x434] ss:$8 sps:$4 sm:$0xff]  }
  0x63   : > { %1059 = vmatpush1.bf16.msra.mxu1 %v4042_v19  ;;  %2207 = vmatpush1.bf16.msra.mxu0 %v4039_v5  ;;  %v4799_v61 = vld [vmem:[#allocation2 + $0x50] sm:$0xff]  ;;  %v4051_v16 = vld [vmem:[%s5588_s1 + $0x420] ss:$8 sps:$4 sm:$0xff]   ;;  %v330_v23 = vor.u32 %v329_v56, %v326_v42  ;;  %v525_v25 = vrot.slane %v523_v6, 5  ;;  %v1566_v43 = vshll.u32 %v4816_v17, 16 }
  0x64   : > { %v4803_v63 = vld [vmem:[#allocation2 + $0x58] sm:$0x11]  ;;  %1060 = vmatprep.subr.bf16.mxu1 %v4050_v18  ;;  %2208 = vmatprep.subr.bf16.mxu0 %v4047_v37  ;;  %v528_v12 = vshrl.u32 %v4799_v61, 16  ;;  %v531_v13 = vshll.u32 %v4799_v61, 16  ;;  %v4811_v15 = vld [vmem:[#allocation2 + $0x50] sm:$0xee] }
  0x65   : > { %v537_v14 = vshll.u32 %v4803_v63, 16  ;;  %v4054_v5 = vld [vmem:[%s5588_s1 + $0xb0] ss:$8 sps:$4 sm:$0xff]   ;;  %v1572_v19 = vshrl.u32 %v4811_v15, 16  ;;  %v1575_v20 = vshll.u32 %v4811_v15, 16  ;;  %v1563_v37 = vshrl.u32 %v4816_v17, 16 }
  0x66   : > { %v4818_v8 = vld [vmem:[#allocation2 + $0x58] sm:$0x33]  ;;  %v530_v27 = vrot.slane %v528_v12, 4  ;;  %v533_v18 = vrot.slane %v531_v13, 5  ;;  %v4062_v32 = vld [vmem:[%s5588_s1 + $0xc4] ss:$8 sps:$4 sm:$0xff]   ;;  %v526_v46 = vsel %vm4515_vm11, %v521_v58, %v525_v25 }
  0x67   : > { %v539_v36 = vrot.slane %v537_v14, 5  ;;  %1061 = vmatpush1.bf16.msra.mxu1 %v4048_v59  ;;  %2209 = vmatpush1.bf16.msra.mxu0 %v4045_v31  ;;  %v1574_v49 = vrot.slane %v1572_v19, 5  ;;  %v1577_v50 = vrot.slane %v1575_v20, 6  ;;  %v1581_v42 = vshrl.u32 %v4818_v8, 16  ;;  %v398_v31 = vld [vmem:[#allocation2 + $0x60] sm:$0xee] }
  0x68   : > { %1062 = vmatprep.subr.bf16.mxu1 %v4056_v60  ;;  %v534_v59 = vor.u32 %v533_v18, %v530_v27  ;;  %v1584_v56 = vshll.u32 %v4818_v8, 16  ;;  %2210 = vmatprep.subr.bf16.mxu0 %v4053_v0  ;;  %v401_v6 = vld [vmem:[#allocation2 + $0x68] sm:$0x33]  ;;  %v1565_v12 = vrot.slane %v1563_v37, 5  ;;  %v1568_v13 = vrot.slane %v1566_v43, 6 }
  0x69   : > { %v1578_v14 = vor.u32 %v1577_v50, %v1574_v49  ;;  %v4057_v60 = vld [vmem:[%s5588_s1 + $0x430] ss:$8 sps:$4 sm:$0xff]   ;;  %v331_v19 = vrot.slane %v330_v23, 4  ;;  %v1583_v33 = vrot.slane %v1581_v42, 5  ;;  %v338_v58 = vrot.slane %v336_v54, 7 }
  0x6a   : > { %v535_v20 = vrot.slane %v534_v59, 4  ;;  %v1586_v34 = vrot.slane %v1584_v56, 6  ;;  %v4060_v25 = vld [vmem:[%s5588_s1 + $0xc0] ss:$8 sps:$4 sm:$0xff]   ;;  %v1569_v27 = vor.u32 %v1568_v13, %v1565_v12  ;;  %v399_v37 = vsel %vm4450_vm4, %v330_v23, %v398_v31  ;;  %v404_v54 = vld [vmem:[#allocation2 + $0x70] sm:$0xee] }
  0x6b   : > { %1063 = vmatpush1.bf16.msra.mxu1 %v4054_v5  ;;  %v1579_v18 = vrot.slane %v1578_v14, 4  ;;  %2211 = vmatpush1.bf16.msra.mxu0 %v4051_v16  ;;  %v402_v5 = vsel %vm4400_vm10, %v331_v19, %v401_v6  ;;  %v4853_v43 = vld [vmem:[#allocation2] sm:$0xcc]  ;;  %v339_v59 = vor.u32 %v338_v58, %v4797_v52  ;;  %400 = vst [vmem:[#allocation2 + $0x60] sm:$0xee] %v399_v37 }
  0x6c   : > { %1064 = vmatprep.subr.bf16.mxu1 %v4062_v32  ;;  %v540_v49 = vsel %vm4515_vm11, %v535_v20, %v539_v36  ;;  %v1587_v50 = vor.u32 %v1586_v34, %v1583_v33  ;;  %2212 = vmatprep.subr.bf16.mxu0 %v4059_v40  ;;  %403 = vst [vmem:[#allocation2 + $0x68] sm:$0x33] %v402_v5  ;;  %v4065_v16 = vld [vmem:[%s5588_s1 + $0x444] ss:$8 sps:$4 sm:$0xff]   ;;  %v4861_v23 = vld [vmem:[#allocation2 + $0x10] sm:$0xcc] }
  0x6d   : > { %v3532_v42 = vrot.slane %v4853_v43, 10  ;;  %v3313_v32 = vcombine.high %v526_v46, %v540_v49  ;;  %v1570_v56 = vsel %vm4529_vm12, %v4805_v2, %v1569_v27  ;;  %v3312_v36 = vcombine.low %v526_v46, %v540_v49  ;;  %v407_v33 = vld [vmem:[#allocation2 + $0x78] sm:$0x33]  ;;  %v4075_v14 = vld [vmem:[%s5588_s1 + $0x1c4] ss:$8 sps:$4 sm:$0xff]  }
  0x6e   : > { %v4068_v34 = vld [vmem:[%s5588_s1 + $0xd4] ss:$8 sps:$4 sm:$0xff]   ;;  %v3533_v52 = vrot.slane %v4861_v23, 10  ;;  %v1588_v40 = vsel %vm4529_vm12, %v1579_v18, %v1587_v50  ;;  %v340_v31 = vrot.slane %v339_v59, 4  ;;  %v405_v6 = vsel %vm4450_vm4, %v339_v59, %v404_v54  ;;  %v4066_v2 = vld [vmem:[%s5588_s1 + $0xd0] ss:$8 sps:$4 sm:$0xff]  }
  0x6f   : > { %1065 = vmatpush1.bf16.msra.mxu1 %v4060_v25  ;;  %v4882_v46 = vsel %vm4845_vm15, %v3532_v42, %v1951_v1  ;;  %3346 = vmatprep.mubr.msk.bf16.mxu1 %vm766_vm8, %v3313_v32  ;;  %v3497_v12 = vcombine.high %v1570_v56, %v1588_v40  ;;  %v3496_v13 = vcombine.low %v1570_v56, %v1588_v40  ;;  %v5013_v28 = vld [vmem:[#allocation2 + $0x40] sm:$0xcc]  ;;  %v5015_v29 = vld [vmem:[#allocation2 + $0x50] sm:$0xcc]  ;;  %vm2287_vm0 = vsmask.f32 5392 }
  0x70   : > { %2213 = vmatpush1.bf16.msra.mxu0 %v4057_v60  ;;  %406 = vst [vmem:[#allocation2 + $0x70] sm:$0xee] %v405_v6  ;;  %v4895_v51 = vsel %vm4845_vm15, %v3533_v52, %v1955_v7  ;;  %832 = vmatmul.mubr.bf16.gmra.mrb[8].mxu1 %v3312_v36  ;;  %v408_v1 = vsel %vm4400_vm10, %v340_v31, %v407_v33  ;;  %v4071_v60 = vld [vmem:[%s5588_s1 + $0x454] ss:$8 sps:$4 sm:$0xff]   ;;  %vm5146_vm10 = vmor %vm200_vm1, %vm2287_vm0  ;;  %vm2755_vm1 = vcmask 1040384   ;;  %vm2756_vm4 = vcmask 1044484  }
  0x71   : > { %2214 = vmatprep.subr.bf16.mxu0 %v4065_v16  ;;  %v3568_v19 = vcombine.low %v4882_v46, %v4895_v51  ;;  %v3569_v20 = vcombine.high %v4882_v46, %v4895_v51  ;;  %3530 = vmatprep.mubr.msk.bf16.mxu0 %vm766_vm8, %v3497_v12  ;;  %409 = vst [vmem:[#allocation2 + $0x78] sm:$0x33] %v408_v1  ;;  %v4091_v46 = vld [vmem:[%s5588_s1 + $0x484] ss:$8 sps:$4 sm:$0xff]   ;;  %vm5397_vm5 = vmor %vm2755_vm1, %vm2756_vm4 }
  0x72   : > { %1066 = vmatprep.subr.bf16.mxu1 %v4068_v34  ;;  %1887 = vmatmul.mubr.bf16.gmra.mrb[8].mxu0 %v3496_v13  ;;  %v4913_v7 = vld [vmem:[#allocation2 + $0x60] sm:$0xff] }
  0x73   : > { %1067 = vmatpush1.bf16.msra.mxu1 %v4066_v2  ;;  %v4915_v58 = vld [vmem:[#allocation2 + $0x68] sm:$0x11]  ;;  %v4917_v25 = vld [vmem:[#allocation2 + $0x60] sm:$0xee]  ;;  %v542_v27 = vshrl.u32 %v4913_v7, 16  ;;  %v545_v18 = vshll.u32 %v4913_v7, 16 }
  0x74   : > { %2215 = vmatpush1.bf16.msra.mxu0 %v4063_v10  ;;  %1381 = vmatprep.subr.bf16.mxu1 %v4075_v14  ;;  %v551_v37 = vshll.u32 %v4915_v58, 16  ;;  %v4922_v5 = vld [vmem:[#allocation2 + $0x68] sm:$0x33]  ;;  %v1590_v54 = vshrl.u32 %v4917_v25, 16  ;;  %v1593_v49 = vshll.u32 %v4917_v25, 16 }
  0x75   : > { %2216 = vmatprep.subr.bf16.mxu0 %v4071_v60  ;;  %v1599_v50 = vshrl.u32 %v4922_v5, 16  ;;  %v1602_v59 = vshll.u32 %v4922_v5, 16  ;;  %v544_v42 = vrot.slane %v542_v27, 4  ;;  %v547_v32 = vrot.slane %v545_v18, 5 }
  0x76   : > { %v553_v56 = vrot.slane %v551_v37, 5  ;;  %v1592_v52 = vrot.slane %v1590_v54, 5  ;;  %v1595_v40 = vrot.slane %v1593_v49, 6 }
  0x77   : > { %v4928_v16 = vld [vmem:[#allocation2 + $0x70] sm:$0xff]  ;;  %v548_v6 = vor.u32 %v547_v32, %v544_v42  ;;  %v1601_v12 = vrot.slane %v1599_v50, 5  ;;  %v1604_v13 = vrot.slane %v1602_v59, 6 }
  0x78   : > { %v556_v36 = vshrl.u32 %v4928_v16, 16  ;;  %v559_v33 = vshll.u32 %v4928_v16, 16  ;;  %v4932_v34 = vld [vmem:[#allocation2 + $0x70] sm:$0xee]  ;;  %2217 = vmatpush1.bf16.msra.mxu0 %v4069_v48  ;;  %v4934_v31 = vld [vmem:[#allocation2 + $0x78] sm:$0x11]  ;;  %v1596_v60 = vor.u32 %v1595_v40, %v1592_v52 }
  0x79   : > { %v4936_v2 = vld [vmem:[#allocation2 + $0x78] sm:$0x33]  ;;  %2642 = vmatprep.subr.bf16.mxu0 %v4078_v53  ;;  %v565_v1 = vshll.u32 %v4934_v31, 16  ;;  %v549_v27 = vrot.slane %v548_v6, 4  ;;  %v1605_v18 = vor.u32 %v1604_v13, %v1601_v12  ;;  %v1608_v37 = vshrl.u32 %v4932_v34, 16 }
  0x7a   : > { %v558_v10 = vrot.slane %v556_v36, 4  ;;  %v561_v14 = vrot.slane %v559_v33, 5  ;;  %v1611_v54 = vshll.u32 %v4932_v34, 16  ;;  %v1597_v57 = vrot.slane %v1596_v60, 4 }
  0x7b   : > { %v567_v49 = vrot.slane %v565_v1, 5  ;;  %v1617_v42 = vshrl.u32 %v4936_v2, 16  ;;  %v1610_v32 = vrot.slane %v1608_v37, 5  ;;  %v1620_v53 = vshll.u32 %v4936_v2, 16 }
  0x7c   : > { %v562_v48 = vor.u32 %v561_v14, %v558_v10  ;;  %v1613_v50 = vrot.slane %v1611_v54, 6  ;;  %v554_v59 = vsel %vm4515_vm11, %v549_v27, %v553_v56  ;;  %v1606_v12 = vsel %vm4529_vm12, %v1597_v57, %v1605_v18  ;;  %v4963_v54 = vld [vmem:[#allocation2 + $0x30] sm:$0xcc] }
  0x7d   : > { %v1619_v33 = vrot.slane %v1617_v42, 5  ;;  %v1622_v40 = vrot.slane %v1620_v53, 6  ;;  %v3390_v37 = vrot.slane %v4663_v4, 9  ;;  %v1959_v57 = vrot.slane %v4699_v38, 6  ;;  %v4073_v38 = vld [vmem:[%s5588_s1 + $0x1c0] ss:$8 sps:$4 sm:$0xff]  }
  0x7e   : > { %v563_v36 = vrot.slane %v562_v48, 4  ;;  %v1614_v52 = vor.u32 %v1613_v50, %v1610_v32  ;;  %v1963_v18 = vrot.slane %v4704_v47, 6  ;;  %v3535_v9 = vrot.slane %v4963_v54, 10  ;;  %v4076_v50 = vld [vmem:[%s5588_s1 + $0x460] ss:$8 sps:$4 sm:$0xff]  }
  0x7f   : > { %v1623_v14 = vor.u32 %v1622_v40, %v1619_v33  ;;  %v4967_v4 = vsel %vm4597_vm2, %v3390_v37, %v1150_v55  ;;  %v3351_v47 = vcombine.high %v4661_v3, %v4674_v41  ;;  %v3391_v48 = vrot.slane %v4694_v26, 9  ;;  %v4080_v26 = vld [vmem:[%s5588_s1 + $0x1d0] ss:$8 sps:$4 sm:$0xff]   ;;  %v4085_v53 = vld [vmem:[%s5588_s1 + $0x474] ss:$8 sps:$4 sm:$0xff]  }
  0x80   : > { %v568_v6 = vsel %vm4515_vm11, %v563_v36, %v567_v49  ;;  %v1615_v10 = vrot.slane %v1614_v52, 4  ;;  %v4082_v49 = vld [vmem:[%s5588_s1 + $0x1d4] ss:$8 sps:$4 sm:$0xff]   ;;  %v4990_v42 = vsel %vm4845_vm15, %v3535_v9, %v1963_v18  ;;  %v1154_v32 = vrot.slane %v4687_v35, 5  ;;  %v4092_v37 = vld [vmem:[%s5588_s1 + $0x1f0] ss:$8 sps:$4 sm:$0xff]  }
  0x81   : > { %v3315_v13 = vcombine.high %v554_v59, %v568_v6  ;;  %v3314_v1 = vcombine.low %v554_v59, %v568_v6  ;;  %v1967_v35 = vrot.slane %v4816_v17, 6  ;;  %v4088_v17 = vld [vmem:[%s5588_s1 + $0x1e4] ss:$8 sps:$4 sm:$0xff]   ;;  %v3536_v40 = vrot.slane %v5013_v28, 10  ;;  %v5071_v18 = vld [vmem:[#allocation2 + $0x70] sm:$0xcc] }
  0x82   : > { %v1624_v60 = vsel %vm4529_vm12, %v1615_v10, %v1623_v14  ;;  %v5010_v36 = vsel %vm4597_vm2, %v3391_v48, %v1154_v32  ;;  %v3537_v6 = vrot.slane %v5015_v29, 10  ;;  %v2293_v10 = vshll.u32 %v4853_v43, 16 }
  0x83   : > { %3347 = vmatprep.mubr.msk.bf16.mxu1 %vm766_vm8, %v3315_v13  ;;  %v3499_v56 = vcombine.high %v1606_v12, %v1624_v60  ;;  %v3498_v27 = vcombine.low %v1606_v12, %v1624_v60  ;;  %v3427_v33 = vcombine.high %v4967_v4, %v5010_v36  ;;  %v3426_v52 = vcombine.low %v4967_v4, %v5010_v36  ;;  %v4086_v12 = vld [vmem:[%s5588_s1 + $0x1e0] ss:$8 sps:$4 sm:$0xff]   ;;  %v4094_v60 = vld [vmem:[%s5588_s1 + $0x1f4] ss:$8 sps:$4 sm:$0xff]   ;;  %v4178_v4 = vld [vmem:[%s5588_s1 + $0x584] ss:$8 sps:$4 sm:$0xff]  }
  0x84   : > { %842 = vmatmul.mubr.bf16.gmra.mrb[12].mxu1 %v3314_v1  ;;  %v2290_v13 = vshrl.u32 %v4853_v43, 16  ;;  %v5044_v51 = vsel %vm4845_vm15, %v3536_v40, %v1967_v35  ;;  %v2308_v14 = vshrl.u32 %v4861_v23, 16  ;;  %v2311_v1 = vshll.u32 %v4861_v23, 16  ;;  %v4089_v43 = vld [vmem:[%s5588_s1 + $0x480] ss:$8 sps:$4 sm:$0xff]  }
  0x85   : > { %3384 = vmatprep.mubr.msk.bf16.mxu1 %vm766_vm8, %v3349_v44  ;;  %3531 = vmatprep.mubr.msk.bf16.mxu0 %vm766_vm8, %v3499_v56  ;;  %v3534_v44 = vrot.slane %v4961_v11, 10  ;;  %v3353_v56 = vcombine.high %v4726_v24, %v4799_v61  ;;  %v4097_v23 = vld [vmem:[%s5588_s1 + $0x494] ss:$8 sps:$4 sm:$0xff]   ;;  %v3392_v48 = vrot.slane %v4735_v39, 9  ;;  %v3393_v32 = vrot.slane %v4811_v15, 9 }
  0x86   : > { %1897 = vmatmul.mubr.bf16.gmra.mrb[12].mxu0 %v3498_v27  ;;  %v1975_v27 = vrot.slane %v4922_v5, 6  ;;  %v5608_v5 = vcombine.low %v4661_v3, %v4674_v41  ;;  %v4100_v3 = vld [vmem:[%s5588_s1 + $0x204] ss:$8 sps:$4 sm:$0xff]   ;;  %v1158_v41 = vrot.slane %v4801_v62, 5  ;;  %v4095_v39 = vld [vmem:[%s5588_s1 + $0x490] ss:$8 sps:$4 sm:$0xff]  }
  0x87   : > { %3604 = vmatprep.mubr.msk.bf16.mxu0 %vm766_vm8, %v3569_v20  ;;  %v4986_v20 = vsel %vm4845_vm15, %v3534_v44, %v1959_v57  ;;  %v5069_v57 = vld [vmem:[#allocation2 + $0x60] sm:$0xcc]  ;;  %v1979_v44 = vrot.slane %v4936_v2, 6  ;;  %v2313_v2 = vrot.slane %v2311_v1, 7  ;;  %v4106_v15 = vld [vmem:[%s5588_s1 + $0x214] ss:$8 sps:$4 sm:$0xff]  }
  0x88   : > { %v3571_v59 = vcombine.high %v4986_v20, %v4990_v42  ;;  %v3570_v55 = vcombine.low %v4986_v20, %v4990_v42  ;;  %v2295_v20 = vrot.slane %v2293_v10, 7  ;;  %v2310_v42 = vrot.slane %v2308_v14, 6  ;;  %v4103_v62 = vld [vmem:[%s5588_s1 + $0x4a4] ss:$8 sps:$4 sm:$0xff]  }
  0x89   : > { %v2735_v36 = vld [vmem:[#allocation2 + $0x40] sm:$0x88] }
  0x8a   : > { %v2314_v40 = vor.u32 %v2313_v2, %v2310_v42  ;;  %v4118_v42 = vld [vmem:[%s5588_s1 + $0x234] ss:$8 sps:$4 sm:$0xff]  }
  0x8c   : > { %1073 = vmatmul.mubr.bf16.vlgmr.msra.gmra.mrb[0].mxu1 %v3348_v45  ;;  %v1971_v45 = vrot.slane %v4818_v8, 6  ;;  %v4083_v8 = vld [vmem:[%s5588_s1 + $0x470] ss:$8 sps:$4 sm:$0xff]  }
  0x8d   : > { %1382 = vmatpush1.bf16.msra.mxu1 %v4073_v38  ;;  %3385 = vmatprep.mubr.msk.bf16.mxu1 %vm766_vm8, %v3351_v47  ;;  %v3538_v38 = vrot.slane %v5069_v57, 10  ;;  %v3539_v47 = vrot.slane %v5071_v18, 10 }
  0x8e   : > { %1383 = vmatprep.subr.bf16.mxu1 %v4082_v49  ;;  %2223 = vmatmul.mubr.bf16.vlgmr.msra.gmra.mrb[0].mxu0 %v3568_v19  ;;  %v5048_v19 = vsel %vm4845_vm15, %v3537_v6, %v1971_v45  ;;  %v2292_v49 = vrot.slane %v2290_v13, 6  ;;  %v5118_v45 = vld [vmem:[#allocation2 + $0x18] sm:$0x77] }
  0x8f   : > { %2643 = vmatpush1.bf16.msra.mxu0 %v4076_v50  ;;  %3605 = vmatprep.mubr.msk.bf16.mxu0 %vm766_vm8, %v3571_v59  ;;  %v3573_v9 = vcombine.high %v5044_v51, %v5048_v19  ;;  %v4098_v50 = vld [vmem:[%s5588_s1 + $0x200] ss:$8 sps:$4 sm:$0xff]   ;;  %v1162_v59 = vrot.slane %v4803_v63, 5  ;;  %v5108_v35 = vsel %vm4845_vm15, %v3538_v38, %v1975_v27  ;;  %v2320_v13 = vshll.u32 %v5118_v45, 16 }
  0x90   : > { %2644 = vmatprep.subr.bf16.mxu0 %v4085_v53  ;;  %v3355_v53 = vcombine.high %v4913_v7, %v4928_v16  ;;  %v5116_v63 = vld [vmem:[#allocation2 + $0x8] sm:$0x77]  ;;  %v3572_v10 = vcombine.low %v5044_v51, %v5048_v19  ;;  %v4104_v51 = vld [vmem:[%s5588_s1 + $0x210] ss:$8 sps:$4 sm:$0xff]   ;;  %v4109_v19 = vld [vmem:[%s5588_s1 + $0x4b4] ss:$8 sps:$4 sm:$0xff]  }
  0x91   : > { %1384 = vmatpush1.bf16.msra.mxu1 %v4080_v26  ;;  %v3352_v26 = vcombine.low %v4726_v24, %v4799_v61  ;;  %v1980_v24 = vsel %vm4845_vm15, %v3539_v47, %v1979_v44  ;;  %v5114_v61 = vsel %vm4597_vm2, %v3392_v48, %v1158_v41  ;;  %v5122_v6 = vsel %vm4597_vm2, %v3393_v32, %v1162_v59  ;;  %v4107_v47 = vld [vmem:[%s5588_s1 + $0x4b0] ss:$8 sps:$4 sm:$0xff]  }
  0x92   : > { %1385 = vmatprep.subr.bf16.mxu1 %v4088_v17  ;;  %v2296_v17 = vor.u32 %v2295_v20, %v2292_v49  ;;  %v2299_v0 = vshrl.u32 %v5116_v63, 16  ;;  %v3429_v14 = vcombine.high %v5114_v61, %v5122_v6  ;;  %v3428_v1 = vcombine.low %v5114_v61, %v5122_v6  ;;  %v4110_v49 = vld [vmem:[%s5588_s1 + $0x220] ss:$8 sps:$4 sm:$0xff]   ;;  %v4115_v20 = vld [vmem:[%s5588_s1 + $0x4c4] ss:$8 sps:$4 sm:$0xff]  }
  0x93   : > { %2645 = vmatpush1.bf16.msra.mxu0 %v4083_v8  ;;  %v2302_v8 = vshll.u32 %v5116_v63, 16  ;;  %v2315_v44 = vrot.slane %v2314_v40, 4  ;;  %v3354_v48 = vcombine.low %v4913_v7, %v4928_v16  ;;  %v3574_v16 = vcombine.low %v5108_v35, %v1980_v24  ;;  %v4116_v32 = vld [vmem:[%s5588_s1 + $0x230] ss:$8 sps:$4 sm:$0xff]   ;;  %v4184_v61 = vld [vmem:[%s5588_s1 + $0x5a4] ss:$8 sps:$4 sm:$0xff]  }
  0x94   : > { %1083 = vmatmul.mubr.bf16.gmra.mrb[4].mxu1 %v5608_v5  ;;  %2646 = vmatprep.subr.bf16.mxu0 %v4091_v46  ;;  %v3575_v46 = vcombine.high %v5108_v35, %v1980_v24  ;;  %v4112_v5 = vld [vmem:[%s5588_s1 + $0x224] ss:$8 sps:$4 sm:$0xff]   ;;  %v1166_v59 = vrot.slane %v4915_v58, 5  ;;  %v1170_v35 = vrot.slane %v4934_v31, 5  ;;  %v4124_v24 = vld [vmem:[%s5588_s1 + $0x240] ss:$8 sps:$4 sm:$0xff]  }
  0x95   : > { %1386 = vmatpush1.bf16.msra.mxu1 %v4086_v12  ;;  %3386 = vmatprep.mubr.msk.bf16.mxu1 %vm766_vm8, %v3353_v56  ;;  %v2317_v12 = vshrl.u32 %v5118_v45, 16  ;;  %v2304_v56 = vrot.slane %v2302_v8, 7  ;;  %v4129_v58 = vld [vmem:[%s5588_s1 + $0x4e4] ss:$8 sps:$4 sm:$0xff]   ;;  %v4130_v40 = vld [vmem:[%s5588_s1 + $0x250] ss:$8 sps:$4 sm:$0xff]  }
  0x96   : > { %1387 = vmatprep.subr.bf16.mxu1 %v4094_v60  ;;  %2233 = vmatmul.mubr.bf16.gmra.mrb[4].mxu0 %v3570_v55  ;;  %v2301_v60 = vrot.slane %v2299_v0, 6  ;;  %v2297_v55 = vrot.slane %v2296_v17, 4  ;;  %v4127_v17 = vld [vmem:[%s5588_s1 + $0x4e0] ss:$8 sps:$4 sm:$0xff]   ;;  %v4135_v8 = vld [vmem:[%s5588_s1 + $0x4f4] ss:$8 sps:$4 sm:$0xff]  }
  0x97   : > { %2647 = vmatpush1.bf16.msra.mxu0 %v4089_v43  ;;  %3606 = vmatprep.mubr.msk.bf16.mxu0 %vm766_vm8, %v3573_v9  ;;  %v4101_v43 = vld [vmem:[%s5588_s1 + $0x4a0] ss:$8 sps:$4 sm:$0xff]   ;;  %v2319_v27 = vrot.slane %v2317_v12, 6  ;;  %v2329_v12 = vshll.u32 %v4961_v11, 16 }
  0x98   : > { %2648 = vmatprep.subr.bf16.mxu0 %v4097_v23  ;;  %v2305_v9 = vor.u32 %v2304_v56, %v2301_v60  ;;  %v4133_v60 = vld [vmem:[%s5588_s1 + $0x4f0] ss:$8 sps:$4 sm:$0xff]  }
  0x99   : > { %1388 = vmatpush1.bf16.msra.mxu1 %v4092_v37  ;;  %v2322_v37 = vrot.slane %v2320_v13, 7  ;;  %v4140_v13 = vld [vmem:[%s5588_s1 + $0x264] ss:$8 sps:$4 sm:$0xff]   ;;  %v5244_v56 = vld [vmem:[#allocation2 + $0x38] sm:$0x77] }
  0x9a   : > { %1389 = vmatprep.subr.bf16.mxu1 %v4100_v3  ;;  %v5171_v2 = vsel %vm5146_vm10, %v2297_v55, %v2305_v9  ;;  %v4113_v3 = vld [vmem:[%s5588_s1 + $0x4c0] ss:$8 sps:$4 sm:$0xff]   ;;  %v4146_v9 = vld [vmem:[%s5588_s1 + $0x274] ss:$8 sps:$4 sm:$0xff]  }
  0x9b   : > { %2649 = vmatpush1.bf16.msra.mxu0 %v4095_v39  ;;  %v2323_v38 = vor.u32 %v2322_v37, %v2319_v27  ;;  %v4121_v39 = vld [vmem:[%s5588_s1 + $0x4d4] ss:$8 sps:$4 sm:$0xff]   ;;  %v4138_v27 = vld [vmem:[%s5588_s1 + $0x260] ss:$8 sps:$4 sm:$0xff]   ;;  %v2328_v37 = vrot.slane %v2326_v30, 6 }
  0x9c   : > { %1093 = vmatmul.mubr.bf16.gmra.mrb[8].mxu1 %v3352_v26  ;;  %2650 = vmatprep.subr.bf16.mxu0 %v4103_v62  ;;  %v5611_v26 = vcombine.high %v4611_v21, %v4615_v22  ;;  %v4119_v62 = vld [vmem:[%s5588_s1 + $0x4d0] ss:$8 sps:$4 sm:$0xff]  }
  0x9d   : > { %1390 = vmatpush1.bf16.msra.mxu1 %v4098_v50  ;;  %3387 = vmatprep.mubr.msk.bf16.mxu1 %vm766_vm8, %v3355_v53  ;;  %v5175_v7 = vsel %vm5146_vm10, %v2315_v44, %v2323_v38  ;;  %v4126_v50 = vld [vmem:[%s5588_s1 + $0x244] ss:$8 sps:$4 sm:$0xff]   ;;  %v3394_v53 = vrot.slane %v4917_v25, 9  ;;  %v2353_v38 = vshrl.u32 %v5244_v56, 16 }
  0x9e   : > { %1391 = vmatprep.subr.bf16.mxu1 %v4106_v15  ;;  %2243 = vmatmul.mubr.bf16.gmra.mrb[8].mxu0 %v3572_v10  ;;  %v3637_v41 = vcombine.high %v5171_v2, %v5175_v7  ;;  %v3395_v15 = vrot.slane %v4932_v34, 9  ;;  %v4132_v34 = vld [vmem:[%s5588_s1 + $0x254] ss:$8 sps:$4 sm:$0xff]   ;;  %v2344_v10 = vshrl.u32 %v4963_v54, 16 }
  0x9f   : > { %2651 = vmatpush1.bf16.msra.mxu0 %v4101_v43  ;;  %3607 = vmatprep.mubr.msk.bf16.mxu0 %vm766_vm8, %v3575_v46  ;;  %v5212_v25 = vsel %vm4597_vm2, %v3394_v53, %v1166_v59  ;;  %v2347_v46 = vshll.u32 %v4963_v54, 16  ;;  %v5239_v43 = vld [vmem:[#allocation2 + $0x28] sm:$0x77]  ;;  %v5276_v59 = vld [vmem:[#allocation2 + $0x58] sm:$0x77] }
  0xa0   : > { %2652 = vmatprep.subr.bf16.mxu0 %v4109_v19  ;;  %v5219_v31 = vsel %vm4597_vm2, %v3395_v15, %v1170_v35  ;;  %v4143_v54 = vld [vmem:[%s5588_s1 + $0x504] ss:$8 sps:$4 sm:$0xff]   ;;  %v2335_v19 = vshrl.u32 %v5239_v43, 16  ;;  %v2338_v55 = vshll.u32 %v5239_v43, 16  ;;  %v2346_v44 = vrot.slane %v2344_v10, 6 }
  0xa1   : > { %1392 = vmatpush1.bf16.msra.mxu1 %v4104_v51  ;;  %v3431_v0 = vcombine.high %v5212_v25, %v5219_v31  ;;  %v3430_v11 = vcombine.low %v5212_v25, %v5219_v31  ;;  %v2331_v51 = vrot.slane %v2329_v12, 7  ;;  %v5274_v53 = vld [vmem:[#allocation2 + $0x48] sm:$0x77]  ;;  %v2380_v15 = vshrl.u32 %v5015_v29, 16  ;;  %v4193_v31 = vld [vmem:[%s5588_s1 + $0x5d4] ss:$8 sps:$4 sm:$0xff]  }
  0xa2   : > { %1393 = vmatprep.subr.bf16.mxu1 %v4112_v5  ;;  %v2349_v5 = vrot.slane %v2347_v46, 7  ;;  %v2383_v35 = vshll.u32 %v5015_v29, 16  ;;  %v4160_v29 = vld [vmem:[%s5588_s1 + $0x294] ss:$8 sps:$4 sm:$0xff]   ;;  %v2371_v12 = vshrl.u32 %v5274_v53, 16  ;;  %v2389_v10 = vshrl.u32 %v5276_v59, 16 }
  0xa3   : > { %2653 = vmatpush1.bf16.msra.mxu0 %v4107_v47  ;;  %v2356_v47 = vshll.u32 %v5244_v56, 16  ;;  %v4188_v25 = vld [vmem:[%s5588_s1 + $0x5c0] ss:$8 sps:$4 sm:$0xff]  }
  0xa4   : > { %1103 = vmatmul.mubr.bf16.gmra.mrb[12].mxu1 %v3354_v48  ;;  %2654 = vmatprep.subr.bf16.mxu0 %v4115_v20  ;;  %v4141_v48 = vld [vmem:[%s5588_s1 + $0x500] ss:$8 sps:$4 sm:$0xff]   ;;  %v2332_v20 = vor.u32 %v2331_v51, %v2328_v37  ;;  %v4158_v51 = vld [vmem:[%s5588_s1 + $0x290] ss:$8 sps:$4 sm:$0xff]  }
  0xa5   : > { %1394 = vmatpush1.bf16.msra.mxu1 %v4110_v49  ;;  %3460 = vmatprep.mubr.msk.bf16.mxu1 %vm766_vm8, %v5611_v26  ;;  %v4144_v49 = vld [vmem:[%s5588_s1 + $0x270] ss:$8 sps:$4 sm:$0xff]   ;;  %v2358_v26 = vrot.slane %v2356_v47, 7  ;;  %v4155_v37 = vld [vmem:[%s5588_s1 + $0x520] ss:$8 sps:$4 sm:$0xff]  }
  0xa6   : > { %1395 = vmatprep.subr.bf16.mxu1 %v4118_v42  ;;  %2253 = vmatmul.mubr.bf16.gmra.mrb[12].mxu0 %v3574_v16  ;;  %v4149_v42 = vld [vmem:[%s5588_s1 + $0x514] ss:$8 sps:$4 sm:$0xff]   ;;  %v2337_v16 = vrot.slane %v2335_v19, 6 }
  0xa7   : > { %2655 = vmatpush1.bf16.msra.mxu0 %v4113_v3  ;;  %3672 = vmatprep.mubr.msk.bf16.mxu0 %vm766_vm8, %v3637_v41  ;;  %v2340_v3 = vrot.slane %v2338_v55, 7  ;;  %v2350_v41 = vor.u32 %v2349_v5, %v2346_v44  ;;  %v4163_v19 = vld [vmem:[%s5588_s1 + $0x534] ss:$8 sps:$4 sm:$0xff]   ;;  %v4166_v55 = vld [vmem:[%s5588_s1 + $0x544] ss:$8 sps:$4 sm:$0xff]  }
  0xa8   : > { %2656 = vmatprep.subr.bf16.mxu0 %v4121_v39  ;;  %v4154_v39 = vld [vmem:[%s5588_s1 + $0x284] ss:$8 sps:$4 sm:$0xff]  }
  0xa9   : > { %1396 = vmatpush1.bf16.msra.mxu1 %v4116_v32  ;;  %v2362_v32 = vshrl.u32 %v5013_v28, 16 }
  0xaa   : > { %1397 = vmatprep.subr.bf16.mxu1 %v4126_v50  ;;  %v2355_v50 = vrot.slane %v2353_v38, 6 }
  0xab   : > { %2657 = vmatpush1.bf16.msra.mxu0 %v4119_v62  ;;  %v2365_v62 = vshll.u32 %v5013_v28, 16  ;;  %v4157_v28 = vld [vmem:[%s5588_s1 + $0x524] ss:$8 sps:$4 sm:$0xff]  }
  0xac   : > { %2658 = vmatprep.subr.bf16.mxu0 %v4129_v58  ;;  %v2333_v58 = vrot.slane %v2332_v20, 4  ;;  %v2359_v30 = vor.u32 %v2358_v26, %v2355_v50  ;;  %v2419_v50 = vshll.u32 %v5071_v18, 16  ;;  %v3636_v26 = vcombine.low %v5171_v2, %v5175_v7 }
  0xad   : > { %1398 = vmatpush1.bf16.msra.mxu1 %v4124_v24  ;;  %v4147_v24 = vld [vmem:[%s5588_s1 + $0x510] ss:$8 sps:$4 sm:$0xff]   ;;  %v2367_v46 = vrot.slane %v2365_v62, 7 }
  0xae   : > { %1399 = vmatprep.subr.bf16.mxu1 %v4132_v34  ;;  %v4152_v34 = vld [vmem:[%s5588_s1 + $0x280] ss:$8 sps:$4 sm:$0xff]  }
  0xaf   : > { %2659 = vmatpush1.bf16.msra.mxu0 %v4127_v17  ;;  %v2341_v17 = vor.u32 %v2340_v3, %v2337_v16  ;;  %v2398_v16 = vshrl.u32 %v5069_v57, 16  ;;  %v2401_v3 = vshll.u32 %v5069_v57, 16  ;;  %v4169_v57 = vld [vmem:[%s5588_s1 + $0x554] ss:$8 sps:$4 sm:$0xff]  }
  0xb0   : > { %2660 = vmatprep.subr.bf16.mxu0 %v4135_v8  ;;  %v2364_v8 = vrot.slane %v2362_v32, 6  ;;  %v5325_v32 = vld [vmem:[#allocation2 + $0x68] sm:$0x77] }
  0xb1   : > { %1400 = vmatpush1.bf16.msra.mxu1 %v4130_v40  ;;  %v2351_v40 = vrot.slane %v2350_v41, 4  ;;  %v5311_v44 = vsel %vm5146_vm10, %v2333_v58, %v2341_v17  ;;  %v4164_v41 = vld [vmem:[%s5588_s1 + $0x540] ss:$8 sps:$4 sm:$0xff]   ;;  %v2400_v2 = vrot.slane %v2398_v16, 6  ;;  %v2403_v7 = vrot.slane %v2401_v3, 7 }
  0xb2   : > { %1401 = vmatprep.subr.bf16.mxu1 %v4140_v13  ;;  %v2374_v13 = vshll.u32 %v5274_v53, 16  ;;  %v2368_v47 = vor.u32 %v2367_v46, %v2364_v8  ;;  %v2410_v17 = vshll.u32 %v5325_v32, 16  ;;  %v2731_v16 = vld [vmem:[#allocation2] sm:$0x88]  ;;  %v2732_v3 = vld [vmem:[#allocation2 + $0x10] sm:$0x88] }
  0xb3   : > { %2661 = vmatpush1.bf16.msra.mxu0 %v4133_v60  ;;  %v2382_v60 = vrot.slane %v2380_v15, 6  ;;  %v5315_v5 = vsel %vm5146_vm10, %v2351_v40, %v2359_v30  ;;  %v5336_v15 = vld [vmem:[#allocation2 + $0x78] sm:$0x77] }
  0xb4   : > { %2662 = vmatprep.subr.bf16.mxu0 %v4143_v54  ;;  %v2392_v54 = vshll.u32 %v5276_v59, 16  ;;  %v2376_v38 = vrot.slane %v2374_v13, 7  ;;  %v3639_v62 = vcombine.high %v5311_v44, %v5315_v5  ;;  %v4167_v40 = vld [vmem:[%s5588_s1 + $0x550] ss:$8 sps:$4 sm:$0xff]   ;;  %v2425_v30 = vshrl.u32 %v5336_v15, 16 }
  0xb5   : > { %1402 = vmatpush1.bf16.msra.mxu1 %v4138_v27  ;;  %v2385_v27 = vrot.slane %v2383_v35, 7  ;;  %v2369_v35 = vrot.slane %v2368_v47, 4 }
  0xb6   : > { %1403 = vmatprep.subr.bf16.mxu1 %v4146_v9  ;;  %v2373_v9 = vrot.slane %v2371_v12, 6  ;;  %v2394_v20 = vrot.slane %v2392_v54, 7  ;;  %v2428_v12 = vshll.u32 %v5336_v15, 16  ;;  %v2427_v54 = vrot.slane %v2425_v30, 6  ;;  %v4202_v30 = vld [vmem:[%s5588_s1 + $0x604] ss:$8 sps:$4 sm:$0xff]  }
  0xb7   : > { %2663 = vmatpush1.bf16.msra.mxu0 %v4141_v48  ;;  %v2386_v48 = vor.u32 %v2385_v27, %v2382_v60  ;;  %v2412_v60 = vrot.slane %v2410_v17, 7  ;;  %v4196_v17 = vld [vmem:[%s5588_s1 + $0x5e4] ss:$8 sps:$4 sm:$0xff]  }
  0xb8   : > { %2664 = vmatprep.subr.bf16.mxu0 %v4149_v42  ;;  %v4161_v42 = vld [vmem:[%s5588_s1 + $0x530] ss:$8 sps:$4 sm:$0xff]  }
  0xb9   : > { %1404 = vmatpush1.bf16.msra.mxu1 %v4144_v49  ;;  %v2391_v49 = vrot.slane %v2389_v10, 6  ;;  %v2387_v58 = vrot.slane %v2386_v48, 4  ;;  %v2404_v10 = vor.u32 %v2403_v7, %v2400_v2  ;;  %v4185_v7 = vld [vmem:[%s5588_s1 + $0x5b0] ss:$8 sps:$4 sm:$0xff]  }
  0xba   : > { %1405 = vmatprep.subr.bf16.mxu1 %v4154_v39  ;;  %v2416_v39 = vshrl.u32 %v5071_v18, 16  ;;  %v5612_v18 = vcombine.low %v4611_v21, %v4615_v22  ;;  %v4172_v21 = vld [vmem:[%s5588_s1 + $0x564] ss:$8 sps:$4 sm:$0xff]  }
  0xbb   : > { %2665 = vmatpush1.bf16.msra.mxu0 %v4147_v24  ;;  %v2377_v24 = vor.u32 %v2376_v38, %v2373_v9  ;;  %v4173_v9 = vld [vmem:[%s5588_s1 + $0x570] ss:$8 sps:$4 sm:$0xff]   ;;  %v2405_v38 = vrot.slane %v2404_v10, 4  ;;  %v2733_v10 = vld [vmem:[#allocation2 + $0x20] sm:$0x88] }
  0xbc   : > { %2666 = vmatprep.subr.bf16.mxu0 %v4157_v28  ;;  %v2407_v28 = vshrl.u32 %v5325_v32, 16  ;;  %v2418_v8 = vrot.slane %v2416_v39, 6  ;;  %v2776_v39 = vrot.slane %v5274_v53, 7  ;;  %v3676_v53 = vrot.slane %v2731_v16, 11 }
  0xbd   : > { %1406 = vmatpush1.bf16.msra.mxu1 %v4152_v34  ;;  %v2395_v34 = vor.u32 %v2394_v20, %v2391_v49  ;;  %v2378_v22 = vsel %vm5146_vm10, %v2369_v35, %v2377_v24  ;;  %v2760_v35 = vrot.slane %v5116_v63, 7  ;;  %v2764_v24 = vrot.slane %v5118_v45, 7  ;;  %v4182_v45 = vld [vmem:[%s5588_s1 + $0x5a0] ss:$8 sps:$4 sm:$0xff]  }
  0xbe   : > { %1407 = vmatprep.subr.bf16.mxu1 %v4160_v29  ;;  %v2421_v29 = vrot.slane %v2419_v50, 7  ;;  %v2409_v46 = vrot.slane %v2407_v28, 6  ;;  %v4190_v28 = vld [vmem:[%s5588_s1 + $0x5c4] ss:$8 sps:$4 sm:$0xff]  }
  0xbf   : > { %2667 = vmatpush1.bf16.msra.mxu0 %v4155_v37  ;;  %v2396_v13 = vsel %vm5146_vm10, %v2387_v58, %v2395_v34  ;;  %v2430_v37 = vrot.slane %v2428_v12, 7  ;;  %v4187_v58 = vld [vmem:[%s5588_s1 + $0x5b4] ss:$8 sps:$4 sm:$0xff]   ;;  %v2737_v12 = vld [vmem:[#allocation2 + $0x60] sm:$0x88] }
  0xc0   : > { %2668 = vmatprep.subr.bf16.mxu0 %v4163_v19  ;;  %v2422_v27 = vor.u32 %v2421_v29, %v2418_v8  ;;  %v3638_v19 = vcombine.low %v5311_v44, %v5315_v5  ;;  %v2413_v47 = vor.u32 %v2412_v60, %v2409_v46  ;;  %v4176_v44 = vld [vmem:[%s5588_s1 + $0x580] ss:$8 sps:$4 sm:$0xff]   ;;  %v3640_v20 = vcombine.low %v2378_v22, %v2396_v13  ;;  %v4199_v8 = vld [vmem:[%s5588_s1 + $0x5f4] ss:$8 sps:$4 sm:$0xff]   ;;  %v4197_v29 = vld [vmem:[%s5588_s1 + $0x5f0] ss:$8 sps:$4 sm:$0xff]  }
  0xc1   : > { %1408 = vmatpush1.bf16.msra.mxu1 %v4158_v51  ;;  %v4175_v51 = vld [vmem:[%s5588_s1 + $0x574] ss:$8 sps:$4 sm:$0xff]   ;;  %v2431_v49 = vor.u32 %v2430_v37, %v2427_v54  ;;  %v2784_v60 = vrot.slane %v5325_v32, 7  ;;  %v2788_v54 = vrot.slane %v5336_v15, 7  ;;  %v4203_v37 = vld [vmem:[%s5588_s1 + $0x610] ss:$8 sps:$4 sm:$0xff]  }
  0xc2   : > { %3772 = vmatprep.subr.bf16.mxu1 %v4166_v55  ;;  %v2423_v48 = vrot.slane %v2422_v27, 4  ;;  %v2414_v5 = vsel %vm5146_vm10, %v2405_v38, %v2413_v47  ;;  %v2734_v46 = vld [vmem:[#allocation2 + $0x30] sm:$0x88] }
  0xc3   : > { %2669 = vmatpush1.bf16.msra.mxu0 %v4161_v42  ;;  %v4181_v42 = vld [vmem:[%s5588_s1 + $0x594] ss:$8 sps:$4 sm:$0xff]  }
  0xc4   : > { %1414 = vmatmul.mubr.bf16.vlgmr.msra.gmra.mrb[0].mxu1 %v5612_v18  ;;  %2999 = vmatprep.subr.bf16.mxu0 %v4166_v55  ;;  %v3641_v55 = vcombine.high %v2378_v22, %v2396_v13  ;;  %v4200_v22 = vld [vmem:[%s5588_s1 + $0x600] ss:$8 sps:$4 sm:$0xff]   ;;  %v4205_v13 = vld [vmem:[%s5588_s1 + $0x614] ss:$8 sps:$4 sm:$0xff]  }
  0xc5   : > { %3786 = vmatpush1.bf16.msra.mxu1 %v4164_v41  ;;  %3461 = vmatprep.mubr.msk.bf16.mxu1 %vm766_vm8, %v3427_v33  ;;  %v4170_v33 = vld [vmem:[%s5588_s1 + $0x560] ss:$8 sps:$4 sm:$0xff]  }
  0xc6   : > { %3773 = vmatprep.subr.bf16.mxu1 %v4169_v57  ;;  %2675 = vmatmul.mubr.bf16.vlgmr.msra.gmra.mrb[0].mxu0 %v3636_v26  ;;  %v2780_v26 = vrot.slane %v5276_v59, 7  ;;  %v3677_v59 = vrot.slane %v2732_v3, 11 }
  0xc7   : > { %3000 = vmatpush1.bf16.msra.mxu0 %v4164_v41  ;;  %3673 = vmatprep.mubr.msk.bf16.mxu0 %vm766_vm8, %v3639_v62  ;;  %v3680_v41 = vrot.slane %v2735_v36, 11  ;;  %v4179_v62 = vld [vmem:[%s5588_s1 + $0x590] ss:$8 sps:$4 sm:$0xff]  }
  0xc8   : > { %3001 = vmatprep.subr.bf16.mxu0 %v4169_v57 }
  0xc9   : > { %3787 = vmatpush1.bf16.msra.mxu1 %v4167_v40  ;;  %v5415_v6 = vsel %vm5397_vm5, %v3680_v41, %v2776_v39 }
  0xca   : > { %3774 = vmatprep.subr.bf16.mxu1 %v4172_v21 }
  0xcb   : > { %3002 = vmatpush1.bf16.msra.mxu0 %v4167_v40  ;;  %v4194_v40 = vld [vmem:[%s5588_s1 + $0x5e0] ss:$8 sps:$4 sm:$0xff]  }
  0xcc   : > { %1424 = vmatmul.mubr.bf16.gmra.mrb[4].mxu1 %v3426_v52  ;;  %3003 = vmatprep.subr.bf16.mxu0 %v4172_v21  ;;  %v2736_v52 = vld [vmem:[#allocation2 + $0x50] sm:$0x88] }
  0xcd   : > { %3788 = vmatpush1.bf16.msra.mxu1 %v4170_v33  ;;  %3462 = vmatprep.mubr.msk.bf16.mxu1 %vm766_vm8, %v3429_v14  ;;  %v2432_v14 = vsel %vm5146_vm10, %v2423_v48, %v2431_v49  ;;  %v3681_v50 = vrot.slane %v2736_v52, 11  ;;  %v2738_v21 = vld [vmem:[#allocation2 + $0x70] sm:$0x88] }
  0xce   : > { %3775 = vmatprep.subr.bf16.mxu1 %v4175_v51  ;;  %2685 = vmatmul.mubr.bf16.gmra.mrb[4].mxu0 %v3638_v19  ;;  %v3643_v23 = vcombine.high %v2414_v5, %v2432_v14  ;;  %v3642_v18 = vcombine.low %v2414_v5, %v2432_v14  ;;  %v3683_v27 = vrot.slane %v2738_v21, 11  ;;  %v2768_v19 = vrot.slane %v5239_v43, 7 }
  0xcf   : > { %3004 = vmatpush1.bf16.msra.mxu0 %v4170_v33  ;;  %3674 = vmatprep.mubr.msk.bf16.mxu0 %vm766_vm8, %v3641_v55  ;;  %v5419_v63 = vsel %vm5397_vm5, %v3681_v50, %v2780_v26  ;;  %v3682_v33 = vrot.slane %v2737_v12, 11  ;;  %v3679_v55 = vrot.slane %v2734_v46, 11 }
  0xd0   : > { %3005 = vmatprep.subr.bf16.mxu0 %v4175_v51  ;;  %v3717_v34 = vcombine.high %v5415_v6, %v5419_v63  ;;  %v3678_v51 = vrot.slane %v2733_v10, 11  ;;  %v2789_v15 = vsel %vm5397_vm5, %v3683_v27, %v2788_v54  ;;  %v3716_v38 = vcombine.low %v5415_v6, %v5419_v63 }
  0xd1   : > { %3789 = vmatpush1.bf16.msra.mxu1 %v4173_v9  ;;  %v2785_v32 = vsel %vm5397_vm5, %v3682_v33, %v2784_v60 }
  0xd2   : > { %3776 = vmatprep.subr.bf16.mxu1 %v4178_v4  ;;  %v2769_v47 = vsel %vm5397_vm5, %v3678_v51, %v2768_v19 }
  0xd3   : > { %3006 = vmatpush1.bf16.msra.mxu0 %v4173_v9  ;;  %v2772_v9 = vrot.slane %v5244_v56, 7  ;;  %v3719_v56 = vcombine.high %v2785_v32, %v2789_v15 }
  0xd4   : > { %1434 = vmatmul.mubr.bf16.gmra.mrb[8].mxu1 %v3428_v1  ;;  %3007 = vmatprep.subr.bf16.mxu0 %v4178_v4  ;;  %v5427_v1 = vsel %vm5397_vm5, %v3676_v53, %v2760_v35  ;;  %v3718_v4 = vcombine.low %v2785_v32, %v2789_v15 }
  0xd5   : > { %3790 = vmatpush1.bf16.msra.mxu1 %v4176_v44  ;;  %3463 = vmatprep.mubr.msk.bf16.mxu1 %vm766_vm8, %v3431_v0  ;;  %v5431_v0 = vsel %vm5397_vm5, %v3677_v59, %v2764_v24  ;;  %v2773_v43 = vsel %vm5397_vm5, %v3679_v55, %v2772_v9 }
  0xd6   : > { %3777 = vmatprep.subr.bf16.mxu1 %v4181_v42  ;;  %2695 = vmatmul.mubr.bf16.gmra.mrb[8].mxu0 %v3640_v20  ;;  %v3713_v2 = vcombine.high %v5427_v1, %v5431_v0  ;;  %v3712_v48 = vcombine.low %v5427_v1, %v5431_v0  ;;  %v3715_v49 = vcombine.high %v2769_v47, %v2773_v43 }
  0xd7   : > { %3008 = vmatpush1.bf16.msra.mxu0 %v4176_v44  ;;  %3675 = vmatprep.mubr.msk.bf16.mxu0 %vm766_vm8, %v3643_v23  ;;  %v3714_v36 = vcombine.low %v2769_v47, %v2773_v43 }
  0xd8   : > { %3009 = vmatprep.subr.bf16.mxu0 %v4181_v42 }
  0xd9   : > { %3791 = vmatpush1.bf16.msra.mxu1 %v4179_v62 }
  0xda   : > { %3778 = vmatprep.subr.bf16.mxu1 %v4184_v61 }
  0xdb   : > { %3010 = vmatpush1.bf16.msra.mxu0 %v4179_v62 }
  0xdc   : > { %1444 = vmatmul.mubr.bf16.gmra.mrb[12].mxu1 %v3430_v11  ;;  %3011 = vmatprep.subr.bf16.mxu0 %v4184_v61  ;;  %v4191_v11 = vld [vmem:[%s5588_s1 + $0x5d0] ss:$8 sps:$4 sm:$0xff]  }
  0xdd   : > { %3792 = vmatpush1.bf16.msra.mxu1 %v4182_v45  ;;  %3750 = vmatprep.mubr.msk.bf16.mxu1 %vm766_vm8, %v3717_v34 }
  0xde   : > { %3779 = vmatprep.subr.bf16.mxu1 %v4187_v58  ;;  %2705 = vmatmul.mubr.bf16.gmra.mrb[12].mxu0 %v3642_v18 }
  0xdf   : > { %3012 = vmatpush1.bf16.msra.mxu0 %v4182_v45  ;;  %3748 = vmatprep.mubr.msk.bf16.mxu0 %vm766_vm8, %v3713_v2 }
  0xe0   : > { %3013 = vmatprep.subr.bf16.mxu0 %v4187_v58 }
  0xe1   : > { %3793 = vmatpush1.bf16.msra.mxu1 %v4185_v7 }
  0xe2   : > { %3780 = vmatprep.subr.bf16.mxu1 %v4190_v28 }
  0xe3   : > { %3014 = vmatpush1.bf16.msra.mxu0 %v4185_v7 }
  0xe4   : > { %3015 = vmatprep.subr.bf16.mxu0 %v4190_v28 }
  0xe5   : > { %3794 = vmatpush1.bf16.msra.mxu1 %v4188_v25 }
  0xe6   : > { %3781 = vmatprep.subr.bf16.mxu1 %v4193_v31 }
  0xe7   : > { %3016 = vmatpush1.bf16.msra.mxu0 %v4188_v25 }
  0xe8   : > { %3017 = vmatprep.subr.bf16.mxu0 %v4193_v31  ;;  %v3090_v31 = vlaneseq }
  0xe9   : > { %3795 = vmatpush1.bf16.msra.mxu1 %v4191_v11 }
  0xea   : > { %3782 = vmatprep.subr.bf16.mxu1 %v4196_v17 }
  0xeb   : > { %3018 = vmatpush1.bf16.msra.mxu0 %v4191_v11  ;;  %v3091_v11 = vshrl.u32 %v3090_v31, 7 }
  0xec   : > { %3019 = vmatprep.subr.bf16.mxu0 %v4196_v17 }
  0xed   : > { %3796 = vmatpush1.bf16.msra.mxu1 %v4194_v40  ;;  %v3092_v17 = vsub.s32 0, %v3091_v11 }
  0xee   : > { %3783 = vmatprep.subr.bf16.mxu1 %v4199_v8 }
  0xef   : > { %3020 = vmatpush1.bf16.msra.mxu0 %v4194_v40  ;;  %v3088_v40 = vld [vmem:[%s5589_s2] sm:$0x3] }
  0xf0   : > { %3021 = vmatprep.subr.bf16.mxu0 %v4199_v8  ;;  %v3096_v8 = vsub.s32 1, %v3091_v11 }
  0xf1   : > { %3797 = vmatpush1.bf16.msra.mxu1 %v4197_v29 }
  0xf2   : > { %3784 = vmatprep.subr.bf16.mxu1 %v4202_v30  ;;  %v5524_v21 = vrot.slane %v3088_v40, %v3096_v8 }
  0xf3   : > { %3022 = vmatpush1.bf16.msra.mxu0 %v4197_v29  ;;  %v3116_v29 = vld [vmem:[%s5590_s3] sm:$0x3] }
  0xf4   : > { %3023 = vmatprep.subr.bf16.mxu0 %v4202_v30  ;;  %v5522_v30 = vrot.slane %v3088_v40, %v3092_v17  ;;  %v5528_v46 = vrot.slane %v3116_v29, %v3096_v8 }
  0xf5   : > { %3798 = vmatpush1.bf16.msra.mxu1 %v4200_v22 }
  0xf6   : > { %3785 = vmatprep.subr.bf16.mxu1 %v4205_v13 }
  0xf7   : > { %3024 = vmatpush1.bf16.msra.mxu0 %v4200_v22  ;;  %v5526_v22 = vrot.slane %v3116_v29, %v3092_v17 }
  0xf8   : > { %3025 = vmatprep.subr.bf16.mxu0 %v4205_v13 }
  0xf9   : > { %3799 = vmatpush1.bf16.msra.mxu1 %v4203_v37 }
  0xfb   : > { %3026 = vmatpush1.bf16.msra.mxu0 %v4203_v37 }
  0xfc   : > { %3052 = vmatmul.mubr.bf16.vlgmr.msra.gmra.mrb[16].mxu1 %v3716_v38 }
  0xfd   : > { %3751 = vmatprep.mubr.msk.bf16.mxu1 %vm766_vm8, %v3719_v56 }
  0xfe   : > { %3032 = vmatmul.mubr.bf16.vlgmr.msra.gmra.mrb[0].mxu0 %v3712_v48 }
  0xff   : > { %3749 = vmatprep.mubr.msk.bf16.mxu0 %vm766_vm8, %v3715_v49 }
 0x104   : > { %3062 = vmatmul.mubr.bf16.gmra.mrb[20].mxu1 %v3718_v4 }
 0x106   : > { %3042 = vmatmul.mubr.bf16.gmra.mrb[4].mxu0 %v3714_v36 }
 0x197   : > { %v1415_v52 = vpop.f32.mrb[0].mxu1 }
 0x198   : > { %v1417_v44 = vpop.f32.mrb[1].mxu1 }
 0x199   : > { %v1419_v5 = vpop.f32.mrb[2].mxu1 }
 0x19a   : > { %v5502_v14 = vpop.f32.mrb[3].mxu1 }
 0x19f   : > { %v5504_v20 = vpop.f32.mrb[4].mxu1 }
 0x1a0   : > { %v5506_v42 = vpop.f32.mrb[5].mxu1 }
 0x1a1   : > { %v5508_v16 = vpop.f32.mrb[6].mxu1 }
 0x1a2   : > { %v5510_v3 = vpop.f32.mrb[7].mxu1 }
 0x1a7   : > { %v1435_v41 = vpop.f32.mrb[8].mxu1 }
 0x1a8   : > { %v1437_v39 = vpop.f32.mrb[9].mxu1 }
 0x1a9   : > { %v1439_v50 = vpop.f32.mrb[10].mxu1  ;;  %v2696_v26 = vpop.f32.mrb[8].mxu0 }
 0x1aa   : > { %v1441_v23 = vpop.f32.mrb[11].mxu1  ;;  %v3808_v57 = vadd.f32 %v2696_v26, %v1435_v41  ;;  %v2698_v62 = vpop.f32.mrb[9].mxu0 }
 0x1ab   : > { %v3810_v53 = vadd.f32 %v2698_v62, %v1437_v39  ;;  %v2700_v35 = vpop.f32.mrb[10].mxu0 }
 0x1ac   : > { %v3812_v59 = vadd.f32 %v2700_v35, %v1439_v50  ;;  %v2702_v24 = vpop.f32.mrb[11].mxu0 }
 0x1ad   : > { %v3814_v61 = vadd.f32 %v2702_v24, %v1441_v23 }
 0x1af   : > { %v1445_v6 = vpop.f32.mrb[12].mxu1 }
 0x1b0   : > { %v1447_v63 = vpop.f32.mrb[13].mxu1 }
 0x1b1   : > { %v1449_v45 = vpop.f32.mrb[14].mxu1  ;;  %v2706_v1 = vpop.f32.mrb[12].mxu0 }
 0x1b2   : > { %v1451_v0 = vpop.f32.mrb[15].mxu1  ;;  %v3816_v58 = vadd.f32 %v2706_v1, %v1445_v6  ;;  %v2708_v34 = vpop.f32.mrb[13].mxu0 }
 0x1b3   : > { %v3818_v18 = vadd.f32 %v2708_v34, %v1447_v63  ;;  %v2710_v2 = vpop.f32.mrb[14].mxu0 }
 0x1b4   : > { %v5512_v7 = vadd.f32 %v2710_v2, %v1449_v45  ;;  %v2712_v28 = vpop.f32.mrb[15].mxu0 }
 0x1b5   : > { %v5514_v25 = vadd.f32 %v2712_v28, %v1451_v0 }
 0x1cf   : > { %v3053_v12 = vpop.f32.mrb[16].mxu1 }
 0x1d0   : > { %v3809_v13 = vadd.f32 %v3808_v57, %v3053_v12  ;;  %v3055_v10 = vpop.f32.mrb[17].mxu1 }
 0x1d1   : > { %v3811_v33 = vadd.f32 %v3810_v53, %v3055_v10  ;;  %v3057_v60 = vpop.f32.mrb[18].mxu1  ;;  %v3033_v27 = vpop.f32.mrb[0].mxu0 }
 0x1d2   : > { %v3108_v54 = vmul.f32 %v3809_v13, %v5522_v30  ;;  %v3813_v37 = vadd.f32 %v3812_v59, %v3057_v60  ;;  %v3059_v51 = vpop.f32.mrb[19].mxu1  ;;  %v3800_v19 = vadd.f32 %v3033_v27, %v1415_v52  ;;  %v3035_v55 = vpop.f32.mrb[1].mxu0 }
 0x1d3   : > { %v3109_v9 = vmul.f32 %v3811_v33, %v5524_v21  ;;  %v3815_v32 = vadd.f32 %v3814_v61, %v3059_v51  ;;  %v3801_v38 = vadd.f32 %v3035_v55, %v1417_v44  ;;  %v3037_v47 = vpop.f32.mrb[2].mxu0 }
 0x1d4   : > { %v3136_v15 = vadd.f32 %v5526_v22, %v3108_v54  ;;  %v3110_v43 = vmul.f32 %v3813_v37, %v5522_v30  ;;  %v3100_v56 = vmul.f32 %v3800_v19, %v5522_v30  ;;  %v3802_v49 = vadd.f32 %v3037_v47, %v1419_v5  ;;  %v3039_v4 = vpop.f32.mrb[3].mxu0 }
 0x1d5   : > { %v3137_v48 = vadd.f32 %v5528_v46, %v3109_v9  ;;  %v3111_v36 = vmul.f32 %v3815_v32, %v5524_v21  ;;  %v3101_v41 = vmul.f32 %v3801_v38, %v5524_v21  ;;  %v3803_v50 = vadd.f32 %v3039_v4, %v5502_v14 }
 0x1d6   : > { %v3152_v52 = vmax.f32 %v3136_v15, 0.0  ;;  %v3138_v39 = vadd.f32 %v5526_v22, %v3110_v43  ;;  %v3128_v44 = vadd.f32 %v5526_v22, %v3100_v56  ;;  %v3102_v23 = vmul.f32 %v3802_v49, %v5522_v30 }
 0x1d7   : > { %v3153_v26 = vmax.f32 %v3137_v48, 0.0  ;;  %v3139_v57 = vadd.f32 %v5528_v46, %v3111_v36  ;;  %v3063_v62 = vpop.f32.mrb[20].mxu1  ;;  %v3129_v5 = vadd.f32 %v5528_v46, %v3101_v41  ;;  %v3103_v14 = vmul.f32 %v3803_v50, %v5524_v21 }
 0x1d8   : > { %v3154_v53 = vmax.f32 %v3138_v39, 0.0  ;;  %v3817_v35 = vadd.f32 %v3816_v58, %v3063_v62  ;;  %v3065_v59 = vpop.f32.mrb[21].mxu1  ;;  %v3144_v24 = vmax.f32 %v3128_v44, 0.0  ;;  %v3130_v6 = vadd.f32 %v5526_v22, %v3102_v23 }
 0x1d9   : > { %v3768_v61 = vpack.c.bf16 %v3153_v26, %v3152_v52  ;;  %v3155_v63 = vmax.f32 %v3139_v57, 0.0  ;;  %v3067_v45 = vpop.f32.mrb[22].mxu1  ;;  %v3145_v1 = vmax.f32 %v3129_v5, 0.0  ;;  %v3131_v0 = vadd.f32 %v5528_v46, %v3103_v14  ;;  %v3043_v34 = vpop.f32.mrb[4].mxu0 }
 0x1da   : > { %v3112_v2 = vmul.f32 %v3817_v35, %v5522_v30  ;;  %v3819_v28 = vadd.f32 %v3818_v18, %v3065_v59  ;;  %v3069_v31 = vpop.f32.mrb[23].mxu1  ;;  %v3146_v11 = vmax.f32 %v3130_v6, 0.0  ;;  %v3804_v17 = vadd.f32 %v3043_v34, %v5504_v20  ;;  %v3045_v40 = vpop.f32.mrb[5].mxu0 }
 0x1db   : > { %3212 = vst [vmem:[%s5548_s28 + $0x20] sm:$0xff] %v3768_v61  ;;  %v3769_v58 = vpack.c.bf16 %v3155_v63, %v3154_v53  ;;  %v3821_v8 = vadd.f32 %v5512_v7, %v3067_v45  ;;  %v3764_v29 = vpack.c.bf16 %v3145_v1, %v3144_v24  ;;  %v3147_v12 = vmax.f32 %v3131_v0, 0.0  ;;  %v3047_v33 = vpop.f32.mrb[6].mxu0 }
 0x1dc   : > { %v3140_v13 = vadd.f32 %v5526_v22, %v3112_v2  ;;  %v3805_v10 = vadd.f32 %v3045_v40, %v5506_v42  ;;  %v3104_v18 = vmul.f32 %v3804_v17, %v5522_v30  ;;  %v3113_v60 = vmul.f32 %v3819_v28, %v5524_v21  ;;  %v3049_v54 = vpop.f32.mrb[7].mxu0 }
 0x1dd   : > { %3213 = vst [vmem:[%s5548_s28 + $0x28] sm:$0xff] %v3769_v58  ;;  %v3806_v27 = vadd.f32 %v3047_v33, %v5508_v16  ;;  %v3114_v20 = vmul.f32 %v3821_v8, %v5522_v30  ;;  %3208 = vst [vmem:[%s5548_s28] sm:$0xff] %v3764_v29  ;;  %v3765_v7 = vpack.c.bf16 %v3147_v12, %v3146_v11 }
 0x1de   : > { %v3105_v37 = vmul.f32 %v3805_v10, %v5524_v21  ;;  %v3807_v51 = vadd.f32 %v3049_v54, %v5510_v3  ;;  %v3132_v42 = vadd.f32 %v5526_v22, %v3104_v18  ;;  %v3156_v19 = vmax.f32 %v3140_v13, 0.0 }
 0x1df   : > { %v3141_v55 = vadd.f32 %v5528_v46, %v3113_v60  ;;  %v3106_v9 = vmul.f32 %v3806_v27, %v5522_v30  ;;  %3209 = vst [vmem:[%s5548_s28 + $0x8] sm:$0xff] %v3765_v7  ;;  %v3142_v16 = vadd.f32 %v5526_v22, %v3114_v20  ;;  %v3823_v38 = vadd.f32 %v5514_v25, %v3069_v31 }
 0x1e0   : > { %v3133_v32 = vadd.f32 %v5528_v46, %v3105_v37  ;;  %v3107_v15 = vmul.f32 %v3807_v51, %v5524_v21  ;;  %v3148_v47 = vmax.f32 %v3132_v42, 0.0 }
 0x1e1   : > { %v3157_v3 = vmax.f32 %v3141_v55, 0.0  ;;  %v3134_v43 = vadd.f32 %v5526_v22, %v3106_v9  ;;  %v3115_v48 = vmul.f32 %v3823_v38, %v5524_v21  ;;  %v3158_v52 = vmax.f32 %v3142_v16, 0.0 }
 0x1e2   : > { %v3149_v56 = vmax.f32 %v3133_v32, 0.0  ;;  %v3135_v30 = vadd.f32 %v5528_v46, %v3107_v15 }
 0x1e3   : > { %v3770_v49 = vpack.c.bf16 %v3157_v3, %v3156_v19  ;;  %v3150_v4 = vmax.f32 %v3134_v43, 0.0  ;;  %v3143_v39 = vadd.f32 %v5528_v46, %v3115_v48 }
 0x1e4   : > { %v3766_v36 = vpack.c.bf16 %v3149_v56, %v3148_v47  ;;  %v3151_v41 = vmax.f32 %v3135_v30, 0.0 }
 0x1e5   : > { %3214 = vst [vmem:[%s5548_s28 + $0x30] sm:$0xff] %v3770_v49  ;;  %v3159_v50 = vmax.f32 %v3143_v39, 0.0 }
 0x1e6   : > { %3210 = vst [vmem:[%s5548_s28 + $0x10] sm:$0xff] %v3766_v36  ;;  %v3767_v25 = vpack.c.bf16 %v3151_v41, %v3150_v4 }
 0x1e7   : > { %v3771_v44 = vpack.c.bf16 %v3159_v50, %v3158_v52 }
 0x1e8   : > { %3211 = vst [vmem:[%s5548_s28 + $0x18] sm:$0xff] %v3767_v25 }
 0x1e9   : > { %3215 = vst [vmem:[%s5548_s28 + $0x38] sm:$0xff] %v3771_v44 }
 0x1ea PF: > { %s14_s15 = sadd.s32 1, %s4212_s15  }
 0x1eb   : > { %p11_p4 = scmp.ge.s32.totalorder %s14_s15, 4  }
 0x1ed   :  { %13 = sbr.rel (!%p11_p4) target bundleno = 1 (0x1), region = 72 }

// kernel: _lambda_.14
= control target key start
LH: loop header
LB: loop body
LE: loop exit
PB: predicated region body
PF: predicated region fallthrough
CT: control target
= control target key end

     0   :  { %s3534_s15 = smov 0   ;;  %s4437_s0 = inlined_call_operand.vmem [shape: bf16[2,8,8,224], index: 0, kind: input, shape index: {}]   ;;  %s4438_s1 = inlined_call_operand.vmem [shape: bf16[7,224,256], index: 1, kind: input, shape index: {}]   ;;  %s4439_s2 = inlined_call_operand.vmem [shape: f32[1,256], index: 2, kind: input, shape index: {}]   ;;  %s4440_s3 = inlined_call_operand.vmem [shape: f32[1,256], index: 3, kind: input, shape index: {}]   ;;  %s4441_s4 = inlined_call_operand.vmem [shape: bf16[2,8,8,256], index: 4, kind: output, shape index: {}]  }
   0x1 LB: > { %s2580_s16 = sadd.s32 4294967295, %s3506_s15   ;;  %p2584_p0 = scmp.ge.s32.totalorder %s3506_s15, 1  ;;  %s3506_s15 = sphi %s3534_s15, %s14_s15  }
   0x2   : > { %p162_p1 = scmp.lt.s32.totalorder %s3506_s15, 3 }
   0x4   : > { %p163_p2 = pnand %p2584_p0, %p162_p1 }
   0x5   : > { %v3190_v0 = vld [vmem:[%s4438_s1 + $0xe4] ss:$8 sps:$4 sm:$0xff] (!%p163_p2)   ;;  %v3194_v2 = vld [vmem:[%s4438_s1 + $0xe0] ss:$8 sps:$4 sm:$0xff] (!%p163_p2)   ;;  %v3196_v4 = vld [vmem:[%s4438_s1 + $0xf4] ss:$8 sps:$4 sm:$0xff] (!%p163_p2)  }
   0x6   : > { %166 = sbr.rel (%p163_p2) target bundleno = 467 (0x1d3), region = 36  ;;  %v3192_v1 = vld [vmem:[%s4438_s1 + $0x2a4] ss:$8 sps:$4 sm:$0xff] (!%p163_p2)   ;;  %489 = vmatprep.subr.bf16.mxu1 (!%p163_p2), %v3190_v0  ;;  %v3195_v3 = vld [vmem:[%s4438_s1 + $0x2a0] ss:$8 sps:$4 sm:$0xff] (!%p163_p2)   ;;  %p188_p3 = scmp.lt.s32.totalorder (!%p163_p2), %s2580_s16, 1 }
   0x7   : > { %1363 = vmatprep.subr.bf16.mxu0 (!%p163_p2), %v3192_v1  ;;  %490 = vmatpush1.bf16.msra.mxu1 (!%p163_p2), %v3194_v2  ;;  %v3198_v5 = vld [vmem:[%s4438_s1 + $0x2b4] ss:$8 sps:$4 sm:$0xff] (!%p163_p2)   ;;  %v3200_v6 = vld [vmem:[%s4438_s1 + $0xf0] ss:$8 sps:$4 sm:$0xff] (!%p163_p2)   ;;  %v3202_v8 = vld [vmem:[%s4438_s1 + $0x104] ss:$8 sps:$4 sm:$0xff] (!%p163_p2)  }
   0x8   : > { %1364 = vmatpush1.bf16.msra.mxu0 (!%p163_p2), %v3195_v3  ;;  %491 = vmatprep.subr.bf16.mxu1 (!%p163_p2), %v3196_v4  ;;  %v3201_v7 = vld [vmem:[%s4438_s1 + $0x2b0] ss:$8 sps:$4 sm:$0xff] (!%p163_p2)   ;;  %v3204_v9 = vld [vmem:[%s4438_s1 + $0x2c4] ss:$8 sps:$4 sm:$0xff] (!%p163_p2)   ;;  %v3206_v10 = vld [vmem:[%s4438_s1 + $0x100] ss:$8 sps:$4 sm:$0xff] (!%p163_p2)  }
   0x9   : > { %1365 = vmatprep.subr.bf16.mxu0 (!%p163_p2), %v3198_v5  ;;  %v3207_v11 = vld [vmem:[%s4438_s1 + $0x2c0] ss:$8 sps:$4 sm:$0xff] (!%p163_p2)   ;;  %v3208_v12 = vld [vmem:[%s4438_s1 + $0x114] ss:$8 sps:$4 sm:$0xff] (!%p163_p2)   ;;  %v3212_v14 = vld [vmem:[%s4438_s1 + $0x110] ss:$8 sps:$4 sm:$0xff] (!%p163_p2)  }
   0xa   : > { %v3210_v13 = vld [vmem:[%s4438_s1 + $0x2d4] ss:$8 sps:$4 sm:$0xff] (!%p163_p2)   ;;  %v3213_v15 = vld [vmem:[%s4438_s1 + $0x2d0] ss:$8 sps:$4 sm:$0xff] (!%p163_p2)   ;;  %v3214_v16 = vld [vmem:[%s4438_s1 + $0x124] ss:$8 sps:$4 sm:$0xff] (!%p163_p2)  }
   0xb   : > { %492 = vmatpush1.bf16.msra.mxu1 (!%p163_p2), %v3200_v6  ;;  %v3216_v17 = vld [vmem:[%s4438_s1 + $0x2e4] ss:$8 sps:$4 sm:$0xff] (!%p163_p2)   ;;  %v3218_v18 = vld [vmem:[%s4438_s1 + $0x120] ss:$8 sps:$4 sm:$0xff] (!%p163_p2)   ;;  %v3220_v20 = vld [vmem:[%s4438_s1 + $0x134] ss:$8 sps:$4 sm:$0xff] (!%p163_p2)  }
   0xc   : > { %1366 = vmatpush1.bf16.msra.mxu0 (!%p163_p2), %v3201_v7  ;;  %493 = vmatprep.subr.bf16.mxu1 (!%p163_p2), %v3202_v8  ;;  %v3219_v19 = vld [vmem:[%s4438_s1 + $0x2e0] ss:$8 sps:$4 sm:$0xff] (!%p163_p2)   ;;  %v3222_v21 = vld [vmem:[%s4438_s1 + $0x2f4] ss:$8 sps:$4 sm:$0xff] (!%p163_p2)   ;;  %v3224_v22 = vld [vmem:[%s4438_s1 + $0x130] ss:$8 sps:$4 sm:$0xff] (!%p163_p2)  }
   0xd   : > { %1367 = vmatprep.subr.bf16.mxu0 %v3204_v9  ;;  %v3225_v23 = vld [vmem:[%s4438_s1 + $0x2f0] ss:$8 sps:$4 sm:$0xff]   ;;  %v3226_v24 = vld [vmem:[%s4438_s1 + $0x144] ss:$8 sps:$4 sm:$0xff]   ;;  %v3230_v26 = vld [vmem:[%s4438_s1 + $0x140] ss:$8 sps:$4 sm:$0xff]  }
   0xe   : > { %v3228_v25 = vld [vmem:[%s4438_s1 + $0x304] ss:$8 sps:$4 sm:$0xff]   ;;  %v3231_v27 = vld [vmem:[%s4438_s1 + $0x300] ss:$8 sps:$4 sm:$0xff]   ;;  %v3232_v28 = vld [vmem:[%s4438_s1 + $0x154] ss:$8 sps:$4 sm:$0xff]  }
   0xf   : > { %494 = vmatpush1.bf16.msra.mxu1 %v3206_v10  ;;  %v3234_v29 = vld [vmem:[%s4438_s1 + $0x314] ss:$8 sps:$4 sm:$0xff]   ;;  %v3236_v30 = vld [vmem:[%s4438_s1 + $0x150] ss:$8 sps:$4 sm:$0xff]   ;;  %v3238_v32 = vld [vmem:[%s4438_s1 + $0x164] ss:$8 sps:$4 sm:$0xff]  }
  0x10   : > { %1368 = vmatpush1.bf16.msra.mxu0 %v3207_v11  ;;  %495 = vmatprep.subr.bf16.mxu1 %v3208_v12  ;;  %v3237_v31 = vld [vmem:[%s4438_s1 + $0x310] ss:$8 sps:$4 sm:$0xff]   ;;  %v3240_v33 = vld [vmem:[%s4438_s1 + $0x324] ss:$8 sps:$4 sm:$0xff]   ;;  %s4445_s16 = smov (!%p188_p3, %s2580_s16), 1  ;;  %vm199_vm0 = vcmask 1043456  }
  0x11   : > { %1369 = vmatprep.subr.bf16.mxu0 %v3210_v13  ;;  %v3242_v34 = vld [vmem:[%s4438_s1 + $0x160] ss:$8 sps:$4 sm:$0xff]   ;;  %v3244_v36 = vld [vmem:[%s4438_s1 + $0x174] ss:$8 sps:$4 sm:$0xff]   ;;  %s3047_s21 = sshll.u32 %s4445_s16, 6  ;;  %vm200_vm1 = vcmask 785412  }
  0x12   : > { %v3243_v35 = vld [vmem:[%s4438_s1 + $0x320] ss:$8 sps:$4 sm:$0xff]   ;;  %v3246_v37 = vld [vmem:[%s4438_s1 + $0x334] ss:$8 sps:$4 sm:$0xff]   ;;  %v3248_v38 = vld [vmem:[%s4438_s1 + $0x170] ss:$8 sps:$4 sm:$0xff]   ;;  %s3677_s30 = scalar_lea.vmem %s4437_s0, %s3047_s21  ;;  %s4401_s27 = scalar_lea.vmem %s4441_s4, %s3047_s21 }
  0x13   : > { %496 = vmatpush1.bf16.msra.mxu1 %v3212_v14  ;;  %v3249_v39 = vld [vmem:[%s4438_s1 + $0x330] ss:$8 sps:$4 sm:$0xff]   ;;  %v3250_v40 = vld [vmem:[%s4438_s1 + $0x184] ss:$8 sps:$4 sm:$0xff]   ;;  %vm3682_vm2 = vmor %vm200_vm1, %vm199_vm0  ;;  %v3508_v44 = vmov 0   ;;  %vm476_vm3 = vcmask 785408  }
  0x14   : > { %1370 = vmatpush1.bf16.msra.mxu0 %v3213_v15  ;;  %497 = vmatprep.subr.bf16.mxu1 %v3214_v16  ;;  %v3252_v41 = vld [vmem:[%s4438_s1 + $0x344] ss:$8 sps:$4 sm:$0xff]   ;;  %v3254_v43 = vld [vmem:[%s4438_s1 + $0x180] ss:$8 sps:$4 sm:$0xff]   ;;  %203 = vst.msk [vmem:[#allocation2 + $0x8] sm:$0xff] %vm3682_vm2, %v3508_v44  ;;  %204 = vst.msk [vmem:[#allocation2 + $0x10] sm:$0xff] %vm3682_vm2, %v3508_v44 }
  0x15   : > { %1371 = vmatprep.subr.bf16.mxu0 %v3216_v17  ;;  %202 = vst.msk [vmem:[#allocation2] sm:$0xff] %vm3682_vm2, %v3508_v44  ;;  %206 = vst.msk [vmem:[#allocation2 + $0x58] sm:$0xff] %vm3682_vm2, %v3508_v44  ;;  %v209_v45 = vld [vmem:[%s3677_s30] sm:$0xff]  ;;  %v210_v46 = vld [vmem:[%s3677_s30 + $0x8] sm:$0xff] }
  0x16   : > { %207 = vst.msk [vmem:[#allocation2 + $0x60] sm:$0xff] %vm3682_vm2, %v3508_v44  ;;  %208 = vst.msk [vmem:[#allocation2 + $0x68] sm:$0xff] %vm3682_vm2, %v3508_v44  ;;  %v3255_v47 = vld [vmem:[%s4438_s1 + $0x340] ss:$8 sps:$4 sm:$0xff]   ;;  %v3256_v48 = vld [vmem:[%s4438_s1 + $0x194] ss:$8 sps:$4 sm:$0xff]  }
  0x17   : > { %498 = vmatpush1.bf16.msra.mxu1 %v3218_v18  ;;  %218 = vst.msk [vmem:[#allocation2 + $0x18] sm:$0xff] %vm3682_vm2, %v209_v45  ;;  %219 = vst.msk [vmem:[#allocation2 + $0x20] sm:$0xff] %vm3682_vm2, %v210_v46  ;;  %v3258_v49 = vld [vmem:[%s4438_s1 + $0x354] ss:$8 sps:$4 sm:$0xff]   ;;  %v3260_v50 = vld [vmem:[%s4438_s1 + $0x190] ss:$8 sps:$4 sm:$0xff]  }
  0x18   : > { %1372 = vmatpush1.bf16.msra.mxu0 %v3219_v19  ;;  %499 = vmatprep.subr.bf16.mxu1 %v3220_v20  ;;  %v3261_v51 = vld [vmem:[%s4438_s1 + $0x350] ss:$8 sps:$4 sm:$0xff]   ;;  %v3262_v52 = vld [vmem:[%s4438_s1 + $0x1a4] ss:$8 sps:$4 sm:$0xff]   ;;  %v3266_v56 = vld [vmem:[%s4438_s1 + $0x1a0] ss:$8 sps:$4 sm:$0xff]  }
  0x19   : > { %1373 = vmatprep.subr.bf16.mxu0 %v3222_v21  ;;  %v3264_v53 = vld [vmem:[%s4438_s1 + $0x364] ss:$8 sps:$4 sm:$0xff]   ;;  %v3267_v60 = vld [vmem:[%s4438_s1 + $0x360] ss:$8 sps:$4 sm:$0xff]   ;;  %v3268_v61 = vld [vmem:[%s4438_s1 + $0x1b4] ss:$8 sps:$4 sm:$0xff]  }
  0x1a   : > { %v3270_v0 = vld [vmem:[%s4438_s1 + $0x374] ss:$8 sps:$4 sm:$0xff]   ;;  %v3272_v2 = vld [vmem:[%s4438_s1 + $0x1b0] ss:$8 sps:$4 sm:$0xff]   ;;  %v3278_v4 = vld [vmem:[%s4438_s1 + $0x4] ss:$8 sps:$4 sm:$0xff]  }
  0x1b   : > { %500 = vmatpush1.bf16.msra.mxu1 %v3224_v22  ;;  %v3728_v54 = vld [vmem:[#allocation2 + $0x8] sm:$0xff]  ;;  %v264_v55 = vld [vmem:[#allocation2 + $0x10] sm:$0xff]  ;;  %v212_v17 = vld [vmem:[%s3677_s30 + $0x18] sm:$0xff] }
  0x1c   : > { %1374 = vmatpush1.bf16.msra.mxu0 %v3225_v23  ;;  %501 = vmatprep.subr.bf16.mxu1 %v3226_v24  ;;  %v2618_v57 = vcombine.high %v3728_v54, %v264_v55  ;;  %v3273_v3 = vld [vmem:[%s4438_s1 + $0x370] ss:$8 sps:$4 sm:$0xff]   ;;  %v3283_v5 = vld [vmem:[%s4438_s1 + $0x384] ss:$8 sps:$4 sm:$0xff]   ;;  %v2617_v6 = vcombine.low %v3728_v54, %v264_v55  ;;  %v3276_v7 = vld [vmem:[%s4438_s1] ss:$8 sps:$4 sm:$0xff]  }
  0x1d   : > { %1375 = vmatprep.subr.bf16.mxu0 %v3228_v25  ;;  %v3281_v9 = vld [vmem:[%s4438_s1 + $0x380] ss:$8 sps:$4 sm:$0xff]   ;;  %v3286_v10 = vld [vmem:[%s4438_s1 + $0x14] ss:$8 sps:$4 sm:$0xff]   ;;  %v3284_v12 = vld [vmem:[%s4438_s1 + $0x10] ss:$8 sps:$4 sm:$0xff]  }
  0x1e   : > { %v1138_v58 = vld [vmem:[#allocation2 + $0x18] sm:$0xff]  ;;  %v3734_v59 = vld [vmem:[#allocation2 + $0x20] sm:$0xff]  ;;  %2653 = vmatprep.mubr.msk.bf16.mxu1 %vm476_vm3, %v2618_v57  ;;  %v211_v16 = vld [vmem:[%s3677_s30 + $0x10] sm:$0xff]  ;;  %221 = vst.msk [vmem:[#allocation2 + $0x30] sm:$0xff] %vm3682_vm2, %v212_v17 }
  0x1f   : > { %502 = vmatpush1.bf16.msra.mxu1 %v3230_v26  ;;  %v2794_v62 = vcombine.high %v1138_v58, %v3734_v59  ;;  %v3743_v63 = vcombine.high %v264_v55, %v1138_v58  ;;  %v3748_v1 = vcombine.low %v264_v55, %v1138_v58  ;;  %v2793_v8 = vcombine.low %v1138_v58, %v3734_v59  ;;  %v3289_v11 = vld [vmem:[%s4438_s1 + $0x394] ss:$8 sps:$4 sm:$0xff]   ;;  %v3287_v13 = vld [vmem:[%s4438_s1 + $0x390] ss:$8 sps:$4 sm:$0xff]   ;;  %v3292_v14 = vld [vmem:[%s4438_s1 + $0x24] ss:$8 sps:$4 sm:$0xff]  }
  0x20   : > { %1376 = vmatpush1.bf16.msra.mxu0 %v3231_v27  ;;  %503 = vmatprep.subr.bf16.mxu1 %v3232_v28  ;;  %v3295_v15 = vld [vmem:[%s4438_s1 + $0x3a4] ss:$8 sps:$4 sm:$0xff]   ;;  %v3290_v18 = vld [vmem:[%s4438_s1 + $0x20] ss:$8 sps:$4 sm:$0xff]   ;;  %220 = vst.msk [vmem:[#allocation2 + $0x28] sm:$0xff] %vm3682_vm2, %v211_v16 }
  0x21   : > { %1377 = vmatprep.subr.bf16.mxu0 %v3234_v29  ;;  %2829 = vmatprep.mubr.msk.bf16.mxu0 %vm476_vm3, %v2794_v62  ;;  %v3293_v19 = vld [vmem:[%s4438_s1 + $0x3a0] ss:$8 sps:$4 sm:$0xff]   ;;  %v3298_v20 = vld [vmem:[%s4438_s1 + $0x34] ss:$8 sps:$4 sm:$0xff]   ;;  %v3296_v22 = vld [vmem:[%s4438_s1 + $0x30] ss:$8 sps:$4 sm:$0xff]  }
  0x22   : > { %v3301_v21 = vld [vmem:[%s4438_s1 + $0x3b4] ss:$8 sps:$4 sm:$0xff]   ;;  %v3299_v23 = vld [vmem:[%s4438_s1 + $0x3b0] ss:$8 sps:$4 sm:$0xff]   ;;  %v3304_v24 = vld [vmem:[%s4438_s1 + $0x44] ss:$8 sps:$4 sm:$0xff]  }
  0x23   : > { %504 = vmatpush1.bf16.msra.mxu1 %v3236_v30  ;;  %v213_v25 = vld [vmem:[%s3677_s30 + $0x20] sm:$0xff]  ;;  %v214_v26 = vld [vmem:[%s3677_s30 + $0x28] sm:$0xff] }
  0x24   : > { %1378 = vmatpush1.bf16.msra.mxu0 %v3237_v31  ;;  %505 = vmatprep.subr.bf16.mxu1 %v3238_v32  ;;  %v3307_v27 = vld [vmem:[%s4438_s1 + $0x3c4] ss:$8 sps:$4 sm:$0xff]   ;;  %222 = vst.msk [vmem:[#allocation2 + $0x38] sm:$0xff] %vm3682_vm2, %v213_v25  ;;  %223 = vst.msk [vmem:[#allocation2 + $0x40] sm:$0xff] %vm3682_vm2, %v214_v26  ;;  %v3302_v30 = vld [vmem:[%s4438_s1 + $0x40] ss:$8 sps:$4 sm:$0xff]  }
  0x25   : > { %1379 = vmatprep.subr.bf16.mxu0 %v3240_v33  ;;  %v3829_v29 = vld [vmem:[#allocation2 + $0x30] sm:$0xff]  ;;  %v3305_v33 = vld [vmem:[%s4438_s1 + $0x3c0] ss:$8 sps:$4 sm:$0xff]   ;;  %v3319_v44 = vld [vmem:[%s4438_s1 + $0x3e4] ss:$8 sps:$4 sm:$0xff]  }
  0x26   : > { %v3314_v46 = vld [vmem:[%s4438_s1 + $0x60] ss:$8 sps:$4 sm:$0xff]   ;;  %v3328_v57 = vld [vmem:[%s4438_s1 + $0x84] ss:$8 sps:$4 sm:$0xff]  }
  0x27   : > { %506 = vmatpush1.bf16.msra.mxu1 %v3242_v34  ;;  %v3827_v28 = vld [vmem:[#allocation2 + $0x28] sm:$0xff]  ;;  %v3310_v34 = vld [vmem:[%s4438_s1 + $0x54] ss:$8 sps:$4 sm:$0xff]  }
  0x28   : > { %1380 = vmatpush1.bf16.msra.mxu0 %v3243_v35  ;;  %507 = vmatprep.subr.bf16.mxu1 %v3244_v36  ;;  %v3836_v31 = vcombine.high %v3827_v28, %v3829_v29  ;;  %v3840_v32 = vcombine.low %v3827_v28, %v3829_v29  ;;  %v3313_v35 = vld [vmem:[%s4438_s1 + $0x3d4] ss:$8 sps:$4 sm:$0xff]   ;;  %v3308_v36 = vld [vmem:[%s4438_s1 + $0x50] ss:$8 sps:$4 sm:$0xff]   ;;  %v3360_v16 = vld [vmem:[%s4438_s1 + $0x444] ss:$8 sps:$4 sm:$0xff]  }
  0x29   : > { %1381 = vmatprep.subr.bf16.mxu0 %v3246_v37  ;;  %v3311_v37 = vld [vmem:[%s4438_s1 + $0x3d0] ss:$8 sps:$4 sm:$0xff]   ;;  %v3354_v17 = vld [vmem:[%s4438_s1 + $0xc0] ss:$8 sps:$4 sm:$0xff]  }
  0x2a   : > { %v3368_v26 = vld [vmem:[%s4438_s1 + $0x1c0] ss:$8 sps:$4 sm:$0xff]  }
  0x2b   : > { %508 = vmatpush1.bf16.msra.mxu1 %v3248_v38  ;;  %v215_v38 = vld [vmem:[%s3677_s30 + $0x30] sm:$0xff] }
  0x2c   : > { %1382 = vmatpush1.bf16.msra.mxu0 %v3249_v39  ;;  %509 = vmatprep.subr.bf16.mxu1 %v3250_v40  ;;  %v216_v39 = vld [vmem:[%s3677_s30 + $0x38] sm:$0xff]  ;;  %224 = vst.msk [vmem:[#allocation2 + $0x48] sm:$0xff] %vm3682_vm2, %v215_v38 }
  0x2d   : > { %1383 = vmatprep.subr.bf16.mxu0 %v3252_v41  ;;  %v3865_v40 = vld [vmem:[#allocation2 + $0x38] sm:$0xff]  ;;  %v3867_v41 = vld [vmem:[#allocation2 + $0x40] sm:$0xff]  ;;  %225 = vst.msk [vmem:[#allocation2 + $0x50] sm:$0xff] %vm3682_vm2, %v216_v39 }
  0x2e   : > { %v3881_v45 = vcombine.high %v3865_v40, %v3867_v41  ;;  %v3890_v42 = vcombine.low %v3865_v40, %v3867_v41  ;;  %v4059_v38 = vcombine.low %v3829_v29, %v3865_v40  ;;  %v3383_v39 = vld [vmem:[%s4438_s1 + $0x480] ss:$8 sps:$4 sm:$0xff]  }
  0x2f   : > { %510 = vmatpush1.bf16.msra.mxu1 %v3254_v43  ;;  %v3316_v43 = vld [vmem:[%s4438_s1 + $0x64] ss:$8 sps:$4 sm:$0xff]  }
  0x30   : > { %1384 = vmatpush1.bf16.msra.mxu0 %v3255_v47  ;;  %511 = vmatprep.subr.bf16.mxu1 %v3256_v48  ;;  %v3317_v47 = vld [vmem:[%s4438_s1 + $0x3e0] ss:$8 sps:$4 sm:$0xff]  }
  0x31   : > { %1385 = vmatprep.subr.bf16.mxu0 %v3258_v49  ;;  %v3897_v48 = vld [vmem:[#allocation2] sm:$0xff]  ;;  %v3322_v49 = vld [vmem:[%s4438_s1 + $0x74] ss:$8 sps:$4 sm:$0xff]  }
  0x32   : > { %v2657_v25 = vcombine.low %v3897_v48, %v3728_v54 }
  0x33   : > { %512 = vmatpush1.bf16.msra.mxu1 %v3260_v50  ;;  %v3325_v50 = vld [vmem:[%s4438_s1 + $0x3f4] ss:$8 sps:$4 sm:$0xff]   ;;  %v3914_v55 = vld [vmem:[#allocation2 + $0x48] sm:$0xff] }
  0x34   : > { %1386 = vmatpush1.bf16.msra.mxu0 %v3261_v51  ;;  %513 = vmatprep.subr.bf16.mxu1 %v3262_v52  ;;  %v3320_v51 = vld [vmem:[%s4438_s1 + $0x70] ss:$8 sps:$4 sm:$0xff]   ;;  %v2658_v52 = vcombine.high %v3897_v48, %v3728_v54  ;;  %v3376_v54 = vld [vmem:[%s4438_s1 + $0x1d4] ss:$8 sps:$4 sm:$0xff]   ;;  %v3397_v48 = vld [vmem:[%s4438_s1 + $0x4a4] ss:$8 sps:$4 sm:$0xff]  }
  0x35   : > { %1387 = vmatprep.subr.bf16.mxu0 %v3264_v53  ;;  %v3323_v53 = vld [vmem:[%s4438_s1 + $0x3f0] ss:$8 sps:$4 sm:$0xff]  }
  0x37   : > { %514 = vmatpush1.bf16.msra.mxu1 %v3266_v56  ;;  %v3916_v56 = vld [vmem:[#allocation2 + $0x50] sm:$0xff] }
  0x38   : > { %1388 = vmatpush1.bf16.msra.mxu0 %v3267_v60  ;;  %515 = vmatprep.subr.bf16.mxu1 %v3268_v61  ;;  %v3924_v58 = vcombine.high %v3914_v55, %v3916_v56  ;;  %v3332_v60 = vld [vmem:[%s4438_s1 + $0x404] ss:$8 sps:$4 sm:$0xff]   ;;  %v3326_v61 = vld [vmem:[%s4438_s1 + $0x80] ss:$8 sps:$4 sm:$0xff]  }
  0x39   : > { %1389 = vmatprep.subr.bf16.mxu0 %v3270_v0  ;;  %v3940_v0 = vcombine.low %v3914_v55, %v3916_v56 }
  0x3b   : > { %516 = vmatpush1.bf16.msra.mxu1 %v3272_v2  ;;  %v3336_v2 = vld [vmem:[%s4438_s1 + $0x94] ss:$8 sps:$4 sm:$0xff]  }
  0x3c   : > { %1390 = vmatpush1.bf16.msra.mxu0 %v3273_v3  ;;  %750 = vmatprep.subr.bf16.mxu1 %v3278_v4  ;;  %v3339_v3 = vld [vmem:[%s4438_s1 + $0x414] ss:$8 sps:$4 sm:$0xff]   ;;  %v3950_v4 = vcombine.high %v3734_v59, %v3827_v28 }
  0x3d   : > { %1678 = vmatprep.subr.bf16.mxu0 %v3283_v5  ;;  %v3334_v5 = vld [vmem:[%s4438_s1 + $0x90] ss:$8 sps:$4 sm:$0xff]  }
  0x3e   : > { %522 = vmatmul.mubr.bf16.vlgmr.msra.gmra.mrb[0].mxu1 %v2617_v6  ;;  %v3337_v6 = vld [vmem:[%s4438_s1 + $0x410] ss:$8 sps:$4 sm:$0xff]  }
  0x3f   : > { %1396 = vmatmul.mubr.bf16.vlgmr.msra.gmra.mrb[0].mxu0 %v2793_v8  ;;  %751 = vmatpush1.bf16.msra.mxu1 %v3276_v7  ;;  %v3342_v7 = vld [vmem:[%s4438_s1 + $0xa4] ss:$8 sps:$4 sm:$0xff]  }
  0x40   : > { %1679 = vmatpush1.bf16.msra.mxu0 %v3281_v9  ;;  %752 = vmatprep.subr.bf16.mxu1 %v3286_v10  ;;  %v3340_v9 = vld [vmem:[%s4438_s1 + $0xa0] ss:$8 sps:$4 sm:$0xff]  }
  0x41   : > { %1680 = vmatprep.subr.bf16.mxu0 %v3289_v11  ;;  %2654 = vmatprep.mubr.msk.bf16.mxu1 %vm476_vm3, %v2794_v62  ;;  %v3330_v62 = vld [vmem:[%s4438_s1 + $0x400] ss:$8 sps:$4 sm:$0xff]   ;;  %v3350_v11 = vld [vmem:[%s4438_s1 + $0xb4] ss:$8 sps:$4 sm:$0xff]  }
  0x42   : > { %2830 = vmatprep.mubr.msk.bf16.mxu0 %vm476_vm3, %v3836_v31  ;;  %v3344_v10 = vld [vmem:[%s4438_s1 + $0x420] ss:$8 sps:$4 sm:$0xff]  }
  0x43   : > { %753 = vmatpush1.bf16.msra.mxu1 %v3284_v12  ;;  %v3353_v12 = vld [vmem:[%s4438_s1 + $0x434] ss:$8 sps:$4 sm:$0xff]  }
  0x44   : > { %1681 = vmatpush1.bf16.msra.mxu0 %v3287_v13  ;;  %754 = vmatprep.subr.bf16.mxu1 %v3292_v14  ;;  %v3348_v13 = vld [vmem:[%s4438_s1 + $0xb0] ss:$8 sps:$4 sm:$0xff]  }
  0x45   : > { %1682 = vmatprep.subr.bf16.mxu0 %v3295_v15  ;;  %v3351_v14 = vld [vmem:[%s4438_s1 + $0x430] ss:$8 sps:$4 sm:$0xff]   ;;  %v3356_v15 = vld [vmem:[%s4438_s1 + $0xc4] ss:$8 sps:$4 sm:$0xff]  }
  0x46   : > { %532 = vmatmul.mubr.bf16.gmra.mrb[4].mxu1 %v2793_v8  ;;  %v3346_v8 = vld [vmem:[%s4438_s1 + $0x424] ss:$8 sps:$4 sm:$0xff]  }
  0x47   : > { %755 = vmatpush1.bf16.msra.mxu1 %v3290_v18  ;;  %2655 = vmatprep.mubr.msk.bf16.mxu1 %vm476_vm3, %v3836_v31  ;;  %v3358_v18 = vld [vmem:[%s4438_s1 + $0x440] ss:$8 sps:$4 sm:$0xff]  }
  0x48   : > { %1683 = vmatpush1.bf16.msra.mxu0 %v3293_v19  ;;  %756 = vmatprep.subr.bf16.mxu1 %v3298_v20  ;;  %v3364_v19 = vld [vmem:[%s4438_s1 + $0xd4] ss:$8 sps:$4 sm:$0xff]  }
  0x49   : > { %1684 = vmatprep.subr.bf16.mxu0 %v3301_v21  ;;  %1406 = vmatmul.mubr.bf16.gmra.mrb[4].mxu0 %v3840_v32  ;;  %v3367_v20 = vld [vmem:[%s4438_s1 + $0x454] ss:$8 sps:$4 sm:$0xff]   ;;  %v3362_v21 = vld [vmem:[%s4438_s1 + $0xd0] ss:$8 sps:$4 sm:$0xff]  }
  0x4a   : > { %2831 = vmatprep.mubr.msk.bf16.mxu0 %vm476_vm3, %v3881_v45 }
  0x4b   : > { %757 = vmatpush1.bf16.msra.mxu1 %v3296_v22  ;;  %v3365_v22 = vld [vmem:[%s4438_s1 + $0x450] ss:$8 sps:$4 sm:$0xff]  }
  0x4c   : > { %1685 = vmatpush1.bf16.msra.mxu0 %v3299_v23  ;;  %758 = vmatprep.subr.bf16.mxu1 %v3304_v24  ;;  %v3370_v23 = vld [vmem:[%s4438_s1 + $0x1c4] ss:$8 sps:$4 sm:$0xff]  }
  0x4d   : > { %1686 = vmatprep.subr.bf16.mxu0 %v3307_v27  ;;  %v3373_v24 = vld [vmem:[%s4438_s1 + $0x464] ss:$8 sps:$4 sm:$0xff]   ;;  %v4022_v27 = vcombine.low %v3734_v59, %v3827_v28  ;;  %v4035_v59 = vcombine.high %v3829_v29, %v3865_v40  ;;  %v3374_v28 = vld [vmem:[%s4438_s1 + $0x1d0] ss:$8 sps:$4 sm:$0xff]   ;;  %v4072_v29 = vcombine.high %v3867_v41, %v3914_v55 }
  0x4e   : > { %542 = vmatmul.mubr.bf16.gmra.mrb[8].mxu1 %v3840_v32  ;;  %v3386_v40 = vld [vmem:[%s4438_s1 + $0x1f0] ss:$8 sps:$4 sm:$0xff]  }
  0x4f   : > { %759 = vmatpush1.bf16.msra.mxu1 %v3302_v30  ;;  %2656 = vmatprep.mubr.msk.bf16.mxu1 %vm476_vm3, %v3881_v45  ;;  %v3371_v30 = vld [vmem:[%s4438_s1 + $0x460] ss:$8 sps:$4 sm:$0xff]  }
  0x50   : > { %1687 = vmatpush1.bf16.msra.mxu0 %v3305_v33  ;;  %760 = vmatprep.subr.bf16.mxu1 %v3310_v34  ;;  %v3379_v33 = vld [vmem:[%s4438_s1 + $0x474] ss:$8 sps:$4 sm:$0xff]   ;;  %v3377_v34 = vld [vmem:[%s4438_s1 + $0x470] ss:$8 sps:$4 sm:$0xff]  }
  0x51   : > { %1688 = vmatprep.subr.bf16.mxu0 %v3313_v35  ;;  %1416 = vmatmul.mubr.bf16.gmra.mrb[8].mxu0 %v3890_v42  ;;  %v3382_v35 = vld [vmem:[%s4438_s1 + $0x1e4] ss:$8 sps:$4 sm:$0xff]  }
  0x52   : > { %2832 = vmatprep.mubr.msk.bf16.mxu0 %vm476_vm3, %v3924_v58 }
  0x53   : > { %761 = vmatpush1.bf16.msra.mxu1 %v3308_v36  ;;  %v3385_v36 = vld [vmem:[%s4438_s1 + $0x484] ss:$8 sps:$4 sm:$0xff]  }
  0x54   : > { %1689 = vmatpush1.bf16.msra.mxu0 %v3311_v37  ;;  %762 = vmatprep.subr.bf16.mxu1 %v3316_v43  ;;  %v3380_v37 = vld [vmem:[%s4438_s1 + $0x1e0] ss:$8 sps:$4 sm:$0xff]   ;;  %v3388_v43 = vld [vmem:[%s4438_s1 + $0x1f4] ss:$8 sps:$4 sm:$0xff]  }
  0x55   : > { %1690 = vmatprep.subr.bf16.mxu0 %v3319_v44  ;;  %v3391_v44 = vld [vmem:[%s4438_s1 + $0x494] ss:$8 sps:$4 sm:$0xff]  }
  0x56   : > { %552 = vmatmul.mubr.bf16.gmra.mrb[12].mxu1 %v3890_v42 }
  0x57   : > { %763 = vmatpush1.bf16.msra.mxu1 %v3314_v46  ;;  %2693 = vmatprep.mubr.msk.bf16.mxu1 %vm476_vm3, %v2658_v52  ;;  %v3389_v46 = vld [vmem:[%s4438_s1 + $0x490] ss:$8 sps:$4 sm:$0xff]   ;;  %v3395_v52 = vld [vmem:[%s4438_s1 + $0x4a0] ss:$8 sps:$4 sm:$0xff]  }
  0x58   : > { %1691 = vmatpush1.bf16.msra.mxu0 %v3317_v47  ;;  %764 = vmatprep.subr.bf16.mxu1 %v3322_v49  ;;  %v3394_v47 = vld [vmem:[%s4438_s1 + $0x204] ss:$8 sps:$4 sm:$0xff]   ;;  %v4094_v49 = vcombine.low %v3867_v41, %v3914_v55  ;;  %v3403_v41 = vld [vmem:[%s4438_s1 + $0x4b4] ss:$8 sps:$4 sm:$0xff]  }
  0x59   : > { %1692 = vmatprep.subr.bf16.mxu0 %v3325_v50  ;;  %1426 = vmatmul.mubr.bf16.gmra.mrb[12].mxu0 %v3940_v0  ;;  %v4096_v50 = vld [vmem:[#allocation2 + $0x58] sm:$0xff] }
  0x5a   : > { %2897 = vmatprep.mubr.msk.bf16.mxu0 %vm476_vm3, %v3950_v4  ;;  %v4112_v55 = vcombine.high %v3916_v56, %v4096_v50 }
  0x5b   : > { %765 = vmatpush1.bf16.msra.mxu1 %v3320_v51  ;;  %v3392_v51 = vld [vmem:[%s4438_s1 + $0x200] ss:$8 sps:$4 sm:$0xff]  }
  0x5c   : > { %1693 = vmatpush1.bf16.msra.mxu0 %v3323_v53  ;;  %766 = vmatprep.subr.bf16.mxu1 %v3328_v57  ;;  %v3400_v53 = vld [vmem:[%s4438_s1 + $0x214] ss:$8 sps:$4 sm:$0xff]   ;;  %v3398_v57 = vld [vmem:[%s4438_s1 + $0x210] ss:$8 sps:$4 sm:$0xff]  }
  0x5d   : > { %1694 = vmatprep.subr.bf16.mxu0 %v3332_v60  ;;  %v3401_v60 = vld [vmem:[%s4438_s1 + $0x4b0] ss:$8 sps:$4 sm:$0xff]  }
  0x5f   : > { %767 = vmatpush1.bf16.msra.mxu1 %v3326_v61  ;;  %v3406_v61 = vld [vmem:[%s4438_s1 + $0x224] ss:$8 sps:$4 sm:$0xff]  }
  0x60   : > { %1695 = vmatpush1.bf16.msra.mxu0 %v3330_v62  ;;  %768 = vmatprep.subr.bf16.mxu1 %v3336_v2  ;;  %v3409_v62 = vld [vmem:[%s4438_s1 + $0x4c4] ss:$8 sps:$4 sm:$0xff]   ;;  %v4134_v2 = vcombine.low %v3916_v56, %v4096_v50  ;;  %v3415_v56 = vld [vmem:[%s4438_s1 + $0x4d4] ss:$8 sps:$4 sm:$0xff]  }
  0x61   : > { %1696 = vmatprep.subr.bf16.mxu0 %v3339_v3  ;;  %v3404_v3 = vld [vmem:[%s4438_s1 + $0x220] ss:$8 sps:$4 sm:$0xff]  }
  0x63   : > { %769 = vmatpush1.bf16.msra.mxu1 %v3334_v5  ;;  %v3407_v5 = vld [vmem:[%s4438_s1 + $0x4c0] ss:$8 sps:$4 sm:$0xff]  }
  0x64   : > { %1697 = vmatpush1.bf16.msra.mxu0 %v3337_v6  ;;  %770 = vmatprep.subr.bf16.mxu1 %v3342_v7  ;;  %v3412_v6 = vld [vmem:[%s4438_s1 + $0x234] ss:$8 sps:$4 sm:$0xff]   ;;  %v3410_v7 = vld [vmem:[%s4438_s1 + $0x230] ss:$8 sps:$4 sm:$0xff]  }
  0x65   : > { %1698 = vmatprep.subr.bf16.mxu0 %v3346_v8  ;;  %v3413_v8 = vld [vmem:[%s4438_s1 + $0x4d0] ss:$8 sps:$4 sm:$0xff]  }
  0x67   : > { %771 = vmatpush1.bf16.msra.mxu1 %v3340_v9  ;;  %v3418_v9 = vld [vmem:[%s4438_s1 + $0x244] ss:$8 sps:$4 sm:$0xff]  }
  0x68   : > { %1699 = vmatpush1.bf16.msra.mxu0 %v3344_v10  ;;  %772 = vmatprep.subr.bf16.mxu1 %v3350_v11  ;;  %v3421_v10 = vld [vmem:[%s4438_s1 + $0x4e4] ss:$8 sps:$4 sm:$0xff]   ;;  %v3416_v11 = vld [vmem:[%s4438_s1 + $0x240] ss:$8 sps:$4 sm:$0xff]  }
  0x69   : > { %1700 = vmatprep.subr.bf16.mxu0 %v3353_v12  ;;  %v3419_v12 = vld [vmem:[%s4438_s1 + $0x4e0] ss:$8 sps:$4 sm:$0xff]  }
  0x6b   : > { %773 = vmatpush1.bf16.msra.mxu1 %v3348_v13  ;;  %v3424_v13 = vld [vmem:[%s4438_s1 + $0x254] ss:$8 sps:$4 sm:$0xff]  }
  0x6c   : > { %1701 = vmatpush1.bf16.msra.mxu0 %v3351_v14  ;;  %774 = vmatprep.subr.bf16.mxu1 %v3356_v15  ;;  %v3425_v14 = vld [vmem:[%s4438_s1 + $0x4f0] ss:$8 sps:$4 sm:$0xff]   ;;  %v3430_v15 = vld [vmem:[%s4438_s1 + $0x264] ss:$8 sps:$4 sm:$0xff]  }
  0x6d   : > { %1702 = vmatprep.subr.bf16.mxu0 %v3360_v16  ;;  %v3433_v16 = vld [vmem:[%s4438_s1 + $0x504] ss:$8 sps:$4 sm:$0xff]  }
  0x6f   : > { %775 = vmatpush1.bf16.msra.mxu1 %v3354_v17  ;;  %v3428_v17 = vld [vmem:[%s4438_s1 + $0x260] ss:$8 sps:$4 sm:$0xff]  }
  0x70   : > { %1703 = vmatpush1.bf16.msra.mxu0 %v3358_v18  ;;  %776 = vmatprep.subr.bf16.mxu1 %v3364_v19  ;;  %v3431_v18 = vld [vmem:[%s4438_s1 + $0x500] ss:$8 sps:$4 sm:$0xff]   ;;  %v3436_v19 = vld [vmem:[%s4438_s1 + $0x274] ss:$8 sps:$4 sm:$0xff]  }
  0x71   : > { %1704 = vmatprep.subr.bf16.mxu0 %v3367_v20  ;;  %v3439_v20 = vld [vmem:[%s4438_s1 + $0x514] ss:$8 sps:$4 sm:$0xff]  }
  0x73   : > { %777 = vmatpush1.bf16.msra.mxu1 %v3362_v21  ;;  %v3434_v21 = vld [vmem:[%s4438_s1 + $0x270] ss:$8 sps:$4 sm:$0xff]  }
  0x74   : > { %1705 = vmatpush1.bf16.msra.mxu0 %v3365_v22  ;;  %1049 = vmatprep.subr.bf16.mxu1 %v3370_v23  ;;  %v3437_v22 = vld [vmem:[%s4438_s1 + $0x510] ss:$8 sps:$4 sm:$0xff]   ;;  %v3443_v23 = vld [vmem:[%s4438_s1 + $0x284] ss:$8 sps:$4 sm:$0xff]  }
  0x75   : > { %1993 = vmatprep.subr.bf16.mxu0 %v3373_v24  ;;  %v3447_v24 = vld [vmem:[%s4438_s1 + $0x524] ss:$8 sps:$4 sm:$0xff]  }
  0x76   : > { %783 = vmatmul.mubr.bf16.vlgmr.msra.gmra.mrb[0].mxu1 %v2657_v25  ;;  %v3441_v25 = vld [vmem:[%s4438_s1 + $0x280] ss:$8 sps:$4 sm:$0xff]  }
  0x77   : > { %1711 = vmatmul.mubr.bf16.vlgmr.msra.gmra.mrb[0].mxu0 %v4022_v27  ;;  %1050 = vmatpush1.bf16.msra.mxu1 %v3368_v26  ;;  %v3445_v26 = vld [vmem:[%s4438_s1 + $0x520] ss:$8 sps:$4 sm:$0xff]  }
  0x78   : > { %1994 = vmatpush1.bf16.msra.mxu0 %v3371_v30  ;;  %1051 = vmatprep.subr.bf16.mxu1 %v3376_v54  ;;  %v3450_v30 = vld [vmem:[%s4438_s1 + $0x294] ss:$8 sps:$4 sm:$0xff]  }
  0x79   : > { %1995 = vmatprep.subr.bf16.mxu0 %v3379_v33  ;;  %2694 = vmatprep.mubr.msk.bf16.mxu1 %vm476_vm3, %v3743_v63  ;;  %v3453_v54 = vld [vmem:[%s4438_s1 + $0x534] ss:$8 sps:$4 sm:$0xff]   ;;  %v3448_v33 = vld [vmem:[%s4438_s1 + $0x290] ss:$8 sps:$4 sm:$0xff]  }
  0x7a   : > { %2898 = vmatprep.mubr.msk.bf16.mxu0 %vm476_vm3, %v4035_v59 }
  0x7b   : > { %1052 = vmatpush1.bf16.msra.mxu1 %v3374_v28  ;;  %v3451_v28 = vld [vmem:[%s4438_s1 + $0x530] ss:$8 sps:$4 sm:$0xff]  }
  0x7c   : > { %1996 = vmatpush1.bf16.msra.mxu0 %v3377_v34  ;;  %1053 = vmatprep.subr.bf16.mxu1 %v3382_v35  ;;  %v3456_v34 = vld [vmem:[%s4438_s1 + $0x544] ss:$8 sps:$4 sm:$0xff]   ;;  %v3454_v35 = vld [vmem:[%s4438_s1 + $0x540] ss:$8 sps:$4 sm:$0xff]  }
  0x7d   : > { %1997 = vmatprep.subr.bf16.mxu0 %v3385_v36  ;;  %v3459_v36 = vld [vmem:[%s4438_s1 + $0x554] ss:$8 sps:$4 sm:$0xff]  }
  0x7e   : > { %793 = vmatmul.mubr.bf16.gmra.mrb[4].mxu1 %v3748_v1 }
  0x7f   : > { %1721 = vmatmul.mubr.bf16.gmra.mrb[4].mxu0 %v4059_v38  ;;  %1054 = vmatpush1.bf16.msra.mxu1 %v3380_v37  ;;  %v3457_v37 = vld [vmem:[%s4438_s1 + $0x550] ss:$8 sps:$4 sm:$0xff]  }
  0x80   : > { %1998 = vmatpush1.bf16.msra.mxu0 %v3383_v39  ;;  %1055 = vmatprep.subr.bf16.mxu1 %v3388_v43  ;;  %v3462_v39 = vld [vmem:[%s4438_s1 + $0x564] ss:$8 sps:$4 sm:$0xff]   ;;  %v3471_v43 = vld [vmem:[%s4438_s1 + $0x594] ss:$8 sps:$4 sm:$0xff]  }
  0x81   : > { %1999 = vmatprep.subr.bf16.mxu0 %v3391_v44  ;;  %2695 = vmatprep.mubr.msk.bf16.mxu1 %vm476_vm3, %v3950_v4 }
  0x82   : > { %2899 = vmatprep.mubr.msk.bf16.mxu0 %vm476_vm3, %v4072_v29 }
  0x83   : > { %1056 = vmatpush1.bf16.msra.mxu1 %v3386_v40  ;;  %v3476_v40 = vld [vmem:[%s4438_s1 + $0x5a4] ss:$8 sps:$4 sm:$0xff]  }
  0x84   : > { %2000 = vmatpush1.bf16.msra.mxu0 %v3389_v46  ;;  %1057 = vmatprep.subr.bf16.mxu1 %v3394_v47  ;;  %v3474_v46 = vld [vmem:[%s4438_s1 + $0x5a0] ss:$8 sps:$4 sm:$0xff]   ;;  %v3479_v47 = vld [vmem:[%s4438_s1 + $0x5b4] ss:$8 sps:$4 sm:$0xff]  }
  0x85   : > { %2001 = vmatprep.subr.bf16.mxu0 %v3397_v48  ;;  %v3477_v48 = vld [vmem:[%s4438_s1 + $0x5b0] ss:$8 sps:$4 sm:$0xff]  }
  0x86   : > { %803 = vmatmul.mubr.bf16.gmra.mrb[8].mxu1 %v4022_v27 }
  0x87   : > { %1731 = vmatmul.mubr.bf16.gmra.mrb[8].mxu0 %v4094_v49  ;;  %1058 = vmatpush1.bf16.msra.mxu1 %v3392_v51  ;;  %v3480_v51 = vld [vmem:[%s4438_s1 + $0x5c0] ss:$8 sps:$4 sm:$0xff]  }
  0x88   : > { %2002 = vmatpush1.bf16.msra.mxu0 %v3395_v52  ;;  %1059 = vmatprep.subr.bf16.mxu1 %v3400_v53  ;;  %v3485_v52 = vld [vmem:[%s4438_s1 + $0x5d4] ss:$8 sps:$4 sm:$0xff]   ;;  %v3488_v53 = vld [vmem:[%s4438_s1 + $0x5e4] ss:$8 sps:$4 sm:$0xff]  }
  0x89   : > { %2003 = vmatprep.subr.bf16.mxu0 %v3403_v41  ;;  %2696 = vmatprep.mubr.msk.bf16.mxu1 %vm476_vm3, %v4035_v59  ;;  %v3486_v41 = vld [vmem:[%s4438_s1 + $0x5e0] ss:$8 sps:$4 sm:$0xff]  }
  0x8a   : > { %2900 = vmatprep.mubr.msk.bf16.mxu0 %vm476_vm3, %v4112_v55 }
  0x8b   : > { %1060 = vmatpush1.bf16.msra.mxu1 %v3398_v57  ;;  %v3489_v57 = vld [vmem:[%s4438_s1 + $0x5f0] ss:$8 sps:$4 sm:$0xff]  }
  0x8c   : > { %2004 = vmatpush1.bf16.msra.mxu0 %v3401_v60  ;;  %1061 = vmatprep.subr.bf16.mxu1 %v3406_v61  ;;  %v3494_v60 = vld [vmem:[%s4438_s1 + $0x604] ss:$8 sps:$4 sm:$0xff]   ;;  %v3492_v61 = vld [vmem:[%s4438_s1 + $0x600] ss:$8 sps:$4 sm:$0xff]  }
  0x8d   : > { %2005 = vmatprep.subr.bf16.mxu0 %v3409_v62  ;;  %v3497_v62 = vld [vmem:[%s4438_s1 + $0x614] ss:$8 sps:$4 sm:$0xff]  }
  0x8e   : > { %813 = vmatmul.mubr.bf16.gmra.mrb[12].mxu1 %v4059_v38 }
  0x8f   : > { %1741 = vmatmul.mubr.bf16.gmra.mrb[12].mxu0 %v4134_v2  ;;  %1062 = vmatpush1.bf16.msra.mxu1 %v3404_v3  ;;  %v3495_v3 = vld [vmem:[%s4438_s1 + $0x610] ss:$8 sps:$4 sm:$0xff]  }
  0x90   : > { %2006 = vmatpush1.bf16.msra.mxu0 %v3407_v5  ;;  %1063 = vmatprep.subr.bf16.mxu1 %v3412_v6  ;;  %v2090_v5 = vld [vmem:[#allocation2 + $0x68] sm:$0xff] }
  0x91   : > { %2007 = vmatprep.subr.bf16.mxu0 %v3415_v56  ;;  %2761 = vmatprep.mubr.msk.bf16.mxu1 %vm476_vm3, %v3743_v63  ;;  %v3427_v63 = vld [vmem:[%s4438_s1 + $0x4f4] ss:$8 sps:$4 sm:$0xff]  }
  0x92   : > { %2965 = vmatprep.mubr.msk.bf16.mxu0 %vm476_vm3, %v3836_v31  ;;  %v3422_v31 = vld [vmem:[%s4438_s1 + $0x250] ss:$8 sps:$4 sm:$0xff]  }
  0x93   : > { %1064 = vmatpush1.bf16.msra.mxu1 %v3410_v7 }
  0x94   : > { %2008 = vmatpush1.bf16.msra.mxu0 %v3413_v8  ;;  %1065 = vmatprep.subr.bf16.mxu1 %v3418_v9 }
  0x95   : > { %2009 = vmatprep.subr.bf16.mxu0 %v3421_v10 }
  0x97   : > { %1066 = vmatpush1.bf16.msra.mxu1 %v3416_v11 }
  0x98   : > { %2010 = vmatpush1.bf16.msra.mxu0 %v3419_v12  ;;  %1067 = vmatprep.subr.bf16.mxu1 %v3424_v13 }
  0x99   : > { %2011 = vmatprep.subr.bf16.mxu0 %v3427_v63 }
  0x9b   : > { %1068 = vmatpush1.bf16.msra.mxu1 %v3422_v31 }
  0x9c   : > { %2012 = vmatpush1.bf16.msra.mxu0 %v3425_v14  ;;  %1069 = vmatprep.subr.bf16.mxu1 %v3430_v15 }
  0x9d   : > { %2013 = vmatprep.subr.bf16.mxu0 %v3433_v16 }
  0x9f   : > { %1070 = vmatpush1.bf16.msra.mxu1 %v3428_v17 }
  0xa0   : > { %2014 = vmatpush1.bf16.msra.mxu0 %v3431_v18  ;;  %1071 = vmatprep.subr.bf16.mxu1 %v3436_v19 }
  0xa1   : > { %2015 = vmatprep.subr.bf16.mxu0 %v3439_v20 }
  0xa3   : > { %1072 = vmatpush1.bf16.msra.mxu1 %v3434_v21 }
  0xa4   : > { %2016 = vmatpush1.bf16.msra.mxu0 %v3437_v22  ;;  %1073 = vmatprep.subr.bf16.mxu1 %v3443_v23 }
  0xa5   : > { %2017 = vmatprep.subr.bf16.mxu0 %v3447_v24 }
  0xa7   : > { %1074 = vmatpush1.bf16.msra.mxu1 %v3441_v25 }
  0xa8   : > { %2018 = vmatpush1.bf16.msra.mxu0 %v3445_v26  ;;  %1075 = vmatprep.subr.bf16.mxu1 %v3450_v30 }
  0xa9   : > { %2019 = vmatprep.subr.bf16.mxu0 %v3453_v54 }
  0xab   : > { %1076 = vmatpush1.bf16.msra.mxu1 %v3448_v33 }
  0xac   : > { %2020 = vmatpush1.bf16.msra.mxu0 %v3451_v28  ;;  %3057 = vmatprep.subr.bf16.mxu1 %v3456_v34 }
  0xad   : > { %2308 = vmatprep.subr.bf16.mxu0 %v3456_v34 }
  0xae   : > { %1082 = vmatmul.mubr.bf16.vlgmr.msra.gmra.mrb[0].mxu1 %v3748_v1  ;;  %v3460_v1 = vld [vmem:[%s4438_s1 + $0x560] ss:$8 sps:$4 sm:$0xff]  }
  0xaf   : > { %2026 = vmatmul.mubr.bf16.vlgmr.msra.gmra.mrb[0].mxu0 %v3840_v32  ;;  %3071 = vmatpush1.bf16.msra.mxu1 %v3454_v35  ;;  %v3465_v32 = vld [vmem:[%s4438_s1 + $0x574] ss:$8 sps:$4 sm:$0xff]  }
  0xb0   : > { %2309 = vmatpush1.bf16.msra.mxu0 %v3454_v35  ;;  %3058 = vmatprep.subr.bf16.mxu1 %v3459_v36 }
  0xb1   : > { %2310 = vmatprep.subr.bf16.mxu0 %v3459_v36  ;;  %2762 = vmatprep.mubr.msk.bf16.mxu1 %vm476_vm3, %v3950_v4  ;;  %v3468_v4 = vld [vmem:[%s4438_s1 + $0x584] ss:$8 sps:$4 sm:$0xff]   ;;  %v2399_v36 = vlaneseq }
  0xb2   : > { %2966 = vmatprep.mubr.msk.bf16.mxu0 %vm476_vm3, %v3881_v45  ;;  %v3463_v45 = vld [vmem:[%s4438_s1 + $0x570] ss:$8 sps:$4 sm:$0xff]  }
  0xb3   : > { %3072 = vmatpush1.bf16.msra.mxu1 %v3457_v37 }
  0xb4   : > { %2311 = vmatpush1.bf16.msra.mxu0 %v3457_v37  ;;  %3059 = vmatprep.subr.bf16.mxu1 %v3462_v39  ;;  %v2400_v37 = vshrl.u32 %v2399_v36, 7 }
  0xb5   : > { %2312 = vmatprep.subr.bf16.mxu0 %v3462_v39 }
  0xb6   : > { %1092 = vmatmul.mubr.bf16.gmra.mrb[4].mxu1 %v4022_v27  ;;  %v4271_v27 = vld [vmem:[#allocation2 + $0x60] sm:$0xff]  ;;  %v2401_v39 = vsub.s32 0, %v2400_v37 }
  0xb7   : > { %2036 = vmatmul.mubr.bf16.gmra.mrb[4].mxu0 %v3890_v42  ;;  %3073 = vmatpush1.bf16.msra.mxu1 %v3460_v1  ;;  %v3466_v42 = vld [vmem:[%s4438_s1 + $0x580] ss:$8 sps:$4 sm:$0xff]   ;;  %v2936_v44 = vcombine.high %v4096_v50, %v4271_v27  ;;  %v3004_v6 = vcombine.high %v4271_v27, %v2090_v5  ;;  %v3003_v56 = vcombine.low %v4271_v27, %v2090_v5 }
  0xb8   : > { %2313 = vmatpush1.bf16.msra.mxu0 %v3460_v1  ;;  %3060 = vmatprep.subr.bf16.mxu1 %v3465_v32  ;;  %v2397_v1 = vld [vmem:[%s4439_s2] sm:$0x3] }
  0xb9   : > { %2314 = vmatprep.subr.bf16.mxu0 %v3465_v32  ;;  %2763 = vmatprep.mubr.msk.bf16.mxu1 %vm476_vm3, %v4035_v59  ;;  %v2405_v32 = vsub.s32 1, %v2400_v37 }
  0xba   : > { %2967 = vmatprep.mubr.msk.bf16.mxu0 %vm476_vm3, %v3924_v58  ;;  %v3469_v58 = vld [vmem:[%s4438_s1 + $0x590] ss:$8 sps:$4 sm:$0xff]  }
  0xbb   : > { %3074 = vmatpush1.bf16.msra.mxu1 %v3463_v45 }
  0xbc   : > { %2315 = vmatpush1.bf16.msra.mxu0 %v3463_v45  ;;  %3061 = vmatprep.subr.bf16.mxu1 %v3468_v4  ;;  %v2425_v45 = vld [vmem:[%s4440_s3] sm:$0x3] }
  0xbd   : > { %2316 = vmatprep.subr.bf16.mxu0 %v3468_v4  ;;  %v4372_v4 = vrot.slane %v2397_v1, %v2401_v39 }
  0xbe   : > { %1102 = vmatmul.mubr.bf16.gmra.mrb[8].mxu1 %v4059_v38 }
  0xbf   : > { %2046 = vmatmul.mubr.bf16.gmra.mrb[8].mxu0 %v3940_v0  ;;  %3075 = vmatpush1.bf16.msra.mxu1 %v3466_v42  ;;  %v2935_v0 = vcombine.low %v4096_v50, %v4271_v27  ;;  %v3482_v50 = vld [vmem:[%s4438_s1 + $0x5c4] ss:$8 sps:$4 sm:$0xff]  }
  0xc0   : > { %2317 = vmatpush1.bf16.msra.mxu0 %v3466_v42  ;;  %3062 = vmatprep.subr.bf16.mxu1 %v3471_v43 }
  0xc1   : > { %2318 = vmatprep.subr.bf16.mxu0 %v3471_v43  ;;  %2764 = vmatprep.mubr.msk.bf16.mxu1 %vm476_vm3, %v4072_v29  ;;  %v4374_v43 = vrot.slane %v2397_v1, %v2405_v32 }
  0xc2   : > { %2968 = vmatprep.mubr.msk.bf16.mxu0 %vm476_vm3, %v2936_v44 }
  0xc3   : > { %3076 = vmatpush1.bf16.msra.mxu1 %v3469_v58 }
  0xc4   : > { %2319 = vmatpush1.bf16.msra.mxu0 %v3469_v58  ;;  %3063 = vmatprep.subr.bf16.mxu1 %v3476_v40  ;;  %v4376_v58 = vrot.slane %v2425_v45, %v2401_v39 }
  0xc5   : > { %2320 = vmatprep.subr.bf16.mxu0 %v3476_v40 }
  0xc6   : > { %1112 = vmatmul.mubr.bf16.gmra.mrb[12].mxu1 %v4094_v49 }
  0xc7   : > { %2056 = vmatmul.mubr.bf16.gmra.mrb[12].mxu0 %v2935_v0  ;;  %3077 = vmatpush1.bf16.msra.mxu1 %v3474_v46 }
  0xc8   : > { %2321 = vmatpush1.bf16.msra.mxu0 %v3474_v46  ;;  %3064 = vmatprep.subr.bf16.mxu1 %v3479_v47 }
  0xc9   : > { %2322 = vmatprep.subr.bf16.mxu0 %v3479_v47  ;;  %3033 = vmatprep.mubr.msk.bf16.mxu0 %vm476_vm3, %v4035_v59  ;;  %v3483_v59 = vld [vmem:[%s4438_s1 + $0x5d0] ss:$8 sps:$4 sm:$0xff]  }
  0xca   : > { %3035 = vmatprep.mubr.msk.bf16.mxu1 %vm476_vm3, %v4112_v55  ;;  %v3491_v55 = vld [vmem:[%s4438_s1 + $0x5f4] ss:$8 sps:$4 sm:$0xff]  }
  0xcb   : > { %3078 = vmatpush1.bf16.msra.mxu1 %v3477_v48 }
  0xcc   : > { %2323 = vmatpush1.bf16.msra.mxu0 %v3477_v48  ;;  %3065 = vmatprep.subr.bf16.mxu1 %v3482_v50  ;;  %v4378_v48 = vrot.slane %v2425_v45, %v2405_v32 }
  0xcd   : > { %2324 = vmatprep.subr.bf16.mxu0 %v3482_v50 }
  0xcf   : > { %3079 = vmatpush1.bf16.msra.mxu1 %v3480_v51 }
  0xd0   : > { %2325 = vmatpush1.bf16.msra.mxu0 %v3480_v51  ;;  %3066 = vmatprep.subr.bf16.mxu1 %v3485_v52 }
  0xd1   : > { %2326 = vmatprep.subr.bf16.mxu0 %v3485_v52 }
  0xd3   : > { %3080 = vmatpush1.bf16.msra.mxu1 %v3483_v59 }
  0xd4   : > { %2327 = vmatpush1.bf16.msra.mxu0 %v3483_v59  ;;  %3067 = vmatprep.subr.bf16.mxu1 %v3488_v53 }
  0xd5   : > { %2328 = vmatprep.subr.bf16.mxu0 %v3488_v53 }
  0xd7   : > { %3081 = vmatpush1.bf16.msra.mxu1 %v3486_v41 }
  0xd8   : > { %2329 = vmatpush1.bf16.msra.mxu0 %v3486_v41  ;;  %3068 = vmatprep.subr.bf16.mxu1 %v3491_v55 }
  0xd9   : > { %2330 = vmatprep.subr.bf16.mxu0 %v3491_v55 }
  0xdb   : > { %3082 = vmatpush1.bf16.msra.mxu1 %v3489_v57 }
  0xdc   : > { %2331 = vmatpush1.bf16.msra.mxu0 %v3489_v57  ;;  %3069 = vmatprep.subr.bf16.mxu1 %v3494_v60 }
  0xdd   : > { %2332 = vmatprep.subr.bf16.mxu0 %v3494_v60 }
  0xdf   : > { %3083 = vmatpush1.bf16.msra.mxu1 %v3492_v61 }
  0xe0   : > { %2333 = vmatpush1.bf16.msra.mxu0 %v3492_v61  ;;  %3070 = vmatprep.subr.bf16.mxu1 %v3497_v62 }
  0xe1   : > { %2334 = vmatprep.subr.bf16.mxu0 %v3497_v62 }
  0xe3   : > { %3084 = vmatpush1.bf16.msra.mxu1 %v3495_v3 }
  0xe4   : > { %2335 = vmatpush1.bf16.msra.mxu0 %v3495_v3 }
  0xe6   : > { %2361 = vmatmul.mubr.bf16.vlgmr.msra.gmra.mrb[16].mxu1 %v4134_v2 }
  0xe7   : > { %2341 = vmatmul.mubr.bf16.vlgmr.msra.gmra.mrb[0].mxu0 %v4059_v38  ;;  %3036 = vmatprep.mubr.msk.bf16.mxu1 %vm476_vm3, %v3004_v6 }
  0xe8   : > { %3034 = vmatprep.mubr.msk.bf16.mxu0 %vm476_vm3, %v4072_v29 }
  0xee   : > { %2371 = vmatmul.mubr.bf16.gmra.mrb[20].mxu1 %v3003_v56 }
  0xef   : > { %2351 = vmatmul.mubr.bf16.gmra.mrb[4].mxu0 %v4094_v49 }
 0x181   : > { %v1083_v7 = vpop.f32.mrb[0].mxu1 }
 0x182   : > { %v1085_v8 = vpop.f32.mrb[1].mxu1 }
 0x183   : > { %v1087_v9 = vpop.f32.mrb[2].mxu1 }
 0x184   : > { %v1089_v10 = vpop.f32.mrb[3].mxu1 }
 0x189   : > { %v4352_v11 = vpop.f32.mrb[4].mxu1 }
 0x18a   : > { %v4354_v12 = vpop.f32.mrb[5].mxu1 }
 0x18b   : > { %v4356_v38 = vpop.f32.mrb[6].mxu1 }
 0x18c   : > { %v4358_v2 = vpop.f32.mrb[7].mxu1 }
 0x191   : > { %v1103_v29 = vpop.f32.mrb[8].mxu1 }
 0x192   : > { %v2047_v13 = vpop.f32.mrb[8].mxu0  ;;  %v1105_v31 = vpop.f32.mrb[9].mxu1 }
 0x193   : > { %v3093_v63 = vadd.f32 %v2047_v13, %v1103_v29  ;;  %v2049_v14 = vpop.f32.mrb[9].mxu0  ;;  %v1107_v49 = vpop.f32.mrb[10].mxu1 }
 0x194   : > { %v3095_v15 = vadd.f32 %v2049_v14, %v1105_v31  ;;  %v2051_v16 = vpop.f32.mrb[10].mxu0  ;;  %v1109_v18 = vpop.f32.mrb[11].mxu1 }
 0x195   : > { %v3097_v17 = vadd.f32 %v2051_v16, %v1107_v49  ;;  %v2053_v19 = vpop.f32.mrb[11].mxu0 }
 0x196   : > { %v3099_v20 = vadd.f32 %v2053_v19, %v1109_v18 }
 0x199   : > { %v1113_v21 = vpop.f32.mrb[12].mxu1 }
 0x19a   : > { %v2057_v22 = vpop.f32.mrb[12].mxu0  ;;  %v1115_v24 = vpop.f32.mrb[13].mxu1 }
 0x19b   : > { %v3101_v23 = vadd.f32 %v2057_v22, %v1113_v21  ;;  %v2059_v25 = vpop.f32.mrb[13].mxu0  ;;  %v1117_v30 = vpop.f32.mrb[14].mxu1 }
 0x19c   : > { %v4360_v26 = vadd.f32 %v2059_v25, %v1115_v24  ;;  %v2061_v54 = vpop.f32.mrb[14].mxu0  ;;  %v1119_v28 = vpop.f32.mrb[15].mxu1 }
 0x19d   : > { %v4362_v33 = vadd.f32 %v2061_v54, %v1117_v30  ;;  %v2063_v34 = vpop.f32.mrb[15].mxu0 }
 0x19e   : > { %v4364_v35 = vadd.f32 %v2063_v34, %v1119_v28 }
 0x1b9   : > { %v2362_v42 = vpop.f32.mrb[16].mxu1 }
 0x1ba   : > { %v2342_v27 = vpop.f32.mrb[0].mxu0  ;;  %v3094_v40 = vadd.f32 %v3093_v63, %v2362_v42  ;;  %v2364_v46 = vpop.f32.mrb[17].mxu1 }
 0x1bb   : > { %v3085_v44 = vadd.f32 %v2342_v27, %v1083_v7  ;;  %v2344_v0 = vpop.f32.mrb[1].mxu0  ;;  %v3096_v50 = vadd.f32 %v3095_v15, %v2364_v46  ;;  %v2366_v52 = vpop.f32.mrb[18].mxu1 }
 0x1bc   : > { %v3086_v47 = vadd.f32 %v2344_v0, %v1085_v8  ;;  %v2346_v51 = vpop.f32.mrb[2].mxu0  ;;  %v2417_v53 = vmul.f32 %v3094_v40, %v4372_v4  ;;  %v3098_v55 = vadd.f32 %v3097_v17, %v2366_v52  ;;  %v2368_v60 = vpop.f32.mrb[19].mxu1 }
 0x1bd   : > { %v2409_v59 = vmul.f32 %v3085_v44, %v4372_v4  ;;  %v3087_v41 = vadd.f32 %v2346_v51, %v1087_v9  ;;  %v2348_v57 = vpop.f32.mrb[3].mxu0  ;;  %v2418_v62 = vmul.f32 %v3096_v50, %v4374_v43  ;;  %v3100_v5 = vadd.f32 %v3099_v20, %v2368_v60 }
 0x1be   : > { %v2410_v61 = vmul.f32 %v3086_v47, %v4374_v43  ;;  %v3088_v3 = vadd.f32 %v2348_v57, %v1089_v10  ;;  %v2445_v56 = vadd.f32 %v4376_v58, %v2417_v53  ;;  %v2419_v8 = vmul.f32 %v3098_v55, %v4372_v4 }
 0x1bf   : > { %v2437_v6 = vadd.f32 %v4376_v58, %v2409_v59  ;;  %v2411_v7 = vmul.f32 %v3087_v41, %v4372_v4  ;;  %v2446_v29 = vadd.f32 %v4378_v48, %v2418_v62  ;;  %v2420_v63 = vmul.f32 %v3100_v5, %v4374_v43 }
 0x1c0   : > { %v2438_v9 = vadd.f32 %v4378_v48, %v2410_v61  ;;  %v2412_v13 = vmul.f32 %v3088_v3, %v4374_v43  ;;  %v2461_v10 = vmax.f32 %v2445_v56, 0.0  ;;  %v2447_v15 = vadd.f32 %v4376_v58, %v2419_v8 }
 0x1c1   : > { %v2453_v31 = vmax.f32 %v2437_v6, 0.0  ;;  %v2439_v14 = vadd.f32 %v4376_v58, %v2411_v7  ;;  %v2462_v16 = vmax.f32 %v2446_v29, 0.0  ;;  %v2448_v18 = vadd.f32 %v4378_v48, %v2420_v63  ;;  %v2372_v20 = vpop.f32.mrb[20].mxu1 }
 0x1c2   : > { %v2454_v49 = vmax.f32 %v2438_v9, 0.0  ;;  %v2440_v17 = vadd.f32 %v4378_v48, %v2412_v13  ;;  %v2352_v19 = vpop.f32.mrb[4].mxu0  ;;  %v2463_v22 = vmax.f32 %v2447_v15, 0.0  ;;  %v3102_v25 = vadd.f32 %v3101_v23, %v2372_v20  ;;  %v2374_v54 = vpop.f32.mrb[21].mxu1 }
 0x1c3   : > { %v2455_v21 = vmax.f32 %v2439_v14, 0.0  ;;  %v3089_v24 = vadd.f32 %v2352_v19, %v4352_v11  ;;  %v2354_v30 = vpop.f32.mrb[5].mxu0  ;;  %v3053_v34 = vpack.c.bf16 %v2462_v16, %v2461_v10  ;;  %v2464_v37 = vmax.f32 %v2448_v18, 0.0  ;;  %v2376_v1 = vpop.f32.mrb[22].mxu1 }
 0x1c4   : > { %v3049_v28 = vpack.c.bf16 %v2454_v49, %v2453_v31  ;;  %v2456_v36 = vmax.f32 %v2440_v17, 0.0  ;;  %v2356_v39 = vpop.f32.mrb[6].mxu0  ;;  %v2421_v45 = vmul.f32 %v3102_v25, %v4372_v4  ;;  %v3090_v27 = vadd.f32 %v2354_v30, %v4354_v12  ;;  %v2378_v42 = vpop.f32.mrb[23].mxu1 }
 0x1c5   : > { %v2413_v32 = vmul.f32 %v3089_v24, %v4372_v4  ;;  %v3104_v11 = vadd.f32 %v4360_v26, %v2374_v54  ;;  %v2358_v23 = vpop.f32.mrb[7].mxu0  ;;  %2521 = vst [vmem:[%s4401_s27 + $0x20] sm:$0xff] %v3053_v34  ;;  %v3054_v40 = vpack.c.bf16 %v2464_v37, %v2463_v22  ;;  %v3091_v0 = vadd.f32 %v2356_v39, %v4356_v38 }
 0x1c6   : > { %2517 = vst [vmem:[%s4401_s27] sm:$0xff] %v3049_v28  ;;  %v3050_v44 = vpack.c.bf16 %v2456_v36, %v2455_v21  ;;  %v3106_v46 = vadd.f32 %v4362_v33, %v2376_v1  ;;  %v2449_v50 = vadd.f32 %v4376_v58, %v2421_v45  ;;  %v2414_v51 = vmul.f32 %v3090_v27, %v4374_v43 }
 0x1c7   : > { %v2441_v47 = vadd.f32 %v4376_v58, %v2413_v32  ;;  %v2422_v12 = vmul.f32 %v3104_v11, %v4374_v43  ;;  %2522 = vst [vmem:[%s4401_s27 + $0x28] sm:$0xff] %v3054_v40  ;;  %v2415_v26 = vmul.f32 %v3091_v0, %v4372_v4  ;;  %v3092_v59 = vadd.f32 %v2358_v23, %v4358_v2 }
 0x1c8   : > { %2518 = vst [vmem:[%s4401_s27 + $0x8] sm:$0xff] %v3050_v44  ;;  %v2423_v52 = vmul.f32 %v3106_v46, %v4372_v4  ;;  %v3108_v38 = vadd.f32 %v4364_v35, %v2378_v42  ;;  %v2465_v33 = vmax.f32 %v2449_v50, 0.0  ;;  %v2442_v41 = vadd.f32 %v4378_v48, %v2414_v51 }
 0x1c9   : > { %v2457_v53 = vmax.f32 %v2441_v47, 0.0  ;;  %v2450_v55 = vadd.f32 %v4378_v48, %v2422_v12  ;;  %v2443_v57 = vadd.f32 %v4376_v58, %v2415_v26  ;;  %v2416_v61 = vmul.f32 %v3092_v59, %v4374_v43 }
 0x1ca   : > { %v2451_v60 = vadd.f32 %v4376_v58, %v2423_v52  ;;  %v2424_v4 = vmul.f32 %v3108_v38, %v4374_v43  ;;  %v2458_v2 = vmax.f32 %v2442_v41, 0.0 }
 0x1cb   : > { %v2466_v35 = vmax.f32 %v2450_v55, 0.0  ;;  %v2459_v62 = vmax.f32 %v2443_v57, 0.0  ;;  %v2444_v5 = vadd.f32 %v4378_v48, %v2416_v61 }
 0x1cc   : > { %v2467_v3 = vmax.f32 %v2451_v60, 0.0  ;;  %v2452_v6 = vadd.f32 %v4378_v48, %v2424_v4  ;;  %v3051_v56 = vpack.c.bf16 %v2458_v2, %v2457_v53 }
 0x1cd   : > { %v3055_v7 = vpack.c.bf16 %v2466_v35, %v2465_v33  ;;  %v2460_v8 = vmax.f32 %v2444_v5, 0.0 }
 0x1ce   : > { %v2468_v9 = vmax.f32 %v2452_v6, 0.0  ;;  %2519 = vst [vmem:[%s4401_s27 + $0x10] sm:$0xff] %v3051_v56 }
 0x1cf   : > { %2523 = vst [vmem:[%s4401_s27 + $0x30] sm:$0xff] %v3055_v7  ;;  %v3052_v58 = vpack.c.bf16 %v2460_v8, %v2459_v62 }
 0x1d0   : > { %v3056_v29 = vpack.c.bf16 %v2468_v9, %v2467_v3 }
 0x1d1   : > { %2520 = vst [vmem:[%s4401_s27 + $0x18] sm:$0xff] %v3052_v58 }
 0x1d2   : > { %2524 = vst [vmem:[%s4401_s27 + $0x38] sm:$0xff] %v3056_v29 }
 0x1d3 PF: > { %s14_s15 = sadd.s32 1, %s3506_s15  }
 0x1d4   : > { %p11_p4 = scmp.ge.s32.totalorder %s14_s15, 4  }
 0x1d6   :  { %13 = sbr.rel (!%p11_p4) target bundleno = 1 (0x1), region = 79 }

</bundles_post_ra>
